<compile_context>
chip_gen: v7x
topology: tpu7x:2x2x1
jax: 0.10.0
libtpu: 0.0.40
codegen_flags: <defaults>
</compile_context>

<pallas_src>
import math
from functools import partial

import jax
import jax.numpy as jnp
from jax.experimental import pallas as pl
from jax.experimental.pallas import tpu as pltpu

F32 = jnp.float32
BF16 = jnp.bfloat16


def _split2(n):
    """2 grid steps when possible (feeds both v7x TensorCores), else 1.
    One extra step costs ~0.35us on single-TC chips -> negligible."""
    return 2 if (n % 2 == 0 and n >= 2) else 1


# --------------------------- fused encoder kernel ---------------------------

def _encoder_kernel(x_ref, wx_ref, bx_ref, whh_ref, o_ref, h_sc, c_sc):
    """Grid = (row_blocks, T).  One step == one LSTM time step for one row block.
    h/c persist in VMEM scratch across the (sequential) time axis."""
    t = pl.program_id(1)

    @pl.when(t == 0)
    def _init():
        h_sc[...] = jnp.zeros_like(h_sc)
        c_sc[...] = jnp.zeros_like(c_sc)

    rows, D = h_sc.shape
    x_t = x_ref[...].reshape(rows, -1)                      # (rows, F)
    wx = wx_ref[...]                                        # (F, 4D) = Wemb @ Wih
    if x_t.shape[-1] == 1:
        # F == 1 contraction -> VPU broadcast MAC instead of an MXU matmul.
        gates_x = x_t * wx + bx_ref[...]
    else:
        gates_x = jnp.dot(x_t, wx, preferred_element_type=F32) + bx_ref[...]

    h = h_sc[...]
    # Recurrent path stays f32: tiny (rows,D)@(D,4D) matmul, avoids bf16 drift.
    gates = gates_x + jnp.dot(h, whh_ref[...], preferred_element_type=F32)
    i_g = jax.nn.sigmoid(gates[:, 0 * D:1 * D])
    f_g = jax.nn.sigmoid(gates[:, 1 * D:2 * D])
    g_g = jnp.tanh(gates[:, 2 * D:3 * D])
    o_g = jax.nn.sigmoid(gates[:, 3 * D:4 * D])
    c_new = f_g * c_sc[...] + i_g * g_g
    h_new = o_g * jnp.tanh(c_new)
    c_sc[...] = c_new
    h_sc[...] = h_new
    o_ref[...] = h_new.reshape(o_ref.shape).astype(o_ref.dtype)


def encoder_forward(params, x, cfg):
    """x: (B, T, N, d_feature) -> (B, T, N, d_model).  (Cell state unused by STTN.)"""
    B, T, N, Fd = x.shape
    D = cfg['d_model']
    BB = _split2(B)                      # batch split for the megacore 'parallel' axis
    rows = (B // BB) * N

    # Fold the embedding + input-to-hidden projection out of the recurrence:
    # gates = x_t @ (Wemb @ Wih) + (b_emb @ Wih + b_lstm) + h @ Whh
    w_x = jnp.dot(params['enc_emb_w'], params['enc_wih'])                       # (F, 4D)
    b_x = (jnp.dot(params['enc_emb_b'][None, :], params['enc_wih'])
           + params['enc_b'][None, :])                                          # (1, 4D)

    return pl.pallas_call(
        _encoder_kernel,
        out_shape=jax.ShapeDtypeStruct((B, T, N, D), F32),
        grid=(BB, T),
        in_specs=[pl.BlockSpec((B // BB, 1, N, Fd), lambda r, t: (r, t, 0, 0)),
                  pl.BlockSpec((Fd, 4 * D), lambda r, t: (0, 0)),
                  pl.BlockSpec((1, 4 * D), lambda r, t: (0, 0)),
                  pl.BlockSpec((D, 4 * D), lambda r, t: (0, 0))],
        out_specs=pl.BlockSpec((B // BB, 1, N, D), lambda r, t: (r, t, 0, 0)),
        scratch_shapes=[pltpu.VMEM((rows, D), F32),    # h
                        pltpu.VMEM((rows, D), F32)],   # c
        compiler_params=pltpu.CompilerParams(
            dimension_semantics=("parallel", "arbitrary")),  # rows || ; time sequential
    )(x, w_x, b_x, params['enc_whh'])


# ----------------- fused MHA + residual + LayerNorm kernel ------------------

def _mha_ln_kernel(x_ref, wqkv_ref, bqkv_ref, wo_ref, bo_ref, g_ref, beta_ref,
                   o_ref, *, n_heads, d_k, d_v):
    """Block of gb independent groups, each a (L, D) self-attention:
    one fused QKV matmul for the whole block, batched-over-group attention per
    head, per-head-accumulated output projection, residual add, LayerNorm."""
    gb, L, D = x_ref.shape
    x = x_ref[...]
    xf = x.reshape(gb * L, D)                               # leading-dim merge (cheap)

    # Fused QKV projection (1/sqrt(d_k) already folded into the Wq columns).
    qkv = (jnp.dot(xf.astype(BF16), wqkv_ref[...].astype(BF16),
                   preferred_element_type=F32) + bqkv_ref[...])           # (gb*L, E)
    qkv3 = qkv.reshape(gb, L, -1)
    wo = wo_ref[...].astype(BF16)

    k_off = n_heads * d_k
    v_off = 2 * n_heads * d_k
    proj = jnp.zeros((gb * L, D), F32)
    for h in range(n_heads):                                # small static head loop
        qh = qkv3[:, :, h * d_k:(h + 1) * d_k].astype(BF16)               # (gb, L, dk)
        kh = qkv3[:, :, k_off + h * d_k:k_off + (h + 1) * d_k].astype(BF16)
        vh = qkv3[:, :, v_off + h * d_v:v_off + (h + 1) * d_v].astype(BF16)
        s = jnp.einsum('glk,gmk->glm', qh, kh, preferred_element_type=F32)
        s = s - jnp.max(s, axis=-1, keepdims=True)
        p = jnp.exp(s)
        p = p * pl.reciprocal(jnp.sum(p, axis=-1, keepdims=True), approx=True)
        oh = jnp.einsum('glm,gmv->glv', p.astype(BF16), vh,
                        preferred_element_type=F32)                        # (gb, L, dv)
        # concat(o_h) @ Wo == sum_h o_h @ Wo[h]  -> accumulate, no in-kernel concat
        proj = proj + jnp.dot(oh.reshape(gb * L, d_v).astype(BF16),
                              wo[h * d_v:(h + 1) * d_v, :],
                              preferred_element_type=F32)

    y = proj + bo_ref[...] + xf                             # residual
    mu = jnp.mean(y, axis=-1, keepdims=True)
    var = jnp.mean((y - mu) ** 2, axis=-1, keepdims=True)
    yn = (y - mu) * jax.lax.rsqrt(var + 1e-5)               # nn.LayerNorm eps
    yn = yn * g_ref[...] + beta_ref[...]
    o_ref[...] = yn.reshape(gb, L, D).astype(o_ref.dtype)


def fused_mha_ln(x3d, wqkv, bqkv, wo, bo, gamma, beta, cfg):
    """x3d: (G, L, D) -> LayerNorm(MHA(x) + x), self-attention along axis L."""
    G, L, D = x3d.shape
    H, dk, dv = cfg['n_heads'], cfg['d_k'], cfg['d_v']
    E = H * (2 * dk + dv)
    nblk = _split2(G)
    gb = G // nblk
    kernel = partial(_mha_ln_kernel, n_heads=H, d_k=dk, d_v=dv)
    return pl.pallas_call(
        kernel,
        out_shape=jax.ShapeDtypeStruct((G, L, D), F32),
        grid=(nblk,),
        in_specs=[pl.BlockSpec((gb, L, D), lambda i: (i, 0, 0)),
                  pl.BlockSpec((D, E), lambda i: (0, 0)),
                  pl.BlockSpec((1, E), lambda i: (0, 0)),
                  pl.BlockSpec((H * dv, D), lambda i: (0, 0)),
                  pl.BlockSpec((1, D), lambda i: (0, 0)),
                  pl.BlockSpec((1, D), lambda i: (0, 0)),
                  pl.BlockSpec((1, D), lambda i: (0, 0))],
        out_specs=pl.BlockSpec((gb, L, D), lambda i: (i, 0, 0)),
        compiler_params=pltpu.CompilerParams(dimension_semantics=("parallel",)),
    )(x3d, wqkv, bqkv.reshape(1, E), wo, bo.reshape(1, D),
      gamma.reshape(1, D), beta.reshape(1, D))


def st_block(x, lp, cfg, *, last_layer):
    """One STBlock: norm1(STN(x)+x) then norm2(TTN(.)+.), dropout = identity."""
    B, T, N, D = x.shape
    # Spatial attention over the node axis: (B,T,N,D)->(B*T,N,D) is a free reshape.
    y = fused_mha_ln(x.reshape(B * T, N, D),
                     lp['s_wqkv'], lp['s_bqkv'], lp['s_wo'], lp['s_bo'],
                     lp['norm1_g'], lp['norm1_b'], cfg).reshape(B, T, N, D)
    # Temporal attention over the time axis: one small XLA transpose to (B*N,T,D).
    t_in = y.transpose(0, 2, 1, 3).reshape(B * N, T, D)
    z = fused_mha_ln(t_in,
                     lp['t_wqkv'], lp['t_bqkv'], lp['t_wo'], lp['t_bo'],
                     lp['norm2_g'], lp['norm2_b'], cfg)
    if last_layer:
        return z                       # (B*N, T, D): exactly what the pred head wants
    return z.reshape(B, N, T, D).transpose(0, 2, 1, 3)      # back to (B,T,N,D)


# ----------------------------- fused pred head ------------------------------

def _pred_kernel(x_ref, wft_ref, wt_ref, bt_ref, o_ref, *, n_feat):
    """Feature projection (d_feature tiny -> VPU multiply + lane reduce, no width-1
    MXU matmul) followed by the time projection (rb,T)@(T,P); lane-dense output."""
    rb, T, D = x_ref.shape
    P = wt_ref.shape[-1]
    x = x_ref[...]                                           # (rb, T, D)
    wt = wt_ref[...]                                         # (T, P)
    cols = []
    for f in range(n_feat):                                  # d_feature == 1 in STTN
        wf_row = wft_ref[f, :].reshape(1, 1, D)
        y1 = jnp.sum(x * wf_row, axis=-1)                    # (rb, T)
        cols.append(jnp.dot(y1, wt, preferred_element_type=F32)
                    + bt_ref[f:f + 1, :])                    # (rb, P)
    out = cols[0] if n_feat == 1 else jnp.stack(cols, axis=-1).reshape(rb, P * n_feat)
    o_ref[...] = out.astype(o_ref.dtype)


def pred_forward(params, x_rtd, cfg, *, batch):
    """x_rtd: (R=B*N, T, D) -> (B, len_pred, N, d_feature)."""
    R, T, D = x_rtd.shape
    Fd, P = cfg['d_feature'], cfg['len_pred']
    N = R // batch
    nblk = _split2(R)
    rb = R // nblk
    wt = params['pred_w_time']                               # (T, P)
    # Fold the feature-projection bias through the time projection:
    # (y + bf) @ Wt + bt  ==  y @ Wt + (bf * sum_t Wt[t,:] + bt)
    bt_eff = (params['pred_b_feat'][:, None] * jnp.sum(wt, axis=0, keepdims=True)
              + params['pred_b_time'][None, :])              # (F, P)

    out = pl.pallas_call(
        partial(_pred_kernel, n_feat=Fd),
        out_shape=jax.ShapeDtypeStruct((R, P * Fd), F32),
        grid=(nblk,),
        in_specs=[pl.BlockSpec((rb, T, D), lambda i: (i, 0, 0)),
                  pl.BlockSpec((Fd, D), lambda i: (0, 0)),
                  pl.BlockSpec((T, P), lambda i: (0, 0)),
                  pl.BlockSpec((Fd, P), lambda i: (0, 0))],
        out_specs=pl.BlockSpec((rb, P * Fd), lambda i: (i, 0)),
        compiler_params=pltpu.CompilerParams(dimension_semantics=("parallel",)),
    )(x_rtd, params['pred_w_feat'].T, wt, bt_eff)
    return out.reshape(batch, N, P, Fd).transpose(0, 2, 1, 3)


# ------------------------------- model glue ---------------------------------

def init_params(key, cfg):
    D, Fd = cfg['d_model'], cfg['d_feature']
    H, dk, dv = cfg['n_heads'], cfg['d_k'], cfg['d_v']
    T, P = cfg['len_his'], cfg['len_pred']
    keys = iter(jax.random.split(key, 8 + 8 * cfg['n_layers']))

    def w(shape):
        return jax.random.normal(next(keys), shape, jnp.float32) * 0.1

    E = H * (2 * dk + dv)
    params = {
        'enc_emb_w': w((Fd, D)), 'enc_emb_b': jnp.zeros((D,), jnp.float32),
        'enc_wih': w((D, 4 * D)), 'enc_whh': w((D, 4 * D)),
        'enc_b': jnp.zeros((4 * D,), jnp.float32),   # = b_ih + b_hh of nn.LSTM
        'pred_w_feat': w((D, Fd)), 'pred_b_feat': jnp.zeros((Fd,), jnp.float32),
        'pred_w_time': w((T, P)), 'pred_b_time': jnp.zeros((P,), jnp.float32),
        'layers': [],
    }
    inv_sqrt_dk = 1.0 / math.sqrt(dk)
    for _ in range(cfg['n_layers']):
        lp = {}
        for pre in ('s', 't'):                       # spatial / temporal attention
            # [Wq | Wk | Wv] concatenated -> single MXU matmul; the 1/sqrt(d_k)
            # score scale is folded into the Wq columns (do the same — plus the
            # q-bias — when porting real PyTorch weights).
            wqkv = w((D, E))
            lp[pre + '_wqkv'] = wqkv.at[:, :H * dk].multiply(inv_sqrt_dk)
            lp[pre + '_bqkv'] = jnp.zeros((E,), jnp.float32)
            lp[pre + '_wo'] = w((H * dv, D))
            lp[pre + '_bo'] = jnp.zeros((D,), jnp.float32)
        lp['norm1_g'] = jnp.ones((D,), jnp.float32)
        lp['norm1_b'] = jnp.zeros((D,), jnp.float32)
        lp['norm2_g'] = jnp.ones((D,), jnp.float32)
        lp['norm2_b'] = jnp.zeros((D,), jnp.float32)
        params['layers'].append(lp)
    return params


def sttn_forward(params, x, cfg):
    B = x.shape[0]
    h = encoder_forward(params, x, cfg)              # (B, T, N, D); cell state unused
    n_layers = len(params['layers'])
    for li, lp in enumerate(params['layers']):
        h = st_block(h, lp, cfg, last_layer=(li == n_layers - 1))
    # After the last layer h is (B*N, T, D) — consumed by the pred head as-is.
    return pred_forward(params, h, cfg, batch=B)


# ---------------------------------- main ------------------------------------

if __name__ == "__main__":
    cfg = dict(d_k=8, d_v=8, d_feature=1, d_model=32, len_his=8, len_pred=8,
               n_heads=4, n_nodes=16, n_layers=2)
    B = 2
    x = jax.random.normal(jax.random.PRNGKey(0),
                          (B, cfg['len_his'], cfg['n_nodes'], cfg['d_feature']),
                          jnp.float32)
    params = init_params(jax.random.PRNGKey(42), cfg)

    fwd = jax.jit(lambda p, xi: sttn_forward(p, xi, cfg))
    out = fwd(params, x)
    jax.block_until_ready(out)
    assert out.shape == (B, cfg['len_pred'], cfg['n_nodes'], cfg['d_feature'])
    assert bool(jnp.all(jnp.isfinite(out)))
    print("KERNEL_OK")
</pallas_src>

<mosaic_0001>
module attributes {stable_mosaic.version = 11 : i64} {
  func.func @_encoder_kernel(%arg0: i32, %arg1: i32, %arg2: memref<1x1x16x1xf32, #tpu.memory_space<vmem>>, %arg3: memref<1x128xf32, #tpu.memory_space<vmem>>, %arg4: memref<1x128xf32, #tpu.memory_space<vmem>>, %arg5: memref<32x128xf32, #tpu.memory_space<vmem>>, %arg6: memref<1x1x16x32xf32, #tpu.memory_space<vmem>>, %arg7: memref<16x32xf32, #tpu.memory_space<vmem>>, %arg8: memref<16x32xf32, #tpu.memory_space<vmem>>) attributes {dimension_semantics = [#tpu.dimension_semantics<parallel>, #tpu.dimension_semantics<arbitrary>], iteration_bounds = array<i64: 2, 8>, scalar_prefetch = 0 : i64, scratch_operands = 2 : i64, tpu.core_type = #tpu.core_type<tc>, window_params = [{transform_indices = @transform_0, window_bounds = array<i64: 1, 1, 16, 1>}, {pipeline_mode = #tpu.pipeline_mode<synchronous>, transform_indices = @transform_1, window_bounds = array<i64: 1, 128>}, {pipeline_mode = #tpu.pipeline_mode<synchronous>, transform_indices = @transform_2, window_bounds = array<i64: 1, 128>}, {pipeline_mode = #tpu.pipeline_mode<synchronous>, transform_indices = @transform_3, window_bounds = array<i64: 32, 128>}, {transform_indices = @transform_4, window_bounds = array<i64: 1, 1, 16, 32>}]} {
    %c0_i32 = arith.constant 0 : i32
    %0 = arith.cmpi eq, %arg1, %c0_i32 : i32
    %1 = arith.extui %0 : i1 to i32
    %c0_i32_0 = arith.constant 0 : i32
    %2 = arith.cmpi ne, %1, %c0_i32_0 : i32
    scf.if %2 {
      %cst_25 = arith.constant 0.000000e+00 : f32
      %46 = vector.broadcast %cst_25 : f32 to vector<16x32xf32>
      %c0_26 = arith.constant 0 : index
      %c0_27 = arith.constant 0 : index
      %47 = vector.load %arg7[%c0_26, %c0_27] : memref<16x32xf32, #tpu.memory_space<vmem>>, vector<16x32xf32>
      tpu.vector_store %arg7[%c0_26, %c0_27], %46 {strides = array<i32>} : memref<16x32xf32, #tpu.memory_space<vmem>>, vector<16x32xf32>,
      %cst_28 = arith.constant 0.000000e+00 : f32
      %48 = vector.broadcast %cst_28 : f32 to vector<16x32xf32>
      %c0_29 = arith.constant 0 : index
      %c0_30 = arith.constant 0 : index
      %49 = vector.load %arg8[%c0_29, %c0_30] : memref<16x32xf32, #tpu.memory_space<vmem>>, vector<16x32xf32>
      tpu.vector_store %arg8[%c0_29, %c0_30], %48 {strides = array<i32>} : memref<16x32xf32, #tpu.memory_space<vmem>>, vector<16x32xf32>,
    } else {
    }
    %c0 = arith.constant 0 : index
    %c0_1 = arith.constant 0 : index
    %c0_2 = arith.constant 0 : index
    %c0_3 = arith.constant 0 : index
    %3 = vector.load %arg2[%c0, %c0_1, %c0_2, %c0_3] : memref<1x1x16x1xf32, #tpu.memory_space<vmem>>, vector<1x1x16x1xf32>
    %4 = vector.shape_cast %3 : vector<1x1x16x1xf32> to vector<16x1xf32>
    %c0_4 = arith.constant 0 : index
    %c0_5 = arith.constant 0 : index
    %5 = vector.load %arg3[%c0_4, %c0_5] : memref<1x128xf32, #tpu.memory_space<vmem>>, vector<1x128xf32>
    %6 = vector.broadcast %4 : vector<16x1xf32> to vector<16x128xf32>
    %7 = vector.broadcast %5 : vector<1x128xf32> to vector<16x128xf32>
    %8 = arith.mulf %6, %7 : vector<16x128xf32>
    %c0_6 = arith.constant 0 : index
    %c0_7 = arith.constant 0 : index
    %9 = vector.load %arg4[%c0_6, %c0_7] : memref<1x128xf32, #tpu.memory_space<vmem>>, vector<1x128xf32>
    %10 = vector.broadcast %9 : vector<1x128xf32> to vector<16x128xf32>
    %11 = arith.addf %8, %10 : vector<16x128xf32>
    %c0_8 = arith.constant 0 : index
    %c0_9 = arith.constant 0 : index
    %12 = vector.load %arg7[%c0_8, %c0_9] : memref<16x32xf32, #tpu.memory_space<vmem>>, vector<16x32xf32>
    %c0_10 = arith.constant 0 : index
    %c0_11 = arith.constant 0 : index
    %13 = vector.load %arg5[%c0_10, %c0_11] : memref<32x128xf32, #tpu.memory_space<vmem>>, vector<32x128xf32>
    %cst = arith.constant dense<0.000000e+00> : vector<16x128xf32>
    %14 = tpu.matmul %12, %13, %cst {dimension_numbers = #tpu.dot_dimension_numbers<[1], [0], [0], [1], [0, 0, 1, 1], [], []>} : vector<16x32xf32>, vector<32x128xf32>, vector<16x128xf32> -> vector<16x128xf32>
    %15 = arith.addf %11, %14 : vector<16x128xf32>
    %16 = vector.extract_strided_slice %15 {offsets = [0, 0], sizes = [16, 32], strides = [1, 1]} : vector<16x128xf32> to vector<16x32xf32>
    %17 = arith.negf %16 : vector<16x32xf32>
    %18 = math.exp %17 : vector<16x32xf32>
    %cst_12 = arith.constant 1.000000e+00 : f32
    %19 = vector.broadcast %cst_12 : f32 to vector<16x32xf32>
    %20 = arith.addf %19, %18 : vector<16x32xf32>
    %21 = arith.divf %19, %20 : vector<16x32xf32>
    %22 = vector.extract_strided_slice %15 {offsets = [0, 32], sizes = [16, 32], strides = [1, 1]} : vector<16x128xf32> to vector<16x32xf32>
    %23 = arith.negf %22 : vector<16x32xf32>
    %24 = math.exp %23 : vector<16x32xf32>
    %cst_13 = arith.constant 1.000000e+00 : f32
    %25 = vector.broadcast %cst_13 : f32 to vector<16x32xf32>
    %26 = arith.addf %25, %24 : vector<16x32xf32>
    %27 = arith.divf %25, %26 : vector<16x32xf32>
    %28 = vector.extract_strided_slice %15 {offsets = [0, 64], sizes = [16, 32], strides = [1, 1]} : vector<16x128xf32> to vector<16x32xf32>
    %29 = math.tanh %28 : vector<16x32xf32>
    %30 = vector.extract_strided_slice %15 {offsets = [0, 96], sizes = [16, 32], strides = [1, 1]} : vector<16x128xf32> to vector<16x32xf32>
    %31 = arith.negf %30 : vector<16x32xf32>
    %32 = math.exp %31 : vector<16x32xf32>
    %cst_14 = arith.constant 1.000000e+00 : f32
    %33 = vector.broadcast %cst_14 : f32 to vector<16x32xf32>
    %34 = arith.addf %33, %32 : vector<16x32xf32>
    %35 = arith.divf %33, %34 : vector<16x32xf32>
    %c0_15 = arith.constant 0 : index
    %c0_16 = arith.constant 0 : index
    %36 = vector.load %arg8[%c0_15, %c0_16] : memref<16x32xf32, #tpu.memory_space<vmem>>, vector<16x32xf32>
    %37 = arith.mulf %27, %36 : vector<16x32xf32>
    %38 = arith.mulf %21, %29 : vector<16x32xf32>
    %39 = arith.addf %37, %38 : vector<16x32xf32>
    %40 = math.tanh %39 : vector<16x32xf32>
    %41 = arith.mulf %35, %40 : vector<16x32xf32>
    %c0_17 = arith.constant 0 : index
    %c0_18 = arith.constant 0 : index
    %42 = vector.load %arg8[%c0_17, %c0_18] : memref<16x32xf32, #tpu.memory_space<vmem>>, vector<16x32xf32>
    tpu.vector_store %arg8[%c0_17, %c0_18], %39 {strides = array<i32>} : memref<16x32xf32, #tpu.memory_space<vmem>>, vector<16x32xf32>,
    %c0_19 = arith.constant 0 : index
    %c0_20 = arith.constant 0 : index
    %43 = vector.load %arg7[%c0_19, %c0_20] : memref<16x32xf32, #tpu.memory_space<vmem>>, vector<16x32xf32>
    tpu.vector_store %arg7[%c0_19, %c0_20], %41 {strides = array<i32>} : memref<16x32xf32, #tpu.memory_space<vmem>>, vector<16x32xf32>,
    %44 = vector.shape_cast %41 : vector<16x32xf32> to vector<1x1x16x32xf32>
    %c0_21 = arith.constant 0 : index
    %c0_22 = arith.constant 0 : index
    %c0_23 = arith.constant 0 : index
    %c0_24 = arith.constant 0 : index
    %45 = vector.load %arg6[%c0_21, %c0_22, %c0_23, %c0_24] : memref<1x1x16x32xf32, #tpu.memory_space<vmem>>, vector<1x1x16x32xf32>
    tpu.vector_store %arg6[%c0_21, %c0_22, %c0_23, %c0_24], %44 {strides = array<i32>} : memref<1x1x16x32xf32, #tpu.memory_space<vmem>>, vector<1x1x16x32xf32>,
    return
  }
  func.func @transform_0(%arg0: i32, %arg1: i32) -> (i32, i32, i32, i32) {
    %c0_i32 = arith.constant 0 : i32
    %c0_i32_0 = arith.constant 0 : i32
    %c0_i32_1 = arith.constant 0 : i32
    return %arg0, %arg1, %c0_i32, %c0_i32_0 : i32, i32, i32, i32
  }
  func.func @transform_1(%arg0: i32, %arg1: i32) -> (i32, i32) {
    %c0_i32 = arith.constant 0 : i32
    %c0_i32_0 = arith.constant 0 : i32
    %c0_i32_1 = arith.constant 0 : i32
    return %c0_i32, %c0_i32_0 : i32, i32
  }
  func.func @transform_2(%arg0: i32, %arg1: i32) -> (i32, i32) {
    %c0_i32 = arith.constant 0 : i32
    %c0_i32_0 = arith.constant 0 : i32
    %c0_i32_1 = arith.constant 0 : i32
    return %c0_i32, %c0_i32_0 : i32, i32
  }
  func.func @transform_3(%arg0: i32, %arg1: i32) -> (i32, i32) {
    %c0_i32 = arith.constant 0 : i32
    %c0_i32_0 = arith.constant 0 : i32
    %c0_i32_1 = arith.constant 0 : i32
    return %c0_i32, %c0_i32_0 : i32, i32
  }
  func.func @transform_4(%arg0: i32, %arg1: i32) -> (i32, i32, i32, i32) {
    %c0_i32 = arith.constant 0 : i32
    %c0_i32_0 = arith.constant 0 : i32
    %c0_i32_1 = arith.constant 0 : i32
    return %arg0, %arg1, %c0_i32, %c0_i32_0 : i32, i32, i32, i32
  }
}

module attributes {stable_mosaic.version = 11 : i64} {
  func.func @_mha_ln_kernel(%arg0: i32, %arg1: memref<8x16x32xf32, #tpu.memory_space<vmem>>, %arg2: memref<32x96xf32, #tpu.memory_space<vmem>>, %arg3: memref<1x96xf32, #tpu.memory_space<vmem>>, %arg4: memref<32x32xf32, #tpu.memory_space<vmem>>, %arg5: memref<1x32xf32, #tpu.memory_space<vmem>>, %arg6: memref<1x32xf32, #tpu.memory_space<vmem>>, %arg7: memref<1x32xf32, #tpu.memory_space<vmem>>, %arg8: memref<8x16x32xf32, #tpu.memory_space<vmem>>) attributes {dimension_semantics = [#tpu.dimension_semantics<parallel>], iteration_bounds = array<i64: 2>, scalar_prefetch = 0 : i64, scratch_operands = 0 : i64, tpu.core_type = #tpu.core_type<tc>, window_params = [{transform_indices = @transform_0, window_bounds = array<i64: 8, 16, 32>}, {pipeline_mode = #tpu.pipeline_mode<synchronous>, transform_indices = @transform_1, window_bounds = array<i64: 32, 96>}, {pipeline_mode = #tpu.pipeline_mode<synchronous>, transform_indices = @transform_2, window_bounds = array<i64: 1, 96>}, {pipeline_mode = #tpu.pipeline_mode<synchronous>, transform_indices = @transform_3, window_bounds = array<i64: 32, 32>}, {pipeline_mode = #tpu.pipeline_mode<synchronous>, transform_indices = @transform_4, window_bounds = array<i64: 1, 32>}, {pipeline_mode = #tpu.pipeline_mode<synchronous>, transform_indices = @transform_5, window_bounds = array<i64: 1, 32>}, {pipeline_mode = #tpu.pipeline_mode<synchronous>, transform_indices = @transform_6, window_bounds = array<i64: 1, 32>}, {transform_indices = @transform_7, window_bounds = array<i64: 8, 16, 32>}]} {
    %c0 = arith.constant 0 : index
    %c0_0 = arith.constant 0 : index
    %c0_1 = arith.constant 0 : index
    %0 = vector.load %arg1[%c0, %c0_0, %c0_1] : memref<8x16x32xf32, #tpu.memory_space<vmem>>, vector<8x16x32xf32>
    %1 = vector.shape_cast %0 : vector<8x16x32xf32> to vector<128x32xf32>
    %2 = arith.truncf %1 : vector<128x32xf32> to vector<128x32xbf16>
    %c0_2 = arith.constant 0 : index
    %c0_3 = arith.constant 0 : index
    %3 = vector.load %arg2[%c0_2, %c0_3] : memref<32x96xf32, #tpu.memory_space<vmem>>, vector<32x96xf32>
    %4 = arith.truncf %3 : vector<32x96xf32> to vector<32x96xbf16>
    %cst = arith.constant dense<0.000000e+00> : vector<128x96xf32>
    %5 = tpu.matmul %2, %4, %cst {dimension_numbers = #tpu.dot_dimension_numbers<[1], [0], [0], [1], [0, 0, 1, 1], [], []>} : vector<128x32xbf16>, vector<32x96xbf16>, vector<128x96xf32> -> vector<128x96xf32>
    %c0_4 = arith.constant 0 : index
    %c0_5 = arith.constant 0 : index
    %6 = vector.load %arg3[%c0_4, %c0_5] : memref<1x96xf32, #tpu.memory_space<vmem>>, vector<1x96xf32>
    %7 = vector.broadcast %6 : vector<1x96xf32> to vector<128x96xf32>
    %8 = arith.addf %5, %7 : vector<128x96xf32>
    %9 = vector.shape_cast %8 : vector<128x96xf32> to vector<8x16x96xf32>
    %c0_6 = arith.constant 0 : index
    %c0_7 = arith.constant 0 : index
    %10 = vector.load %arg4[%c0_6, %c0_7] : memref<32x32xf32, #tpu.memory_space<vmem>>, vector<32x32xf32>
    %11 = arith.truncf %10 : vector<32x32xf32> to vector<32x32xbf16>
    %cst_8 = arith.constant 0.000000e+00 : f32
    %12 = vector.broadcast %cst_8 : f32 to vector<128x32xf32>
    %13 = vector.extract_strided_slice %9 {offsets = [0, 0, 0], sizes = [8, 16, 8], strides = [1, 1, 1]} : vector<8x16x96xf32> to vector<8x16x8xf32>
    %14 = arith.truncf %13 : vector<8x16x8xf32> to vector<8x16x8xbf16>
    %15 = vector.extract_strided_slice %9 {offsets = [0, 0, 32], sizes = [8, 16, 8], strides = [1, 1, 1]} : vector<8x16x96xf32> to vector<8x16x8xf32>
    %16 = arith.truncf %15 : vector<8x16x8xf32> to vector<8x16x8xbf16>
    %17 = vector.extract_strided_slice %9 {offsets = [0, 0, 64], sizes = [8, 16, 8], strides = [1, 1, 1]} : vector<8x16x96xf32> to vector<8x16x8xf32>
    %18 = arith.truncf %17 : vector<8x16x8xf32> to vector<8x16x8xbf16>
    "tpu.trace_start"() <{level = 10 : i32, message = "glk,gmk->glm"}> : () -> ()
    %cst_9 = arith.constant dense<0.000000e+00> : vector<8x16x16xf32>
    %19 = tpu.matmul %14, %16, %cst_9 {dimension_numbers = #tpu.dot_dimension_numbers<[2], [2], [1], [1], [0, 0, 0, 1, 1, 1], [0], [0]>} : vector<8x16x8xbf16>, vector<8x16x8xbf16>, vector<8x16x16xf32> -> vector<8x16x16xf32>
    "tpu.trace_stop"() : () -> ()
    %cst_10 = arith.constant dense<0xFF800000> : vector<8x16xf32>
    %20 = vector.multi_reduction <maximumf>, %19, %cst_10 [2] : vector<8x16x16xf32> to vector<8x16xf32>
    %21 = vector.shape_cast %20 : vector<8x16xf32> to vector<8x16x1xf32>
    %22 = vector.broadcast %21 : vector<8x16x1xf32> to vector<8x16x16xf32>
    %23 = arith.subf %19, %22 : vector<8x16x16xf32>
    %24 = math.exp %23 : vector<8x16x16xf32>
    %cst_11 = arith.constant dense<0.000000e+00> : vector<8x16xf32>
    %25 = vector.multi_reduction <add>, %24, %cst_11 [2] : vector<8x16x16xf32> to vector<8x16xf32>
    %26 = vector.shape_cast %25 : vector<8x16xf32> to vector<8x16x1xf32>
    %27 = tpu.reciprocal %26 {approx = true} : vector<8x16x1xf32> -> vector<8x16x1xf32>
    %28 = vector.broadcast %27 : vector<8x16x1xf32> to vector<8x16x16xf32>
    %29 = arith.mulf %24, %28 : vector<8x16x16xf32>
    %30 = arith.truncf %29 : vector<8x16x16xf32> to vector<8x16x16xbf16>
    "tpu.trace_start"() <{level = 10 : i32, message = "glm,gmv->glv"}> : () -> ()
    %cst_12 = arith.constant dense<0.000000e+00> : vector<8x16x8xf32>
    %31 = tpu.matmul %30, %18, %cst_12 {dimension_numbers = #tpu.dot_dimension_numbers<[2], [1], [1], [2], [0, 0, 0, 1, 1, 2], [0], [0]>} : vector<8x16x16xbf16>, vector<8x16x8xbf16>, vector<8x16x8xf32> -> vector<8x16x8xf32>
    "tpu.trace_stop"() : () -> ()
    %32 = vector.shape_cast %31 : vector<8x16x8xf32> to vector<128x8xf32>
    %33 = arith.truncf %32 : vector<128x8xf32> to vector<128x8xbf16>
    %34 = vector.extract_strided_slice %11 {offsets = [0, 0], sizes = [8, 32], strides = [1, 1]} : vector<32x32xbf16> to vector<8x32xbf16>
    %cst_13 = arith.constant dense<0.000000e+00> : vector<128x32xf32>
    %35 = tpu.matmul %33, %34, %cst_13 {dimension_numbers = #tpu.dot_dimension_numbers<[1], [0], [0], [1], [0, 0, 1, 1], [], []>} : vector<128x8xbf16>, vector<8x32xbf16>, vector<128x32xf32> -> vector<128x32xf32>
    %36 = arith.addf %12, %35 : vector<128x32xf32>
    %37 = vector.extract_strided_slice %9 {offsets = [0, 0, 8], sizes = [8, 16, 8], strides = [1, 1, 1]} : vector<8x16x96xf32> to vector<8x16x8xf32>
    %38 = arith.truncf %37 : vector<8x16x8xf32> to vector<8x16x8xbf16>
    %39 = vector.extract_strided_slice %9 {offsets = [0, 0, 40], sizes = [8, 16, 8], strides = [1, 1, 1]} : vector<8x16x96xf32> to vector<8x16x8xf32>
    %40 = arith.truncf %39 : vector<8x16x8xf32> to vector<8x16x8xbf16>
    %41 = vector.extract_strided_slice %9 {offsets = [0, 0, 72], sizes = [8, 16, 8], strides = [1, 1, 1]} : vector<8x16x96xf32> to vector<8x16x8xf32>
    %42 = arith.truncf %41 : vector<8x16x8xf32> to vector<8x16x8xbf16>
    "tpu.trace_start"() <{level = 10 : i32, message = "glk,gmk->glm"}> : () -> ()
    %cst_14 = arith.constant dense<0.000000e+00> : vector<8x16x16xf32>
    %43 = tpu.matmul %38, %40, %cst_14 {dimension_numbers = #tpu.dot_dimension_numbers<[2], [2], [1], [1], [0, 0, 0, 1, 1, 1], [0], [0]>} : vector<8x16x8xbf16>, vector<8x16x8xbf16>, vector<8x16x16xf32> -> vector<8x16x16xf32>
    "tpu.trace_stop"() : () -> ()
    %cst_15 = arith.constant dense<0xFF800000> : vector<8x16xf32>
    %44 = vector.multi_reduction <maximumf>, %43, %cst_15 [2] : vector<8x16x16xf32> to vector<8x16xf32>
    %45 = vector.shape_cast %44 : vector<8x16xf32> to vector<8x16x1xf32>
    %46 = vector.broadcast %45 : vector<8x16x1xf32> to vector<8x16x16xf32>
    %47 = arith.subf %43, %46 : vector<8x16x16xf32>
    %48 = math.exp %47 : vector<8x16x16xf32>
    %cst_16 = arith.constant dense<0.000000e+00> : vector<8x16xf32>
    %49 = vector.multi_reduction <add>, %48, %cst_16 [2] : vector<8x16x16xf32> to vector<8x16xf32>
    %50 = vector.shape_cast %49 : vector<8x16xf32> to vector<8x16x1xf32>
    %51 = tpu.reciprocal %50 {approx = true} : vector<8x16x1xf32> -> vector<8x16x1xf32>
    %52 = vector.broadcast %51 : vector<8x16x1xf32> to vector<8x16x16xf32>
    %53 = arith.mulf %48, %52 : vector<8x16x16xf32>
    %54 = arith.truncf %53 : vector<8x16x16xf32> to vector<8x16x16xbf16>
    "tpu.trace_start"() <{level = 10 : i32, message = "glm,gmv->glv"}> : () -> ()
    %cst_17 = arith.constant dense<0.000000e+00> : vector<8x16x8xf32>
    %55 = tpu.matmul %54, %42, %cst_17 {dimension_numbers = #tpu.dot_dimension_numbers<[2], [1], [1], [2], [0, 0, 0, 1, 1, 2], [0], [0]>} : vector<8x16x16xbf16>, vector<8x16x8xbf16>, vector<8x16x8xf32> -> vector<8x16x8xf32>
    "tpu.trace_stop"() : () -> ()
    %56 = vector.shape_cast %55 : vector<8x16x8xf32> to vector<128x8xf32>
    %57 = arith.truncf %56 : vector<128x8xf32> to vector<128x8xbf16>
    %58 = vector.extract_strided_slice %11 {offsets = [8, 0], sizes = [8, 32], strides = [1, 1]} : vector<32x32xbf16> to vector<8x32xbf16>
    %cst_18 = arith.constant dense<0.000000e+00> : vector<128x32xf32>
    %59 = tpu.matmul %57, %58, %cst_18 {dimension_numbers = #tpu.dot_dimension_numbers<[1], [0], [0], [1], [0, 0, 1, 1], [], []>} : vector<128x8xbf16>, vector<8x32xbf16>, vector<128x32xf32> -> vector<128x32xf32>
    %60 = arith.addf %36, %59 : vector<128x32xf32>
    %61 = vector.extract_strided_slice %9 {offsets = [0, 0, 16], sizes = [8, 16, 8], strides = [1, 1, 1]} : vector<8x16x96xf32> to vector<8x16x8xf32>
    %62 = arith.truncf %61 : vector<8x16x8xf32> to vector<8x16x8xbf16>
    %63 = vector.extract_strided_slice %9 {offsets = [0, 0, 48], sizes = [8, 16, 8], strides = [1, 1, 1]} : vector<8x16x96xf32> to vector<8x16x8xf32>
    %64 = arith.truncf %63 : vector<8x16x8xf32> to vector<8x16x8xbf16>
    %65 = vector.extract_strided_slice %9 {offsets = [0, 0, 80], sizes = [8, 16, 8], strides = [1, 1, 1]} : vector<8x16x96xf32> to vector<8x16x8xf32>
    %66 = arith.truncf %65 : vector<8x16x8xf32> to vector<8x16x8xbf16>
    "tpu.trace_start"() <{level = 10 : i32, message = "glk,gmk->glm"}> : () -> ()
    %cst_19 = arith.constant dense<0.000000e+00> : vector<8x16x16xf32>
    %67 = tpu.matmul %62, %64, %cst_19 {dimension_numbers = #tpu.dot_dimension_numbers<[2], [2], [1], [1], [0, 0, 0, 1, 1, 1], [0], [0]>} : vector<8x16x8xbf16>, vector<8x16x8xbf16>, vector<8x16x16xf32> -> vector<8x16x16xf32>
    "tpu.trace_stop"() : () -> ()
    %cst_20 = arith.constant dense<0xFF800000> : vector<8x16xf32>
    %68 = vector.multi_reduction <maximumf>, %67, %cst_20 [2] : vector<8x16x16xf32> to vector<8x16xf32>
    %69 = vector.shape_cast %68 : vector<8x16xf32> to vector<8x16x1xf32>
    %70 = vector.broadcast %69 : vector<8x16x1xf32> to vector<8x16x16xf32>
    %71 = arith.subf %67, %70 : vector<8x16x16xf32>
    %72 = math.exp %71 : vector<8x16x16xf32>
    %cst_21 = arith.constant dense<0.000000e+00> : vector<8x16xf32>
    %73 = vector.multi_reduction <add>, %72, %cst_21 [2] : vector<8x16x16xf32> to vector<8x16xf32>
    %74 = vector.shape_cast %73 : vector<8x16xf32> to vector<8x16x1xf32>
    %75 = tpu.reciprocal %74 {approx = true} : vector<8x16x1xf32> -> vector<8x16x1xf32>
    %76 = vector.broadcast %75 : vector<8x16x1xf32> to vector<8x16x16xf32>
    %77 = arith.mulf %72, %76 : vector<8x16x16xf32>
    %78 = arith.truncf %77 : vector<8x16x16xf32> to vector<8x16x16xbf16>
    "tpu.trace_start"() <{level = 10 : i32, message = "glm,gmv->glv"}> : () -> ()
    %cst_22 = arith.constant dense<0.000000e+00> : vector<8x16x8xf32>
    %79 = tpu.matmul %78, %66, %cst_22 {dimension_numbers = #tpu.dot_dimension_numbers<[2], [1], [1], [2], [0, 0, 0, 1, 1, 2], [0], [0]>} : vector<8x16x16xbf16>, vector<8x16x8xbf16>, vector<8x16x8xf32> -> vector<8x16x8xf32>
    "tpu.trace_stop"() : () -> ()
    %80 = vector.shape_cast %79 : vector<8x16x8xf32> to vector<128x8xf32>
    %81 = arith.truncf %80 : vector<128x8xf32> to vector<128x8xbf16>
    %82 = vector.extract_strided_slice %11 {offsets = [16, 0], sizes = [8, 32], strides = [1, 1]} : vector<32x32xbf16> to vector<8x32xbf16>
    %cst_23 = arith.constant dense<0.000000e+00> : vector<128x32xf32>
    %83 = tpu.matmul %81, %82, %cst_23 {dimension_numbers = #tpu.dot_dimension_numbers<[1], [0], [0], [1], [0, 0, 1, 1], [], []>} : vector<128x8xbf16>, vector<8x32xbf16>, vector<128x32xf32> -> vector<128x32xf32>
    %84 = arith.addf %60, %83 : vector<128x32xf32>
    %85 = vector.extract_strided_slice %9 {offsets = [0, 0, 24], sizes = [8, 16, 8], strides = [1, 1, 1]} : vector<8x16x96xf32> to vector<8x16x8xf32>
    %86 = arith.truncf %85 : vector<8x16x8xf32> to vector<8x16x8xbf16>
    %87 = vector.extract_strided_slice %9 {offsets = [0, 0, 56], sizes = [8, 16, 8], strides = [1, 1, 1]} : vector<8x16x96xf32> to vector<8x16x8xf32>
    %88 = arith.truncf %87 : vector<8x16x8xf32> to vector<8x16x8xbf16>
    %89 = vector.extract_strided_slice %9 {offsets = [0, 0, 88], sizes = [8, 16, 8], strides = [1, 1, 1]} : vector<8x16x96xf32> to vector<8x16x8xf32>
    %90 = arith.truncf %89 : vector<8x16x8xf32> to vector<8x16x8xbf16>
    "tpu.trace_start"() <{level = 10 : i32, message = "glk,gmk->glm"}> : () -> ()
    %cst_24 = arith.constant dense<0.000000e+00> : vector<8x16x16xf32>
    %91 = tpu.matmul %86, %88, %cst_24 {dimension_numbers = #tpu.dot_dimension_numbers<[2], [2], [1], [1], [0, 0, 0, 1, 1, 1], [0], [0]>} : vector<8x16x8xbf16>, vector<8x16x8xbf16>, vector<8x16x16xf32> -> vector<8x16x16xf32>
    "tpu.trace_stop"() : () -> ()
    %cst_25 = arith.constant dense<0xFF800000> : vector<8x16xf32>
    %92 = vector.multi_reduction <maximumf>, %91, %cst_25 [2] : vector<8x16x16xf32> to vector<8x16xf32>
    %93 = vector.shape_cast %92 : vector<8x16xf32> to vector<8x16x1xf32>
    %94 = vector.broadcast %93 : vector<8x16x1xf32> to vector<8x16x16xf32>
    %95 = arith.subf %91, %94 : vector<8x16x16xf32>
    %96 = math.exp %95 : vector<8x16x16xf32>
    %cst_26 = arith.constant dense<0.000000e+00> : vector<8x16xf32>
    %97 = vector.multi_reduction <add>, %96, %cst_26 [2] : vector<8x16x16xf32> to vector<8x16xf32>
    %98 = vector.shape_cast %97 : vector<8x16xf32> to vector<8x16x1xf32>
    %99 = tpu.reciprocal %98 {approx = true} : vector<8x16x1xf32> -> vector<8x16x1xf32>
    %100 = vector.broadcast %99 : vector<8x16x1xf32> to vector<8x16x16xf32>
    %101 = arith.mulf %96, %100 : vector<8x16x16xf32>
    %102 = arith.truncf %101 : vector<8x16x16xf32> to vector<8x16x16xbf16>
    "tpu.trace_start"() <{level = 10 : i32, message = "glm,gmv->glv"}> : () -> ()
    %cst_27 = arith.constant dense<0.000000e+00> : vector<8x16x8xf32>
    %103 = tpu.matmul %102, %90, %cst_27 {dimension_numbers = #tpu.dot_dimension_numbers<[2], [1], [1], [2], [0, 0, 0, 1, 1, 2], [0], [0]>} : vector<8x16x16xbf16>, vector<8x16x8xbf16>, vector<8x16x8xf32> -> vector<8x16x8xf32>
    "tpu.trace_stop"() : () -> ()
    %104 = vector.shape_cast %103 : vector<8x16x8xf32> to vector<128x8xf32>
    %105 = arith.truncf %104 : vector<128x8xf32> to vector<128x8xbf16>
    %106 = vector.extract_strided_slice %11 {offsets = [24, 0], sizes = [8, 32], strides = [1, 1]} : vector<32x32xbf16> to vector<8x32xbf16>
    %cst_28 = arith.constant dense<0.000000e+00> : vector<128x32xf32>
    %107 = tpu.matmul %105, %106, %cst_28 {dimension_numbers = #tpu.dot_dimension_numbers<[1], [0], [0], [1], [0, 0, 1, 1], [], []>} : vector<128x8xbf16>, vector<8x32xbf16>, vector<128x32xf32> -> vector<128x32xf32>
    %108 = arith.addf %84, %107 : vector<128x32xf32>
    %c0_29 = arith.constant 0 : index
    %c0_30 = arith.constant 0 : index
    %109 = vector.load %arg5[%c0_29, %c0_30] : memref<1x32xf32, #tpu.memory_space<vmem>>, vector<1x32xf32>
    %110 = vector.broadcast %109 : vector<1x32xf32> to vector<128x32xf32>
    %111 = arith.addf %108, %110 : vector<128x32xf32>
    %112 = arith.addf %111, %1 : vector<128x32xf32>
    %cst_31 = arith.constant dense<0.000000e+00> : vector<128xf32>
    %113 = vector.multi_reduction <add>, %112, %cst_31 [1] : vector<128x32xf32> to vector<128xf32>
    %114 = vector.shape_cast %113 : vector<128xf32> to vector<128x1xf32>
    %cst_32 = arith.constant 3.200000e+01 : f32
    %115 = vector.broadcast %cst_32 : f32 to vector<128x1xf32>
    %116 = arith.divf %114, %115 : vector<128x1xf32>
    %117 = vector.broadcast %116 : vector<128x1xf32> to vector<128x32xf32>
    %118 = arith.subf %112, %117 : vector<128x32xf32>
    %119 = arith.mulf %118, %118 : vector<128x32xf32>
    %cst_33 = arith.constant dense<0.000000e+00> : vector<128xf32>
    %120 = vector.multi_reduction <add>, %119, %cst_33 [1] : vector<128x32xf32> to vector<128xf32>
    %121 = vector.shape_cast %120 : vector<128xf32> to vector<128x1xf32>
    %cst_34 = arith.constant 3.200000e+01 : f32
    %122 = vector.broadcast %cst_34 : f32 to vector<128x1xf32>
    %123 = arith.divf %121, %122 : vector<128x1xf32>
    %124 = vector.broadcast %116 : vector<128x1xf32> to vector<128x32xf32>
    %125 = arith.subf %112, %124 : vector<128x32xf32>
    %cst_35 = arith.constant 9.99999974E-6 : f32
    %126 = vector.broadcast %cst_35 : f32 to vector<128x1xf32>
    %127 = arith.addf %123, %126 : vector<128x1xf32>
    %128 = math.rsqrt %127 : vector<128x1xf32>
    %129 = vector.broadcast %128 : vector<128x1xf32> to vector<128x32xf32>
    %130 = arith.mulf %125, %129 : vector<128x32xf32>
    %c0_36 = arith.constant 0 : index
    %c0_37 = arith.constant 0 : index
    %131 = vector.load %arg6[%c0_36, %c0_37] : memref<1x32xf32, #tpu.memory_space<vmem>>, vector<1x32xf32>
    %132 = vector.broadcast %131 : vector<1x32xf32> to vector<128x32xf32>
    %133 = arith.mulf %130, %132 : vector<128x32xf32>
    %c0_38 = arith.constant 0 : index
    %c0_39 = arith.constant 0 : index
    %134 = vector.load %arg7[%c0_38, %c0_39] : memref<1x32xf32, #tpu.memory_space<vmem>>, vector<1x32xf32>
    %135 = vector.broadcast %134 : vector<1x32xf32> to vector<128x32xf32>
    %136 = arith.addf %133, %135 : vector<128x32xf32>
    %137 = vector.shape_cast %136 : vector<128x32xf32> to vector<8x16x32xf32>
    %c0_40 = arith.constant 0 : index
    %c0_41 = arith.constant 0 : index
    %c0_42 = arith.constant 0 : index
    %138 = vector.load %arg8[%c0_40, %c0_41, %c0_42] : memref<8x16x32xf32, #tpu.memory_space<vmem>>, vector<8x16x32xf32>
    tpu.vector_store %arg8[%c0_40, %c0_41, %c0_42], %137 {strides = array<i32>} : memref<8x16x32xf32, #tpu.memory_space<vmem>>, vector<8x16x32xf32>,
    return
  }
  func.func @transform_0(%arg0: i32) -> (i32, i32, i32) {
    %c0_i32 = arith.constant 0 : i32
    %c0_i32_0 = arith.constant 0 : i32
    %c0_i32_1 = arith.constant 0 : i32
    return %arg0, %c0_i32, %c0_i32_0 : i32, i32, i32
  }
  func.func @transform_1(%arg0: i32) -> (i32, i32) {
    %c0_i32 = arith.constant 0 : i32
    %c0_i32_0 = arith.constant 0 : i32
    %c0_i32_1 = arith.constant 0 : i32
    return %c0_i32, %c0_i32_0 : i32, i32
  }
  func.func @transform_2(%arg0: i32) -> (i32, i32) {
    %c0_i32 = arith.constant 0 : i32
    %c0_i32_0 = arith.constant 0 : i32
    %c0_i32_1 = arith.constant 0 : i32
    return %c0_i32, %c0_i32_0 : i32, i32
  }
  func.func @transform_3(%arg0: i32) -> (i32, i32) {
    %c0_i32 = arith.constant 0 : i32
    %c0_i32_0 = arith.constant 0 : i32
    %c0_i32_1 = arith.constant 0 : i32
    return %c0_i32, %c0_i32_0 : i32, i32
  }
  func.func @transform_4(%arg0: i32) -> (i32, i32) {
    %c0_i32 = arith.constant 0 : i32
    %c0_i32_0 = arith.constant 0 : i32
    %c0_i32_1 = arith.constant 0 : i32
    return %c0_i32, %c0_i32_0 : i32, i32
  }
  func.func @transform_5(%arg0: i32) -> (i32, i32) {
    %c0_i32 = arith.constant 0 : i32
    %c0_i32_0 = arith.constant 0 : i32
    %c0_i32_1 = arith.constant 0 : i32
    return %c0_i32, %c0_i32_0 : i32, i32
  }
  func.func @transform_6(%arg0: i32) -> (i32, i32) {
    %c0_i32 = arith.constant 0 : i32
    %c0_i32_0 = arith.constant 0 : i32
    %c0_i32_1 = arith.constant 0 : i32
    return %c0_i32, %c0_i32_0 : i32, i32
  }
  func.func @transform_7(%arg0: i32) -> (i32, i32, i32) {
    %c0_i32 = arith.constant 0 : i32
    %c0_i32_0 = arith.constant 0 : i32
    %c0_i32_1 = arith.constant 0 : i32
    return %arg0, %c0_i32, %c0_i32_0 : i32, i32, i32
  }
}

module attributes {stable_mosaic.version = 11 : i64} {
  func.func @_mha_ln_kernel(%arg0: i32, %arg1: memref<16x8x32xf32, #tpu.memory_space<vmem>>, %arg2: memref<32x96xf32, #tpu.memory_space<vmem>>, %arg3: memref<1x96xf32, #tpu.memory_space<vmem>>, %arg4: memref<32x32xf32, #tpu.memory_space<vmem>>, %arg5: memref<1x32xf32, #tpu.memory_space<vmem>>, %arg6: memref<1x32xf32, #tpu.memory_space<vmem>>, %arg7: memref<1x32xf32, #tpu.memory_space<vmem>>, %arg8: memref<16x8x32xf32, #tpu.memory_space<vmem>>) attributes {dimension_semantics = [#tpu.dimension_semantics<parallel>], iteration_bounds = array<i64: 2>, scalar_prefetch = 0 : i64, scratch_operands = 0 : i64, tpu.core_type = #tpu.core_type<tc>, window_params = [{transform_indices = @transform_0, window_bounds = array<i64: 16, 8, 32>}, {pipeline_mode = #tpu.pipeline_mode<synchronous>, transform_indices = @transform_1, window_bounds = array<i64: 32, 96>}, {pipeline_mode = #tpu.pipeline_mode<synchronous>, transform_indices = @transform_2, window_bounds = array<i64: 1, 96>}, {pipeline_mode = #tpu.pipeline_mode<synchronous>, transform_indices = @transform_3, window_bounds = array<i64: 32, 32>}, {pipeline_mode = #tpu.pipeline_mode<synchronous>, transform_indices = @transform_4, window_bounds = array<i64: 1, 32>}, {pipeline_mode = #tpu.pipeline_mode<synchronous>, transform_indices = @transform_5, window_bounds = array<i64: 1, 32>}, {pipeline_mode = #tpu.pipeline_mode<synchronous>, transform_indices = @transform_6, window_bounds = array<i64: 1, 32>}, {transform_indices = @transform_7, window_bounds = array<i64: 16, 8, 32>}]} {
    %c0 = arith.constant 0 : index
    %c0_0 = arith.constant 0 : index
    %c0_1 = arith.constant 0 : index
    %0 = vector.load %arg1[%c0, %c0_0, %c0_1] : memref<16x8x32xf32, #tpu.memory_space<vmem>>, vector<16x8x32xf32>
    %1 = vector.shape_cast %0 : vector<16x8x32xf32> to vector<128x32xf32>
    %2 = arith.truncf %1 : vector<128x32xf32> to vector<128x32xbf16>
    %c0_2 = arith.constant 0 : index
    %c0_3 = arith.constant 0 : index
    %3 = vector.load %arg2[%c0_2, %c0_3] : memref<32x96xf32, #tpu.memory_space<vmem>>, vector<32x96xf32>
    %4 = arith.truncf %3 : vector<32x96xf32> to vector<32x96xbf16>
    %cst = arith.constant dense<0.000000e+00> : vector<128x96xf32>
    %5 = tpu.matmul %2, %4, %cst {dimension_numbers = #tpu.dot_dimension_numbers<[1], [0], [0], [1], [0, 0, 1, 1], [], []>} : vector<128x32xbf16>, vector<32x96xbf16>, vector<128x96xf32> -> vector<128x96xf32>
    %c0_4 = arith.constant 0 : index
    %c0_5 = arith.constant 0 : index
    %6 = vector.load %arg3[%c0_4, %c0_5] : memref<1x96xf32, #tpu.memory_space<vmem>>, vector<1x96xf32>
    %7 = vector.broadcast %6 : vector<1x96xf32> to vector<128x96xf32>
    %8 = arith.addf %5, %7 : vector<128x96xf32>
    %9 = vector.shape_cast %8 : vector<128x96xf32> to vector<16x8x96xf32>
    %c0_6 = arith.constant 0 : index
    %c0_7 = arith.constant 0 : index
    %10 = vector.load %arg4[%c0_6, %c0_7] : memref<32x32xf32, #tpu.memory_space<vmem>>, vector<32x32xf32>
    %11 = arith.truncf %10 : vector<32x32xf32> to vector<32x32xbf16>
    %cst_8 = arith.constant 0.000000e+00 : f32
    %12 = vector.broadcast %cst_8 : f32 to vector<128x32xf32>
    %13 = vector.extract_strided_slice %9 {offsets = [0, 0, 0], sizes = [16, 8, 8], strides = [1, 1, 1]} : vector<16x8x96xf32> to vector<16x8x8xf32>
    %14 = arith.truncf %13 : vector<16x8x8xf32> to vector<16x8x8xbf16>
    %15 = vector.extract_strided_slice %9 {offsets = [0, 0, 32], sizes = [16, 8, 8], strides = [1, 1, 1]} : vector<16x8x96xf32> to vector<16x8x8xf32>
    %16 = arith.truncf %15 : vector<16x8x8xf32> to vector<16x8x8xbf16>
    %17 = vector.extract_strided_slice %9 {offsets = [0, 0, 64], sizes = [16, 8, 8], strides = [1, 1, 1]} : vector<16x8x96xf32> to vector<16x8x8xf32>
    %18 = arith.truncf %17 : vector<16x8x8xf32> to vector<16x8x8xbf16>
    "tpu.trace_start"() <{level = 10 : i32, message = "glk,gmk->glm"}> : () -> ()
    %cst_9 = arith.constant dense<0.000000e+00> : vector<16x8x8xf32>
    %19 = tpu.matmul %14, %16, %cst_9 {dimension_numbers = #tpu.dot_dimension_numbers<[2], [2], [1], [1], [0, 0, 0, 1, 1, 1], [0], [0]>} : vector<16x8x8xbf16>, vector<16x8x8xbf16>, vector<16x8x8xf32> -> vector<16x8x8xf32>
    "tpu.trace_stop"() : () -> ()
    %cst_10 = arith.constant dense<0xFF800000> : vector<16x8xf32>
    %20 = vector.multi_reduction <maximumf>, %19, %cst_10 [2] : vector<16x8x8xf32> to vector<16x8xf32>
    %21 = vector.shape_cast %20 : vector<16x8xf32> to vector<16x8x1xf32>
    %22 = vector.broadcast %21 : vector<16x8x1xf32> to vector<16x8x8xf32>
    %23 = arith.subf %19, %22 : vector<16x8x8xf32>
    %24 = math.exp %23 : vector<16x8x8xf32>
    %cst_11 = arith.constant dense<0.000000e+00> : vector<16x8xf32>
    %25 = vector.multi_reduction <add>, %24, %cst_11 [2] : vector<16x8x8xf32> to vector<16x8xf32>
    %26 = vector.shape_cast %25 : vector<16x8xf32> to vector<16x8x1xf32>
    %27 = tpu.reciprocal %26 {approx = true} : vector<16x8x1xf32> -> vector<16x8x1xf32>
    %28 = vector.broadcast %27 : vector<16x8x1xf32> to vector<16x8x8xf32>
    %29 = arith.mulf %24, %28 : vector<16x8x8xf32>
    %30 = arith.truncf %29 : vector<16x8x8xf32> to vector<16x8x8xbf16>
    "tpu.trace_start"() <{level = 10 : i32, message = "glm,gmv->glv"}> : () -> ()
    %cst_12 = arith.constant dense<0.000000e+00> : vector<16x8x8xf32>
    %31 = tpu.matmul %30, %18, %cst_12 {dimension_numbers = #tpu.dot_dimension_numbers<[2], [1], [1], [2], [0, 0, 0, 1, 1, 2], [0], [0]>} : vector<16x8x8xbf16>, vector<16x8x8xbf16>, vector<16x8x8xf32> -> vector<16x8x8xf32>
    "tpu.trace_stop"() : () -> ()
    %32 = vector.shape_cast %31 : vector<16x8x8xf32> to vector<128x8xf32>
    %33 = arith.truncf %32 : vector<128x8xf32> to vector<128x8xbf16>
    %34 = vector.extract_strided_slice %11 {offsets = [0, 0], sizes = [8, 32], strides = [1, 1]} : vector<32x32xbf16> to vector<8x32xbf16>
    %cst_13 = arith.constant dense<0.000000e+00> : vector<128x32xf32>
    %35 = tpu.matmul %33, %34, %cst_13 {dimension_numbers = #tpu.dot_dimension_numbers<[1], [0], [0], [1], [0, 0, 1, 1], [], []>} : vector<128x8xbf16>, vector<8x32xbf16>, vector<128x32xf32> -> vector<128x32xf32>
    %36 = arith.addf %12, %35 : vector<128x32xf32>
    %37 = vector.extract_strided_slice %9 {offsets = [0, 0, 8], sizes = [16, 8, 8], strides = [1, 1, 1]} : vector<16x8x96xf32> to vector<16x8x8xf32>
    %38 = arith.truncf %37 : vector<16x8x8xf32> to vector<16x8x8xbf16>
    %39 = vector.extract_strided_slice %9 {offsets = [0, 0, 40], sizes = [16, 8, 8], strides = [1, 1, 1]} : vector<16x8x96xf32> to vector<16x8x8xf32>
    %40 = arith.truncf %39 : vector<16x8x8xf32> to vector<16x8x8xbf16>
    %41 = vector.extract_strided_slice %9 {offsets = [0, 0, 72], sizes = [16, 8, 8], strides = [1, 1, 1]} : vector<16x8x96xf32> to vector<16x8x8xf32>
    %42 = arith.truncf %41 : vector<16x8x8xf32> to vector<16x8x8xbf16>
    "tpu.trace_start"() <{level = 10 : i32, message = "glk,gmk->glm"}> : () -> ()
    %cst_14 = arith.constant dense<0.000000e+00> : vector<16x8x8xf32>
    %43 = tpu.matmul %38, %40, %cst_14 {dimension_numbers = #tpu.dot_dimension_numbers<[2], [2], [1], [1], [0, 0, 0, 1, 1, 1], [0], [0]>} : vector<16x8x8xbf16>, vector<16x8x8xbf16>, vector<16x8x8xf32> -> vector<16x8x8xf32>
    "tpu.trace_stop"() : () -> ()
    %cst_15 = arith.constant dense<0xFF800000> : vector<16x8xf32>
    %44 = vector.multi_reduction <maximumf>, %43, %cst_15 [2] : vector<16x8x8xf32> to vector<16x8xf32>
    %45 = vector.shape_cast %44 : vector<16x8xf32> to vector<16x8x1xf32>
    %46 = vector.broadcast %45 : vector<16x8x1xf32> to vector<16x8x8xf32>
    %47 = arith.subf %43, %46 : vector<16x8x8xf32>
    %48 = math.exp %47 : vector<16x8x8xf32>
    %cst_16 = arith.constant dense<0.000000e+00> : vector<16x8xf32>
    %49 = vector.multi_reduction <add>, %48, %cst_16 [2] : vector<16x8x8xf32> to vector<16x8xf32>
    %50 = vector.shape_cast %49 : vector<16x8xf32> to vector<16x8x1xf32>
    %51 = tpu.reciprocal %50 {approx = true} : vector<16x8x1xf32> -> vector<16x8x1xf32>
    %52 = vector.broadcast %51 : vector<16x8x1xf32> to vector<16x8x8xf32>
    %53 = arith.mulf %48, %52 : vector<16x8x8xf32>
    %54 = arith.truncf %53 : vector<16x8x8xf32> to vector<16x8x8xbf16>
    "tpu.trace_start"() <{level = 10 : i32, message = "glm,gmv->glv"}> : () -> ()
    %cst_17 = arith.constant dense<0.000000e+00> : vector<16x8x8xf32>
    %55 = tpu.matmul %54, %42, %cst_17 {dimension_numbers = #tpu.dot_dimension_numbers<[2], [1], [1], [2], [0, 0, 0, 1, 1, 2], [0], [0]>} : vector<16x8x8xbf16>, vector<16x8x8xbf16>, vector<16x8x8xf32> -> vector<16x8x8xf32>
    "tpu.trace_stop"() : () -> ()
    %56 = vector.shape_cast %55 : vector<16x8x8xf32> to vector<128x8xf32>
    %57 = arith.truncf %56 : vector<128x8xf32> to vector<128x8xbf16>
    %58 = vector.extract_strided_slice %11 {offsets = [8, 0], sizes = [8, 32], strides = [1, 1]} : vector<32x32xbf16> to vector<8x32xbf16>
    %cst_18 = arith.constant dense<0.000000e+00> : vector<128x32xf32>
    %59 = tpu.matmul %57, %58, %cst_18 {dimension_numbers = #tpu.dot_dimension_numbers<[1], [0], [0], [1], [0, 0, 1, 1], [], []>} : vector<128x8xbf16>, vector<8x32xbf16>, vector<128x32xf32> -> vector<128x32xf32>
    %60 = arith.addf %36, %59 : vector<128x32xf32>
    %61 = vector.extract_strided_slice %9 {offsets = [0, 0, 16], sizes = [16, 8, 8], strides = [1, 1, 1]} : vector<16x8x96xf32> to vector<16x8x8xf32>
    %62 = arith.truncf %61 : vector<16x8x8xf32> to vector<16x8x8xbf16>
    %63 = vector.extract_strided_slice %9 {offsets = [0, 0, 48], sizes = [16, 8, 8], strides = [1, 1, 1]} : vector<16x8x96xf32> to vector<16x8x8xf32>
    %64 = arith.truncf %63 : vector<16x8x8xf32> to vector<16x8x8xbf16>
    %65 = vector.extract_strided_slice %9 {offsets = [0, 0, 80], sizes = [16, 8, 8], strides = [1, 1, 1]} : vector<16x8x96xf32> to vector<16x8x8xf32>
    %66 = arith.truncf %65 : vector<16x8x8xf32> to vector<16x8x8xbf16>
    "tpu.trace_start"() <{level = 10 : i32, message = "glk,gmk->glm"}> : () -> ()
    %cst_19 = arith.constant dense<0.000000e+00> : vector<16x8x8xf32>
    %67 = tpu.matmul %62, %64, %cst_19 {dimension_numbers = #tpu.dot_dimension_numbers<[2], [2], [1], [1], [0, 0, 0, 1, 1, 1], [0], [0]>} : vector<16x8x8xbf16>, vector<16x8x8xbf16>, vector<16x8x8xf32> -> vector<16x8x8xf32>
    "tpu.trace_stop"() : () -> ()
    %cst_20 = arith.constant dense<0xFF800000> : vector<16x8xf32>
    %68 = vector.multi_reduction <maximumf>, %67, %cst_20 [2] : vector<16x8x8xf32> to vector<16x8xf32>
    %69 = vector.shape_cast %68 : vector<16x8xf32> to vector<16x8x1xf32>
    %70 = vector.broadcast %69 : vector<16x8x1xf32> to vector<16x8x8xf32>
    %71 = arith.subf %67, %70 : vector<16x8x8xf32>
    %72 = math.exp %71 : vector<16x8x8xf32>
    %cst_21 = arith.constant dense<0.000000e+00> : vector<16x8xf32>
    %73 = vector.multi_reduction <add>, %72, %cst_21 [2] : vector<16x8x8xf32> to vector<16x8xf32>
    %74 = vector.shape_cast %73 : vector<16x8xf32> to vector<16x8x1xf32>
    %75 = tpu.reciprocal %74 {approx = true} : vector<16x8x1xf32> -> vector<16x8x1xf32>
    %76 = vector.broadcast %75 : vector<16x8x1xf32> to vector<16x8x8xf32>
    %77 = arith.mulf %72, %76 : vector<16x8x8xf32>
    %78 = arith.truncf %77 : vector<16x8x8xf32> to vector<16x8x8xbf16>
    "tpu.trace_start"() <{level = 10 : i32, message = "glm,gmv->glv"}> : () -> ()
    %cst_22 = arith.constant dense<0.000000e+00> : vector<16x8x8xf32>
    %79 = tpu.matmul %78, %66, %cst_22 {dimension_numbers = #tpu.dot_dimension_numbers<[2], [1], [1], [2], [0, 0, 0, 1, 1, 2], [0], [0]>} : vector<16x8x8xbf16>, vector<16x8x8xbf16>, vector<16x8x8xf32> -> vector<16x8x8xf32>
    "tpu.trace_stop"() : () -> ()
    %80 = vector.shape_cast %79 : vector<16x8x8xf32> to vector<128x8xf32>
    %81 = arith.truncf %80 : vector<128x8xf32> to vector<128x8xbf16>
    %82 = vector.extract_strided_slice %11 {offsets = [16, 0], sizes = [8, 32], strides = [1, 1]} : vector<32x32xbf16> to vector<8x32xbf16>
    %cst_23 = arith.constant dense<0.000000e+00> : vector<128x32xf32>
    %83 = tpu.matmul %81, %82, %cst_23 {dimension_numbers = #tpu.dot_dimension_numbers<[1], [0], [0], [1], [0, 0, 1, 1], [], []>} : vector<128x8xbf16>, vector<8x32xbf16>, vector<128x32xf32> -> vector<128x32xf32>
    %84 = arith.addf %60, %83 : vector<128x32xf32>
    %85 = vector.extract_strided_slice %9 {offsets = [0, 0, 24], sizes = [16, 8, 8], strides = [1, 1, 1]} : vector<16x8x96xf32> to vector<16x8x8xf32>
    %86 = arith.truncf %85 : vector<16x8x8xf32> to vector<16x8x8xbf16>
    %87 = vector.extract_strided_slice %9 {offsets = [0, 0, 56], sizes = [16, 8, 8], strides = [1, 1, 1]} : vector<16x8x96xf32> to vector<16x8x8xf32>
    %88 = arith.truncf %87 : vector<16x8x8xf32> to vector<16x8x8xbf16>
    %89 = vector.extract_strided_slice %9 {offsets = [0, 0, 88], sizes = [16, 8, 8], strides = [1, 1, 1]} : vector<16x8x96xf32> to vector<16x8x8xf32>
    %90 = arith.truncf %89 : vector<16x8x8xf32> to vector<16x8x8xbf16>
    "tpu.trace_start"() <{level = 10 : i32, message = "glk,gmk->glm"}> : () -> ()
    %cst_24 = arith.constant dense<0.000000e+00> : vector<16x8x8xf32>
    %91 = tpu.matmul %86, %88, %cst_24 {dimension_numbers = #tpu.dot_dimension_numbers<[2], [2], [1], [1], [0, 0, 0, 1, 1, 1], [0], [0]>} : vector<16x8x8xbf16>, vector<16x8x8xbf16>, vector<16x8x8xf32> -> vector<16x8x8xf32>
    "tpu.trace_stop"() : () -> ()
    %cst_25 = arith.constant dense<0xFF800000> : vector<16x8xf32>
    %92 = vector.multi_reduction <maximumf>, %91, %cst_25 [2] : vector<16x8x8xf32> to vector<16x8xf32>
    %93 = vector.shape_cast %92 : vector<16x8xf32> to vector<16x8x1xf32>
    %94 = vector.broadcast %93 : vector<16x8x1xf32> to vector<16x8x8xf32>
    %95 = arith.subf %91, %94 : vector<16x8x8xf32>
    %96 = math.exp %95 : vector<16x8x8xf32>
    %cst_26 = arith.constant dense<0.000000e+00> : vector<16x8xf32>
    %97 = vector.multi_reduction <add>, %96, %cst_26 [2] : vector<16x8x8xf32> to vector<16x8xf32>
    %98 = vector.shape_cast %97 : vector<16x8xf32> to vector<16x8x1xf32>
    %99 = tpu.reciprocal %98 {approx = true} : vector<16x8x1xf32> -> vector<16x8x1xf32>
    %100 = vector.broadcast %99 : vector<16x8x1xf32> to vector<16x8x8xf32>
    %101 = arith.mulf %96, %100 : vector<16x8x8xf32>
    %102 = arith.truncf %101 : vector<16x8x8xf32> to vector<16x8x8xbf16>
    "tpu.trace_start"() <{level = 10 : i32, message = "glm,gmv->glv"}> : () -> ()
    %cst_27 = arith.constant dense<0.000000e+00> : vector<16x8x8xf32>
    %103 = tpu.matmul %102, %90, %cst_27 {dimension_numbers = #tpu.dot_dimension_numbers<[2], [1], [1], [2], [0, 0, 0, 1, 1, 2], [0], [0]>} : vector<16x8x8xbf16>, vector<16x8x8xbf16>, vector<16x8x8xf32> -> vector<16x8x8xf32>
    "tpu.trace_stop"() : () -> ()
    %104 = vector.shape_cast %103 : vector<16x8x8xf32> to vector<128x8xf32>
    %105 = arith.truncf %104 : vector<128x8xf32> to vector<128x8xbf16>
    %106 = vector.extract_strided_slice %11 {offsets = [24, 0], sizes = [8, 32], strides = [1, 1]} : vector<32x32xbf16> to vector<8x32xbf16>
    %cst_28 = arith.constant dense<0.000000e+00> : vector<128x32xf32>
    %107 = tpu.matmul %105, %106, %cst_28 {dimension_numbers = #tpu.dot_dimension_numbers<[1], [0], [0], [1], [0, 0, 1, 1], [], []>} : vector<128x8xbf16>, vector<8x32xbf16>, vector<128x32xf32> -> vector<128x32xf32>
    %108 = arith.addf %84, %107 : vector<128x32xf32>
    %c0_29 = arith.constant 0 : index
    %c0_30 = arith.constant 0 : index
    %109 = vector.load %arg5[%c0_29, %c0_30] : memref<1x32xf32, #tpu.memory_space<vmem>>, vector<1x32xf32>
    %110 = vector.broadcast %109 : vector<1x32xf32> to vector<128x32xf32>
    %111 = arith.addf %108, %110 : vector<128x32xf32>
    %112 = arith.addf %111, %1 : vector<128x32xf32>
    %cst_31 = arith.constant dense<0.000000e+00> : vector<128xf32>
    %113 = vector.multi_reduction <add>, %112, %cst_31 [1] : vector<128x32xf32> to vector<128xf32>
    %114 = vector.shape_cast %113 : vector<128xf32> to vector<128x1xf32>
    %cst_32 = arith.constant 3.200000e+01 : f32
    %115 = vector.broadcast %cst_32 : f32 to vector<128x1xf32>
    %116 = arith.divf %114, %115 : vector<128x1xf32>
    %117 = vector.broadcast %116 : vector<128x1xf32> to vector<128x32xf32>
    %118 = arith.subf %112, %117 : vector<128x32xf32>
    %119 = arith.mulf %118, %118 : vector<128x32xf32>
    %cst_33 = arith.constant dense<0.000000e+00> : vector<128xf32>
    %120 = vector.multi_reduction <add>, %119, %cst_33 [1] : vector<128x32xf32> to vector<128xf32>
    %121 = vector.shape_cast %120 : vector<128xf32> to vector<128x1xf32>
    %cst_34 = arith.constant 3.200000e+01 : f32
    %122 = vector.broadcast %cst_34 : f32 to vector<128x1xf32>
    %123 = arith.divf %121, %122 : vector<128x1xf32>
    %124 = vector.broadcast %116 : vector<128x1xf32> to vector<128x32xf32>
    %125 = arith.subf %112, %124 : vector<128x32xf32>
    %cst_35 = arith.constant 9.99999974E-6 : f32
    %126 = vector.broadcast %cst_35 : f32 to vector<128x1xf32>
    %127 = arith.addf %123, %126 : vector<128x1xf32>
    %128 = math.rsqrt %127 : vector<128x1xf32>
    %129 = vector.broadcast %128 : vector<128x1xf32> to vector<128x32xf32>
    %130 = arith.mulf %125, %129 : vector<128x32xf32>
    %c0_36 = arith.constant 0 : index
    %c0_37 = arith.constant 0 : index
    %131 = vector.load %arg6[%c0_36, %c0_37] : memref<1x32xf32, #tpu.memory_space<vmem>>, vector<1x32xf32>
    %132 = vector.broadcast %131 : vector<1x32xf32> to vector<128x32xf32>
    %133 = arith.mulf %130, %132 : vector<128x32xf32>
    %c0_38 = arith.constant 0 : index
    %c0_39 = arith.constant 0 : index
    %134 = vector.load %arg7[%c0_38, %c0_39] : memref<1x32xf32, #tpu.memory_space<vmem>>, vector<1x32xf32>
    %135 = vector.broadcast %134 : vector<1x32xf32> to vector<128x32xf32>
    %136 = arith.addf %133, %135 : vector<128x32xf32>
    %137 = vector.shape_cast %136 : vector<128x32xf32> to vector<16x8x32xf32>
    %c0_40 = arith.constant 0 : index
    %c0_41 = arith.constant 0 : index
    %c0_42 = arith.constant 0 : index
    %138 = vector.load %arg8[%c0_40, %c0_41, %c0_42] : memref<16x8x32xf32, #tpu.memory_space<vmem>>, vector<16x8x32xf32>
    tpu.vector_store %arg8[%c0_40, %c0_41, %c0_42], %137 {strides = array<i32>} : memref<16x8x32xf32, #tpu.memory_space<vmem>>, vector<16x8x32xf32>,
    return
  }
  func.func @transform_0(%arg0: i32) -> (i32, i32, i32) {
    %c0_i32 = arith.constant 0 : i32
    %c0_i32_0 = arith.constant 0 : i32
    %c0_i32_1 = arith.constant 0 : i32
    return %arg0, %c0_i32, %c0_i32_0 : i32, i32, i32
  }
  func.func @transform_1(%arg0: i32) -> (i32, i32) {
    %c0_i32 = arith.constant 0 : i32
    %c0_i32_0 = arith.constant 0 : i32
    %c0_i32_1 = arith.constant 0 : i32
    return %c0_i32, %c0_i32_0 : i32, i32
  }
  func.func @transform_2(%arg0: i32) -> (i32, i32) {
    %c0_i32 = arith.constant 0 : i32
    %c0_i32_0 = arith.constant 0 : i32
    %c0_i32_1 = arith.constant 0 : i32
    return %c0_i32, %c0_i32_0 : i32, i32
  }
  func.func @transform_3(%arg0: i32) -> (i32, i32) {
    %c0_i32 = arith.constant 0 : i32
    %c0_i32_0 = arith.constant 0 : i32
    %c0_i32_1 = arith.constant 0 : i32
    return %c0_i32, %c0_i32_0 : i32, i32
  }
  func.func @transform_4(%arg0: i32) -> (i32, i32) {
    %c0_i32 = arith.constant 0 : i32
    %c0_i32_0 = arith.constant 0 : i32
    %c0_i32_1 = arith.constant 0 : i32
    return %c0_i32, %c0_i32_0 : i32, i32
  }
  func.func @transform_5(%arg0: i32) -> (i32, i32) {
    %c0_i32 = arith.constant 0 : i32
    %c0_i32_0 = arith.constant 0 : i32
    %c0_i32_1 = arith.constant 0 : i32
    return %c0_i32, %c0_i32_0 : i32, i32
  }
  func.func @transform_6(%arg0: i32) -> (i32, i32) {
    %c0_i32 = arith.constant 0 : i32
    %c0_i32_0 = arith.constant 0 : i32
    %c0_i32_1 = arith.constant 0 : i32
    return %c0_i32, %c0_i32_0 : i32, i32
  }
  func.func @transform_7(%arg0: i32) -> (i32, i32, i32) {
    %c0_i32 = arith.constant 0 : i32
    %c0_i32_0 = arith.constant 0 : i32
    %c0_i32_1 = arith.constant 0 : i32
    return %arg0, %c0_i32, %c0_i32_0 : i32, i32, i32
  }
}

module attributes {stable_mosaic.version = 11 : i64} {
  func.func @_pred_kernel(%arg0: i32, %arg1: memref<16x8x32xf32, #tpu.memory_space<vmem>>, %arg2: memref<1x32xf32, #tpu.memory_space<vmem>>, %arg3: memref<8x8xf32, #tpu.memory_space<vmem>>, %arg4: memref<1x8xf32, #tpu.memory_space<vmem>>, %arg5: memref<16x8xf32, #tpu.memory_space<vmem>>) attributes {dimension_semantics = [#tpu.dimension_semantics<parallel>], iteration_bounds = array<i64: 2>, scalar_prefetch = 0 : i64, scratch_operands = 0 : i64, tpu.core_type = #tpu.core_type<tc>, window_params = [{transform_indices = @transform_0, window_bounds = array<i64: 16, 8, 32>}, {pipeline_mode = #tpu.pipeline_mode<synchronous>, transform_indices = @transform_1, window_bounds = array<i64: 1, 32>}, {pipeline_mode = #tpu.pipeline_mode<synchronous>, transform_indices = @transform_2, window_bounds = array<i64: 8, 8>}, {pipeline_mode = #tpu.pipeline_mode<synchronous>, transform_indices = @transform_3, window_bounds = array<i64: 1, 8>}, {transform_indices = @transform_4, window_bounds = array<i64: 16, 8>}]} {
    %c0 = arith.constant 0 : index
    %c0_0 = arith.constant 0 : index
    %c0_1 = arith.constant 0 : index
    %0 = vector.load %arg1[%c0, %c0_0, %c0_1] : memref<16x8x32xf32, #tpu.memory_space<vmem>>, vector<16x8x32xf32>
    %c0_2 = arith.constant 0 : index
    %c0_3 = arith.constant 0 : index
    %1 = vector.load %arg3[%c0_2, %c0_3] : memref<8x8xf32, #tpu.memory_space<vmem>>, vector<8x8xf32>
    %c0_4 = arith.constant 0 : index
    %c0_5 = arith.constant 0 : index
    %2 = vector.load %arg2[%c0_4, %c0_5] : memref<1x32xf32, #tpu.memory_space<vmem>>, vector<1x32xf32>
    %3 = vector.shape_cast %2 : vector<1x32xf32> to vector<32xf32>
    %4 = vector.shape_cast %3 : vector<32xf32> to vector<1x1x32xf32>
    %5 = vector.broadcast %4 : vector<1x1x32xf32> to vector<16x8x32xf32>
    %6 = arith.mulf %0, %5 : vector<16x8x32xf32>
    %cst = arith.constant dense<0.000000e+00> : vector<16x8xf32>
    %7 = vector.multi_reduction <add>, %6, %cst [2] : vector<16x8x32xf32> to vector<16x8xf32>
    %cst_6 = arith.constant dense<0.000000e+00> : vector<16x8xf32>
    %8 = tpu.matmul %7, %1, %cst_6 {dimension_numbers = #tpu.dot_dimension_numbers<[1], [0], [0], [1], [0, 0, 1, 1], [], []>} : vector<16x8xf32>, vector<8x8xf32>, vector<16x8xf32> -> vector<16x8xf32>
    %c0_7 = arith.constant 0 : index
    %c0_8 = arith.constant 0 : index
    %9 = vector.load %arg4[%c0_7, %c0_8] : memref<1x8xf32, #tpu.memory_space<vmem>>, vector<1x8xf32>
    %10 = vector.broadcast %9 : vector<1x8xf32> to vector<16x8xf32>
    %11 = arith.addf %8, %10 : vector<16x8xf32>
    %c0_9 = arith.constant 0 : index
    %c0_10 = arith.constant 0 : index
    %12 = vector.load %arg5[%c0_9, %c0_10] : memref<16x8xf32, #tpu.memory_space<vmem>>, vector<16x8xf32>
    tpu.vector_store %arg5[%c0_9, %c0_10], %11 {strides = array<i32>} : memref<16x8xf32, #tpu.memory_space<vmem>>, vector<16x8xf32>,
    return
  }
  func.func @transform_0(%arg0: i32) -> (i32, i32, i32) {
    %c0_i32 = arith.constant 0 : i32
    %c0_i32_0 = arith.constant 0 : i32
    %c0_i32_1 = arith.constant 0 : i32
    return %arg0, %c0_i32, %c0_i32_0 : i32, i32, i32
  }
  func.func @transform_1(%arg0: i32) -> (i32, i32) {
    %c0_i32 = arith.constant 0 : i32
    %c0_i32_0 = arith.constant 0 : i32
    %c0_i32_1 = arith.constant 0 : i32
    return %c0_i32, %c0_i32_0 : i32, i32
  }
  func.func @transform_2(%arg0: i32) -> (i32, i32) {
    %c0_i32 = arith.constant 0 : i32
    %c0_i32_0 = arith.constant 0 : i32
    %c0_i32_1 = arith.constant 0 : i32
    return %c0_i32, %c0_i32_0 : i32, i32
  }
  func.func @transform_3(%arg0: i32) -> (i32, i32) {
    %c0_i32 = arith.constant 0 : i32
    %c0_i32_0 = arith.constant 0 : i32
    %c0_i32_1 = arith.constant 0 : i32
    return %c0_i32, %c0_i32_0 : i32, i32
  }
  func.func @transform_4(%arg0: i32) -> (i32, i32) {
    %c0_i32 = arith.constant 0 : i32
    %c0_i32_0 = arith.constant 0 : i32
    return %arg0, %c0_i32 : i32, i32
  }
}

</mosaic_0001>

<bundles_post_ra>
// kernel: _lambda_.6
= control target key start
LH: loop header
LB: loop body
LE: loop exit
PB: predicated region body
PF: predicated region fallthrough
CT: control target
= control target key end

     0   :  { %s715_s15 = smov 0   ;;  %s717_s16 = smov 0   ;;  %s806_s0 = inlined_call_operand.vmem [shape: f32[2,8,16,1], index: 0, kind: input, shape index: {}]   ;;  %s807_s1 = inlined_call_operand.vmem [shape: f32[1,128], index: 1, kind: input, shape index: {}]   ;;  %s808_s2 = inlined_call_operand.vmem [shape: f32[1,128], index: 2, kind: input, shape index: {}]   ;;  %s809_s3 = inlined_call_operand.vmem [shape: f32[32,128], index: 3, kind: input, shape index: {}]   ;;  %s810_s4 = inlined_call_operand.vmem [shape: f32[2,8,16,32], index: 4, kind: output, shape index: {}]  }
   0x1   :  { %s719_s17 = smov 0   ;;  %s721_s18 = smov 0  }
   0x2   :  { %s723_s19 = smov 0  }
   0x3 LB: > { %s23_s20 = sadd.s32 1, %s675_s17  ;;  %s26_s21 = sadd.s32 1, %s679_s18  ;;  %s683_s19 = sphi %s723_s19, %s14_s19   ;;  %s679_s18 = sphi %s721_s18, %s814_s18   ;;  %s675_s17 = sphi %s719_s17, %s813_s17   ;;  %s671_s16 = sphi %s717_s16, %s812_s16   ;;  %s667_s15 = sphi %s715_s15, %s811_s15  }
   0x4   : > { %p24_p0 = scmp.ge.s32.totalorder %s23_s20, 8  ;;  %p542_p1 = scmp.ge.s32.totalorder %s683_s19, 1 }
   0x5   : > { %p182_p2 = scmp.lt.s32.totalorder %s683_s19, 17 }
   0x6   : > { %s816_s20 = smov (%p24_p0, %s23_s20), 0  ;;  %s818_s21 = smov (!%p24_p0, %s26_s21), %s679_s18 }
   0x7   : > { %p183_p3 = pnand %p542_p1, %p182_p2  ;;  %p28_p4 = scmp.ge.s32.totalorder %s818_s21, 2 }
   0x8   : > { %p216_p5 = scmp.lt.s32.totalorder (!%p183_p3), %s671_s16, 1  ;;  %p218_p6 = scmp.lt.s32.totalorder (!%p183_p3), %s667_s15, 7 }
   0x9   : > { %s820_s21 = smov (%p28_p4, %s818_s21), 0  ;;  %186 = sbr.rel (%p183_p3) target bundleno = 742 (0x2e6), region = 36 }
   0xa   : > { %p549_p7 = scmp.ne.s32.totalorder (!%p183_p3), %s667_s15, 0 }
  0x10   : > { %s822_s16 = smov (!%p216_p5, %s671_s16), 1  ;;  %237 = sbr.rel (%p549_p7) target bundleno = 23 (0x17), region = 40 }
  0x11   : > { %s219_s22 = scalar_select %p218_p6, %s667_s15, 7 }
  0x12   : > { %s544_s23 = sshll.u32 %s822_s16, 4  ;;  %vm238_vm0 = vcmask (!%p549_p7), 261120   ;;  %v685_v0 = vmov (!%p549_p7), 0.0  }
  0x13   : > { %s543_s24 = sshll.u32 %s219_s22, 1  ;;  %239 = vst.msk [vmem:[#allocation2] sm:$0xff] (!%p549_p7), %vm238_vm0, %v685_v0  ;;  %240 = vst.msk [vmem:[#allocation2 + $0x8] sm:$0xff] (!%p549_p7), %vm238_vm0, %v685_v0 }
  0x14   : > { %s222_s25 = sadd.s32 %s544_s23, %s543_s24  ;;  %241 = vst.msk [vmem:[#allocation3] sm:$0xff] (!%p549_p7), %vm238_vm0, %v685_v0  ;;  %242 = vst.msk [vmem:[#allocation3 + $0x8] sm:$0xff] (!%p549_p7), %vm238_vm0, %v685_v0 }
  0x15   : > { %s545_s26 = sshll.u32 %s222_s25, 3 }
  0x16   : > { %s224_s29 = scalar_lea.vmem %s806_s0, %s545_s26  ;;  %s751_s6 = scalar_lea.vmem %s810_s4, %s545_s26 }
  0x17 PF: > { %v275_v1 = vld [vmem:[%s809_s3] sm:$0xff]  ;;  %v276_v2 = vld [vmem:[%s809_s3 + $0x8] sm:$0xff]  ;;  %v277_v3 = vld [vmem:[%s809_s3 + $0x10] sm:$0xff]  ;;  %vm279_vm1 = vcmask 261120   ;;  %v686_v7 = vmov 0   ;;  %s687_s15 = smov 32  }
  0x18   : > { %v575_v4 = vpack.c.bf16 %v276_v2, %v275_v1  ;;  %v278_v5 = vld [vmem:[%s809_s3 + $0x18] sm:$0xff]  ;;  %628 = vset.pattern.permute.xlu0 %v686_v7  ;;  %v243_v9 = vld [vmem:[%s224_s29] sm:$0xff]  ;;  %v244_v10 = vld [vmem:[%s224_s29 + $0x8] sm:$0xff]  ;;  %s688_s25 = smov 64   ;;  %s689_s26 = smov 96  }
  0x19   : > { %v579_v8 = vpack.c.bf16 %v278_v5, %v277_v3  ;;  %248 = vperm.xlu0 %628, %v243_v9   ;;  %v550_v14 = vld [vmem:[%s807_s1] ss:$0 sm:$0xff] }
  0x1a   : > { %v273_v6 = vld [vmem:[#allocation2] sm:$0xff]  ;;  %576 = vmatprep.subr.bf16.mxu0 %v575_v4  ;;  %v274_v11 = vld [vmem:[#allocation2 + $0x8] sm:$0xff] }
  0x1b   : > { %572 = vmatprep.mubr.msk.f32.mxu0 %vm279_vm1, %v273_v6  ;;  %578 = vmatpush3.bf16.msra.mxu0 %v575_v4  ;;  %v377_v12 = vld [vmem:[#allocation3] sm:$0xff]  ;;  %v551_v17 = vld [vmem:[%s808_s2] ss:$0 sm:$0xff]  ;;  %v378_v27 = vld [vmem:[#allocation3 + $0x8] sm:$0xff] }
  0x1c   : > { %580 = vmatprep.subr.bf16.mxu0 %v579_v8 }
  0x1d   : > { %253 = vperm.xlu0 %628, %v244_v10  }
  0x1f   : > { %582 = vmatpush3.bf16.msra.mxu0 %v579_v8 }
  0x21   : > { %381 = vrot.lane.b32.xlu0 %v377_v12, %s687_s15 }
  0x22   : > { %573 = vmatmul.mubr.msk.f32.vlgmr.msra.gmra.mrb[0].mxu0 %vm279_vm1, %v274_v11 }
  0x98   : > { %v249_v13 = vpop.permute.xlu0 %248 }
  0x99   : > { %v262_v16 = vmul.f32 %v550_v14, %v249_v13 }
  0x9b   : > { %v271_v19 = vadd.f32 %v551_v17, %v262_v16 }
  0x9c   : > { %v254_v15 = vpop.permute.xlu0 %253 }
  0x9d   : > { %v263_v18 = vmul.f32 %v550_v14, %v254_v15 }
  0x9f   : > { %v272_v20 = vadd.f32 %v551_v17, %v263_v18 }
  0xa0   : > { %v382_v40 = vpop.permute.xlu0 %381 }
  0xf5   : > { %v574_v21 = vpop.f32.mrb[0].mxu0 }
  0xf6   : > { %v352_v22 = vpop.f32.mrb[1].mxu0  ;;  %v362_v24 = vadd.f32 %v574_v21, %v272_v20 }
  0xf7   : > { %v361_v23 = vadd.f32 %v352_v22, %v271_v19 }
  0xf8   : > { %v555_v29 = vmul.f32 -1.442695, %v362_v24 }
  0xf9   : > { %629 = vtanh.f32 %v361_v23  ;;  %v554_v28 = vmul.f32 -1.442695, %v361_v23 }
  0xfa   : > { %631 = vtanh.f32 %v362_v24 }
  0xfb   : > { %633 = vpow2.f32 %v554_v28 }
  0xfc   : > { %635 = vpow2.f32 %v555_v29 }
 0x103   : > { %v630_v25 = vpop.eup %629 }
 0x104   : > { %391 = vrot.lane.b32.xlu1 %v630_v25, %s688_s25  ;;  %v632_v26 = vpop.eup %631 }
 0x105   : > { %v634_v30 = vpop.eup %633 }
 0x106   : > { %v369_v31 = vadd.f32 1.0, %v634_v30  ;;  %v636_v32 = vpop.eup %635 }
 0x107   : > { %v370_v33 = vadd.f32 1.0, %v636_v32 }
 0x108   : > { %393 = vrot.lane.b32.xlu1 %v632_v26, %s688_s25  ;;  %637 = vrcp.f32 %v369_v31 }
 0x109   : > { %639 = vrcp.f32 %v370_v33 }
 0x10c   : > { %383 = vrot.lane.b32.xlu1 %v378_v27, %s687_s15 }
 0x112   : > { %v638_v34 = vpop.eup %637 }
 0x113   : > { %v640_v37 = vpop.eup %639  ;;  %v387_v41 = vmul.f32 %v638_v34, %v382_v40 }
 0x176   : > { %v392_v35 = vpop.permute.xlu1 %391 }
 0x177   : > { %v397_v36 = vmul.f32 %v638_v34, %v392_v35 }
 0x179   : > { %401 = vrot.lane.b32.xlu0 %v397_v36, %s687_s15 }
 0x17a   : > { %v394_v38 = vpop.permute.xlu1 %393 }
 0x17b   : > { %v398_v39 = vmul.f32 %v640_v37, %v394_v38 }
 0x17d   : > { %403 = vrot.lane.b32.xlu1 %v398_v39, %s687_s15 }
 0x17e   : > { %v384_v42 = vpop.permute.xlu1 %383 }
 0x17f   : > { %v388_v45 = vmul.f32 %v640_v37, %v384_v42 }
 0x1eb   : > { %v402_v43 = vpop.permute.xlu0 %401 }
 0x1ec   : > { %v407_v44 = vadd.f32 %v402_v43, %v387_v41 }
 0x1ee   : > { %641 = vtanh.f32 %v407_v44 }
 0x1ef   : > { %v404_v46 = vpop.permute.xlu1 %403 }
 0x1f0   : > { %v408_v47 = vadd.f32 %v404_v46, %v388_v45 }
 0x1f2   : > { %643 = vtanh.f32 %v408_v47 }
 0x1f8   : > { %v642_v48 = vpop.eup %641 }
 0x1f9   : > { %413 = vrot.lane.b32.xlu0 %v642_v48, %s688_s25 }
 0x1fc   : > { %v644_v49 = vpop.eup %643 }
 0x1fd   : > { %415 = vrot.lane.b32.xlu1 %v644_v49, %s688_s25  ;;  %423 = vrot.lane.b32.xlu0 %v407_v44, %s689_s26 }
 0x201   : > { %425 = vrot.lane.b32.xlu1 %v408_v47, %s689_s26 }
 0x26b   : > { %v414_v50 = vpop.permute.xlu0 %413 }
 0x26c   : > { %v419_v51 = vmul.f32 %v638_v34, %v414_v50 }
 0x26e   : > { %433 = vrot.lane.b32.xlu0 %v419_v51, %s687_s15 }
 0x26f   : > { %v416_v52 = vpop.permute.xlu1 %415  ;;  %v424_v53 = vpop.permute.xlu0 %423 }
 0x270   : > { %v420_v54 = vmul.f32 %v640_v37, %v416_v52  ;;  %429 = vst.msk [vmem:[#allocation3] sm:$0xff] %vm279_vm1, %v424_v53 }
 0x272   : > { %435 = vrot.lane.b32.xlu1 %v420_v54, %s687_s15 }
 0x273   : > { %v426_v55 = vpop.permute.xlu1 %425 }
 0x274   : > { %430 = vst.msk [vmem:[#allocation3 + $0x8] sm:$0xff] %vm279_vm1, %v426_v55 }
 0x2e0   : > { %v434_v56 = vpop.permute.xlu0 %433 }
 0x2e1   : > { %439 = vst.msk [vmem:[#allocation2] sm:$0xff] %vm279_vm1, %v434_v56  ;;  %441 = vst.msk [vmem:[%s751_s6] sm:$0xff] %vm279_vm1, %v434_v56 }
 0x2e4   : > { %v436_v57 = vpop.permute.xlu1 %435 }
 0x2e5   : > { %440 = vst.msk [vmem:[#allocation2 + $0x8] sm:$0xff] %vm279_vm1, %v436_v57  ;;  %442 = vst.msk [vmem:[%s751_s6 + $0x8] sm:$0xff] %vm279_vm1, %v436_v57 }
 0x2e6 PF: > { %s14_s19 = sadd.s32 1, %s683_s19   ;;  %s811_s15 = smov %s675_s17 }
 0x2e7   : > { %p11_p8 = scmp.ge.s32.totalorder %s14_s19, 18   ;;  %s812_s16 = smov %s679_s18 }
 0x2e8   : > { %s813_s17 = smov %s816_s20  ;;  %s814_s18 = smov %s820_s21 }
 0x2e9   :  { %13 = sbr.rel (!%p11_p8) target bundleno = 3 (0x3), region = 70 }

// kernel: _lambda_.11
= control target key start
LH: loop header
LB: loop body
LE: loop exit
PB: predicated region body
PF: predicated region fallthrough
CT: control target
= control target key end

     0   :  { %s602_s15 = smov 0   ;;  %s684_s0 = inlined_call_operand.vmem [shape: f32[32,8,32], index: 0, kind: input, shape index: {}]   ;;  %s685_s1 = inlined_call_operand.vmem [shape: f32[1,32], index: 1, kind: input, shape index: {}]   ;;  %s686_s2 = inlined_call_operand.vmem [shape: f32[8,8], index: 2, kind: input, shape index: {}]   ;;  %s687_s3 = inlined_call_operand.vmem [shape: f32[1,8], index: 3, kind: input, shape index: {}]   ;;  %s688_s4 = inlined_call_operand.vmem [shape: f32[32,8], index: 4, kind: output, shape index: {}]  }
   0x1 LB: > { %s538_s16 = sadd.s32 4294967295, %s575_s15   ;;  %p542_p0 = scmp.ge.s32.totalorder %s575_s15, 1  ;;  %s575_s15 = sphi %s602_s15, %s14_s15  }
   0x2   : > { %p163_p1 = scmp.lt.s32.totalorder %s575_s15, 3 }
   0x4   : > { %p164_p2 = pnand %p542_p0, %p163_p1 }
   0x5   : > { %s543_s17 = sshll.u32 (!%p164_p2), %s538_s16, 4  ;;  %v547_v0 = vld [vmem:[%s685_s1] ss:$0 sm:$0xff] (!%p164_p2)  ;;  %vm241_vm0 = vcmask (!%p164_p2), 261120   ;;  %v313_v54 = vlaneseq (!%p164_p2)  ;;  %vm379_vm1 = vcmask (!%p164_p2), 1041409   ;;  %vm381_vm2 = vcmask (!%p164_p2), 1042434  }
   0x6   : > { %167 = sbr.rel (%p164_p2) target bundleno = 410 (0x19a), region = 36  ;;  %p190_p3 = scmp.lt.s32.totalorder (!%p164_p2), %s543_s17, 31  ;;  %v217_v49 = vld [vmem:[%s686_s2] sm:$0xff] (!%p164_p2)  ;;  %vm383_vm3 = vcmask (!%p164_p2), 1043459   ;;  %vm385_vm4 = vcmask (!%p164_p2), 1044484   ;;  %vm387_vm5 = vcmask (!%p164_p2), 1045509  }
   0x7   : > { %556 = vmatprep.subr.mxu0 (!%p164_p2), %v217_v49  ;;  %v314_v57 = vand.u32 (!%p164_p2), 127, %v313_v54  ;;  %v316_v58 = vshrl.u32 (!%p164_p2), %v313_v54, 7  ;;  %vm389_vm6 = vcmask (!%p164_p2), 1046534   ;;  %vm391_vm7 = vcmask (!%p164_p2), 1047559   ;;  %s545_s26 = sshll.u32 (!%p164_p2), %s538_s16, 1 }
   0x8   : > { %557 = vmatpush3.msra.mxu0 (!%p164_p2), %v217_v49  ;;  %vm400_vm8 = vcmask (!%p164_p2), 64512   ;;  %p196_p4 = scmp.lt.s32.totalorder (!%p164_p2), %s545_s26, 3 }
   0x9   : > { %v317_v61 = vsub.s32 (!%p164_p2), %v314_v57, %v316_v58 }
   0xd   : > { %s690_s17 = smov (!%p190_p3, %s543_s17), 31  ;;  %s692_s26 = smov (!%p196_p4, %s545_s26), 3 }
   0xe   : > { %s544_s18 = sshll.u32 %s690_s17, 3  ;;  %s546_s27 = sshll.u32 %s692_s26, 3 }
   0xf   : > { %s618_s23 = scalar_lea.vmem %s684_s0, %s544_s18  ;;  %s199_s6 = scalar_lea.vmem %s688_s4, %s546_s27 }
  0x10   : > { %v203_v1 = vld [vmem:[%s618_s23 + $0x10] sm:$0xff]  ;;  %v201_v2 = vld [vmem:[%s618_s23] sm:$0xff]  ;;  %v202_v7 = vld [vmem:[%s618_s23 + $0x8] sm:$0xff] }
  0x11   : > { %v209_v3 = vld [vmem:[%s618_s23 + $0x40] sm:$0xff]  ;;  %v227_v4 = vmul.f32 %v547_v0, %v203_v1  ;;  %v225_v5 = vmul.f32 %v547_v0, %v201_v2  ;;  %v226_v8 = vmul.f32 %v547_v0, %v202_v7  ;;  %v204_v9 = vld [vmem:[%s618_s23 + $0x18] sm:$0xff]  ;;  %v210_v10 = vld [vmem:[%s618_s23 + $0x48] sm:$0xff] }
  0x12   : > { %v233_v6 = vmul.f32 %v547_v0, %v209_v3  ;;  %v228_v15 = vmul.f32 %v547_v0, %v204_v9  ;;  %v234_v16 = vmul.f32 %v547_v0, %v210_v10  ;;  %v205_v17 = vld [vmem:[%s618_s23 + $0x20] sm:$0xff]  ;;  %v211_v18 = vld [vmem:[%s618_s23 + $0x50] sm:$0xff]  ;;  %v206_v23 = vld [vmem:[%s618_s23 + $0x28] sm:$0xff] }
  0x13   : > { %v248_v11 = vsel %vm241_vm0, %v227_v4, 0.0  ;;  %v242_v12 = vsel %vm241_vm0, %v225_v5, 0.0  ;;  %v245_v14 = vsel %vm241_vm0, %v226_v8, 0.0  ;;  %v229_v21 = vmul.f32 %v547_v0, %v205_v17  ;;  %v212_v24 = vld [vmem:[%s618_s23 + $0x58] sm:$0xff]  ;;  %v207_v29 = vld [vmem:[%s618_s23 + $0x30] sm:$0xff]  ;;  %v213_v30 = vld [vmem:[%s618_s23 + $0x60] sm:$0xff] }
  0x14   : > { %249 = vadd.xlane.f32.xlu1 %v248_v11  ;;  %243 = vadd.xlane.f32.xlu0 %v242_v12  ;;  %v266_v13 = vsel %vm241_vm0, %v233_v6, 0.0  ;;  %v251_v19 = vsel %vm241_vm0, %v228_v15, 0.0  ;;  %v269_v20 = vsel %vm241_vm0, %v234_v16, 0.0  ;;  %v235_v22 = vmul.f32 %v547_v0, %v211_v18  ;;  %v208_v35 = vld [vmem:[%s618_s23 + $0x38] sm:$0xff]  ;;  %v214_v36 = vld [vmem:[%s618_s23 + $0x68] sm:$0xff]  ;;  %v215_v41 = vld [vmem:[%s618_s23 + $0x70] sm:$0xff] }
  0x15   : > { %v254_v25 = vsel %vm241_vm0, %v229_v21, 0.0  ;;  %v230_v27 = vmul.f32 %v547_v0, %v206_v23  ;;  %v236_v28 = vmul.f32 %v547_v0, %v212_v24  ;;  %v231_v33 = vmul.f32 %v547_v0, %v207_v29  ;;  %v216_v42 = vld [vmem:[%s618_s23 + $0x78] sm:$0xff] }
  0x16   : > { %v272_v26 = vsel %vm241_vm0, %v235_v22, 0.0  ;;  %v237_v34 = vmul.f32 %v547_v0, %v213_v30  ;;  %v232_v39 = vmul.f32 %v547_v0, %v208_v35  ;;  %v238_v40 = vmul.f32 %v547_v0, %v214_v36  ;;  %v548_v36 = vld [vmem:[%s687_s3] ss:$0 sm:$0xff] }
  0x17   : > { %v257_v31 = vsel %vm241_vm0, %v230_v27, 0.0  ;;  %v275_v32 = vsel %vm241_vm0, %v236_v28, 0.0  ;;  %v260_v37 = vsel %vm241_vm0, %v231_v33, 0.0  ;;  %v239_v45 = vmul.f32 %v547_v0, %v215_v41 }
  0x18   : > { %267 = vadd.xlane.f32.xlu1 %v266_v13  ;;  %246 = vadd.xlane.f32.xlu0 %v245_v14  ;;  %v278_v38 = vsel %vm241_vm0, %v237_v34, 0.0  ;;  %v263_v43 = vsel %vm241_vm0, %v232_v39, 0.0  ;;  %v281_v44 = vsel %vm241_vm0, %v238_v40, 0.0  ;;  %v240_v46 = vmul.f32 %v547_v0, %v216_v42 }
  0x19   : > { %v284_v47 = vsel %vm241_vm0, %v239_v45, 0.0 }
  0x1a   : > { %v287_v48 = vsel %vm241_vm0, %v240_v46, 0.0 }
  0x1c   : > { %252 = vadd.xlane.f32.xlu1 %v251_v19  ;;  %270 = vadd.xlane.f32.xlu0 %v269_v20 }
  0x20   : > { %255 = vadd.xlane.f32.xlu1 %v254_v25  ;;  %273 = vadd.xlane.f32.xlu0 %v272_v26 }
  0x24   : > { %258 = vadd.xlane.f32.xlu1 %v257_v31  ;;  %276 = vadd.xlane.f32.xlu0 %v275_v32 }
  0x28   : > { %261 = vadd.xlane.f32.xlu1 %v260_v37  ;;  %279 = vadd.xlane.f32.xlu0 %v278_v38 }
  0x2c   : > { %264 = vadd.xlane.f32.xlu1 %v263_v43  ;;  %282 = vadd.xlane.f32.xlu0 %v281_v44 }
  0x30   : > { %285 = vadd.xlane.f32.xlu0 %v284_v47  ;;  %288 = vadd.xlane.f32.xlu1 %v287_v48 }
  0xa1   : > { %v250_v50 = vpop.xlane.xlu1 %249  ;;  %v244_v51 = vpop.xlane.xlu0 %243 }
  0xa2   : > { %v318_v1 = vrot.slane %v244_v51, %v317_v61  ;;  %v326_v4 = vrot.slane %v250_v50, %v317_v61 }
  0xa5   : > { %v268_v52 = vpop.xlane.xlu1 %267  ;;  %v247_v53 = vpop.xlane.xlu0 %246 }
  0xa6   : > { %v322_v62 = vrot.slane %v247_v53, %v317_v61  ;;  %v350_v14 = vrot.slane %v268_v52, %v317_v61 }
  0xa8   : > { %v380_v2 = vsel %vm379_vm1, %v322_v62, %v318_v1 }
  0xa9   : > { %v253_v55 = vpop.xlane.xlu1 %252  ;;  %v271_v56 = vpop.xlane.xlu0 %270  ;;  %v382_v9 = vsel %vm381_vm2, %v326_v4, %v380_v2 }
  0xaa   : > { %v330_v3 = vrot.slane %v253_v55, %v317_v61  ;;  %v354_v10 = vrot.slane %v271_v56, %v317_v61 }
  0xac   : > { %v384_v12 = vsel %vm383_vm3, %v330_v3, %v382_v9  ;;  %v393_v22 = vsel %vm379_vm1, %v354_v10, %v350_v14 }
  0xad   : > { %v256_v59 = vpop.xlane.xlu1 %255  ;;  %v274_v60 = vpop.xlane.xlu0 %273 }
  0xae   : > { %v334_v5 = vrot.slane %v256_v59, %v317_v61  ;;  %v358_v13 = vrot.slane %v274_v60, %v317_v61 }
  0xb0   : > { %v386_v15 = vsel %vm385_vm4, %v334_v5, %v384_v12  ;;  %v394_v25 = vsel %vm381_vm2, %v358_v13, %v393_v22 }
  0xb1   : > { %v259_v63 = vpop.xlane.xlu1 %258  ;;  %v277_v0 = vpop.xlane.xlu0 %276 }
  0xb2   : > { %v338_v8 = vrot.slane %v259_v63, %v317_v61  ;;  %v362_v16 = vrot.slane %v277_v0, %v317_v61 }
  0xb4   : > { %v388_v21 = vsel %vm387_vm5, %v338_v8, %v386_v15  ;;  %v395_v27 = vsel %vm383_vm3, %v362_v16, %v394_v25 }
  0xb5   : > { %v262_v6 = vpop.xlane.xlu1 %261  ;;  %v280_v7 = vpop.xlane.xlu0 %279 }
  0xb6   : > { %v342_v11 = vrot.slane %v262_v6, %v317_v61  ;;  %v366_v19 = vrot.slane %v280_v7, %v317_v61 }
  0xb8   : > { %v390_v24 = vsel %vm389_vm6, %v342_v11, %v388_v21  ;;  %v396_v30 = vsel %vm385_vm4, %v366_v19, %v395_v27 }
  0xb9   : > { %v265_v17 = vpop.xlane.xlu1 %264  ;;  %v283_v18 = vpop.xlane.xlu0 %282 }
  0xba   : > { %v346_v20 = vrot.slane %v265_v17, %v317_v61  ;;  %v370_v23 = vrot.slane %v283_v18, %v317_v61 }
  0xbc   : > { %v392_v26 = vsel %vm391_vm7, %v346_v20, %v390_v24  ;;  %v397_v33 = vsel %vm387_vm5, %v370_v23, %v396_v30 }
  0xbd   : > { %558 = vmatprep.mubr.msk.f32.mxu0 %vm400_vm8, %v392_v26  ;;  %v286_v28 = vpop.xlane.xlu0 %285  ;;  %v289_v29 = vpop.xlane.xlu1 %288 }
  0xbe   : > { %v374_v31 = vrot.slane %v286_v28, %v317_v61  ;;  %v378_v32 = vrot.slane %v289_v29, %v317_v61 }
  0xc0   : > { %v398_v34 = vsel %vm389_vm6, %v374_v31, %v397_v33 }
  0xc1   : > { %v399_v35 = vsel %vm391_vm7, %v378_v32, %v398_v34 }
  0xc2   : > { %559 = vmatmul.mubr.msk.f32.vlgmr.msra.gmra.mrb[0].mxu0 %vm400_vm8, %v399_v35 }
 0x195   : > { %v560_v37 = vpop.f32.mrb[0].mxu0 }
 0x196   : > { %v471_v38 = vpop.f32.mrb[1].mxu0  ;;  %v477_v40 = vadd.f32 %v560_v37, %v548_v36 }
 0x197   : > { %v472_v39 = vadd.f32 %v548_v36, %v471_v38 }
 0x198   : > { %481 = vst.msk [vmem:[%s199_s6 + $0x8] sm:$0xff] %vm400_vm8, %v477_v40 }
 0x199   : > { %480 = vst.msk [vmem:[%s199_s6] sm:$0xff] %vm400_vm8, %v472_v39 }
 0x19a PF: > { %s14_s15 = sadd.s32 1, %s575_s15  }
 0x19b   : > { %p11_p5 = scmp.ge.s32.totalorder %s14_s15, 4  }
 0x19d   :  { %13 = sbr.rel (!%p11_p5) target bundleno = 1 (0x1), region = 66 }

// kernel: _lambda_.7
= control target key start
LH: loop header
LB: loop body
LE: loop exit
PB: predicated region body
PF: predicated region fallthrough
CT: control target
= control target key end

     0   :  { %s6475_s24 = smov 0   ;;  %s8164_s0 = inlined_call_operand.vmem [shape: f32[16,16,32], index: 0, kind: input, shape index: {}]   ;;  %s8165_s1 = inlined_call_operand.vmem [shape: f32[32,96], index: 1, kind: input, shape index: {}]   ;;  %s8166_s2 = inlined_call_operand.vmem [shape: f32[1,96], index: 2, kind: input, shape index: {}]   ;;  %s8167_s3 = inlined_call_operand.vmem [shape: f32[32,32], index: 3, kind: input, shape index: {}]   ;;  %s8168_s4 = inlined_call_operand.vmem [shape: f32[1,32], index: 4, kind: input, shape index: {}]   ;;  %s8169_s5 = inlined_call_operand.vmem [shape: f32[1,32], index: 5, kind: input, shape index: {}]   ;;  %s8170_s6 = inlined_call_operand.vmem [shape: f32[1,32], index: 6, kind: input, shape index: {}]   ;;  %s8171_s7 = inlined_call_operand.vmem [shape: f32[16,16,32], index: 7, kind: output, shape index: {}]  }
   0x1 LB: > { %s5260_s25 = sadd.s32 4294967295, %s6420_s24   ;;  %p5264_p0 = scmp.ge.s32.totalorder %s6420_s24, 1  ;;  %s6420_s24 = sphi %s6475_s24, %s17_s24  }
   0x2   : > { %p239_p1 = scmp.lt.s32.totalorder %s6420_s24, 3 }
   0x4   : > { %p240_p2 = pnand %p5264_p0, %p239_p1 }
   0x6   : > { %243 = sbr.rel (%p240_p2) target bundleno = 4115 (0x1013), region = 48 }
   0xd   : > { %v312_v0 = vld [vmem:[%s8165_s1] sm:$0xff]  ;;  %v313_v1 = vld [vmem:[%s8165_s1 + $0x8] sm:$0xff]  ;;  %v314_v2 = vld [vmem:[%s8165_s1 + $0x10] sm:$0xff]  ;;  %s5265_s9 = sshll.u32 %s5260_s25, 3  ;;  %vm325_vm0 = vcmask 261120   ;;  %v8172_v30 = vmov 0.0  }
   0xe   : > { %v316_v3 = vpack.c.bf16 %v313_v1, %v312_v0  ;;  %v315_v4 = vld [vmem:[%s8165_s1 + $0x18] sm:$0xff]  ;;  %p274_p3 = scmp.lt.s32.totalorder %s5265_s9, 15  ;;  %v5271_v32 = vld [vmem:[%s8166_s2] ss:$0 sm:$0xff]  ;;  %vm6423_vm1 = vmmov 0   ;;  %s6424_s18 = smov 96  }
   0xf   : > { %v317_v5 = vpack.c.bf16 %v315_v4, %v314_v2  ;;  %s6425_s19 = smov 64   ;;  %vm464_vm2 = vcmask 64512   ;;  %vm862_vm3 = vcmask 130048   ;;  %s6426_s20 = smov 88   ;;  %vm2433_vm4 = vcmask 1043456  }
  0x10   : > { %5557 = vmatprep.subr.bf16.mxu0 %v316_v3  ;;  %s8195_s9 = smov (!%p274_p3, %s5265_s9), 15  ;;  %6033 = vmatprep.subr.bf16.mxu1 %v316_v3  ;;  %s6427_s21 = smov 120  }
  0x11   : > { %5558 = vmatpush3.bf16.msra.mxu0 %v316_v3  ;;  %6035 = vmatpush3.bf16.msra.mxu1 %v316_v3  ;;  %s5381_s12 = sshll.u32 %s8195_s9, 4  ;;  %s6428_s22 = smov 56  }
  0x12   : > { %5559 = vmatprep.subr.bf16.mxu0 %v317_v5  ;;  %6034 = vmatprep.subr.bf16.mxu1 %v317_v5  ;;  %s6503_s15 = scalar_lea.vmem %s8164_s0, %s5381_s12  ;;  %s6429_s23 = smov 80  }
  0x13   : > { %v288_v6 = vld [vmem:[%s6503_s15] sm:$0xff]  ;;  %v289_v7 = vld [vmem:[%s6503_s15 + $0x8] sm:$0xff]  ;;  %v290_v8 = vld [vmem:[%s6503_s15 + $0x10] sm:$0xff]  ;;  %s6430_s25 = smov 112   ;;  %s6431_s30 = smov 48  }
  0x14   : > { %v304_v9 = vpack.c.bf16 %v289_v7, %v288_v6  ;;  %v291_v10 = vld [vmem:[%s6503_s15 + $0x18] sm:$0xff]  ;;  %v292_v11 = vld [vmem:[%s6503_s15 + $0x20] sm:$0xff]  ;;  %v293_v12 = vld [vmem:[%s6503_s15 + $0x28] sm:$0xff]  ;;  %s6432_s8 = smov 72   ;;  %s6433_s10 = smov 104  }
  0x15   : > { %5560 = vmatpush3.bf16.msra.mxu0 %v317_v5  ;;  %6036 = vmatpush3.bf16.msra.mxu1 %v317_v5  ;;  %v305_v13 = vpack.c.bf16 %v291_v10, %v290_v8  ;;  %v306_v14 = vpack.c.bf16 %v293_v12, %v292_v11  ;;  %v296_v15 = vld [vmem:[%s6503_s15 + $0x40] sm:$0xff]  ;;  %v297_v16 = vld [vmem:[%s6503_s15 + $0x48] sm:$0xff]  ;;  %v298_v17 = vld [vmem:[%s6503_s15 + $0x50] sm:$0xff]  ;;  %s6434_s17 = smov 40   ;;  %s8082_s26 = scalar_lea.vmem %s8171_s7, %s5381_s12 }
  0x16   : > { %5561 = vmatprep.mubr.msk.bf16.mxu0 %vm325_vm0, %v304_v9  ;;  %v299_v18 = vld [vmem:[%s6503_s15 + $0x58] sm:$0xff]  ;;  %v308_v19 = vpack.c.bf16 %v297_v16, %v296_v15  ;;  %v300_v21 = vld [vmem:[%s6503_s15 + $0x60] sm:$0xff]  ;;  %v301_v22 = vld [vmem:[%s6503_s15 + $0x68] sm:$0xff]  ;;  %5577 = vmatprep.subr.bf16.mxu1 %v8172_v30 }
  0x17   : > { %v309_v20 = vpack.c.bf16 %v299_v18, %v298_v17  ;;  %v294_v23 = vld [vmem:[%s6503_s15 + $0x30] sm:$0xff]  ;;  %v295_v24 = vld [vmem:[%s6503_s15 + $0x38] sm:$0xff]  ;;  %v310_v25 = vpack.c.bf16 %v301_v22, %v300_v21  ;;  %5601 = vmatprep.subr.bf16.mxu0 %v8172_v30 }
  0x18   : > { %5562 = vmatmul.mubr.msk.bf16.vlgmr.msra.gmra.mrb[0].mxu0 %vm325_vm0, %v305_v13  ;;  %5569 = vmatprep.mubr.msk.bf16.mxu1 %vm325_vm0, %v308_v19  ;;  %v307_v26 = vpack.c.bf16 %v295_v24, %v294_v23  ;;  %v302_v27 = vld [vmem:[%s6503_s15 + $0x70] sm:$0xff]  ;;  %v303_v28 = vld [vmem:[%s6503_s15 + $0x78] sm:$0xff] }
  0x19   : > { %5565 = vmatprep.mubr.msk.bf16.mxu0 %vm325_vm0, %v306_v14  ;;  %5570 = vmatmul.mubr.msk.bf16.vlgmr.msra.gmra.mrb[0].mxu1 %vm325_vm0, %v309_v20  ;;  %v311_v29 = vpack.c.bf16 %v303_v28, %v302_v27 }
  0x1a   : > { %5573 = vmatprep.mubr.msk.bf16.mxu1 %vm325_vm0, %v310_v25 }
  0x20   : > { %5566 = vmatmul.mubr.msk.bf16.gmra.mrb[4].mxu0 %vm325_vm0, %v307_v26 }
  0x21   : > { %5574 = vmatmul.mubr.msk.bf16.gmra.mrb[4].mxu1 %vm325_vm0, %v311_v29  ;;  %5603 = vmatprep.mubr.msk.bf16.mxu0 %vm6423_vm1, %v8172_v30 }
  0x22   : > { %5579 = vmatprep.mubr.msk.bf16.mxu1 %vm6423_vm1, %v8172_v30 }
  0xeb   : > { %v5563_v31 = vpop.f32.mrb[0].mxu0 }
  0xec   : > { %v384_v33 = vpop.f32.mrb[1].mxu0  ;;  %v393_v35 = vadd.f32 %v5563_v31, %v5271_v32  ;;  %v5571_v38 = vpop.f32.mrb[0].mxu1 }
  0xed   : > { %v5564_v34 = vpop.f32.mrb[2].mxu0  ;;  %v385_v39 = vadd.f32 %v5271_v32, %v384_v33  ;;  %v425_v41 = vadd.f32 %v5571_v38, %v5271_v32  ;;  %v416_v42 = vpop.f32.mrb[1].mxu1 }
  0xee   : > { %v396_v36 = vadd.f32 %v5564_v34, %v5271_v32  ;;  %v387_v37 = vpop.f32.mrb[3].mxu0  ;;  %v417_v44 = vadd.f32 %v5271_v32, %v416_v42  ;;  %v5572_v45 = vpop.f32.mrb[2].mxu1 }
  0xef   : > { %v388_v40 = vadd.f32 %v5271_v32, %v387_v37  ;;  %v428_v47 = vadd.f32 %v5572_v45, %v5271_v32  ;;  %v419_v48 = vpop.f32.mrb[3].mxu1 }
  0xf0   : > { %v6538_v43 = vpack.c.bf16 %v396_v36, %v393_v35  ;;  %v420_v49 = vadd.f32 %v5271_v32, %v419_v48 }
  0xf1   : > { %v6540_v46 = vpack.c.bf16 %v388_v40, %v385_v39  ;;  %v6544_v51 = vpack.c.bf16 %v428_v47, %v425_v41 }
  0xf2   : > { %v6546_v54 = vpack.c.bf16 %v420_v49, %v417_v44 }
  0xf3   : > { %v5567_v50 = vpop.f32.mrb[4].mxu0  ;;  %462 = vrot.lane.b32.xlu0 %v6540_v46, %s6424_s18 }
  0xf4   : > { %v409_v52 = vadd.f32 %v5567_v50, %v5271_v32  ;;  %v400_v53 = vpop.f32.mrb[5].mxu0  ;;  %v5575_v59 = vpop.f32.mrb[4].mxu1 }
  0xf5   : > { %v401_v55 = vadd.f32 %v5271_v32, %v400_v53  ;;  %v5568_v56 = vpop.f32.mrb[6].mxu0  ;;  %v441_v61 = vadd.f32 %v5575_v59, %v5271_v32  ;;  %v432_v62 = vpop.f32.mrb[5].mxu1 }
  0xf6   : > { %v412_v57 = vadd.f32 %v5568_v56, %v5271_v32  ;;  %v403_v58 = vpop.f32.mrb[7].mxu0  ;;  %v433_v0 = vadd.f32 %v5271_v32, %v432_v62  ;;  %v5576_v1 = vpop.f32.mrb[6].mxu1 }
  0xf7   : > { %v404_v60 = vadd.f32 %v5271_v32, %v403_v58  ;;  %513 = vrot.lane.b32.xlu0 %v6538_v43, %s6424_s18  ;;  %v444_v3 = vadd.f32 %v5576_v1, %v5271_v32  ;;  %v435_v4 = vpop.f32.mrb[7].mxu1 }
  0xf8   : > { %v6550_v63 = vpack.c.bf16 %v412_v57, %v409_v52  ;;  %v436_v5 = vadd.f32 %v5271_v32, %v435_v4 }
  0xf9   : > { %v6552_v2 = vpack.c.bf16 %v404_v60, %v401_v55  ;;  %v6558_v6 = vpack.c.bf16 %v444_v3, %v441_v61 }
  0xfa   : > { %v6560_v7 = vpack.c.bf16 %v436_v5, %v433_v0 }
  0xfb   : > { %563 = vrot.lane.b32.xlu1 %v6552_v2, %s6424_s18  ;;  %713 = vrot.lane.b32.xlu0 %v6544_v51, %s6424_s18  ;;  %8178 = vst [vmem:[#allocation2_spill] sm:$0xff] %v6558_v6 }
  0xff   : > { %613 = vrot.lane.b32.xlu1 %v6550_v63, %s6424_s18  ;;  %663 = vrot.lane.b32.xlu0 %v6546_v54, %s6424_s18 }
 0x103   : > { %813 = vrot.lane.b32.xlu1 %v6558_v6, %s6424_s18  ;;  %1188 = vrot.lane.b32.xlu0 %v6550_v63, %s6425_s19 }
 0x107   : > { %763 = vrot.lane.b32.xlu1 %v6560_v7, %s6424_s18 }
 0x10b   : > { %1094 = vrot.lane.b32.xlu1 %v6538_v43, %s6425_s19 }
 0x165   : > { %v463_v8 = vpop.permute.xlu0 %462 }
 0x166   : > { %v469_v9 = vsel %vm464_vm2, %v463_v8, 0 }
 0x167   : > { %5578 = vmatpush3.bf16.xpose.msra.mxu1 %v469_v9 }
 0x168   : > { %5583 = vmatprep.subr.bf16.mxu1 %v8172_v30 }
 0x169   : > { %v514_v10 = vpop.permute.xlu0 %513 }
 0x16a   : > { %v519_v13 = vsel %vm464_vm2, %v514_v10, 0 }
 0x16d   : > { %v564_v11 = vpop.permute.xlu1 %563  ;;  %v714_v12 = vpop.permute.xlu0 %713 }
 0x16e   : > { %5580 = vmatmul.mubr.msk.bf16.vlgmr.msra.gmra.mrb[8].mxu1 %vm464_vm2, %v6540_v46  ;;  %v569_v18 = vsel %vm464_vm2, %v564_v11, 0  ;;  %v719_v22 = vsel %vm464_vm2, %v714_v12, 0 }
 0x16f   : > { %5584 = vmatpush3.bf16.xpose.msra.mxu1 %v519_v13  ;;  %5585 = vmatprep.mubr.msk.bf16.mxu1 %vm6423_vm1, %v8172_v30 }
 0x170   : > { %5589 = vmatprep.subr.bf16.mxu1 %v8172_v30 }
 0x171   : > { %v614_v14 = vpop.permute.xlu1 %613  ;;  %v664_v15 = vpop.permute.xlu0 %663 }
 0x172   : > { %v669_v16 = vsel %vm464_vm2, %v664_v15, 0  ;;  %v619_v21 = vsel %vm464_vm2, %v614_v14, 0 }
 0x173   : > { %5602 = vmatpush3.bf16.xpose.msra.mxu0 %v669_v16 }
 0x174   : > { %5613 = vmatprep.subr.bf16.mxu0 %v8172_v30 }
 0x175   : > { %v814_v17 = vpop.permute.xlu1 %813  ;;  %v6652_v10 = vpop.permute.xlu0 %1188 }
 0x176   : > { %5586 = vmatmul.mubr.msk.bf16.vlgmr.msra.gmra.mrb[12].mxu1 %vm464_vm2, %v6538_v43  ;;  %v819_v23 = vsel %vm464_vm2, %v814_v17, 0 }
 0x177   : > { %5590 = vmatpush3.bf16.xpose.msra.mxu1 %v569_v18  ;;  %5591 = vmatprep.mubr.msk.bf16.mxu1 %vm6423_vm1, %v8172_v30 }
 0x178   : > { %5595 = vmatprep.subr.bf16.mxu1 %v8172_v30 }
 0x179   : > { %v764_v19 = vpop.permute.xlu1 %763 }
 0x17a   : > { %v769_v20 = vsel %vm464_vm2, %v764_v19, 0  ;;  %5604 = vmatmul.mubr.msk.bf16.vlgmr.msra.gmra.mrb[8].mxu0 %vm464_vm2, %v6546_v54 }
 0x17b   : > { %5614 = vmatpush3.bf16.xpose.msra.mxu0 %v769_v20  ;;  %5615 = vmatprep.mubr.msk.bf16.mxu0 %vm6423_vm1, %v8172_v30 }
 0x17c   : > { %5625 = vmatprep.subr.bf16.mxu0 %v8172_v30 }
 0x17d   : > { %v1095_v24 = vpop.permute.xlu1 %1094 }
 0x17e   : > { %5592 = vmatmul.mubr.msk.bf16.vlgmr.msra.gmra.mrb[16].mxu1 %vm464_vm2, %v6552_v2 }
 0x17f   : > { %5596 = vmatpush3.bf16.xpose.msra.mxu1 %v619_v21  ;;  %5597 = vmatprep.mubr.msk.bf16.mxu1 %vm6423_vm1, %v8172_v30 }
 0x180   : > { %5607 = vmatprep.subr.bf16.mxu1 %v8172_v30 }
 0x182   : > { %5616 = vmatmul.mubr.msk.bf16.vlgmr.msra.gmra.mrb[12].mxu0 %vm464_vm2, %v6560_v7 }
 0x183   : > { %5627 = vmatprep.mubr.msk.bf16.mxu0 %vm6423_vm1, %v8172_v30 }
 0x186   : > { %5598 = vmatmul.mubr.msk.bf16.vlgmr.msra.gmra.mrb[20].mxu1 %vm464_vm2, %v6550_v63 }
 0x187   : > { %5608 = vmatpush3.bf16.xpose.msra.mxu1 %v719_v22  ;;  %5609 = vmatprep.mubr.msk.bf16.mxu1 %vm6423_vm1, %v8172_v30 }
 0x188   : > { %5619 = vmatprep.subr.bf16.mxu1 %v8172_v30 }
 0x18e   : > { %5610 = vmatmul.mubr.msk.bf16.vlgmr.msra.gmra.mrb[24].mxu1 %vm464_vm2, %v6544_v51 }
 0x18f   : > { %5620 = vmatpush3.bf16.xpose.msra.mxu1 %v819_v23  ;;  %5621 = vmatprep.mubr.msk.bf16.mxu1 %vm6423_vm1, %v8172_v30 }
 0x190   : > { %5631 = vmatprep.subr.bf16.mxu1 %v8172_v30 }
 0x196   : > { %5622 = vmatmul.mubr.msk.bf16.vlgmr.msra.gmra.mrb[28].mxu1 %vm464_vm2, %v6558_v6 }
 0x197   : > { %5632 = vmatpush3.bf16.msra.mxu1 %v1095_v24  ;;  %5633 = vmatprep.mubr.msk.bf16.mxu1 %vm6423_vm1, %v8172_v30 }
 0x198   : > { %5643 = vmatprep.subr.bf16.mxu1 %v8172_v30 }
 0x241   : > { %v6623_v25 = vpop.f32.mrb[8].mxu1 }
 0x242   : > { %v5581_v26 = vpop.f32.mrb[9].mxu1 }
 0x243   : > { %v6625_v27 = vpop.f32.mrb[10].mxu1 }
 0x244   : > { %v5582_v28 = vpop.f32.mrb[11].mxu1 }
 0x249   : > { %v555_v29 = vpop.f32.mrb[12].mxu1 }
 0x24a   : > { %v5587_v31 = vpop.f32.mrb[13].mxu1  ;;  %v869_v32 = vsel %vm862_vm3, %v555_v29, -inf }
 0x24b   : > { %870 = vmax.xlane.f32.xlu0 %v869_v32  ;;  %v558_v33 = vpop.f32.mrb[14].mxu1 }
 0x24c   : > { %v5588_v34 = vpop.f32.mrb[15].mxu1  ;;  %v872_v35 = vsel %vm862_vm3, %v558_v33, -inf }
 0x24d   : > { %873 = vmax.xlane.f32.xlu1 %v872_v35  ;;  %v6629_v36 = vpop.f32.mrb[8].mxu0 }
 0x24e   : > { %v5605_v37 = vpop.f32.mrb[9].mxu0 }
 0x24f   : > { %v6631_v38 = vpop.f32.mrb[10].mxu0 }
 0x250   : > { %v5606_v39 = vpop.f32.mrb[11].mxu0 }
 0x251   : > { %v6633_v40 = vpop.f32.mrb[16].mxu1 }
 0x252   : > { %v5593_v41 = vpop.f32.mrb[17].mxu1 }
 0x253   : > { %v6635_v42 = vpop.f32.mrb[18].mxu1 }
 0x254   : > { %v5594_v44 = vpop.f32.mrb[19].mxu1 }
 0x255   : > { %v6637_v45 = vpop.f32.mrb[12].mxu0 }
 0x256   : > { %v5617_v47 = vpop.f32.mrb[13].mxu0 }
 0x257   : > { %v6639_v48 = vpop.f32.mrb[14].mxu0 }
 0x258   : > { %v5618_v49 = vpop.f32.mrb[15].mxu0 }
 0x259   : > { %v655_v50 = vpop.f32.mrb[20].mxu1 }
 0x25a   : > { %v5599_v52 = vpop.f32.mrb[21].mxu1  ;;  %v881_v53 = vsel %vm862_vm3, %v655_v50, -inf }
 0x25b   : > { %882 = vmax.xlane.f32.xlu0 %v881_v53  ;;  %v658_v55 = vpop.f32.mrb[22].mxu1 }
 0x25c   : > { %v5600_v56 = vpop.f32.mrb[23].mxu1  ;;  %v884_v57 = vsel %vm862_vm3, %v658_v55, -inf }
 0x25f   : > { %885 = vmax.xlane.f32.xlu0 %v884_v57 }
 0x261   : > { %v755_v58 = vpop.f32.mrb[24].mxu1 }
 0x262   : > { %v5611_v59 = vpop.f32.mrb[25].mxu1  ;;  %v893_v60 = vsel %vm862_vm3, %v755_v58, -inf }
 0x263   : > { %894 = vmax.xlane.f32.xlu1 %v893_v60  ;;  %v758_v61 = vpop.f32.mrb[26].mxu1 }
 0x264   : > { %v5612_v62 = vpop.f32.mrb[27].mxu1  ;;  %v896_v0 = vsel %vm862_vm3, %v758_v61, -inf }
 0x265   : > { %897 = vmax.xlane.f32.xlu0 %v896_v0 }
 0x269   : > { %v855_v1 = vpop.f32.mrb[28].mxu1 }
 0x26a   : > { %v5623_v3 = vpop.f32.mrb[29].mxu1  ;;  %v905_v4 = vsel %vm862_vm3, %v855_v1, -inf }
 0x26b   : > { %906 = vmax.xlane.f32.xlu1 %v905_v4  ;;  %v6646_v5 = vpop.f32.mrb[30].mxu1  ;;  %v863_v3 = vsel %vm862_vm3, %v6623_v25, -inf }
 0x26c   : > { %v5624_v8 = vpop.f32.mrb[31].mxu1  ;;  %v908_v9 = vsel %vm862_vm3, %v6646_v5, -inf }
 0x26d   : > { %909 = vmax.xlane.f32.xlu0 %v908_v9  ;;  %v875_v8 = vsel %vm862_vm3, %v6633_v40, -inf  ;;  %v878_v9 = vsel %vm862_vm3, %v6635_v42, -inf }
 0x27c   : > { %1282 = vrot.lane.b32.xlu1 %v6544_v51, %s6425_s19 }
 0x2d8   : > { %v871_v11 = vpop.xlane.xlu0 %870 }
 0x2d9   : > { %v913_v12 = vsub.f32 %v555_v29, %v871_v11  ;;  %v887_v11 = vsel %vm862_vm3, %v6629_v36, -inf }
 0x2da   : > { %v874_v13 = vpop.xlane.xlu1 %873 }
 0x2db   : > { %v931_v14 = vmul.f32 1.442695, %v913_v12  ;;  %v914_v15 = vsub.f32 %v558_v33, %v874_v13  ;;  %v890_v13 = vsel %vm862_vm3, %v6631_v38, -inf }
 0x2dd   : > { %6110 = vpow2.f32 %v931_v14  ;;  %v933_v16 = vmul.f32 1.442695, %v914_v15 }
 0x2df   : > { %6112 = vpow2.f32 %v933_v16 }
 0x2e7   : > { %v6654_v17 = vpop.eup %6110 }
 0x2e8   : > { %v883_v18 = vpop.xlane.xlu0 %882  ;;  %v965_v19 = vsel %vm862_vm3, %v6654_v17, 0.0 }
 0x2e9   : > { %v6658_v20 = vpop.eup %6112  ;;  %v917_v21 = vsub.f32 %v655_v50, %v883_v18  ;;  %966 = vadd.xlane.f32.xlu1 %v965_v19  ;;  %v899_v19 = vsel %vm862_vm3, %v6637_v45, -inf }
 0x2ea   : > { %v968_v22 = vsel %vm862_vm3, %v6658_v20, 0.0 }
 0x2eb   : > { %v939_v23 = vmul.f32 1.442695, %v917_v21  ;;  %969 = vadd.xlane.f32.xlu0 %v968_v22 }
 0x2ec   : > { %v886_v24 = vpop.xlane.xlu0 %885 }
 0x2ed   : > { %6114 = vpow2.f32 %v939_v23  ;;  %v918_v26 = vsub.f32 %v658_v55, %v886_v24 }
 0x2ef   : > { %v941_v28 = vmul.f32 1.442695, %v918_v26 }
 0x2f0   : > { %v895_v29 = vpop.xlane.xlu1 %894 }
 0x2f1   : > { %6116 = vpow2.f32 %v941_v28  ;;  %v921_v31 = vsub.f32 %v755_v58, %v895_v29 }
 0x2f2   : > { %v898_v44 = vpop.xlane.xlu0 %897 }
 0x2f3   : > { %v947_v32 = vmul.f32 1.442695, %v921_v31  ;;  %v922_v47 = vsub.f32 %v758_v61, %v898_v44 }
 0x2f5   : > { %6118 = vpow2.f32 %v947_v32  ;;  %v949_v50 = vmul.f32 1.442695, %v922_v47 }
 0x2f7   : > { %v6662_v33 = vpop.eup %6114  ;;  %6120 = vpow2.f32 %v949_v50 }
 0x2f8   : > { %v977_v34 = vsel %vm862_vm3, %v6662_v33, 0.0  ;;  %v907_v49 = vpop.xlane.xlu1 %906 }
 0x2f9   : > { %978 = vadd.xlane.f32.xlu1 %v977_v34  ;;  %v925_v52 = vsub.f32 %v855_v1, %v907_v49 }
 0x2fa   : > { %v910_v59 = vpop.xlane.xlu0 %909 }
 0x2fb   : > { %v6666_v35 = vpop.eup %6116  ;;  %v955_v53 = vmul.f32 1.442695, %v925_v52  ;;  %v926_v60 = vsub.f32 %v6646_v5, %v910_v59 }
 0x2fc   : > { %v980_v37 = vsel %vm862_vm3, %v6666_v35, 0.0  ;;  %v1283_v1 = vpop.permute.xlu1 %1282 }
 0x2fd   : > { %981 = vadd.xlane.f32.xlu0 %v980_v37  ;;  %6122 = vpow2.f32 %v955_v53  ;;  %v957_v61 = vmul.f32 1.442695, %v926_v60 }
 0x2ff   : > { %v6670_v39 = vpop.eup %6118  ;;  %6124 = vpow2.f32 %v957_v61 }
 0x300   : > { %v989_v41 = vsel %vm862_vm3, %v6670_v39, 0.0 }
 0x301   : > { %990 = vadd.xlane.f32.xlu1 %v989_v41  ;;  %v6678_v55 = vpop.eup %6120 }
 0x302   : > { %v992_v56 = vsel %vm862_vm3, %v6678_v55, 0.0 }
 0x307   : > { %v6682_v57 = vpop.eup %6122 }
 0x308   : > { %v1001_v58 = vsel %vm862_vm3, %v6682_v57, 0.0 }
 0x309   : > { %v6697_v62 = vpop.eup %6124 }
 0x30a   : > { %v1004_v0 = vsel %vm862_vm3, %v6697_v62, 0.0 }
 0x312   : > { %1376 = vrot.lane.b32.xlu1 %v6558_v6, %s6425_s19 }
 0x313   : > { %1484 = vrot.lane.b32.xlu0 %v6538_v43, %s6426_s20 }
 0x332   : > { %993 = vadd.xlane.f32.xlu0 %v992_v56 }
 0x336   : > { %1002 = vadd.xlane.f32.xlu1 %v1001_v58 }
 0x347   : > { %1482 = vrot.lane.b32.xlu1 %v6538_v43, %s6427_s21 }
 0x348   : > { %1586 = vrot.lane.b32.xlu0 %v6550_v63, %s6426_s20 }
 0x34b   : > { %1584 = vrot.lane.b32.xlu1 %v6550_v63, %s6427_s21 }
 0x34c   : > { %1688 = vrot.lane.b32.xlu0 %v6544_v51, %s6426_s20 }
 0x34f   : > { %1686 = vrot.lane.b32.xlu1 %v6544_v51, %s6427_s21 }
 0x36b   : > { %1005 = vadd.xlane.f32.xlu0 %v1004_v0 }
 0x373   : > { %864 = vmax.xlane.f32.xlu1 %v863_v3 }
 0x376   : > { %v967_v4 = vpop.xlane.xlu1 %966 }
 0x377   : > { %6126 = vrcp.f32 %v967_v4  ;;  %876 = vmax.xlane.f32.xlu1 %v875_v8 }
 0x378   : > { %v970_v5 = vpop.xlane.xlu0 %969 }
 0x379   : > { %6128 = vrcp.f32 %v970_v5 }
 0x37b   : > { %879 = vmax.xlane.f32.xlu1 %v878_v9 }
 0x37f   : > { %888 = vmax.xlane.f32.xlu1 %v887_v11 }
 0x381   : > { %v6127_v12 = vpop.eup %6126  ;;  %1790 = vrot.lane.b32.xlu0 %v6558_v6, %s6426_s20 }
 0x382   : > { %v1025_v15 = vmul.f32 %v6127_v12, %v6654_v17  ;;  %v902_v17 = vsel %vm862_vm3, %v6639_v48, -inf }
 0x383   : > { %v6129_v14 = vpop.eup %6128  ;;  %891 = vmax.xlane.f32.xlu1 %v890_v13 }
 0x384   : > { %v1026_v16 = vmul.f32 %v6129_v14, %v6658_v20 }
 0x386   : > { %v979_v18 = vpop.xlane.xlu1 %978  ;;  %v1040_v21 = vpack.c.bf16 %v1026_v16, %v1025_v15 }
 0x387   : > { %900 = vmax.xlane.f32.xlu1 %v899_v19  ;;  %6130 = vrcp.f32 %v979_v18 }
 0x388   : > { %5634 = vmatmul.mubr.msk.bf16.vlgmr.msra.gmra.mrb[32].mxu1 %vm862_vm3, %v1040_v21 }
 0x389   : > { %5644 = vmatpush3.bf16.msra.mxu1 %v6652_v10  ;;  %5645 = vmatprep.mubr.msk.bf16.mxu1 %vm6423_vm1, %v8172_v30  ;;  %v866_v10 = vsel %vm862_vm3, %v6625_v27, -inf }
 0x38a   : > { %v982_v22 = vpop.xlane.xlu0 %981  ;;  %5655 = vmatprep.subr.bf16.mxu1 %v8172_v30 }
 0x38b   : > { %6132 = vrcp.f32 %v982_v22  ;;  %903 = vmax.xlane.f32.xlu1 %v902_v17 }
 0x38e   : > { %v991_v29 = vpop.xlane.xlu1 %990  ;;  %v1485_v31 = vpop.permute.xlu0 %1484 }
 0x38f   : > { %6134 = vrcp.f32 %v991_v29  ;;  %v1490_v4 = vsel %vm464_vm2, %v1485_v31, 0 }
 0x391   : > { %v6131_v20 = vpop.eup %6130 }
 0x392   : > { %v1029_v24 = vmul.f32 %v6131_v20, %v6662_v33  ;;  %v1377_v44 = vpop.permute.xlu1 %1376 }
 0x395   : > { %v6133_v23 = vpop.eup %6132 }
 0x396   : > { %v1030_v26 = vmul.f32 %v6133_v23, %v6666_v35 }
 0x398   : > { %v1042_v28 = vpack.c.bf16 %v1030_v26, %v1029_v24 }
 0x399   : > { %v6135_v33 = vpop.eup %6134 }
 0x39a   : > { %5646 = vmatmul.mubr.msk.bf16.vlgmr.msra.gmra.mrb[36].mxu1 %vm862_vm3, %v1042_v28  ;;  %v1033_v35 = vmul.f32 %v6135_v33, %v6670_v39 }
 0x39b   : > { %5656 = vmatpush3.bf16.msra.mxu1 %v1283_v1  ;;  %5657 = vmatprep.mubr.msk.bf16.mxu1 %vm6423_vm1, %v8172_v30 }
 0x39c   : > { %5667 = vmatprep.subr.bf16.mxu1 %v8172_v30 }
 0x3a0   : > { %867 = vmax.xlane.f32.xlu0 %v866_v10 }
 0x3b6   : > { %1788 = vrot.lane.b32.xlu0 %v6558_v6, %s6427_s21 }
 0x3bf   : > { %v994_v32 = vpop.xlane.xlu0 %993 }
 0x3c0   : > { %6136 = vrcp.f32 %v994_v32 }
 0x3c3   : > { %v1003_v47 = vpop.xlane.xlu1 %1002  ;;  %v1587_v49 = vpop.permute.xlu0 %1586 }
 0x3c4   : > { %6138 = vrcp.f32 %v1003_v47 }
 0x3c7   : > { %v1483_v50 = vpop.permute.xlu1 %1482  ;;  %v1689_v52 = vpop.permute.xlu0 %1688 }
 0x3ca   : > { %v6137_v34 = vpop.eup %6136 }
 0x3cb   : > { %v1034_v37 = vmul.f32 %v6137_v34, %v6678_v55  ;;  %v1585_v53 = vpop.permute.xlu1 %1584 }
 0x3cd   : > { %v1044_v41 = vpack.c.bf16 %v1034_v37, %v1033_v35 }
 0x3ce   : > { %v6139_v58 = vpop.eup %6138 }
 0x3cf   : > { %5658 = vmatmul.mubr.msk.bf16.vlgmr.msra.gmra.mrb[40].mxu1 %vm862_vm3, %v1044_v41  ;;  %v1687_v39 = vpop.permute.xlu1 %1686  ;;  %v1037_v0 = vmul.f32 %v6139_v58, %v6682_v57 }
 0x3d0   : > { %5668 = vmatpush3.bf16.msra.mxu1 %v1377_v44  ;;  %5669 = vmatprep.mubr.msk.bf16.mxu1 %vm6423_vm1, %v8172_v30 }
 0x3d1   : > { %5679 = vmatprep.subr.bf16.mxu1 %v8172_v30 }
 0x3f8   : > { %v1006_v56 = vpop.xlane.xlu0 %1005 }
 0x3f9   : > { %6140 = vrcp.f32 %v1006_v56 }
 0x3fc   : > { %v1791_v5 = vpop.permute.xlu0 %1790 }
 0x3fd   : > { %v1796_v11 = vsel %vm464_vm2, %v1791_v5, 0 }
 0x400   : > { %v865_v55 = vpop.xlane.xlu1 %864 }
 0x401   : > { %v911_v59 = vsub.f32 %v6623_v25, %v865_v55  ;;  %v1592_v25 = vsel %vm464_vm2, %v1587_v49, 0 }
 0x403   : > { %v6141_v60 = vpop.eup %6140  ;;  %v927_v61 = vmul.f32 1.442695, %v911_v59 }
 0x404   : > { %v1038_v1 = vmul.f32 %v6141_v60, %v6697_v62  ;;  %v1694_v62 = vsel %vm464_vm2, %v1689_v52, 0  ;;  %v877_v9 = vpop.xlane.xlu1 %876 }
 0x405   : > { %6142 = vpow2.f32 %v927_v61  ;;  %v915_v14 = vsub.f32 %v6633_v40, %v877_v9 }
 0x406   : > { %v1046_v3 = vpack.c.bf16 %v1038_v1, %v1037_v0 }
 0x407   : > { %v935_v18 = vmul.f32 1.442695, %v915_v14 }
 0x408   : > { %5670 = vmatmul.mubr.msk.bf16.vlgmr.msra.gmra.mrb[44].mxu1 %vm862_vm3, %v1046_v3  ;;  %v880_v12 = vpop.xlane.xlu1 %879 }
 0x409   : > { %5680 = vmatpush3.bf16.xpose.msra.mxu1 %v1490_v4  ;;  %5681 = vmatprep.mubr.msk.bf16.mxu1 %vm6423_vm1, %v8172_v30  ;;  %v916_v19 = vsub.f32 %v6635_v42, %v880_v12 }
 0x40a   : > { %5691 = vmatprep.subr.bf16.mxu1 %v8172_v30 }
 0x40c   : > { %v889_v13 = vpop.xlane.xlu1 %888 }
 0x40d   : > { %v919_v40 = vsub.f32 %v6629_v36, %v889_v13 }
 0x40f   : > { %v6748_v8 = vpop.eup %6142  ;;  %v943_v42 = vmul.f32 1.442695, %v919_v40 }
 0x410   : > { %5682 = vmatmul.mubr.msk.bf16.vlgmr.msra.gmra.mrb[48].mxu1 %vm464_vm2, %v1483_v50  ;;  %v959_v57 = vsel %vm862_vm3, %v6748_v8, 0.0  ;;  %v892_v22 = vpop.xlane.xlu1 %891 }
 0x411   : > { %5692 = vmatpush3.bf16.xpose.msra.mxu1 %v1592_v25  ;;  %960 = vadd.xlane.f32.xlu0 %v959_v57  ;;  %v920_v23 = vsub.f32 %v6631_v38, %v892_v22 }
 0x412   : > { %5693 = vmatprep.mubr.msk.bf16.mxu1 %vm6423_vm1, %v8172_v30  ;;  %5703 = vmatprep.subr.bf16.mxu1 %v8172_v30 }
 0x413   : > { %v945_v26 = vmul.f32 1.442695, %v920_v23 }
 0x414   : > { %v901_v20 = vpop.xlane.xlu1 %900 }
 0x415   : > { %v923_v28 = vsub.f32 %v6637_v45, %v901_v20 }
 0x417   : > { %v951_v38 = vmul.f32 1.442695, %v923_v28 }
 0x418   : > { %5694 = vmatmul.mubr.msk.bf16.vlgmr.msra.gmra.mrb[52].mxu1 %vm464_vm2, %v1585_v53  ;;  %v904_v10 = vpop.xlane.xlu1 %903 }
 0x419   : > { %5704 = vmatpush3.bf16.xpose.msra.mxu1 %v1694_v62  ;;  %5705 = vmatprep.mubr.msk.bf16.mxu1 %vm6423_vm1, %v8172_v30  ;;  %v924_v31 = vsub.f32 %v6639_v48, %v904_v10 }
 0x41a   : > { %5715 = vmatprep.subr.bf16.mxu1 %v8172_v30 }
 0x41b   : > { %v953_v45 = vmul.f32 1.442695, %v924_v31 }
 0x420   : > { %5706 = vmatmul.mubr.msk.bf16.vlgmr.msra.gmra.mrb[56].mxu1 %vm464_vm2, %v1687_v39 }
 0x421   : > { %5716 = vmatpush3.bf16.xpose.msra.mxu1 %v1796_v11  ;;  %5717 = vmatprep.mubr.msk.bf16.mxu1 %vm6423_vm1, %v8172_v30 }
 0x422   : > { %5727 = vmatprep.subr.bf16.mxu1 %v8172_v30 }
 0x427   : > { %1047 = vrot.lane.b32.xlu0 %v6540_v46, %s6425_s19 }
 0x42b   : > { %1433 = vrot.lane.b32.xlu0 %v6540_v46, %s6426_s20 }
 0x42d   : > { %v868_v15 = vpop.xlane.xlu0 %867 }
 0x42e   : > { %v912_v16 = vsub.f32 %v6625_v27, %v868_v15  ;;  %v937_v27 = vmul.f32 1.442695, %v916_v19 }
 0x42f   : > { %1535 = vrot.lane.b32.xlu0 %v6552_v2, %s6426_s20 }
 0x430   : > { %v929_v21 = vmul.f32 1.442695, %v912_v16 }
 0x431   : > { %v1789_v17 = vpop.permute.xlu0 %1788 }
 0x432   : > { %6144 = vpow2.f32 %v929_v21  ;;  %5718 = vmatmul.mubr.msk.bf16.vlgmr.msra.gmra.mrb[60].mxu1 %vm464_vm2, %v1789_v17 }
 0x433   : > { %1637 = vrot.lane.b32.xlu0 %v6546_v54, %s6426_s20  ;;  %5729 = vmatprep.mubr.msk.bf16.mxu1 %vm6423_vm1, %v8172_v30  ;;  %6146 = vpow2.f32 %v935_v18 }
 0x434   : > { %6148 = vpow2.f32 %v937_v27 }
 0x435   : > { %6150 = vpow2.f32 %v943_v42 }
 0x436   : > { %6152 = vpow2.f32 %v945_v26 }
 0x437   : > { %1739 = vrot.lane.b32.xlu0 %v6560_v7, %s6426_s20  ;;  %6154 = vpow2.f32 %v951_v38 }
 0x438   : > { %6156 = vpow2.f32 %v953_v45 }
 0x43b   : > { %2070 = vrot.lane.b32.xlu0 %v6538_v43, %s6428_s22 }
 0x43c   : > { %v6787_v24 = vpop.eup %6144 }
 0x43d   : > { %v962_v36 = vsel %vm862_vm3, %v6787_v24, 0.0  ;;  %v6792_v29 = vpop.eup %6146 }
 0x43e   : > { %963 = vadd.xlane.f32.xlu1 %v962_v36  ;;  %v971_v32 = vsel %vm862_vm3, %v6792_v29, 0.0  ;;  %v6799_v33 = vpop.eup %6148 }
 0x43f   : > { %2660 = vrot.lane.b32.xlu0 %v6540_v46, %s6429_s23  ;;  %v974_v34 = vsel %vm862_vm3, %v6799_v33, 0.0  ;;  %v6805_v35 = vpop.eup %6150 }
 0x440   : > { %v983_v48 = vsel %vm862_vm3, %v6805_v35, 0.0  ;;  %v6811_v37 = vpop.eup %6152 }
 0x441   : > { %v986_v41 = vsel %vm862_vm3, %v6811_v37, 0.0  ;;  %v6817_v44 = vpop.eup %6154 }
 0x442   : > { %972 = vadd.xlane.f32.xlu1 %v971_v32  ;;  %v995_v47 = vsel %vm862_vm3, %v6817_v44, 0.0  ;;  %v6821_v49 = vpop.eup %6156 }
 0x443   : > { %2711 = vrot.lane.b32.xlu0 %v6538_v43, %s6429_s23  ;;  %v998_v50 = vsel %vm862_vm3, %v6821_v49, 0.0 }
 0x446   : > { %975 = vadd.xlane.f32.xlu1 %v974_v34 }
 0x447   : > { %2762 = vrot.lane.b32.xlu0 %v6552_v2, %s6429_s23 }
 0x44a   : > { %984 = vadd.xlane.f32.xlu1 %v983_v48 }
 0x44b   : > { %2813 = vrot.lane.b32.xlu0 %v6550_v63, %s6429_s23 }
 0x44e   : > { %987 = vadd.xlane.f32.xlu1 %v986_v41 }
 0x452   : > { %996 = vadd.xlane.f32.xlu1 %v995_v47 }
 0x456   : > { %999 = vadd.xlane.f32.xlu1 %v998_v50 }
 0x45b   : > { %v6825_v52 = vpop.f32.mrb[32].mxu1 }
 0x45c   : > { %v5635_v53 = vpop.f32.mrb[33].mxu1 }
 0x45d   : > { %v6827_v56 = vpop.f32.mrb[34].mxu1 }
 0x45e   : > { %v5636_v55 = vpop.f32.mrb[35].mxu1 }
 0x467   : > { %1141 = vrot.lane.b32.xlu1 %v6552_v2, %s6425_s19 }
 0x46b   : > { %1235 = vrot.lane.b32.xlu1 %v6546_v54, %s6425_s19 }
 0x46d   : > { %v6835_v58 = vpop.f32.mrb[36].mxu1 }
 0x46e   : > { %v5647_v59 = vpop.f32.mrb[37].mxu1 }
 0x46f   : > { %v6837_v60 = vpop.f32.mrb[38].mxu1  ;;  %1329 = vrot.lane.b32.xlu1 %v6560_v7, %s6425_s19 }
 0x470   : > { %v5648_v0 = vpop.f32.mrb[39].mxu1 }
 0x473   : > { %1431 = vrot.lane.b32.xlu1 %v6540_v46, %s6427_s21 }
 0x477   : > { %1533 = vrot.lane.b32.xlu1 %v6552_v2, %s6427_s21 }
 0x47b   : > { %1635 = vrot.lane.b32.xlu1 %v6546_v54, %s6427_s21 }
 0x47f   : > { %1737 = vrot.lane.b32.xlu1 %v6560_v7, %s6427_s21 }
 0x483   : > { %2164 = vrot.lane.b32.xlu1 %v6550_v63, %s6428_s22 }
 0x487   : > { %2258 = vrot.lane.b32.xlu1 %v6544_v51, %s6428_s22 }
 0x48b   : > { %2352 = vrot.lane.b32.xlu1 %v6558_v6, %s6428_s22 }
 0x48f   : > { %2658 = vrot.lane.b32.xlu1 %v6540_v46, %s6430_s25 }
 0x493   : > { %2709 = vrot.lane.b32.xlu1 %v6538_v43, %s6430_s25 }
 0x497   : > { %2760 = vrot.lane.b32.xlu1 %v6552_v2, %s6430_s25 }
 0x49e   : > { %v961_v1 = vpop.xlane.xlu0 %960 }
 0x49f   : > { %6158 = vrcp.f32 %v961_v1 }
 0x4a2   : > { %v6863_v3 = vpop.f32.mrb[40].mxu1  ;;  %v1048_v4 = vpop.permute.xlu0 %1047 }
 0x4a3   : > { %5626 = vmatpush3.bf16.msra.mxu0 %v1048_v4  ;;  %v5659_v25 = vpop.f32.mrb[41].mxu1 }
 0x4a4   : > { %v6865_v57 = vpop.f32.mrb[42].mxu1  ;;  %5637 = vmatprep.subr.bf16.mxu0 %v8172_v30 }
 0x4a5   : > { %v5660_v5 = vpop.f32.mrb[43].mxu1 }
 0x4a6   : > { %v6870_v9 = vpop.permute.xlu0 %1433 }
 0x4a9   : > { %v6159_v19 = vpop.eup %6158 }
 0x4aa   : > { %v6872_v11 = vpop.permute.xlu0 %1535  ;;  %v1023_v22 = vmul.f32 %v6159_v19, %v6748_v8 }
 0x4ae   : > { %v6874_v12 = vpop.permute.xlu0 %1637 }
 0x4b2   : > { %v6876_v13 = vpop.permute.xlu0 %1739 }
 0x4b6   : > { %v2071_v14 = vpop.permute.xlu0 %2070 }
 0x4b7   : > { %5728 = vmatpush3.bf16.msra.mxu1 %v2071_v14 }
 0x4b8   : > { %5739 = vmatprep.subr.bf16.mxu1 %v8172_v30 }
 0x4cb   : > { %v964_v15 = vpop.xlane.xlu1 %963 }
 0x4cc   : > { %6160 = vrcp.f32 %v964_v15 }
 0x4cf   : > { %v973_v16 = vpop.xlane.xlu1 %972 }
 0x4d3   : > { %v976_v18 = vpop.xlane.xlu1 %975 }
 0x4d4   : > { %6162 = vrcp.f32 %v976_v18 }
 0x4d5   : > { %6164 = vrcp.f32 %v973_v16 }
 0x4d6   : > { %v6161_v21 = vpop.eup %6160 }
 0x4d7   : > { %v1024_v17 = vmul.f32 %v6161_v21, %v6787_v24  ;;  %v985_v27 = vpop.xlane.xlu1 %984 }
 0x4d9   : > { %v1039_v40 = vpack.c.bf16 %v1024_v17, %v1023_v22 }
 0x4db   : > { %v6881_v20 = vpop.f32.mrb[44].mxu1  ;;  %v988_v42 = vpop.xlane.xlu1 %987  ;;  %5628 = vmatmul.mubr.msk.bf16.vlgmr.msra.gmra.mrb[16].mxu0 %vm862_vm3, %v1039_v40  ;;  %v1541_v40 = vsel %vm464_vm2, %v6872_v11, 0 }
 0x4dc   : > { %8179 = vst [vmem:[#allocation3_spill] sm:$0xff] %v6881_v20  ;;  %v5671_v23 = vpop.f32.mrb[45].mxu1  ;;  %5639 = vmatprep.mubr.msk.bf16.mxu0 %vm6423_vm1, %v8172_v30  ;;  %6166 = vrcp.f32 %v988_v42 }
 0x4dd   : > { %v6886_v26 = vpop.f32.mrb[46].mxu1  ;;  %6168 = vrcp.f32 %v985_v27  ;;  %v1439_v27 = vsel %vm464_vm2, %v6870_v9, 0 }
 0x4de   : > { %8180 = vst [vmem:[#allocation4_spill] sm:$0xff] %v6886_v26  ;;  %v5672_v28 = vpop.f32.mrb[47].mxu1  ;;  %v6163_v10 = vpop.eup %6162 }
 0x4df   : > { %v997_v24 = vpop.xlane.xlu1 %996  ;;  %v6165_v31 = vpop.eup %6164  ;;  %v1028_v45 = vmul.f32 %v6163_v10, %v6799_v33  ;;  %v1745_v10 = vsel %vm464_vm2, %v6876_v13, 0 }
 0x4e0   : > { %v1027_v41 = vmul.f32 %v6165_v31, %v6792_v29 }
 0x4e2   : > { %v1041_v50 = vpack.c.bf16 %v1028_v45, %v1027_v41 }
 0x4e3   : > { %v6890_v36 = vpop.f32.mrb[48].mxu1  ;;  %v1000_v38 = vpop.xlane.xlu1 %999 }
 0x4e4   : > { %v5683_v32 = vpop.f32.mrb[49].mxu1  ;;  %6170 = vrcp.f32 %v1000_v38 }
 0x4e5   : > { %v6893_v34 = vpop.f32.mrb[50].mxu1  ;;  %6172 = vrcp.f32 %v997_v24  ;;  %v1643_v24 = vsel %vm464_vm2, %v6874_v12, 0 }
 0x4e6   : > { %v5684_v48 = vpop.f32.mrb[51].mxu1  ;;  %v6167_v53 = vpop.eup %6166 }
 0x4e7   : > { %v1142_v47 = vpop.permute.xlu1 %1141  ;;  %v6169_v0 = vpop.eup %6168  ;;  %v1032_v29 = vmul.f32 %v6167_v53, %v6811_v37 }
 0x4e8   : > { %5638 = vmatpush3.bf16.msra.mxu0 %v1142_v47  ;;  %v1031_v25 = vmul.f32 %v6169_v0, %v6805_v35 }
 0x4e9   : > { %5649 = vmatprep.subr.bf16.mxu0 %v8172_v30 }
 0x4ea   : > { %v1043_v5 = vpack.c.bf16 %v1032_v29, %v1031_v25 }
 0x4eb   : > { %v6897_v55 = vpop.f32.mrb[52].mxu1  ;;  %v1236_v59 = vpop.permute.xlu1 %1235  ;;  %5640 = vmatmul.mubr.msk.bf16.vlgmr.msra.gmra.mrb[20].mxu0 %vm862_vm3, %v1041_v50 }
 0x4ec   : > { %5650 = vmatpush3.bf16.msra.mxu0 %v1236_v59  ;;  %v5695_v33 = vpop.f32.mrb[53].mxu1  ;;  %5651 = vmatprep.mubr.msk.bf16.mxu0 %vm6423_vm1, %v8172_v30 }
 0x4ed   : > { %v6903_v1 = vpop.f32.mrb[54].mxu1  ;;  %5661 = vmatprep.subr.bf16.mxu0 %v8172_v30 }
 0x4ee   : > { %v5696_v4 = vpop.f32.mrb[55].mxu1  ;;  %v6171_v14 = vpop.eup %6170 }
 0x4ef   : > { %v1330_v15 = vpop.permute.xlu1 %1329  ;;  %v6173_v18 = vpop.eup %6172  ;;  %v1036_v37 = vmul.f32 %v6171_v14, %v6821_v49 }
 0x4f0   : > { %v1035_v22 = vmul.f32 %v6173_v18, %v6817_v44 }
 0x4f2   : > { %v1045_v17 = vpack.c.bf16 %v1036_v37, %v1035_v22 }
 0x4f3   : > { %v6907_v16 = vpop.f32.mrb[56].mxu1  ;;  %5652 = vmatmul.mubr.msk.bf16.vlgmr.msra.gmra.mrb[24].mxu0 %vm862_vm3, %v1043_v5  ;;  %v1432_v49 = vpop.permute.xlu1 %1431 }
 0x4f4   : > { %5662 = vmatpush3.bf16.msra.mxu0 %v1330_v15  ;;  %v5707_v19 = vpop.f32.mrb[57].mxu1  ;;  %5663 = vmatprep.mubr.msk.bf16.mxu0 %vm6423_vm1, %v8172_v30 }
 0x4f5   : > { %v6913_v21 = vpop.f32.mrb[58].mxu1  ;;  %5673 = vmatprep.subr.bf16.mxu0 %v8172_v30 }
 0x4f6   : > { %v5708_v35 = vpop.f32.mrb[59].mxu1 }
 0x4f7   : > { %v1534_v28 = vpop.permute.xlu1 %1533 }
 0x4fb   : > { %5664 = vmatmul.mubr.msk.bf16.vlgmr.msra.gmra.mrb[28].mxu0 %vm862_vm3, %v1045_v17  ;;  %v1636_v11 = vpop.permute.xlu1 %1635 }
 0x4fc   : > { %5675 = vmatprep.mubr.msk.bf16.mxu0 %vm6423_vm1, %v8172_v30 }
 0x4fd   : > { %5674 = vmatpush3.bf16.xpose.msra.mxu0 %v1439_v27 }
 0x4fe   : > { %5685 = vmatprep.subr.bf16.mxu0 %v8172_v30 }
 0x4ff   : > { %v1738_v12 = vpop.permute.xlu1 %1737 }
 0x504   : > { %5676 = vmatmul.mubr.msk.bf16.vlgmr.msra.gmra.mrb[32].mxu0 %vm464_vm2, %v1432_v49  ;;  %v1848_v49 = vsel %vm862_vm3, %v6893_v34, -inf }
 0x505   : > { %5686 = vmatpush3.bf16.xpose.msra.mxu0 %v1541_v40  ;;  %v6926_v44 = vpop.f32.mrb[60].mxu1  ;;  %5687 = vmatprep.mubr.msk.bf16.mxu0 %vm6423_vm1, %v8172_v30  ;;  %v1845_v40 = vsel %vm862_vm3, %v6890_v36, -inf }
 0x506   : > { %v5719_v42 = vpop.f32.mrb[61].mxu1  ;;  %5697 = vmatprep.subr.bf16.mxu0 %v8172_v30 }
 0x507   : > { %v6931_v9 = vpop.f32.mrb[62].mxu1 }
 0x508   : > { %v5720_v23 = vpop.f32.mrb[63].mxu1 }
 0x50c   : > { %5688 = vmatmul.mubr.msk.bf16.vlgmr.msra.gmra.mrb[36].mxu0 %vm464_vm2, %v1534_v28  ;;  %v1872_v28 = vsel %vm862_vm3, %v6913_v21, -inf }
 0x50d   : > { %5698 = vmatpush3.bf16.xpose.msra.mxu0 %v1643_v24  ;;  %5699 = vmatprep.mubr.msk.bf16.mxu0 %vm6423_vm1, %v8172_v30 }
 0x50e   : > { %5709 = vmatprep.subr.bf16.mxu0 %v8172_v30 }
 0x514   : > { %5700 = vmatmul.mubr.msk.bf16.vlgmr.msra.gmra.mrb[40].mxu0 %vm464_vm2, %v1636_v11 }
 0x515   : > { %5710 = vmatpush3.bf16.xpose.msra.mxu0 %v1745_v10  ;;  %5711 = vmatprep.mubr.msk.bf16.mxu0 %vm6423_vm1, %v8172_v30  ;;  %v1857_v10 = vsel %vm862_vm3, %v6897_v55, -inf }
 0x516   : > { %5721 = vmatprep.subr.bf16.mxu0 %v8172_v30 }
 0x51c   : > { %5712 = vmatmul.mubr.msk.bf16.vlgmr.msra.gmra.mrb[44].mxu0 %vm464_vm2, %v1738_v12  ;;  %v1884_v12 = vsel %vm862_vm3, %v6931_v9, -inf }
 0x51d   : > { %5723 = vmatprep.mubr.msk.bf16.mxu0 %vm6423_vm1, %v8172_v30 }
 0x5ae   : > { %v6948_v38 = vpop.f32.mrb[16].mxu0 }
 0x5af   : > { %v5629_v31 = vpop.f32.mrb[17].mxu0 }
 0x5b0   : > { %v6950_v32 = vpop.f32.mrb[18].mxu0  ;;  %v1860_v31 = vsel %vm862_vm3, %v6903_v1, -inf }
 0x5b1   : > { %v5630_v45 = vpop.f32.mrb[19].mxu0 }
 0x5be   : > { %v6954_v48 = vpop.f32.mrb[20].mxu0 }
 0x5bf   : > { %v5641_v41 = vpop.f32.mrb[21].mxu0 }
 0x5c0   : > { %v6956_v47 = vpop.f32.mrb[22].mxu0 }
 0x5c1   : > { %v5642_v53 = vpop.f32.mrb[23].mxu0 }
 0x5c6   : > { %v6960_v59 = vpop.f32.mrb[24].mxu0 }
 0x5c7   : > { %v5653_v0 = vpop.f32.mrb[25].mxu0 }
 0x5c8   : > { %v6962_v33 = vpop.f32.mrb[26].mxu0 }
 0x5c9   : > { %v5654_v4 = vpop.f32.mrb[27].mxu0 }
 0x5ca   : > { %v1869_v4 = vsel %vm862_vm3, %v6907_v16, -inf }
 0x5ce   : > { %v6966_v25 = vpop.f32.mrb[28].mxu0 }
 0x5cf   : > { %v5665_v5 = vpop.f32.mrb[29].mxu0 }
 0x5d0   : > { %v6968_v14 = vpop.f32.mrb[30].mxu0  ;;  %v1881_v5 = vsel %vm862_vm3, %v6926_v44, -inf }
 0x5d1   : > { %v5666_v18 = vpop.f32.mrb[31].mxu0 }
 0x5d7   : > { %v6972_v19 = vpop.f32.mrb[32].mxu0 }
 0x5d8   : > { %v5677_v37 = vpop.f32.mrb[33].mxu0  ;;  %v1839_v35 = vsel %vm862_vm3, %v6972_v19, -inf }
 0x5d9   : > { %1840 = vmax.xlane.f32.xlu1 %v1839_v35  ;;  %v6976_v22 = vpop.f32.mrb[34].mxu0 }
 0x5da   : > { %v5678_v17 = vpop.f32.mrb[35].mxu0  ;;  %v1842_v27 = vsel %vm862_vm3, %v6976_v22, -inf }
 0x5db   : > { %1843 = vmax.xlane.f32.xlu0 %v1842_v27 }
 0x5dd   : > { %1849 = vmax.xlane.f32.xlu1 %v1848_v49 }
 0x5df   : > { %1846 = vmax.xlane.f32.xlu0 %v1845_v40  ;;  %v6984_v42 = vpop.f32.mrb[36].mxu0  ;;  %v7016_v40 = vpop.permute.xlu1 %2164 }
 0x5e0   : > { %v5689_v23 = vpop.f32.mrb[37].mxu0  ;;  %v1851_v27 = vsel %vm862_vm3, %v6984_v42, -inf }
 0x5e1   : > { %1873 = vmax.xlane.f32.xlu1 %v1872_v28  ;;  %v6988_v24 = vpop.f32.mrb[38].mxu0 }
 0x5e2   : > { %v5690_v11 = vpop.f32.mrb[39].mxu0  ;;  %v1854_v49 = vsel %vm862_vm3, %v6988_v24, -inf }
 0x5e3   : > { %1858 = vmax.xlane.f32.xlu0 %v1857_v10  ;;  %v7018_v23 = vpop.permute.xlu1 %2258  ;;  %v7022_v11 = vpop.permute.xlu0 %2660 }
 0x5e5   : > { %1885 = vmax.xlane.f32.xlu1 %v1884_v12 }
 0x5e7   : > { %1861 = vmax.xlane.f32.xlu0 %v1860_v31  ;;  %v6996_v45 = vpop.f32.mrb[40].mxu0  ;;  %v7020_v28 = vpop.permute.xlu1 %2352 }
 0x5e8   : > { %v5701_v41 = vpop.f32.mrb[41].mxu0  ;;  %v7026_v12 = vpop.permute.xlu0 %2711 }
 0x5e9   : > { %v6998_v53 = vpop.f32.mrb[42].mxu0 }
 0x5ea   : > { %v5702_v0 = vpop.f32.mrb[43].mxu0 }
 0x5eb   : > { %1870 = vmax.xlane.f32.xlu0 %v1869_v4  ;;  %v7024_v10 = vpop.permute.xlu1 %2658 }
 0x5ec   : > { %v7030_v41 = vpop.permute.xlu0 %2762 }
 0x5ef   : > { %1882 = vmax.xlane.f32.xlu0 %v1881_v5  ;;  %v7004_v18 = vpop.f32.mrb[44].mxu0  ;;  %v7028_v31 = vpop.permute.xlu1 %2709 }
 0x5f0   : > { %v5713_v37 = vpop.f32.mrb[45].mxu0  ;;  %v7034_v4 = vpop.permute.xlu0 %2813 }
 0x5f1   : > { %v7006_v35 = vpop.f32.mrb[46].mxu0 }
 0x5f2   : > { %v5714_v17 = vpop.f32.mrb[47].mxu0 }
 0x5f3   : > { %v7032_v0 = vpop.permute.xlu1 %2760 }
 0x5f6   : > { %2864 = vrot.lane.b32.xlu1 %v6546_v54, %s6429_s23 }
 0x605   : > { %2811 = vrot.lane.b32.xlu0 %v6550_v63, %s6430_s25 }
 0x61a   : > { %1852 = vmax.xlane.f32.xlu1 %v1851_v27 }
 0x624   : > { %1855 = vmax.xlane.f32.xlu0 %v1854_v49 }
 0x666   : > { %v7036_v5 = vpop.xlane.xlu1 %1840 }
 0x668   : > { %v7038_v37 = vpop.xlane.xlu0 %1843 }
 0x66a   : > { %v1850_v17 = vpop.xlane.xlu1 %1849 }
 0x66b   : > { %v1890_v27 = vsub.f32 %v6893_v34, %v1850_v17 }
 0x66c   : > { %v1847_v49 = vpop.xlane.xlu0 %1846 }
 0x66d   : > { %v1909_v8 = vmul.f32 1.442695, %v1890_v27  ;;  %v1889_v15 = vsub.f32 %v6890_v36, %v1847_v49 }
 0x66f   : > { %6174 = vpow2.f32 %v1909_v8  ;;  %v1907_v62 = vmul.f32 1.442695, %v1889_v15 }
 0x670   : > { %v1859_v29 = vpop.xlane.xlu0 %1858 }
 0x671   : > { %6176 = vpow2.f32 %v1907_v62  ;;  %v1893_v61 = vsub.f32 %v6897_v55, %v1859_v29 }
 0x673   : > { %v1915_v50 = vmul.f32 1.442695, %v1893_v61 }
 0x674   : > { %v1862_v39 = vpop.xlane.xlu0 %1861 }
 0x675   : > { %6178 = vpow2.f32 %v1915_v50  ;;  %v1894_v13 = vsub.f32 %v6903_v1, %v1862_v39 }
 0x677   : > { %v1917_v30 = vmul.f32 1.442695, %v1894_v13  ;;  %v1874_v13 = vpop.xlane.xlu1 %1873 }
 0x678   : > { %v1871_v20 = vpop.xlane.xlu0 %1870  ;;  %v1898_v29 = vsub.f32 %v6913_v21, %v1874_v13  ;;  %v1875_v13 = vsel %vm862_vm3, %v7004_v18, -inf }
 0x679   : > { %v7044_v26 = vpop.eup %6174  ;;  %6180 = vpow2.f32 %v1917_v30  ;;  %v1897_v34 = vsub.f32 %v6907_v16, %v1871_v20 }
 0x67a   : > { %v1944_v8 = vsel %vm862_vm3, %v7044_v26, 0.0  ;;  %v1925_v27 = vmul.f32 1.442695, %v1898_v29 }
 0x67b   : > { %v7049_v36 = vpop.eup %6176  ;;  %v1923_v62 = vmul.f32 1.442695, %v1897_v34  ;;  %1945 = vadd.xlane.f32.xlu1 %v1944_v8  ;;  %v1886_v17 = vpop.xlane.xlu1 %1885 }
 0x67c   : > { %v1941_v61 = vsel %vm862_vm3, %v7049_v36, 0.0  ;;  %v1883_v50 = vpop.xlane.xlu0 %1882  ;;  %v1902_v49 = vsub.f32 %v6931_v9, %v1886_v17 }
 0x67d   : > { %6182 = vpow2.f32 %v1923_v62  ;;  %1942 = vadd.xlane.f32.xlu0 %v1941_v61  ;;  %v1901_v15 = vsub.f32 %v6926_v44, %v1883_v50  ;;  %v1863_v61 = vsel %vm862_vm3, %v6996_v45, -inf  ;;  %v1878_v50 = vsel %vm862_vm3, %v7006_v35, -inf }
 0x67e   : > { %6184 = vpow2.f32 %v1925_v27  ;;  %v1933_v8 = vmul.f32 1.442695, %v1902_v49 }
 0x67f   : > { %v7053_v39 = vpop.eup %6178  ;;  %v1931_v34 = vmul.f32 1.442695, %v1901_v15  ;;  %v7096_v29 = vpop.permute.xlu1 %2864 }
 0x680   : > { %v1953_v55 = vsel %vm862_vm3, %v7053_v39, 0.0  ;;  %v7098_v15 = vpop.permute.xlu0 %2811 }
 0x681   : > { %1954 = vadd.xlane.f32.xlu0 %v1953_v55  ;;  %6186 = vpow2.f32 %v1931_v34 }
 0x682   : > { %6188 = vpow2.f32 %v1933_v8 }
 0x683   : > { %v7057_v30 = vpop.eup %6180 }
 0x684   : > { %v1956_v20 = vsel %vm862_vm3, %v7057_v30, 0.0 }
 0x685   : > { %1957 = vadd.xlane.f32.xlu1 %v1956_v20 }
 0x687   : > { %v7061_v1 = vpop.eup %6182 }
 0x688   : > { %v1965_v16 = vsel %vm862_vm3, %v7061_v1, 0.0  ;;  %v7072_v62 = vpop.eup %6184 }
 0x689   : > { %1966 = vadd.xlane.f32.xlu0 %v1965_v16  ;;  %v1968_v21 = vsel %vm862_vm3, %v7072_v62, 0.0  ;;  %v1866_v16 = vsel %vm862_vm3, %v6998_v53, -inf }
 0x68b   : > { %v7076_v55 = vpop.eup %6186 }
 0x68c   : > { %v1977_v44 = vsel %vm862_vm3, %v7076_v55, 0.0  ;;  %v7082_v9 = vpop.eup %6188 }
 0x68d   : > { %v1980_v20 = vsel %vm862_vm3, %v7082_v9, 0.0 }
 0x696   : > { %2915 = vrot.lane.b32.xlu1 %v6544_v51, %s6429_s23 }
 0x69f   : > { %2862 = vrot.lane.b32.xlu0 %v6546_v54, %s6430_s25 }
 0x6a7   : > { %v1853_v17 = vpop.xlane.xlu1 %1852 }
 0x6b1   : > { %v1856_v27 = vpop.xlane.xlu0 %1855 }
 0x6ba   : > { %1864 = vmax.xlane.f32.xlu1 %v1863_v61 }
 0x6be   : > { %1969 = vadd.xlane.f32.xlu1 %v1968_v21  ;;  %1978 = vadd.xlane.f32.xlu0 %v1977_v44 }
 0x6c2   : > { %1981 = vadd.xlane.f32.xlu1 %v1980_v20  ;;  %1867 = vmax.xlane.f32.xlu0 %v1866_v16  ;;  %v1887_v20 = vsub.f32 %v6972_v19, %v7036_v5 }
 0x6d3   : > { %2966 = vrot.lane.b32.xlu1 %v6560_v7, %s6429_s23 }
 0x6d8   : > { %2913 = vrot.lane.b32.xlu0 %v6544_v51, %s6430_s25 }
 0x6f7   : > { %1876 = vmax.xlane.f32.xlu1 %v1875_v13  ;;  %1879 = vmax.xlane.f32.xlu0 %v1878_v50 }
 0x708   : > { %v1946_v49 = vpop.xlane.xlu1 %1945  ;;  %3017 = vrot.lane.b32.xlu1 %v6558_v6, %s6429_s23 }
 0x709   : > { %6190 = vrcp.f32 %v1946_v49  ;;  %v1903_v49 = vmul.f32 1.442695, %v1887_v20 }
 0x70a   : > { %v1943_v34 = vpop.xlane.xlu0 %1942 }
 0x70b   : > { %6192 = vrcp.f32 %v1943_v34  ;;  %v1888_v34 = vsub.f32 %v6976_v22, %v7038_v37 }
 0x70c   : > { %3015 = vrot.lane.b32.xlu1 %v6558_v6, %s6430_s25  ;;  %v1891_v6 = vsub.f32 %v6984_v42, %v1853_v17 }
 0x70d   : > { %2964 = vrot.lane.b32.xlu0 %v6560_v7, %s6430_s25  ;;  %v1905_v19 = vmul.f32 1.442695, %v1888_v34 }
 0x70e   : > { %v1955_v8 = vpop.xlane.xlu0 %1954  ;;  %v1911_v5 = vmul.f32 1.442695, %v1891_v6 }
 0x70f   : > { %6194 = vrcp.f32 %v1955_v8 }
 0x712   : > { %v1958_v61 = vpop.xlane.xlu1 %1957 }
 0x713   : > { %v6191_v21 = vpop.eup %6190  ;;  %6196 = vrcp.f32 %v1958_v61  ;;  %v8181_v61 = vmov 0.0  }
 0x714   : > { %v2002_v16 = vmul.f32 %v6191_v21, %v7044_v26  ;;  %6198 = vpow2.f32 %v1903_v49 }
 0x715   : > { %v6193_v44 = vpop.eup %6192  ;;  %6200 = vpow2.f32 %v1905_v19 }
 0x716   : > { %v2001_v13 = vmul.f32 %v6193_v44, %v7049_v36  ;;  %v1892_v36 = vsub.f32 %v6988_v24, %v1856_v27  ;;  %6202 = vpow2.f32 %v1911_v5  ;;  %v1967_v44 = vpop.xlane.xlu0 %1966  ;;  %v7142_v20 = vpop.permute.xlu1 %2915 }
 0x718   : > { %v2016_v50 = vpack.c.bf16 %v2002_v16, %v2001_v13  ;;  %v1913_v17 = vmul.f32 1.442695, %v1892_v36 }
 0x719   : > { %v6195_v8 = vpop.eup %6194 }
 0x71a   : > { %5730 = vmatmul.mubr.msk.bf16.vlgmr.msra.gmra.mrb[64].mxu1 %vm862_vm3, %v2016_v50  ;;  %v2005_v22 = vmul.f32 %v6195_v8, %v7053_v39  ;;  %6204 = vpow2.f32 %v1913_v17  ;;  %v7144_v16 = vpop.permute.xlu0 %2862 }
 0x71b   : > { %5740 = vmatpush3.bf16.msra.mxu1 %v7016_v40  ;;  %5741 = vmatprep.mubr.msk.bf16.mxu1 %vm6423_vm1, %v8181_v61  ;;  %6206 = vrcp.f32 %v1967_v44 }
 0x71c   : > { %5751 = vmatprep.subr.bf16.mxu1 %v8181_v61 }
 0x71d   : > { %v6197_v26 = vpop.eup %6196 }
 0x71e   : > { %v2006_v42 = vmul.f32 %v6197_v26, %v7057_v30  ;;  %v7126_v6 = vpop.eup %6198 }
 0x71f   : > { %v7128_v24 = vpop.eup %6200  ;;  %v1935_v40 = vsel %vm862_vm3, %v7126_v6, 0.0 }
 0x720   : > { %v2018_v37 = vpack.c.bf16 %v2006_v42, %v2005_v22  ;;  %v7132_v39 = vpop.eup %6202  ;;  %v1938_v30 = vsel %vm862_vm3, %v7128_v24, 0.0 }
 0x722   : > { %5742 = vmatmul.mubr.msk.bf16.vlgmr.msra.gmra.mrb[68].mxu1 %vm862_vm3, %v2018_v37 }
 0x723   : > { %5752 = vmatpush3.bf16.msra.mxu1 %v7018_v23  ;;  %5753 = vmatprep.mubr.msk.bf16.mxu1 %vm6423_vm1, %v8181_v61  ;;  %v1947_v23 = vsel %vm862_vm3, %v7132_v39, 0.0 }
 0x724   : > { %5763 = vmatprep.subr.bf16.mxu1 %v8181_v61  ;;  %v7138_v27 = vpop.eup %6204 }
 0x725   : > { %v1950_v21 = vsel %vm862_vm3, %v7138_v27, 0.0  ;;  %v6207_v22 = vpop.eup %6206 }
 0x726   : > { %v2009_v17 = vmul.f32 %v6207_v22, %v7061_v1 }
 0x72c   : > { %1936 = vadd.xlane.f32.xlu0 %v1935_v40 }
 0x730   : > { %1939 = vadd.xlane.f32.xlu1 %v1938_v30  ;;  %1948 = vadd.xlane.f32.xlu0 %v1947_v23 }
 0x734   : > { %1951 = vadd.xlane.f32.xlu0 %v1950_v21 }
 0x747   : > { %v1865_v13 = vpop.xlane.xlu1 %1864 }
 0x748   : > { %v1895_v50 = vsub.f32 %v6996_v45, %v1865_v13 }
 0x74a   : > { %v1919_v49 = vmul.f32 1.442695, %v1895_v50  ;;  %v2870_v50 = vsel %vm464_vm2, %v7096_v29, 0  ;;  %v2921_v29 = vsel %vm464_vm2, %v7142_v20, 0 }
 0x74b   : > { %v1970_v34 = vpop.xlane.xlu1 %1969  ;;  %v1979_v8 = vpop.xlane.xlu0 %1978 }
 0x74c   : > { %6208 = vpow2.f32 %v1919_v49 }
 0x74d   : > { %6210 = vrcp.f32 %v1970_v34 }
 0x74f   : > { %v1982_v26 = vpop.xlane.xlu1 %1981  ;;  %v1868_v19 = vpop.xlane.xlu0 %1867 }
 0x750   : > { %v1896_v5 = vsub.f32 %v6998_v53, %v1868_v19  ;;  %6212 = vrcp.f32 %v1982_v26 }
 0x751   : > { %6214 = vrcp.f32 %v1979_v8 }
 0x752   : > { %v1921_v36 = vmul.f32 1.442695, %v1896_v5 }
 0x754   : > { %6216 = vpow2.f32 %v1921_v36 }
 0x756   : > { %v7148_v42 = vpop.eup %6208 }
 0x757   : > { %v6211_v37 = vpop.eup %6210  ;;  %v1959_v45 = vsel %vm862_vm3, %v7148_v42, 0.0 }
 0x758   : > { %v2010_v40 = vmul.f32 %v6211_v37, %v7072_v62  ;;  %1960 = vadd.xlane.f32.xlu0 %v1959_v45 }
 0x75a   : > { %v2020_v30 = vpack.c.bf16 %v2010_v40, %v2009_v17  ;;  %v6213_v23 = vpop.eup %6212 }
 0x75b   : > { %v6215_v53 = vpop.eup %6214  ;;  %v2014_v44 = vmul.f32 %v6213_v23, %v7082_v9  ;;  %v2717_v9 = vsel %vm464_vm2, %v7026_v12, 0  ;;  %v2967_v12 = vpop.permute.xlu1 %2966 }
 0x75c   : > { %5754 = vmatmul.mubr.msk.bf16.vlgmr.msra.gmra.mrb[72].mxu1 %vm862_vm3, %v2020_v30  ;;  %v2013_v62 = vmul.f32 %v6215_v53, %v7076_v55  ;;  %v2972_v8 = vsel %vm464_vm2, %v2967_v12, 0 }
 0x75d   : > { %5764 = vmatpush3.bf16.msra.mxu1 %v7020_v28  ;;  %5765 = vmatprep.mubr.msk.bf16.mxu1 %vm6423_vm1, %v8181_v61  ;;  %v2666_v28 = vsel %vm464_vm2, %v7022_v11, 0  ;;  %v2768_v11 = vsel %vm464_vm2, %v7030_v41, 0 }
 0x75e   : > { %v7158_v21 = vpop.eup %6216  ;;  %5805 = vmatprep.subr.bf16.mxu1 %v8181_v61  ;;  %v2022_v13 = vpack.c.bf16 %v2014_v44, %v2013_v62 }
 0x75f   : > { %v1962_v1 = vsel %vm862_vm3, %v7158_v21, 0.0 }
 0x760   : > { %1963 = vadd.xlane.f32.xlu1 %v1962_v1 }
 0x764   : > { %5766 = vmatmul.mubr.msk.bf16.vlgmr.msra.gmra.mrb[76].mxu1 %vm862_vm3, %v2022_v13 }
 0x765   : > { %5807 = vmatprep.mubr.msk.bf16.mxu1 %vm6423_vm1, %v8181_v61 }
 0x766   : > { %5806 = vmatpush3.bf16.xpose.msra.mxu1 %v2666_v28 }
 0x767   : > { %5811 = vmatprep.subr.bf16.mxu1 %v8181_v61 }
 0x76d   : > { %5808 = vmatmul.mubr.msk.bf16.vlgmr.msra.gmra.mrb[80].mxu1 %vm464_vm2, %v7024_v10  ;;  %v2819_v10 = vsel %vm464_vm2, %v7034_v4, 0 }
 0x76e   : > { %5812 = vmatpush3.bf16.xpose.msra.mxu1 %v2717_v9  ;;  %5813 = vmatprep.mubr.msk.bf16.mxu1 %vm6423_vm1, %v8181_v61 }
 0x76f   : > { %5817 = vmatprep.subr.bf16.mxu1 %v8181_v61 }
 0x775   : > { %5814 = vmatmul.mubr.msk.bf16.vlgmr.msra.gmra.mrb[84].mxu1 %vm464_vm2, %v7028_v31  ;;  %v2914_v31 = vpop.permute.xlu0 %2913 }
 0x776   : > { %5818 = vmatpush3.bf16.xpose.msra.mxu1 %v2768_v11  ;;  %5819 = vmatprep.mubr.msk.bf16.mxu1 %vm6423_vm1, %v8181_v61 }
 0x777   : > { %5823 = vmatprep.subr.bf16.mxu1 %v8181_v61 }
 0x77d   : > { %5820 = vmatmul.mubr.msk.bf16.vlgmr.msra.gmra.mrb[88].mxu1 %vm464_vm2, %v7032_v0 }
 0x77e   : > { %5824 = vmatpush3.bf16.xpose.msra.mxu1 %v2819_v10  ;;  %5825 = vmatprep.mubr.msk.bf16.mxu1 %vm6423_vm1, %v8181_v61 }
 0x77f   : > { %5829 = vmatprep.subr.bf16.mxu1 %v8181_v61 }
 0x784   : > { %v1877_v41 = vpop.xlane.xlu1 %1876  ;;  %v1880_v55 = vpop.xlane.xlu0 %1879 }
 0x785   : > { %5826 = vmatmul.mubr.msk.bf16.vlgmr.msra.gmra.mrb[92].mxu1 %vm464_vm2, %v7098_v15  ;;  %v1899_v4 = vsub.f32 %v7004_v18, %v1877_v41  ;;  %v1900_v0 = vsub.f32 %v7006_v35, %v1880_v55 }
 0x786   : > { %5830 = vmatpush3.bf16.xpose.msra.mxu1 %v2870_v50  ;;  %5831 = vmatprep.mubr.msk.bf16.mxu1 %vm6423_vm1, %v8181_v61 }
 0x787   : > { %v1927_v49 = vmul.f32 1.442695, %v1899_v4  ;;  %v1929_v34 = vmul.f32 1.442695, %v1900_v0  ;;  %5835 = vmatprep.subr.bf16.mxu1 %v8181_v61 }
 0x788   : > { %v2965_v26 = vpop.permute.xlu0 %2964 }
 0x789   : > { %6218 = vpow2.f32 %v1927_v49 }
 0x78a   : > { %6220 = vpow2.f32 %v1929_v34 }
 0x78d   : > { %5832 = vmatmul.mubr.msk.bf16.vlgmr.msra.gmra.mrb[96].mxu1 %vm464_vm2, %v7144_v16  ;;  %v3018_v16 = vpop.permute.xlu1 %3017 }
 0x78e   : > { %5836 = vmatpush3.bf16.xpose.msra.mxu1 %v2921_v29  ;;  %5837 = vmatprep.mubr.msk.bf16.mxu1 %vm6423_vm1, %v8181_v61  ;;  %v3023_v19 = vsel %vm464_vm2, %v3018_v16, 0 }
 0x78f   : > { %5841 = vmatprep.subr.bf16.mxu1 %v8181_v61 }
 0x791   : > { %v3016_v5 = vpop.permute.xlu1 %3015 }
 0x793   : > { %v7208_v18 = vpop.eup %6218 }
 0x794   : > { %v7210_v35 = vpop.eup %6220  ;;  %v1971_v15 = vsel %vm862_vm3, %v7208_v18, 0.0 }
 0x795   : > { %5838 = vmatmul.mubr.msk.bf16.vlgmr.msra.gmra.mrb[100].mxu1 %vm464_vm2, %v2914_v31  ;;  %1972 = vadd.xlane.f32.xlu0 %v1971_v15  ;;  %v1974_v20 = vsel %vm862_vm3, %v7210_v35, 0.0 }
 0x796   : > { %5842 = vmatpush3.bf16.xpose.msra.mxu1 %v2972_v8  ;;  %1975 = vadd.xlane.f32.xlu1 %v1974_v20 }
 0x797   : > { %5843 = vmatprep.mubr.msk.bf16.mxu1 %vm6423_vm1, %v8181_v61  ;;  %5847 = vmatprep.subr.bf16.mxu1 %v8181_v61 }
 0x79d   : > { %5844 = vmatmul.mubr.msk.bf16.vlgmr.msra.gmra.mrb[104].mxu1 %vm464_vm2, %v2965_v26 }
 0x79e   : > { %5848 = vmatpush3.bf16.xpose.msra.mxu1 %v3023_v19  ;;  %5849 = vmatprep.mubr.msk.bf16.mxu1 %vm6423_vm1, %v8181_v61 }
 0x79f   : > { %5859 = vmatprep.subr.bf16.mxu1 %v8181_v61 }
 0x7a5   : > { %5850 = vmatmul.mubr.msk.bf16.vlgmr.msra.gmra.mrb[108].mxu1 %vm464_vm2, %v3016_v5 }
 0x7a6   : > { %5861 = vmatprep.mubr.msk.bf16.mxu1 %vm6423_vm1, %v8181_v61 }
 0x7a7   : > { %2117 = vrot.lane.b32.xlu1 %v6552_v2, %s6428_s22 }
 0x7ab   : > { %2211 = vrot.lane.b32.xlu1 %v6546_v54, %s6428_s22  ;;  %2023 = vrot.lane.b32.xlu0 %v6540_v46, %s6428_s22 }
 0x7af   : > { %2305 = vrot.lane.b32.xlu1 %v6560_v7, %s6428_s22 }
 0x7b9   : > { %v1937_v1 = vpop.xlane.xlu0 %1936 }
 0x7bd   : > { %v1940_v62 = vpop.xlane.xlu1 %1939  ;;  %v1949_v13 = vpop.xlane.xlu0 %1948 }
 0x7be   : > { %6222 = vrcp.f32 %v1940_v62 }
 0x7bf   : > { %6224 = vrcp.f32 %v1937_v1 }
 0x7c1   : > { %v1952_v28 = vpop.xlane.xlu0 %1951 }
 0x7c2   : > { %6226 = vrcp.f32 %v1952_v28 }
 0x7c3   : > { %6228 = vrcp.f32 %v1949_v13 }
 0x7c8   : > { %v6223_v10 = vpop.eup %6222 }
 0x7c9   : > { %v6225_v31 = vpop.eup %6224  ;;  %v2000_v41 = vmul.f32 %v6223_v10, %v7128_v24 }
 0x7ca   : > { %v1999_v50 = vmul.f32 %v6225_v31, %v7126_v6 }
 0x7cc   : > { %v2015_v0 = vpack.c.bf16 %v2000_v41, %v1999_v50  ;;  %v6227_v49 = vpop.eup %6226 }
 0x7cd   : > { %v6229_v29 = vpop.eup %6228  ;;  %v2004_v24 = vmul.f32 %v6227_v49, %v7138_v27 }
 0x7ce   : > { %v2003_v6 = vmul.f32 %v6229_v29, %v7132_v39 }
 0x7d0   : > { %v2017_v20 = vpack.c.bf16 %v2004_v24, %v2003_v6 }
 0x7e5   : > { %v1961_v9 = vpop.xlane.xlu0 %1960 }
 0x7ed   : > { %v7237_v36 = vpop.f32.mrb[64].mxu1  ;;  %v1964_v11 = vpop.xlane.xlu1 %1963 }
 0x7ee   : > { %v5731_v22 = vpop.f32.mrb[65].mxu1  ;;  %6230 = vrcp.f32 %v1964_v11 }
 0x7ef   : > { %v7239_v37 = vpop.f32.mrb[66].mxu1  ;;  %6232 = vrcp.f32 %v1961_v9 }
 0x7f0   : > { %v2400_v45 = vpack.c.bf16 %v7239_v37, %v7237_v36  ;;  %v5732_v17 = vpop.f32.mrb[67].mxu1 }
 0x7f5   : > { %v7243_v40 = vpop.f32.mrb[68].mxu1 }
 0x7f6   : > { %v5743_v30 = vpop.f32.mrb[69].mxu1 }
 0x7f7   : > { %v7245_v23 = vpop.f32.mrb[70].mxu1 }
 0x7f8   : > { %v2402_v53 = vpack.c.bf16 %v7245_v23, %v7243_v40  ;;  %v5744_v44 = vpop.f32.mrb[71].mxu1  ;;  %v6231_v16 = vpop.eup %6230 }
 0x7f9   : > { %v6233_v27 = vpop.eup %6232  ;;  %v2008_v39 = vmul.f32 %v6231_v16, %v7158_v21 }
 0x7fa   : > { %v2007_v17 = vmul.f32 %v6233_v27, %v7148_v42 }
 0x7fc   : > { %v2019_v62 = vpack.c.bf16 %v2008_v39, %v2007_v17 }
 0x822   : > { %v1973_v12 = vpop.xlane.xlu0 %1972 }
 0x823   : > { %v1976_v55 = vpop.xlane.xlu1 %1975  ;;  %6234 = vrcp.f32 %v1973_v12 }
 0x824   : > { %6236 = vrcp.f32 %v1976_v55 }
 0x826   : > { %v2024_v4 = vpop.permute.xlu0 %2023 }
 0x827   : > { %5722 = vmatpush3.bf16.msra.mxu0 %v2024_v4  ;;  %v2118_v34 = vpop.permute.xlu1 %2117 }
 0x828   : > { %5733 = vmatprep.subr.bf16.mxu0 %v8181_v61 }
 0x82a   : > { %5724 = vmatmul.mubr.msk.bf16.vlgmr.msra.gmra.mrb[48].mxu0 %vm862_vm3, %v2015_v0 }
 0x82b   : > { %5734 = vmatpush3.bf16.msra.mxu0 %v2118_v34  ;;  %5735 = vmatprep.mubr.msk.bf16.mxu0 %vm6423_vm1, %v8181_v61  ;;  %v2212_v19 = vpop.permute.xlu1 %2211 }
 0x82c   : > { %5745 = vmatprep.subr.bf16.mxu0 %v8181_v61 }
 0x82d   : > { %v6235_v44 = vpop.eup %6234 }
 0x82e   : > { %v6237_v13 = vpop.eup %6236  ;;  %v2011_v21 = vmul.f32 %v6235_v44, %v7208_v18 }
 0x82f   : > { %v7258_v15 = vpop.f32.mrb[72].mxu1  ;;  %v2306_v9 = vpop.permute.xlu1 %2305  ;;  %v2012_v42 = vmul.f32 %v6237_v13, %v7210_v35 }
 0x830   : > { %v5755_v8 = vpop.f32.mrb[73].mxu1 }
 0x831   : > { %v7260_v26 = vpop.f32.mrb[74].mxu1  ;;  %v2021_v31 = vpack.c.bf16 %v2012_v42, %v2011_v21 }
 0x832   : > { %v2404_v5 = vpack.c.bf16 %v7260_v26, %v7258_v15  ;;  %v5756_v22 = vpop.f32.mrb[75].mxu1  ;;  %5736 = vmatmul.mubr.msk.bf16.vlgmr.msra.gmra.mrb[52].mxu0 %vm862_vm3, %v2017_v20  ;;  %v8183_v15 = vpack.c.bf16 %v6950_v32, %v6948_v38  ;;  %v8187_v38 = vpack.c.bf16 %v6962_v33, %v6960_v59  ;;  %v8190_v32 = vld [vmem:[#allocation4_spill] sm:$0xff] }
 0x833   : > { %5746 = vmatpush3.bf16.msra.mxu0 %v2212_v19  ;;  %5747 = vmatprep.mubr.msk.bf16.mxu0 %vm6423_vm1, %v8181_v61 }
 0x834   : > { %5757 = vmatprep.subr.bf16.mxu0 %v8181_v61 }
 0x837   : > { %v7270_v30 = vpop.f32.mrb[76].mxu1 }
 0x838   : > { %v5767_v1 = vpop.f32.mrb[77].mxu1 }
 0x839   : > { %v7272_v28 = vpop.f32.mrb[78].mxu1 }
 0x83a   : > { %v5768_v10 = vpop.f32.mrb[79].mxu1  ;;  %5748 = vmatmul.mubr.msk.bf16.vlgmr.msra.gmra.mrb[56].mxu0 %vm862_vm3, %v2019_v62 }
 0x83b   : > { %5758 = vmatpush3.bf16.msra.mxu0 %v2306_v9  ;;  %5759 = vmatprep.mubr.msk.bf16.mxu0 %vm6423_vm1, %v8181_v61 }
 0x840   : > { %v7281_v12 = vpop.f32.mrb[80].mxu1 }
 0x841   : > { %v5809_v41 = vpop.f32.mrb[81].mxu1  ;;  %v3066_v55 = vsel %vm862_vm3, %v7281_v12, -inf }
 0x842   : > { %3067 = vmax.xlane.f32.xlu0 %v3066_v55  ;;  %v7285_v50 = vpop.f32.mrb[82].mxu1  ;;  %5760 = vmatmul.mubr.msk.bf16.vlgmr.msra.gmra.mrb[60].mxu0 %vm862_vm3, %v2021_v31 }
 0x843   : > { %v5810_v4 = vpop.f32.mrb[83].mxu1  ;;  %v3069_v0 = vsel %vm862_vm3, %v7285_v50, -inf }
 0x844   : > { %3070 = vmax.xlane.f32.xlu1 %v3069_v0 }
 0x848   : > { %v7290_v35 = vpop.f32.mrb[84].mxu1 }
 0x849   : > { %v5815_v18 = vpop.f32.mrb[85].mxu1  ;;  %v3072_v49 = vsel %vm862_vm3, %v7290_v35, -inf }
 0x84a   : > { %3073 = vmax.xlane.f32.xlu0 %v3072_v49  ;;  %v7294_v34 = vpop.f32.mrb[86].mxu1 }
 0x84b   : > { %v5816_v29 = vpop.f32.mrb[87].mxu1  ;;  %v3075_v24 = vsel %vm862_vm3, %v7294_v34, -inf }
 0x84e   : > { %3076 = vmax.xlane.f32.xlu0 %v3075_v24 }
 0x850   : > { %v7298_v6 = vpop.f32.mrb[88].mxu1 }
 0x851   : > { %v5821_v8 = vpop.f32.mrb[89].mxu1  ;;  %v3078_v20 = vsel %vm862_vm3, %v7298_v6, -inf }
 0x852   : > { %3079 = vmax.xlane.f32.xlu0 %v3078_v20  ;;  %v7302_v16 = vpop.f32.mrb[90].mxu1 }
 0x853   : > { %v5822_v19 = vpop.f32.mrb[91].mxu1  ;;  %v3081_v22 = vsel %vm862_vm3, %v7302_v16, -inf }
 0x854   : > { %3082 = vmax.xlane.f32.xlu1 %v3081_v22 }
 0x858   : > { %v7306_v27 = vpop.f32.mrb[92].mxu1 }
 0x859   : > { %v5827_v39 = vpop.f32.mrb[93].mxu1  ;;  %v3084_v17 = vsel %vm862_vm3, %v7306_v27, -inf }
 0x85a   : > { %3085 = vmax.xlane.f32.xlu0 %v3084_v17  ;;  %v7310_v44 = vpop.f32.mrb[94].mxu1 }
 0x85b   : > { %v5828_v1 = vpop.f32.mrb[95].mxu1  ;;  %v3087_v62 = vsel %vm862_vm3, %v7310_v44, -inf }
 0x85c   : > { %3088 = vmax.xlane.f32.xlu1 %v3087_v62 }
 0x860   : > { %v7314_v13 = vpop.f32.mrb[96].mxu1 }
 0x861   : > { %v5833_v9 = vpop.f32.mrb[97].mxu1  ;;  %v3090_v10 = vsel %vm862_vm3, %v7314_v13, -inf }
 0x862   : > { %3091 = vmax.xlane.f32.xlu0 %v3090_v10  ;;  %v7318_v42 = vpop.f32.mrb[98].mxu1  ;;  %v447_v10 = vld [vmem:[%s8167_s3] sm:$0xff] }
 0x863   : > { %v5834_v21 = vpop.f32.mrb[99].mxu1  ;;  %v3093_v31 = vsel %vm862_vm3, %v7318_v42, -inf }
 0x864   : > { %3094 = vmax.xlane.f32.xlu1 %v3093_v31  ;;  %v448_v21 = vld [vmem:[%s8167_s3 + $0x8] sm:$0xff] }
 0x865   : > { %v7350_v31 = vpack.c.bf16 %v448_v21, %v447_v10 }
 0x868   : > { %v7322_v41 = vpop.f32.mrb[100].mxu1 }
 0x869   : > { %v5839_v55 = vpop.f32.mrb[101].mxu1  ;;  %v3096_v4 = vsel %vm862_vm3, %v7322_v41, -inf }
 0x86a   : > { %3097 = vmax.xlane.f32.xlu0 %v3096_v4  ;;  %v7326_v0 = vpop.f32.mrb[102].mxu1  ;;  %v2408_v55 = vrot.slane %v7350_v31, 4 }
 0x86b   : > { %v5840_v18 = vpop.f32.mrb[103].mxu1  ;;  %v3099_v49 = vsel %vm862_vm3, %v7326_v0, -inf }
 0x86c   : > { %3100 = vmax.xlane.f32.xlu1 %v3099_v49  ;;  %6085 = vmatprep.subr.msk.bf16.mxu0 %vm2433_vm4, %v2408_v55  ;;  %v2435_v4 = vsel %vm2433_vm4, %v2408_v55, 0 }
 0x86d   : > { %5770 = vmatpush3.bf16.msra.mxu0 %v2435_v4 }
 0x86e   : > { %6086 = vmatprep.subr.msk.bf16.mxu0 %vm2433_vm4, %v7350_v31 }
 0x870   : > { %v7330_v29 = vpop.f32.mrb[104].mxu1 }
 0x871   : > { %v5845_v24 = vpop.f32.mrb[105].mxu1  ;;  %v3102_v8 = vsel %vm862_vm3, %v7330_v29, -inf }
 0x872   : > { %3103 = vmax.xlane.f32.xlu0 %v3102_v8  ;;  %v7334_v20 = vpop.f32.mrb[106].mxu1 }
 0x873   : > { %v5846_v19 = vpop.f32.mrb[107].mxu1  ;;  %v3105_v22 = vsel %vm862_vm3, %v7334_v20, -inf }
 0x874   : > { %3106 = vmax.xlane.f32.xlu1 %v3105_v22 }
 0x878   : > { %v7338_v39 = vpop.f32.mrb[108].mxu1 }
 0x879   : > { %v5851_v17 = vpop.f32.mrb[109].mxu1  ;;  %v3108_v1 = vsel %vm862_vm3, %v7338_v39, -inf }
 0x87a   : > { %3109 = vmax.xlane.f32.xlu0 %v3108_v1  ;;  %v7342_v62 = vpop.f32.mrb[110].mxu1 }
 0x87b   : > { %v5852_v9 = vpop.f32.mrb[111].mxu1  ;;  %v3111_v18 = vsel %vm862_vm3, %v7342_v62, -inf }
 0x885   : > { %3297 = vrot.lane.b32.xlu1 %v6538_v43, %s6431_s30 }
 0x889   : > { %3344 = vrot.lane.b32.xlu1 %v6552_v2, %s6431_s30 }
 0x88d   : > { %3391 = vrot.lane.b32.xlu1 %v6550_v63, %s6431_s30 }
 0x890   : > { %3250 = vrot.lane.b32.xlu0 %v6540_v46, %s6431_s30 }
 0x894   : > { %3438 = vrot.lane.b32.xlu0 %v6546_v54, %s6431_s30 }
 0x8b1   : > { %3112 = vmax.xlane.f32.xlu1 %v3111_v18 }
 0x8c2   : > { %3485 = vrot.lane.b32.xlu1 %v6544_v51, %s6431_s30 }
 0x8cf   : > { %v3068_v49 = vpop.xlane.xlu0 %3067 }
 0x8d0   : > { %v3114_v24 = vsub.f32 %v7281_v12, %v3068_v49 }
 0x8d1   : > { %v3071_v8 = vpop.xlane.xlu1 %3070 }
 0x8d2   : > { %v3130_v19 = vmul.f32 1.442695, %v3114_v24  ;;  %v3115_v22 = vsub.f32 %v7285_v50, %v3071_v8 }
 0x8d4   : > { %6238 = vpow2.f32 %v3130_v19  ;;  %v3132_v17 = vmul.f32 1.442695, %v3115_v22 }
 0x8d6   : > { %6240 = vpow2.f32 %v3132_v17 }
 0x8d7   : > { %v3074_v1 = vpop.xlane.xlu0 %3073 }
 0x8d8   : > { %v3116_v9 = vsub.f32 %v7290_v35, %v3074_v1 }
 0x8da   : > { %v3134_v10 = vmul.f32 1.442695, %v3116_v9 }
 0x8db   : > { %v3077_v21 = vpop.xlane.xlu0 %3076 }
 0x8dc   : > { %6242 = vpow2.f32 %v3134_v10  ;;  %v3117_v55 = vsub.f32 %v7294_v34, %v3077_v21 }
 0x8de   : > { %v7375_v4 = vpop.eup %6238  ;;  %v3136_v18 = vmul.f32 1.442695, %v3117_v55 }
 0x8df   : > { %v3080_v11 = vpop.xlane.xlu0 %3079  ;;  %v3162_v12 = vsel %vm862_vm3, %v7375_v4, 0.0 }
 0x8e0   : > { %6244 = vpow2.f32 %v3136_v18  ;;  %v3118_v50 = vsub.f32 %v7298_v6, %v3080_v11  ;;  %3163 = vadd.xlane.f32.xlu0 %v3162_v12  ;;  %v7380_v24 = vpop.eup %6240 }
 0x8e1   : > { %v3083_v49 = vpop.xlane.xlu1 %3082  ;;  %v3165_v34 = vsel %vm862_vm3, %v7380_v24, 0.0 }
 0x8e2   : > { %v3138_v35 = vmul.f32 1.442695, %v3118_v50  ;;  %v3119_v8 = vsub.f32 %v7302_v16, %v3083_v49 }
 0x8e4   : > { %6246 = vpow2.f32 %v3138_v35  ;;  %v3140_v19 = vmul.f32 1.442695, %v3119_v8 }
 0x8e6   : > { %v7385_v22 = vpop.eup %6242  ;;  %6248 = vpow2.f32 %v3140_v19  ;;  %3166 = vadd.xlane.f32.xlu1 %v3165_v34 }
 0x8e7   : > { %v3086_v17 = vpop.xlane.xlu0 %3085  ;;  %v3168_v11 = vsel %vm862_vm3, %v7385_v22, 0.0 }
 0x8e8   : > { %v3120_v6 = vsub.f32 %v7306_v27, %v3086_v17  ;;  %3169 = vadd.xlane.f32.xlu0 %v3168_v11 }
 0x8e9   : > { %v3089_v1 = vpop.xlane.xlu1 %3088 }
 0x8ea   : > { %v7390_v9 = vpop.eup %6244  ;;  %v3142_v16 = vmul.f32 1.442695, %v3120_v6  ;;  %v3121_v10 = vsub.f32 %v7310_v44, %v3089_v1 }
 0x8eb   : > { %v3171_v21 = vsel %vm862_vm3, %v7390_v9, 0.0 }
 0x8ec   : > { %6250 = vpow2.f32 %v3142_v16  ;;  %v3144_v55 = vmul.f32 1.442695, %v3121_v10  ;;  %3172 = vadd.xlane.f32.xlu1 %v3171_v21 }
 0x8ee   : > { %v7395_v18 = vpop.eup %6246  ;;  %6252 = vpow2.f32 %v3144_v55 }
 0x8ef   : > { %v3092_v12 = vpop.xlane.xlu0 %3091  ;;  %v3174_v27 = vsel %vm862_vm3, %v7395_v18, 0.0 }
 0x8f0   : > { %v7399_v50 = vpop.eup %6248  ;;  %v3122_v49 = vsub.f32 %v7314_v13, %v3092_v12  ;;  %3175 = vadd.xlane.f32.xlu0 %v3174_v27 }
 0x8f1   : > { %v3095_v35 = vpop.xlane.xlu1 %3094  ;;  %v3177_v44 = vsel %vm862_vm3, %v7399_v50, 0.0 }
 0x8f2   : > { %v3146_v8 = vmul.f32 1.442695, %v3122_v49  ;;  %v3123_v19 = vsub.f32 %v7318_v42, %v3095_v35  ;;  %3178 = vadd.xlane.f32.xlu1 %v3177_v44 }
 0x8f4   : > { %6254 = vpow2.f32 %v3146_v8  ;;  %v3148_v34 = vmul.f32 1.442695, %v3123_v19 }
 0x8f6   : > { %v7405_v17 = vpop.eup %6250  ;;  %6256 = vpow2.f32 %v3148_v34 }
 0x8f7   : > { %v3098_v11 = vpop.xlane.xlu0 %3097  ;;  %v3180_v6 = vsel %vm862_vm3, %v7405_v17, 0.0 }
 0x8f8   : > { %v7409_v1 = vpop.eup %6252  ;;  %v3124_v13 = vsub.f32 %v7322_v41, %v3098_v11  ;;  %3181 = vadd.xlane.f32.xlu0 %v3180_v6 }
 0x8f9   : > { %v3101_v16 = vpop.xlane.xlu1 %3100  ;;  %v3183_v10 = vsel %vm862_vm3, %v7409_v1, 0.0 }
 0x8fa   : > { %v3150_v42 = vmul.f32 1.442695, %v3124_v13  ;;  %v3125_v21 = vsub.f32 %v7326_v0, %v3101_v16  ;;  %3184 = vadd.xlane.f32.xlu1 %v3183_v10  ;;  %v2559_v13 = vsel %vm2433_vm4, %v7350_v31, 0 }
 0x8fc   : > { %6258 = vpow2.f32 %v3150_v42  ;;  %v3152_v55 = vmul.f32 1.442695, %v3125_v21 }
 0x8fd   : > { %v2063_v12 = vpop.f32.mrb[48].mxu0 }
 0x8fe   : > { %v7415_v27 = vpop.eup %6254  ;;  %6260 = vpow2.f32 %v3152_v55  ;;  %v5725_v49 = vpop.f32.mrb[49].mxu0 }
 0x8ff   : > { %v3104_v35 = vpop.xlane.xlu0 %3103  ;;  %v3186_v41 = vsel %vm862_vm3, %v7415_v27, 0.0  ;;  %v2066_v44 = vpop.f32.mrb[50].mxu0 }
 0x900   : > { %v7419_v8 = vpop.eup %6256  ;;  %v3126_v19 = vsub.f32 %v7330_v29, %v3104_v35  ;;  %3187 = vadd.xlane.f32.xlu0 %v3186_v41  ;;  %v2399_v34 = vpack.c.bf16 %v2066_v44, %v2063_v12  ;;  %v5726_v0 = vpop.f32.mrb[51].mxu0 }
 0x901   : > { %v3107_v11 = vpop.xlane.xlu1 %3106  ;;  %v3189_v6 = vsel %vm862_vm3, %v7419_v8, 0.0 }
 0x902   : > { %v3154_v16 = vmul.f32 1.442695, %v3126_v19  ;;  %v3127_v10 = vsub.f32 %v7334_v20, %v3107_v11  ;;  %3190 = vadd.xlane.f32.xlu1 %v3189_v6  ;;  %5771 = vmatprep.mubr.msk.bf16.mxu0 %vm464_vm2, %v2399_v34 }
 0x903   : > { %5772 = vmatmul.mubr.msk.bf16.vlgmr.msra.gmra.mrb[64].mxu0 %vm464_vm2, %v2400_v45 }
 0x904   : > { %6262 = vpow2.f32 %v3154_v16  ;;  %v3156_v29 = vmul.f32 1.442695, %v3127_v10  ;;  %5788 = vmatpush3.bf16.msra.mxu0 %v2559_v13 }
 0x905   : > { %v3298_v42 = vpop.permute.xlu1 %3297  ;;  %v2157_v21 = vpop.f32.mrb[52].mxu0  ;;  %5853 = vmatprep.subr.bf16.mxu0 %v8181_v61 }
 0x906   : > { %v7433_v55 = vpop.eup %6258  ;;  %6264 = vpow2.f32 %v3156_v29  ;;  %5860 = vmatpush3.bf16.msra.mxu1 %v3298_v42  ;;  %v5737_v20 = vpop.f32.mrb[53].mxu0 }
 0x907   : > { %v3110_v31 = vpop.xlane.xlu0 %3109  ;;  %v3192_v12 = vsel %vm862_vm3, %v7433_v55, 0.0  ;;  %v2160_v49 = vpop.f32.mrb[54].mxu0  ;;  %5871 = vmatprep.subr.bf16.mxu1 %v8181_v61 }
 0x908   : > { %v7438_v36 = vpop.eup %6260  ;;  %v3128_v37 = vsub.f32 %v7338_v39, %v3110_v31  ;;  %3193 = vadd.xlane.f32.xlu0 %v3192_v12  ;;  %v2401_v45 = vpack.c.bf16 %v2160_v49, %v2157_v21  ;;  %v5738_v35 = vpop.f32.mrb[55].mxu0  ;;  %v8182_v31 = vpack.c.bf16 %v7272_v28, %v7270_v30  ;;  %v8185_v12 = vpack.c.bf16 %v6956_v47, %v6954_v48  ;;  %v8191_v48 = vld [vmem:[#allocation3_spill] sm:$0xff] }
 0x909   : > { %v3195_v41 = vsel %vm862_vm3, %v7438_v36, 0.0  ;;  %v8186_v30 = vpack.c.bf16 %v6837_v60, %v6835_v58  ;;  %v8189_v58 = vpack.c.bf16 %v6968_v14, %v6966_v25  ;;  %v8192_v47 = vpack.c.bf16 %v8190_v32, %v8191_v48  ;;  %v8193_v14 = vld [vmem:[#allocation2_spill] sm:$0xff] }
 0x90a   : > { %v3158_v44 = vmul.f32 1.442695, %v3128_v37  ;;  %3196 = vadd.xlane.f32.xlu1 %v3195_v41  ;;  %5775 = vmatprep.mubr.msk.bf16.mxu0 %vm464_vm2, %v2401_v45 }
 0x90b   : > { %5776 = vmatmul.mubr.msk.bf16.gmra.mrb[68].mxu0 %vm464_vm2, %v2402_v53  ;;  %v3251_v26 = vpop.permute.xlu0 %3250 }
 0x90c   : > { %6266 = vpow2.f32 %v3158_v44 }
 0x90d   : > { %v2251_v19 = vpop.f32.mrb[56].mxu0 }
 0x90e   : > { %v7448_v34 = vpop.eup %6262  ;;  %v5749_v39 = vpop.f32.mrb[57].mxu0 }
 0x90f   : > { %v3198_v0 = vsel %vm862_vm3, %v7448_v34, 0.0  ;;  %v2254_v11 = vpop.f32.mrb[58].mxu0  ;;  %v3439_v28 = vpop.permute.xlu0 %3438 }
 0x910   : > { %v7452_v6 = vpop.eup %6264  ;;  %3199 = vadd.xlane.f32.xlu0 %v3198_v0  ;;  %v2403_v13 = vpack.c.bf16 %v2254_v11, %v2251_v19  ;;  %v5750_v16 = vpop.f32.mrb[59].mxu0 }
 0x911   : > { %v3201_v10 = vsel %vm862_vm3, %v7452_v6, 0.0 }
 0x912   : > { %3202 = vadd.xlane.f32.xlu1 %v3201_v10  ;;  %5779 = vmatprep.mubr.msk.bf16.mxu0 %vm464_vm2, %v2403_v13 }
 0x913   : > { %5780 = vmatmul.mubr.msk.bf16.gmra.mrb[72].mxu0 %vm464_vm2, %v2404_v5  ;;  %v8184_v5 = vpack.c.bf16 %v6827_v56, %v6825_v52  ;;  %v8188_v52 = vpack.c.bf16 %v6865_v57, %v6863_v3  ;;  %v3345_v56 = vpop.permute.xlu1 %3344 }
 0x915   : > { %v2345_v40 = vpop.f32.mrb[60].mxu0 }
 0x916   : > { %v7461_v23 = vpop.eup %6266  ;;  %v5761_v53 = vpop.f32.mrb[61].mxu0 }
 0x917   : > { %v3204_v29 = vsel %vm862_vm3, %v7461_v23, 0.0  ;;  %v2348_v42 = vpop.f32.mrb[62].mxu0  ;;  %v3392_v60 = vpop.permute.xlu1 %3391 }
 0x918   : > { %3205 = vadd.xlane.f32.xlu0 %v3204_v29  ;;  %v2405_v21 = vpack.c.bf16 %v2348_v42, %v2345_v40  ;;  %v5762_v20 = vpop.f32.mrb[63].mxu0 }
 0x91a   : > { %5783 = vmatprep.mubr.msk.bf16.mxu0 %vm464_vm2, %v2405_v21 }
 0x91b   : > { %5784 = vmatmul.mubr.msk.bf16.gmra.mrb[76].mxu0 %vm464_vm2, %v8182_v31 }
 0x91c   : > { %5789 = vmatprep.mubr.msk.bf16.mxu0 %vm464_vm2, %v8183_v15 }
 0x923   : > { %5790 = vmatmul.mubr.msk.bf16.vlgmr.msra.gmra.mrb[64].mxu0 %vm464_vm2, %v8184_v5 }
 0x924   : > { %5854 = vmatpush3.bf16.msra.mxu0 %v3251_v26  ;;  %5793 = vmatprep.mubr.msk.bf16.mxu0 %vm464_vm2, %v8185_v12 }
 0x925   : > { %5865 = vmatprep.subr.bf16.mxu0 %v8181_v61 }
 0x92b   : > { %5794 = vmatmul.mubr.msk.bf16.gmra.mrb[68].mxu0 %vm464_vm2, %v8186_v30 }
 0x92c   : > { %5797 = vmatprep.mubr.msk.bf16.mxu0 %vm464_vm2, %v8187_v38 }
 0x92e   : > { %3532 = vrot.lane.b32.xlu0 %v6560_v7, %s6431_s30 }
 0x932   : > { %3776 = vrot.lane.b32.xlu0 %v6540_v46, %s6432_s8 }
 0x933   : > { %5798 = vmatmul.mubr.msk.bf16.gmra.mrb[72].mxu0 %vm464_vm2, %v8188_v52 }
 0x934   : > { %5801 = vmatprep.mubr.msk.bf16.mxu0 %vm464_vm2, %v8189_v58 }
 0x936   : > { %3827 = vrot.lane.b32.xlu0 %v6538_v43, %s6432_s8 }
 0x93a   : > { %3878 = vrot.lane.b32.xlu0 %v6552_v2, %s6432_s8 }
 0x93b   : > { %5802 = vmatmul.mubr.msk.bf16.gmra.mrb[76].mxu0 %vm464_vm2, %v8192_v47 }
 0x93c   : > { %5855 = vmatprep.mubr.msk.bf16.mxu0 %vm6423_vm1, %v8181_v61 }
 0x93e   : > { %v3113_v3 = vpop.xlane.xlu1 %3112  ;;  %3929 = vrot.lane.b32.xlu0 %v6550_v63, %s6432_s8 }
 0x93f   : > { %v3129_v57 = vsub.f32 %v7342_v62, %v3113_v3 }
 0x941   : > { %v3160_v59 = vmul.f32 1.442695, %v3129_v57 }
 0x942   : > { %3927 = vrot.lane.b32.xlu0 %v6550_v63, %s6433_s10  ;;  %v7536_v62 = vpop.permute.xlu1 %3485 }
 0x943   : > { %6268 = vpow2.f32 %v3160_v59 }
 0x946   : > { %3978 = vrot.lane.b32.xlu0 %v6546_v54, %s6433_s10 }
 0x94a   : > { %4029 = vrot.lane.b32.xlu0 %v6544_v51, %s6433_s10 }
 0x94d   : > { %v7522_v33 = vpop.eup %6268 }
 0x94e   : > { %4080 = vrot.lane.b32.xlu0 %v6560_v7, %s6433_s10  ;;  %v3207_v25 = vsel %vm862_vm3, %v7522_v33, 0.0 }
 0x94f   : > { %3208 = vadd.xlane.f32.xlu1 %v3207_v25 }
 0x960   : > { %3579 = vrot.lane.b32.xlu1 %v8193_v14, %s6431_s30 }
 0x964   : > { %3774 = vrot.lane.b32.xlu1 %v6540_v46, %s6433_s10 }
 0x968   : > { %3825 = vrot.lane.b32.xlu1 %v6538_v43, %s6433_s10 }
 0x96c   : > { %3876 = vrot.lane.b32.xlu1 %v6552_v2, %s6433_s10 }
 0x96d   : > { %v3164_v49 = vpop.xlane.xlu0 %3163 }
 0x96e   : > { %6270 = vrcp.f32 %v3164_v49 }
 0x970   : > { %3980 = vrot.lane.b32.xlu1 %v6546_v54, %s6432_s8 }
 0x973   : > { %v3167_v37 = vpop.xlane.xlu1 %3166 }
 0x974   : > { %6272 = vrcp.f32 %v3167_v37  ;;  %4031 = vrot.lane.b32.xlu1 %v6544_v51, %s6432_s8 }
 0x975   : > { %v3170_v45 = vpop.xlane.xlu0 %3169 }
 0x976   : > { %6274 = vrcp.f32 %v3170_v45 }
 0x978   : > { %4082 = vrot.lane.b32.xlu1 %v6560_v7, %s6432_s8  ;;  %v6271_v41 = vpop.eup %6270 }
 0x979   : > { %v3173_v35 = vpop.xlane.xlu1 %3172  ;;  %v3226_v39 = vmul.f32 %v6271_v41, %v7375_v4 }
 0x97a   : > { %6276 = vrcp.f32 %v3173_v35 }
 0x97c   : > { %4133 = vrot.lane.b32.xlu1 %v8193_v14, %s6432_s8 }
 0x97d   : > { %v3176_v44 = vpop.xlane.xlu0 %3175 }
 0x97e   : > { %v6273_v19 = vpop.eup %6272  ;;  %6278 = vrcp.f32 %v3176_v44 }
 0x97f   : > { %v3227_v0 = vmul.f32 %v6273_v19, %v7380_v24  ;;  %v3179_v11 = vpop.xlane.xlu1 %3178 }
 0x980   : > { %6280 = vrcp.f32 %v3179_v11  ;;  %4131 = vrot.lane.b32.xlu1 %v8193_v14, %s6433_s10  ;;  %v6275_v16 = vpop.eup %6274 }
 0x981   : > { %v3242_v13 = vpack.c.bf16 %v3227_v0, %v3226_v39  ;;  %v3228_v40 = vmul.f32 %v6275_v16, %v7385_v22 }
 0x983   : > { %5856 = vmatmul.mubr.msk.bf16.vlgmr.msra.gmra.mrb[80].mxu0 %vm862_vm3, %v3242_v13 }
 0x984   : > { %v6277_v10 = vpop.eup %6276  ;;  %5866 = vmatpush3.bf16.msra.mxu0 %v3345_v56  ;;  %5867 = vmatprep.mubr.msk.bf16.mxu0 %vm6423_vm1, %v8181_v61 }
 0x985   : > { %v3229_v4 = vmul.f32 %v6277_v10, %v7390_v9  ;;  %v3182_v53 = vpop.xlane.xlu0 %3181  ;;  %5877 = vmatprep.subr.bf16.mxu0 %v8181_v61 }
 0x986   : > { %6282 = vrcp.f32 %v3182_v53 }
 0x987   : > { %v3185_v24 = vpop.xlane.xlu1 %3184  ;;  %v3243_v29 = vpack.c.bf16 %v3229_v4, %v3228_v40 }
 0x988   : > { %v6279_v42 = vpop.eup %6278  ;;  %6284 = vrcp.f32 %v3185_v24 }
 0x989   : > { %5862 = vmatmul.mubr.msk.bf16.vlgmr.msra.gmra.mrb[112].mxu1 %vm862_vm3, %v3243_v29  ;;  %v3230_v20 = vmul.f32 %v6279_v42, %v7395_v18 }
 0x98a   : > { %v6281_v21 = vpop.eup %6280  ;;  %5872 = vmatpush3.bf16.msra.mxu1 %v3392_v60  ;;  %5873 = vmatprep.mubr.msk.bf16.mxu1 %vm6423_vm1, %v8181_v61 }
 0x98b   : > { %v3231_v22 = vmul.f32 %v6281_v21, %v7399_v50  ;;  %5883 = vmatprep.subr.bf16.mxu1 %v8181_v61 }
 0x98d   : > { %v3188_v9 = vpop.xlane.xlu0 %3187  ;;  %v3244_v31 = vpack.c.bf16 %v3231_v22, %v3230_v20 }
 0x98e   : > { %6286 = vrcp.f32 %v3188_v9 }
 0x98f   : > { %v3191_v15 = vpop.xlane.xlu1 %3190  ;;  %5868 = vmatmul.mubr.msk.bf16.vlgmr.msra.gmra.mrb[84].mxu0 %vm862_vm3, %v3244_v31 }
 0x990   : > { %v6283_v26 = vpop.eup %6282  ;;  %6288 = vrcp.f32 %v3191_v15  ;;  %5878 = vmatpush3.bf16.msra.mxu0 %v3439_v28  ;;  %5879 = vmatprep.mubr.msk.bf16.mxu0 %vm6423_vm1, %v8181_v61 }
 0x991   : > { %5889 = vmatprep.subr.bf16.mxu0 %v8181_v61  ;;  %v3232_v18 = vmul.f32 %v6283_v26, %v7405_v17 }
 0x992   : > { %v6285_v5 = vpop.eup %6284 }
 0x993   : > { %v3233_v50 = vmul.f32 %v6285_v5, %v7409_v1 }
 0x995   : > { %v3194_v12 = vpop.xlane.xlu0 %3193  ;;  %v3245_v30 = vpack.c.bf16 %v3233_v50, %v3232_v18 }
 0x996   : > { %6290 = vrcp.f32 %v3194_v12 }
 0x997   : > { %v3197_v38 = vpop.xlane.xlu1 %3196  ;;  %5874 = vmatmul.mubr.msk.bf16.vlgmr.msra.gmra.mrb[116].mxu1 %vm862_vm3, %v3245_v30 }
 0x998   : > { %v6287_v52 = vpop.eup %6286  ;;  %6292 = vrcp.f32 %v3197_v38  ;;  %5884 = vmatpush3.bf16.msra.mxu1 %v7536_v62  ;;  %5885 = vmatprep.mubr.msk.bf16.mxu1 %vm6423_vm1, %v8181_v61 }
 0x999   : > { %5895 = vmatprep.subr.bf16.mxu1 %v8181_v61  ;;  %v3234_v17 = vmul.f32 %v6287_v52, %v7415_v27 }
 0x99a   : > { %v6289_v56 = vpop.eup %6288 }
 0x99b   : > { %v3235_v1 = vmul.f32 %v6289_v56, %v7419_v8 }
 0x99d   : > { %v3200_v58 = vpop.xlane.xlu0 %3199  ;;  %v3246_v60 = vpack.c.bf16 %v3235_v1, %v3234_v17 }
 0x99e   : > { %6294 = vrcp.f32 %v3200_v58 }
 0x99f   : > { %v3203_v32 = vpop.xlane.xlu1 %3202  ;;  %5880 = vmatmul.mubr.msk.bf16.vlgmr.msra.gmra.mrb[88].mxu0 %vm862_vm3, %v3246_v60 }
 0x9a0   : > { %v6291_v48 = vpop.eup %6290  ;;  %6296 = vrcp.f32 %v3203_v32  ;;  %5891 = vmatprep.mubr.msk.bf16.mxu0 %vm6423_vm1, %v8181_v61 }
 0x9a1   : > { %v3236_v3 = vmul.f32 %v6291_v48, %v7433_v55  ;;  %v449_v55 = vld [vmem:[%s8167_s3 + $0x10] sm:$0xff] }
 0x9a2   : > { %v6293_v47 = vpop.eup %6292 }
 0x9a3   : > { %v3237_v57 = vmul.f32 %v6293_v47, %v7438_v36  ;;  %v450_v36 = vld [vmem:[%s8167_s3 + $0x18] sm:$0xff] }
 0x9a4   : > { %v7592_v45 = vpack.c.bf16 %v450_v36, %v449_v55 }
 0x9a5   : > { %v3206_v59 = vpop.xlane.xlu0 %3205  ;;  %v3247_v27 = vpack.c.bf16 %v3237_v57, %v3236_v3 }
 0x9a6   : > { %6298 = vrcp.f32 %v3206_v59 }
 0x9a7   : > { %5886 = vmatmul.mubr.msk.bf16.vlgmr.msra.gmra.mrb[120].mxu1 %vm862_vm3, %v3247_v27 }
 0x9a8   : > { %v6295_v8 = vpop.eup %6294  ;;  %5897 = vmatprep.mubr.msk.bf16.mxu1 %vm6423_vm1, %v8181_v61 }
 0x9a9   : > { %v3533_v25 = vpop.permute.xlu0 %3532  ;;  %v3238_v62 = vmul.f32 %v6295_v8, %v7448_v34  ;;  %v3659_v34 = vsel %vm2433_vm4, %v7592_v45, 0 }
 0x9aa   : > { %v6297_v28 = vpop.eup %6296  ;;  %5890 = vmatpush3.bf16.msra.mxu0 %v3533_v25 }
 0x9ab   : > { %v3239_v49 = vmul.f32 %v6297_v28, %v7452_v6  ;;  %6087 = vmatprep.subr.msk.bf16.mxu0 %vm2433_vm4, %v7592_v45 }
 0x9ad   : > { %v3248_v37 = vpack.c.bf16 %v3239_v49, %v3238_v62  ;;  %v3777_v0 = vpop.permute.xlu0 %3776 }
 0x9ae   : > { %v3782_v13 = vsel %vm464_vm2, %v3777_v0, 0 }
 0x9af   : > { %5892 = vmatmul.mubr.msk.bf16.vlgmr.msra.gmra.mrb[92].mxu0 %vm862_vm3, %v3248_v37 }
 0x9b0   : > { %5902 = vmatpush3.bf16.msra.mxu0 %v3659_v34  ;;  %v6299_v41 = vpop.eup %6298 }
 0x9b1   : > { %5943 = vmatprep.subr.bf16.mxu0 %v8181_v61  ;;  %v3240_v19 = vmul.f32 %v6299_v41, %v7461_v23  ;;  %v3828_v10 = vpop.permute.xlu0 %3827 }
 0x9b2   : > { %v3833_v4 = vsel %vm464_vm2, %v3828_v10, 0 }
 0x9b5   : > { %v3879_v23 = vpop.permute.xlu0 %3878 }
 0x9b6   : > { %v3884_v53 = vsel %vm464_vm2, %v3879_v23, 0 }
 0x9b9   : > { %v3930_v29 = vpop.permute.xlu0 %3929 }
 0x9ba   : > { %v3935_v42 = vsel %vm464_vm2, %v3930_v29, 0 }
 0x9bd   : > { %v3928_v20 = vpop.permute.xlu0 %3927 }
 0x9c1   : > { %v7626_v31 = vpop.permute.xlu0 %3978 }
 0x9c5   : > { %v4030_v26 = vpop.permute.xlu0 %4029 }
 0x9dc   : > { %v3209_v6 = vpop.xlane.xlu1 %3208 }
 0x9dd   : > { %6300 = vrcp.f32 %v3209_v6 }
 0x9e0   : > { %v3580_v35 = vpop.permute.xlu1 %3579 }
 0x9e1   : > { %5896 = vmatpush3.bf16.msra.mxu1 %v3580_v35 }
 0x9e2   : > { %5919 = vmatprep.subr.bf16.mxu1 %v8181_v61 }
 0x9e4   : > { %v3775_v16 = vpop.permute.xlu1 %3774 }
 0x9e7   : > { %v6301_v44 = vpop.eup %6300 }
 0x9e8   : > { %v3241_v39 = vmul.f32 %v6301_v44, %v7522_v33  ;;  %v3826_v40 = vpop.permute.xlu1 %3825 }
 0x9ea   : > { %v3249_v11 = vpack.c.bf16 %v3241_v39, %v3240_v19 }
 0x9ec   : > { %5898 = vmatmul.mubr.msk.bf16.vlgmr.msra.gmra.mrb[124].mxu1 %vm862_vm3, %v3249_v11  ;;  %v3877_v33 = vpop.permute.xlu1 %3876 }
 0x9ed   : > { %5920 = vmatpush3.bf16.xpose.msra.mxu1 %v3782_v13  ;;  %5921 = vmatprep.mubr.msk.bf16.mxu1 %vm6423_vm1, %v8181_v61 }
 0x9ee   : > { %5925 = vmatprep.subr.bf16.mxu1 %v8181_v61 }
 0x9f0   : > { %v3981_v24 = vpop.permute.xlu1 %3980 }
 0x9f1   : > { %v3986_v32 = vsel %vm464_vm2, %v3981_v24, 0 }
 0x9f4   : > { %5922 = vmatmul.mubr.msk.bf16.vlgmr.msra.gmra.mrb[128].mxu1 %vm464_vm2, %v3775_v16  ;;  %v4032_v21 = vpop.permute.xlu1 %4031 }
 0x9f5   : > { %5926 = vmatpush3.bf16.xpose.msra.mxu1 %v3833_v4  ;;  %5927 = vmatprep.mubr.msk.bf16.mxu1 %vm6423_vm1, %v8181_v61  ;;  %v4037_v9 = vsel %vm464_vm2, %v4032_v21, 0 }
 0x9f6   : > { %5931 = vmatprep.subr.bf16.mxu1 %v8181_v61 }
 0x9f8   : > { %v7622_v22 = vpop.permute.xlu1 %4082 }
 0x9fc   : > { %5928 = vmatmul.mubr.msk.bf16.vlgmr.msra.gmra.mrb[132].mxu1 %vm464_vm2, %v3826_v40  ;;  %v4134_v15 = vpop.permute.xlu1 %4133 }
 0x9fd   : > { %5932 = vmatpush3.bf16.xpose.msra.mxu1 %v3884_v53  ;;  %5933 = vmatprep.mubr.msk.bf16.mxu1 %vm6423_vm1, %v8181_v61  ;;  %v4139_v5 = vsel %vm464_vm2, %v4134_v15, 0 }
 0x9fe   : > { %5937 = vmatprep.subr.bf16.mxu1 %v8181_v61 }
 0xa00   : > { %v4132_v18 = vpop.permute.xlu1 %4131 }
 0xa04   : > { %5934 = vmatmul.mubr.msk.bf16.vlgmr.msra.gmra.mrb[136].mxu1 %vm464_vm2, %v3877_v33 }
 0xa05   : > { %5938 = vmatpush3.bf16.xpose.msra.mxu1 %v3935_v42  ;;  %5939 = vmatprep.mubr.msk.bf16.mxu1 %vm6423_vm1, %v8181_v61 }
 0xa06   : > { %5949 = vmatprep.subr.bf16.mxu1 %v8181_v61 }
 0xa0c   : > { %5940 = vmatmul.mubr.msk.bf16.vlgmr.msra.gmra.mrb[140].mxu1 %vm464_vm2, %v3928_v20 }
 0xa0d   : > { %5950 = vmatpush3.bf16.xpose.msra.mxu1 %v4037_v9  ;;  %5951 = vmatprep.mubr.msk.bf16.mxu1 %vm6423_vm1, %v8181_v61  ;;  %v4088_v9 = vsel %vm464_vm2, %v7622_v22, 0 }
 0xa0e   : > { %5961 = vmatprep.subr.bf16.mxu1 %v8181_v61 }
 0xa14   : > { %5952 = vmatmul.mubr.msk.bf16.vlgmr.msra.gmra.mrb[144].mxu1 %vm464_vm2, %v4030_v26 }
 0xa15   : > { %5962 = vmatpush3.bf16.xpose.msra.mxu1 %v4139_v5  ;;  %5963 = vmatprep.mubr.msk.bf16.mxu1 %vm6423_vm1, %v8181_v61 }
 0xa16   : > { %5973 = vmatprep.subr.bf16.mxu1 %v8181_v61 }
 0xa1c   : > { %5964 = vmatmul.mubr.msk.bf16.vlgmr.msra.gmra.mrb[148].mxu1 %vm464_vm2, %v4132_v18 }
 0xa1d   : > { %5975 = vmatprep.mubr.msk.bf16.mxu1 %vm6423_vm1, %v8181_v61 }
 0xa56   : > { %v3290_v50 = vpop.f32.mrb[80].mxu0 }
 0xa57   : > { %v5857_v12 = vpop.f32.mrb[81].mxu0 }
 0xa58   : > { %v3293_v30 = vpop.f32.mrb[82].mxu0  ;;  %v4081_v12 = vpop.permute.xlu0 %4080 }
 0xa59   : > { %v3626_v38 = vpack.c.bf16 %v3293_v30, %v3290_v50  ;;  %v5858_v52 = vpop.f32.mrb[83].mxu0 }
 0xa5b   : > { %5903 = vmatprep.mubr.msk.bf16.mxu0 %vm464_vm2, %v3626_v38 }
 0xa5c   : > { %v3337_v56 = vpop.f32.mrb[112].mxu1 }
 0xa5d   : > { %v5863_v17 = vpop.f32.mrb[113].mxu1 }
 0xa5e   : > { %v3340_v1 = vpop.f32.mrb[114].mxu1 }
 0xa5f   : > { %v3627_v58 = vpack.c.bf16 %v3340_v1, %v3337_v56  ;;  %v5864_v60 = vpop.f32.mrb[115].mxu1 }
 0xa61   : > { %5904 = vmatmul.mubr.msk.bf16.vlgmr.msra.gmra.mrb[64].mxu0 %vm464_vm2, %v3627_v58 }
 0xa62   : > { %5944 = vmatpush3.bf16.xpose.msra.mxu0 %v3986_v32  ;;  %v3384_v48 = vpop.f32.mrb[84].mxu0 }
 0xa63   : > { %v5869_v47 = vpop.f32.mrb[85].mxu0  ;;  %5955 = vmatprep.subr.bf16.mxu0 %v8181_v61 }
 0xa64   : > { %v3387_v3 = vpop.f32.mrb[86].mxu0 }
 0xa65   : > { %v3628_v57 = vpack.c.bf16 %v3387_v3, %v3384_v48  ;;  %v5870_v59 = vpop.f32.mrb[87].mxu0 }
 0xa67   : > { %5907 = vmatprep.mubr.msk.bf16.mxu0 %vm464_vm2, %v3628_v57 }
 0xa6a   : > { %v3431_v27 = vpop.f32.mrb[116].mxu1 }
 0xa6b   : > { %v5875_v8 = vpop.f32.mrb[117].mxu1 }
 0xa6c   : > { %v3434_v25 = vpop.f32.mrb[118].mxu1 }
 0xa6d   : > { %v3629_v28 = vpack.c.bf16 %v3434_v25, %v3431_v27  ;;  %v5876_v62 = vpop.f32.mrb[119].mxu1 }
 0xa6f   : > { %5908 = vmatmul.mubr.msk.bf16.gmra.mrb[68].mxu0 %vm464_vm2, %v3629_v28 }
 0xa72   : > { %v3478_v49 = vpop.f32.mrb[88].mxu0 }
 0xa73   : > { %v5881_v37 = vpop.f32.mrb[89].mxu0 }
 0xa74   : > { %v3481_v55 = vpop.f32.mrb[90].mxu0 }
 0xa75   : > { %v3630_v36 = vpack.c.bf16 %v3481_v55, %v3478_v49  ;;  %v5882_v34 = vpop.f32.mrb[91].mxu0 }
 0xa77   : > { %5911 = vmatprep.mubr.msk.bf16.mxu0 %vm464_vm2, %v3630_v36 }
 0xa7a   : > { %v3525_v6 = vpop.f32.mrb[120].mxu1 }
 0xa7b   : > { %v5887_v35 = vpop.f32.mrb[121].mxu1 }
 0xa7c   : > { %v3528_v41 = vpop.f32.mrb[122].mxu1 }
 0xa7d   : > { %v3631_v44 = vpack.c.bf16 %v3528_v41, %v3525_v6  ;;  %v5888_v19 = vpop.f32.mrb[123].mxu1 }
 0xa7f   : > { %5912 = vmatmul.mubr.msk.bf16.gmra.mrb[72].mxu0 %vm464_vm2, %v3631_v44 }
 0xa82   : > { %v3572_v39 = vpop.f32.mrb[92].mxu0 }
 0xa83   : > { %v5893_v0 = vpop.f32.mrb[93].mxu0 }
 0xa84   : > { %v3575_v11 = vpop.f32.mrb[94].mxu0 }
 0xa85   : > { %v3632_v13 = vpack.c.bf16 %v3575_v11, %v3572_v39  ;;  %v5894_v16 = vpop.f32.mrb[95].mxu0 }
 0xa87   : > { %5915 = vmatprep.mubr.msk.bf16.mxu0 %vm464_vm2, %v3632_v13 }
 0xabf   : > { %v3619_v10 = vpop.f32.mrb[124].mxu1 }
 0xac0   : > { %v5899_v40 = vpop.f32.mrb[125].mxu1 }
 0xac1   : > { %v3622_v4 = vpop.f32.mrb[126].mxu1 }
 0xac2   : > { %v3633_v23 = vpack.c.bf16 %v3622_v4, %v3619_v10  ;;  %v5900_v33 = vpop.f32.mrb[127].mxu1 }
 0xac4   : > { %5916 = vmatmul.mubr.msk.bf16.gmra.mrb[76].mxu0 %vm464_vm2, %v3633_v23 }
 0xac5   : > { %5945 = vmatprep.mubr.msk.bf16.mxu0 %vm6423_vm1, %v8181_v61 }
 0xac7   : > { %v7651_v53 = vpop.f32.mrb[128].mxu1 }
 0xac8   : > { %v5923_v24 = vpop.f32.mrb[129].mxu1  ;;  %v4182_v29 = vsel %vm862_vm3, %v7651_v53, -inf }
 0xac9   : > { %4183 = vmax.xlane.f32.xlu0 %v4182_v29  ;;  %v3821_v42 = vpop.f32.mrb[130].mxu1 }
 0xaca   : > { %v5924_v21 = vpop.f32.mrb[131].mxu1  ;;  %v4185_v20 = vsel %vm862_vm3, %v3821_v42, -inf }
 0xacb   : > { %4186 = vmax.xlane.f32.xlu1 %v4185_v20 }
 0xacc   : > { %5946 = vmatmul.mubr.msk.bf16.vlgmr.msra.gmra.mrb[96].mxu0 %vm464_vm2, %v7626_v31 }
 0xacd   : > { %5956 = vmatpush3.bf16.xpose.msra.mxu0 %v4088_v9  ;;  %5957 = vmatprep.mubr.msk.bf16.mxu0 %vm6423_vm1, %v8181_v61 }
 0xace   : > { %5967 = vmatprep.subr.bf16.mxu0 %v8181_v61 }
 0xacf   : > { %v3869_v15 = vpop.f32.mrb[132].mxu1 }
 0xad0   : > { %v5929_v26 = vpop.f32.mrb[133].mxu1  ;;  %v4188_v5 = vsel %vm862_vm3, %v3869_v15, -inf }
 0xad1   : > { %4189 = vmax.xlane.f32.xlu0 %v4188_v5  ;;  %v3872_v18 = vpop.f32.mrb[134].mxu1 }
 0xad2   : > { %v5930_v50 = vpop.f32.mrb[135].mxu1  ;;  %v4191_v22 = vsel %vm862_vm3, %v3872_v18, -inf }
 0xad4   : > { %5958 = vmatmul.mubr.msk.bf16.vlgmr.msra.gmra.mrb[100].mxu0 %vm464_vm2, %v4081_v12 }
 0xad5   : > { %4192 = vmax.xlane.f32.xlu0 %v4191_v22  ;;  %5969 = vmatprep.mubr.msk.bf16.mxu0 %vm6423_vm1, %v8181_v61 }
 0xad7   : > { %v7668_v31 = vpop.f32.mrb[136].mxu1 }
 0xad8   : > { %v5935_v30 = vpop.f32.mrb[137].mxu1  ;;  %v4194_v38 = vsel %vm862_vm3, %v7668_v31, -inf }
 0xad9   : > { %4195 = vmax.xlane.f32.xlu0 %v4194_v38  ;;  %v3923_v52 = vpop.f32.mrb[138].mxu1 }
 0xada   : > { %v5936_v56 = vpop.f32.mrb[139].mxu1  ;;  %v4197_v17 = vsel %vm862_vm3, %v3923_v52, -inf }
 0xadb   : > { %4198 = vmax.xlane.f32.xlu1 %v4197_v17 }
 0xadf   : > { %v7673_v1 = vpop.f32.mrb[140].mxu1 }
 0xae0   : > { %v5941_v58 = vpop.f32.mrb[141].mxu1  ;;  %v4200_v60 = vsel %vm862_vm3, %v7673_v1, -inf }
 0xae1   : > { %4201 = vmax.xlane.f32.xlu0 %v4200_v60  ;;  %v3974_v32 = vpop.f32.mrb[142].mxu1 }
 0xae2   : > { %v5942_v48 = vpop.f32.mrb[143].mxu1  ;;  %v4203_v47 = vsel %vm862_vm3, %v3974_v32, -inf }
 0xae3   : > { %4204 = vmax.xlane.f32.xlu1 %v4203_v47 }
 0xae7   : > { %v7678_v3 = vpop.f32.mrb[144].mxu1 }
 0xae8   : > { %v5953_v57 = vpop.f32.mrb[145].mxu1  ;;  %v4212_v59 = vsel %vm862_vm3, %v7678_v3, -inf }
 0xae9   : > { %4213 = vmax.xlane.f32.xlu0 %v4212_v59  ;;  %v7682_v27 = vpop.f32.mrb[146].mxu1 }
 0xaea   : > { %v5954_v8 = vpop.f32.mrb[147].mxu1  ;;  %v4215_v25 = vsel %vm862_vm3, %v7682_v27, -inf }
 0xaeb   : > { %4216 = vmax.xlane.f32.xlu1 %v4215_v25 }
 0xaef   : > { %v7686_v28 = vpop.f32.mrb[148].mxu1 }
 0xaf0   : > { %v5965_v62 = vpop.f32.mrb[149].mxu1 }
 0xaf1   : > { %v7688_v49 = vpop.f32.mrb[150].mxu1 }
 0xaf2   : > { %v5966_v37 = vpop.f32.mrb[151].mxu1  ;;  %v4227_v55 = vsel %vm862_vm3, %v7688_v49, -inf }
 0xaf3   : > { %4228 = vmax.xlane.f32.xlu1 %v4227_v55 }
 0xb56   : > { %v4184_v36 = vpop.xlane.xlu0 %4183 }
 0xb57   : > { %v4230_v0 = vsub.f32 %v7651_v53, %v4184_v36 }
 0xb58   : > { %v4187_v6 = vpop.xlane.xlu1 %4186 }
 0xb59   : > { %v4231_v35 = vsub.f32 %v3821_v42, %v4187_v6  ;;  %v4246_v16 = vmul.f32 1.442695, %v4230_v0 }
 0xb5b   : > { %v4248_v44 = vmul.f32 1.442695, %v4231_v35 }
 0xb5d   : > { %6302 = vpow2.f32 %v4248_v44 }
 0xb5e   : > { %v4190_v34 = vpop.xlane.xlu0 %4189 }
 0xb5f   : > { %v4232_v10 = vsub.f32 %v3869_v15, %v4190_v34 }
 0xb61   : > { %v4250_v33 = vmul.f32 1.442695, %v4232_v10 }
 0xb62   : > { %v4193_v41 = vpop.xlane.xlu0 %4192 }
 0xb63   : > { %v4233_v19 = vsub.f32 %v3872_v18, %v4193_v41 }
 0xb65   : > { %v4252_v11 = vmul.f32 1.442695, %v4233_v19 }
 0xb66   : > { %v4196_v40 = vpop.xlane.xlu0 %4195 }
 0xb67   : > { %6304 = vpow2.f32 %v4252_v11  ;;  %v4234_v24 = vsub.f32 %v7668_v31, %v4196_v40  ;;  %v7702_v18 = vpop.eup %6302  ;;  %v4224_v31 = vsel %vm862_vm3, %v7686_v28, -inf }
 0xb68   : > { %v4199_v39 = vpop.xlane.xlu1 %4198  ;;  %6306 = vpow2.f32 %v4246_v16  ;;  %v4281_v56 = vsel %vm862_vm3, %v7702_v18, 0.0 }
 0xb69   : > { %v4235_v13 = vsub.f32 %v3923_v52, %v4199_v39  ;;  %v4254_v50 = vmul.f32 1.442695, %v4234_v24 }
 0xb6b   : > { %v4256_v4 = vmul.f32 1.442695, %v4235_v13 }
 0xb6d   : > { %6308 = vpow2.f32 %v4256_v4 }
 0xb6e   : > { %v4202_v42 = vpop.xlane.xlu0 %4201  ;;  %6310 = vpow2.f32 %v4250_v33 }
 0xb6f   : > { %v4236_v12 = vsub.f32 %v7673_v1, %v4202_v42  ;;  %6312 = vpow2.f32 %v4254_v50 }
 0xb70   : > { %v4205_v23 = vpop.xlane.xlu1 %4204 }
 0xb71   : > { %v4237_v20 = vsub.f32 %v3974_v32, %v4205_v23  ;;  %v7710_v17 = vpop.eup %6304  ;;  %v4258_v58 = vmul.f32 1.442695, %v4236_v12 }
 0xb72   : > { %v7717_v47 = vpop.eup %6306 }
 0xb73   : > { %v4260_v30 = vmul.f32 1.442695, %v4237_v20  ;;  %v4278_v37 = vsel %vm862_vm3, %v7717_v47, 0.0 }
 0xb75   : > { %6314 = vpow2.f32 %v4260_v30 }
 0xb76   : > { %v4214_v22 = vpop.xlane.xlu0 %4213  ;;  %6316 = vpow2.f32 %v4258_v58 }
 0xb77   : > { %v4240_v60 = vsub.f32 %v7678_v3, %v4214_v22  ;;  %v4287_v3 = vsel %vm862_vm3, %v7710_v17, 0.0  ;;  %v7724_v25 = vpop.eup %6308 }
 0xb78   : > { %v4217_v15 = vpop.xlane.xlu1 %4216  ;;  %v7728_v55 = vpop.eup %6310 }
 0xb79   : > { %v4241_v38 = vsub.f32 %v7682_v27, %v4217_v15  ;;  %v4266_v62 = vmul.f32 1.442695, %v4240_v60  ;;  %v4284_v34 = vsel %vm862_vm3, %v7728_v55, 0.0  ;;  %v7734_v6 = vpop.eup %6312 }
 0xb7a   : > { %v4290_v44 = vsel %vm862_vm3, %v7734_v6, 0.0 }
 0xb7b   : > { %v4268_v57 = vmul.f32 1.442695, %v4241_v38 }
 0xb7d   : > { %6318 = vpow2.f32 %v4268_v57 }
 0xb7e   : > { %6320 = vpow2.f32 %v4266_v62 }
 0xb7f   : > { %v7738_v41 = vpop.eup %6314 }
 0xb80   : > { %v4229_v52 = vpop.xlane.xlu1 %4228  ;;  %v7742_v19 = vpop.eup %6316  ;;  %v4299_v39 = vsel %vm862_vm3, %v7738_v41, 0.0 }
 0xb81   : > { %v4245_v59 = vsub.f32 %v7688_v49, %v4229_v52  ;;  %v4293_v49 = vsel %vm862_vm3, %v7724_v25, 0.0  ;;  %v4296_v11 = vsel %vm862_vm3, %v7742_v19, 0.0 }
 0xb83   : > { %v4276_v36 = vmul.f32 1.442695, %v4245_v59 }
 0xb85   : > { %6322 = vpow2.f32 %v4276_v36 }
 0xb87   : > { %v7746_v0 = vpop.eup %6318 }
 0xb88   : > { %v7750_v13 = vpop.eup %6320  ;;  %v4311_v16 = vsel %vm862_vm3, %v7746_v0, 0.0 }
 0xb89   : > { %v4308_v40 = vsel %vm862_vm3, %v7750_v13, 0.0 }
 0xb8f   : > { %v7754_v10 = vpop.eup %6322 }
 0xb90   : > { %v4323_v4 = vsel %vm862_vm3, %v7754_v10, 0.0 }
 0xb9f   : > { %v7694_v29 = vpop.f32.mrb[96].mxu0 }
 0xba0   : > { %v5947_v21 = vpop.f32.mrb[97].mxu0  ;;  %v4206_v53 = vsel %vm862_vm3, %v7694_v29, -inf }
 0xba1   : > { %v7698_v9 = vpop.f32.mrb[98].mxu0  ;;  %4207 = vmax.xlane.f32.xlu0 %v4206_v53 }
 0xba2   : > { %v5948_v26 = vpop.f32.mrb[99].mxu0  ;;  %v4209_v5 = vsel %vm862_vm3, %v7698_v9, -inf }
 0xba3   : > { %4210 = vmax.xlane.f32.xlu1 %v4209_v5 }
 0xba5   : > { %4225 = vmax.xlane.f32.xlu0 %v4224_v31 }
 0xba7   : > { %4282 = vadd.xlane.f32.xlu1 %v4281_v56  ;;  %v7713_v1 = vpop.f32.mrb[100].mxu0 }
 0xba8   : > { %v5959_v32 = vpop.f32.mrb[101].mxu0  ;;  %v4218_v48 = vsel %vm862_vm3, %v7713_v1, -inf }
 0xba9   : > { %4219 = vmax.xlane.f32.xlu0 %v4218_v48  ;;  %v7720_v27 = vpop.f32.mrb[102].mxu0 }
 0xbaa   : > { %v5960_v8 = vpop.f32.mrb[103].mxu0  ;;  %v4221_v35 = vsel %vm862_vm3, %v7720_v27, -inf }
 0xbab   : > { %4288 = vadd.xlane.f32.xlu1 %v4287_v3 }
 0xbad   : > { %4279 = vadd.xlane.f32.xlu0 %v4278_v37 }
 0xbaf   : > { %4294 = vadd.xlane.f32.xlu1 %v4293_v49 }
 0xbb1   : > { %4285 = vadd.xlane.f32.xlu0 %v4284_v34 }
 0xbb3   : > { %4222 = vmax.xlane.f32.xlu1 %v4221_v35 }
 0xbb5   : > { %4291 = vadd.xlane.f32.xlu0 %v4290_v44 }
 0xbb7   : > { %4300 = vadd.xlane.f32.xlu1 %v4299_v39 }
 0xbb9   : > { %4297 = vadd.xlane.f32.xlu0 %v4296_v11 }
 0xbbb   : > { %4312 = vadd.xlane.f32.xlu1 %v4311_v16 }
 0xbbd   : > { %4309 = vadd.xlane.f32.xlu0 %v4308_v40 }
 0xbbf   : > { %4324 = vadd.xlane.f32.xlu1 %v4323_v4 }
 0xbd0   : > { %4413 = vrot.lane.b32.xlu1 %v6538_v43, %s6434_s17 }
 0xbd4   : > { %4460 = vrot.lane.b32.xlu1 %v6552_v2, %s6434_s17 }
 0xbd8   : > { %4507 = vrot.lane.b32.xlu1 %v6550_v63, %s6434_s17 }
 0xbdc   : > { %4601 = vrot.lane.b32.xlu1 %v6544_v51, %s6434_s17 }
 0xc2e   : > { %v7768_v23 = vpop.xlane.xlu0 %4207 }
 0xc30   : > { %v4211_v33 = vpop.xlane.xlu1 %4210 }
 0xc31   : > { %v4239_v24 = vsub.f32 %v7698_v9, %v4211_v33 }
 0xc32   : > { %v4226_v42 = vpop.xlane.xlu0 %4225 }
 0xc33   : > { %v4264_v21 = vmul.f32 1.442695, %v4239_v24  ;;  %v4244_v53 = vsub.f32 %v7686_v28, %v4226_v42 }
 0xc34   : > { %v4283_v20 = vpop.xlane.xlu1 %4282 }
 0xc35   : > { %6324 = vpow2.f32 %v4264_v21  ;;  %v4274_v43 = vmul.f32 1.442695, %v4244_v53 }
 0xc36   : > { %v7772_v15 = vpop.xlane.xlu0 %4219 }
 0xc37   : > { %6326 = vpow2.f32 %v4274_v43  ;;  %v4242_v21 = vsub.f32 %v7713_v1, %v7772_v15 }
 0xc38   : > { %v4289_v2 = vpop.xlane.xlu1 %4288  ;;  %6328 = vrcp.f32 %v4283_v20 }
 0xc39   : > { %v4270_v53 = vmul.f32 1.442695, %v4242_v21 }
 0xc3a   : > { %v4280_v63 = vpop.xlane.xlu0 %4279 }
 0xc3b   : > { %6330 = vrcp.f32 %v4280_v63 }
 0xc3c   : > { %v4295_v51 = vpop.xlane.xlu1 %4294 }
 0xc3d   : > { %6332 = vrcp.f32 %v4295_v51 }
 0xc3e   : > { %v4286_v26 = vpop.xlane.xlu0 %4285 }
 0xc3f   : > { %v7774_v5 = vpop.eup %6324  ;;  %6334 = vrcp.f32 %v4286_v26 }
 0xc40   : > { %v4223_v9 = vpop.xlane.xlu1 %4222  ;;  %v4305_v50 = vsel %vm862_vm3, %v7774_v5, 0.0  ;;  %6336 = vrcp.f32 %v4289_v2 }
 0xc41   : > { %v7778_v28 = vpop.eup %6326  ;;  %v4243_v12 = vsub.f32 %v7720_v27, %v4223_v9  ;;  %4306 = vadd.xlane.f32.xlu1 %v4305_v50 }
 0xc42   : > { %v4292_v22 = vpop.xlane.xlu0 %4291  ;;  %v4320_v31 = vsel %vm862_vm3, %v7778_v28, 0.0  ;;  %v6329_v38 = vpop.eup %6328 }
 0xc43   : > { %v4272_v30 = vmul.f32 1.442695, %v4243_v12  ;;  %6338 = vrcp.f32 %v4292_v22  ;;  %4321 = vadd.xlane.f32.xlu0 %v4320_v31  ;;  %v7784_v60 = vmul.f32 %v6329_v38, %v7702_v18 }
 0xc44   : > { %v4301_v52 = vpop.xlane.xlu1 %4300 }
 0xc45   : > { %6340 = vpow2.f32 %v4272_v30  ;;  %v6331_v56 = vpop.eup %6330 }
 0xc46   : > { %v4298_v58 = vpop.xlane.xlu0 %4297  ;;  %v7787_v32 = vmul.f32 %v6331_v56, %v7717_v47 }
 0xc47   : > { %6342 = vrcp.f32 %v4298_v58  ;;  %v6333_v59 = vpop.eup %6332 }
 0xc48   : > { %v4313_v48 = vpop.xlane.xlu1 %4312  ;;  %v4358_v57 = vpack.c.bf16 %v7784_v60, %v7787_v32  ;;  %6344 = vrcp.f32 %v4301_v52  ;;  %v7792_v37 = vmul.f32 %v6333_v59, %v7724_v25 }
 0xc49   : > { %v6335_v27 = vpop.eup %6334 }
 0xc4a   : > { %v6337_v8 = vpop.eup %6336  ;;  %v4344_v18 = vmul.f32 %v6335_v27, %v7728_v55  ;;  %v4310_v47 = vpop.xlane.xlu0 %4309 }
 0xc4b   : > { %v4345_v34 = vmul.f32 %v6337_v8, %v7710_v17  ;;  %6346 = vrcp.f32 %v4310_v47 }
 0xc4c   : > { %v4325_v3 = vpop.xlane.xlu1 %4324  ;;  %6348 = vrcp.f32 %v4313_v48 }
 0xc4d   : > { %v6339_v62 = vpop.eup %6338  ;;  %v4359_v25 = vpack.c.bf16 %v4345_v34, %v4344_v18 }
 0xc4e   : > { %v7796_v36 = vmul.f32 %v6339_v62, %v7734_v6 }
 0xc4f   : > { %v7798_v49 = vpop.eup %6340 }
 0xc50   : > { %v4414_v35 = vpop.permute.xlu1 %4413  ;;  %v4317_v44 = vsel %vm862_vm3, %v7798_v49, 0.0  ;;  %v4360_v39 = vpack.c.bf16 %v7792_v37, %v7796_v36 }
 0xc51   : > { %4318 = vadd.xlane.f32.xlu1 %v4317_v44  ;;  %5974 = vmatpush3.bf16.msra.mxu1 %v4414_v35  ;;  %v6343_v55 = vpop.eup %6342 }
 0xc52   : > { %5985 = vmatprep.subr.bf16.mxu1 %v8181_v61  ;;  %v6345_v11 = vpop.eup %6344  ;;  %v4348_v17 = vmul.f32 %v6343_v55, %v7742_v19 }
 0xc53   : > { %v4349_v16 = vmul.f32 %v6345_v11, %v7738_v41 }
 0xc54   : > { %v4461_v6 = vpop.permute.xlu1 %4460  ;;  %5976 = vmatmul.mubr.msk.bf16.vlgmr.msra.gmra.mrb[152].mxu1 %vm862_vm3, %v4359_v25 }
 0xc55   : > { %5987 = vmatprep.mubr.msk.bf16.mxu1 %vm6423_vm1, %v8181_v61  ;;  %v4361_v4 = vpack.c.bf16 %v4349_v16, %v4348_v17  ;;  %v6347_v33 = vpop.eup %6346 }
 0xc56   : > { %v6349_v42 = vpop.eup %6348  ;;  %v4352_v19 = vmul.f32 %v6347_v33, %v7750_v13 }
 0xc58   : > { %v4508_v40 = vpop.permute.xlu1 %4507 }
 0xc59   : > { %4366 = vrot.lane.b32.xlu0 %v6540_v46, %s6434_s17  ;;  %5986 = vmatpush3.bf16.msra.mxu1 %v4508_v40  ;;  %v4353_v46 = vmul.f32 %v6349_v42, %v7746_v0 }
 0xc5a   : > { %5997 = vmatprep.subr.bf16.mxu1 %v8181_v61 }
 0xc5b   : > { %v4363_v41 = vpack.c.bf16 %v4353_v46, %v4352_v19 }
 0xc5c   : > { %v4602_v24 = vpop.permute.xlu1 %4601  ;;  %5988 = vmatmul.mubr.msk.bf16.vlgmr.msra.gmra.mrb[156].mxu1 %vm862_vm3, %v4361_v4 }
 0xc5d   : > { %4554 = vrot.lane.b32.xlu0 %v6546_v54, %s6434_s17  ;;  %5998 = vmatpush3.bf16.msra.mxu1 %v4602_v24  ;;  %v4238_v54 = vsub.f32 %v7694_v29, %v7768_v23 }
 0xc5e   : > { %5999 = vmatprep.mubr.msk.bf16.mxu1 %vm6423_vm1, %v8181_v61  ;;  %6009 = vmatprep.subr.bf16.mxu1 %v8181_v61 }
 0xc5f   : > { %v4262_v13 = vmul.f32 1.442695, %v4238_v54 }
 0xc61   : > { %6350 = vpow2.f32 %v4262_v13 }
 0xc62   : > { %4695 = vrot.lane.b32.xlu1 %v8193_v14, %s6434_s17  ;;  %6352 = vpow2.f32 %v4270_v53 }
 0xc64   : > { %6000 = vmatmul.mubr.msk.bf16.vlgmr.msra.gmra.mrb[160].mxu1 %vm862_vm3, %v4363_v41 }
 0xc65   : > { %6011 = vmatprep.mubr.msk.bf16.mxu1 %vm6423_vm1, %v8181_v61 }
 0xc6b   : > { %v6351_v0 = vpop.eup %6350 }
 0xc6c   : > { %v4302_v20 = vsel %vm862_vm3, %v6351_v0, 0.0  ;;  %v6353_v14 = vpop.eup %6352 }
 0xc6d   : > { %v4314_v43 = vsel %vm862_vm3, %v6353_v14, 0.0 }
 0xc7c   : > { %4303 = vadd.xlane.f32.xlu0 %v4302_v20 }
 0xc80   : > { %4315 = vadd.xlane.f32.xlu0 %v4314_v43 }
 0xc96   : > { %4648 = vrot.lane.b32.xlu0 %v6560_v7, %s6434_s17 }
 0xcce   : > { %v4307_v1 = vpop.xlane.xlu1 %4306 }
 0xcd0   : > { %v4322_v2 = vpop.xlane.xlu0 %4321 }
 0xcd1   : > { %6354 = vrcp.f32 %v4322_v2 }
 0xcd2   : > { %6356 = vrcp.f32 %v4325_v3  ;;  %v4751_v3 = vrot.slane %v7592_v45, 4 }
 0xcd3   : > { %6358 = vrcp.f32 %v4307_v1  ;;  %v7870_v1 = vld [vmem:[%s8168_s4] ss:$0 sm:$0xff] }
 0xcd4   : > { %v4367_v29 = vpop.permute.xlu0 %4366  ;;  %v4777_v62 = vsel %vm2433_vm4, %v4751_v3, 0 }
 0xcd5   : > { %5968 = vmatpush3.bf16.msra.mxu0 %v4367_v29 }
 0xcd6   : > { %5979 = vmatprep.subr.bf16.mxu0 %v8181_v61 }
 0xcd8   : > { %5970 = vmatmul.mubr.msk.bf16.vlgmr.msra.gmra.mrb[104].mxu0 %vm862_vm3, %v4358_v57  ;;  %v4555_v51 = vpop.permute.xlu0 %4554 }
 0xcd9   : > { %5980 = vmatpush3.bf16.msra.mxu0 %v4461_v6  ;;  %5981 = vmatprep.mubr.msk.bf16.mxu0 %vm6423_vm1, %v8181_v61 }
 0xcda   : > { %5991 = vmatprep.subr.bf16.mxu0 %v8181_v61 }
 0xcdb   : > { %v6355_v7 = vpop.eup %6354 }
 0xcdc   : > { %v6357_v15 = vpop.eup %6356  ;;  %v4356_v63 = vmul.f32 %v6355_v7, %v7778_v28 }
 0xcdd   : > { %v4357_v26 = vmul.f32 %v6357_v15, %v7754_v10  ;;  %v6359_v22 = vpop.eup %6358 }
 0xcde   : > { %v4319_v23 = vpop.xlane.xlu1 %4318  ;;  %v4351_v30 = vmul.f32 %v6359_v22, %v7774_v5 }
 0xcdf   : > { %v4365_v50 = vpack.c.bf16 %v4357_v26, %v4356_v63  ;;  %v6398_v26 = vld [vmem:[%s6503_s15 + $0x10] sm:$0xff] }
 0xce0   : > { %5982 = vmatmul.mubr.msk.bf16.vlgmr.msra.gmra.mrb[108].mxu0 %vm862_vm3, %v4360_v39 }
 0xce1   : > { %5992 = vmatpush3.bf16.msra.mxu0 %v4555_v51  ;;  %5993 = vmatprep.mubr.msk.bf16.mxu0 %vm6423_vm1, %v8181_v61 }
 0xce2   : > { %v4696_v9 = vpop.permute.xlu1 %4695  ;;  %6003 = vmatprep.subr.bf16.mxu0 %v8181_v61 }
 0xce3   : > { %6010 = vmatpush3.bf16.msra.mxu1 %v4696_v9 }
 0xce6   : > { %6012 = vmatmul.mubr.msk.bf16.vlgmr.msra.gmra.mrb[164].mxu1 %vm862_vm3, %v4365_v50 }
 0xd09   : > { %v4304_v12 = vpop.xlane.xlu0 %4303 }
 0xd0a   : > { %6360 = vrcp.f32 %v4304_v12 }
 0xd0d   : > { %v4316_v28 = vpop.xlane.xlu0 %4315 }
 0xd0e   : > { %6362 = vrcp.f32 %v4316_v28  ;;  %v6399_v28 = vld [vmem:[%s6503_s15] sm:$0xff] }
 0xd0f   : > { %6364 = vrcp.f32 %v4319_v23 }
 0xd11   : > { %v4649_v56 = vpop.permute.xlu0 %4648 }
 0xd14   : > { %v6361_v31 = vpop.eup %6360 }
 0xd15   : > { %v4350_v38 = vmul.f32 %v6361_v31, %v6351_v0 }
 0xd17   : > { %v4362_v52 = vpack.c.bf16 %v4351_v30, %v4350_v38  ;;  %v6400_v38 = vld [vmem:[%s6503_s15 + $0x8] sm:$0xff] }
 0xd18   : > { %v6363_v10 = vpop.eup %6362 }
 0xd19   : > { %5994 = vmatmul.mubr.msk.bf16.vlgmr.msra.gmra.mrb[112].mxu0 %vm862_vm3, %v4362_v52  ;;  %v6365_v58 = vpop.eup %6364  ;;  %v4354_v60 = vmul.f32 %v6363_v10, %v6353_v14 }
 0xd1a   : > { %6004 = vmatpush3.bf16.msra.mxu0 %v4649_v56  ;;  %6005 = vmatprep.mubr.msk.bf16.mxu0 %vm6423_vm1, %v8181_v61  ;;  %v4355_v32 = vmul.f32 %v6365_v58, %v7798_v49  ;;  %v6401_v58 = vld [vmem:[%s6503_s15 + $0x18] sm:$0xff] }
 0xd1b   : > { %6088 = vmatprep.subr.msk.bf16.mxu0 %vm2433_vm4, %v4751_v3  ;;  %v6402_v3 = vld [vmem:[%s6503_s15 + $0x30] sm:$0xff] }
 0xd1c   : > { %v4364_v48 = vpack.c.bf16 %v4355_v32, %v4354_v60 }
 0xd21   : > { %6006 = vmatmul.mubr.msk.bf16.vlgmr.msra.gmra.mrb[116].mxu0 %vm862_vm3, %v4364_v48 }
 0xd22   : > { %6016 = vmatpush3.bf16.msra.mxu0 %v4777_v62 }
 0xd27   : > { %v4453_v57 = vpop.f32.mrb[152].mxu1 }
 0xd28   : > { %v5977_v59 = vpop.f32.mrb[153].mxu1 }
 0xd29   : > { %v4456_v5 = vpop.f32.mrb[154].mxu1 }
 0xd2a   : > { %v4743_v27 = vpack.c.bf16 %v4456_v5, %v4453_v57  ;;  %v5978_v8 = vpop.f32.mrb[155].mxu1 }
 0xd2f   : > { %v4547_v37 = vpop.f32.mrb[156].mxu1 }
 0xd30   : > { %v5989_v61 = vpop.f32.mrb[157].mxu1 }
 0xd31   : > { %v4550_v18 = vpop.f32.mrb[158].mxu1  ;;  %v6403_v61 = vld [vmem:[%s6503_s15 + $0x38] sm:$0xff] }
 0xd32   : > { %v4745_v36 = vpack.c.bf16 %v4550_v18, %v4547_v37  ;;  %v5990_v47 = vpop.f32.mrb[159].mxu1 }
 0xd33   : > { %v6404_v47 = vld [vmem:[%s6503_s15 + $0x28] sm:$0xff] }
 0xd37   : > { %v4641_v49 = vpop.f32.mrb[160].mxu1 }
 0xd38   : > { %v6001_v34 = vpop.f32.mrb[161].mxu1 }
 0xd39   : > { %v4644_v35 = vpop.f32.mrb[162].mxu1 }
 0xd3a   : > { %v4747_v44 = vpack.c.bf16 %v4644_v35, %v4641_v49  ;;  %v6002_v39 = vpop.f32.mrb[163].mxu1  ;;  %v6405_v35 = vld [vmem:[%s6503_s15 + $0x20] sm:$0xff] }
 0xdab   : > { %v4406_v25 = vpop.f32.mrb[104].mxu0 }
 0xdac   : > { %v5971_v55 = vpop.f32.mrb[105].mxu0 }
 0xdad   : > { %v4409_v6 = vpop.f32.mrb[106].mxu0 }
 0xdae   : > { %v4742_v11 = vpack.c.bf16 %v4409_v6, %v4406_v25  ;;  %v5972_v45 = vpop.f32.mrb[107].mxu0 }
 0xdb0   : > { %6017 = vmatprep.mubr.msk.bf16.mxu0 %vm464_vm2, %v4742_v11 }
 0xdb1   : > { %6018 = vmatmul.mubr.msk.bf16.vlgmr.msra.gmra.mrb[64].mxu0 %vm464_vm2, %v4743_v27 }
 0xdb3   : > { %v4500_v17 = vpop.f32.mrb[108].mxu0 }
 0xdb4   : > { %v5983_v16 = vpop.f32.mrb[109].mxu0 }
 0xdb5   : > { %v4503_v40 = vpop.f32.mrb[110].mxu0 }
 0xdb6   : > { %v4744_v4 = vpack.c.bf16 %v4503_v40, %v4500_v17  ;;  %v5984_v33 = vpop.f32.mrb[111].mxu0  ;;  %v6406_v40 = vld [vmem:[%s6503_s15 + $0x50] sm:$0xff] }
 0xdb8   : > { %6021 = vmatprep.mubr.msk.bf16.mxu0 %vm464_vm2, %v4744_v4 }
 0xdb9   : > { %v4735_v24 = vpop.f32.mrb[164].mxu1  ;;  %6022 = vmatmul.mubr.msk.bf16.gmra.mrb[68].mxu0 %vm464_vm2, %v4745_v36 }
 0xdba   : > { %v6013_v42 = vpop.f32.mrb[165].mxu1 }
 0xdbb   : > { %v4738_v19 = vpop.f32.mrb[166].mxu1 }
 0xdbc   : > { %v4749_v46 = vpack.c.bf16 %v4738_v19, %v4735_v24  ;;  %v6014_v41 = vpop.f32.mrb[167].mxu1  ;;  %v6407_v19 = vld [vmem:[%s6503_s15 + $0x40] sm:$0xff] }
 0xdbd   : > { %v6408_v41 = vld [vmem:[%s6503_s15 + $0x58] sm:$0xff] }
 0xdec   : > { %v4594_v54 = vpop.f32.mrb[112].mxu0 }
 0xded   : > { %v5995_v13 = vpop.f32.mrb[113].mxu0 }
 0xdee   : > { %v4597_v21 = vpop.f32.mrb[114].mxu0 }
 0xdef   : > { %v4746_v53 = vpack.c.bf16 %v4597_v21, %v4594_v54  ;;  %v5996_v0 = vpop.f32.mrb[115].mxu0  ;;  %v6409_v21 = vld [vmem:[%s6503_s15 + $0x48] sm:$0xff] }
 0xdf1   : > { %6025 = vmatprep.mubr.msk.bf16.mxu0 %vm464_vm2, %v4746_v53 }
 0xdf2   : > { %6026 = vmatmul.mubr.msk.bf16.gmra.mrb[72].mxu0 %vm464_vm2, %v4747_v44 }
 0xdf4   : > { %v4688_v20 = vpop.f32.mrb[116].mxu0 }
 0xdf5   : > { %v6007_v14 = vpop.f32.mrb[117].mxu0 }
 0xdf6   : > { %v4691_v43 = vpop.f32.mrb[118].mxu0 }
 0xdf7   : > { %v4748_v2 = vpack.c.bf16 %v4691_v43, %v4688_v20  ;;  %v6008_v29 = vpop.f32.mrb[119].mxu0 }
 0xdf9   : > { %6029 = vmatprep.mubr.msk.bf16.mxu0 %vm464_vm2, %v4748_v2 }
 0xdfa   : > { %6030 = vmatmul.mubr.msk.bf16.gmra.mrb[76].mxu0 %vm464_vm2, %v4749_v46 }
 0xe84   : > { %v6019_v7 = vpop.f32.mrb[64].mxu0 }
 0xe85   : > { %v4901_v23 = vadd.f32 %v6019_v7, %v7870_v1  ;;  %v4813_v15 = vpop.f32.mrb[65].mxu0 }
 0xe86   : > { %v4899_v63 = vadd.f32 %v7870_v1, %v4813_v15  ;;  %v6020_v51 = vpop.f32.mrb[66].mxu0 }
 0xe87   : > { %v7875_v9 = vadd.f32 %v6398_v26, %v4901_v23  ;;  %v4816_v50 = vpop.f32.mrb[67].mxu0  ;;  %v4902_v31 = vadd.f32 %v6020_v51, %v7870_v1 }
 0xe88   : > { %v4900_v12 = vadd.f32 %v7870_v1, %v4816_v50  ;;  %v7879_v22 = vadd.f32 %v6399_v28, %v4899_v63  ;;  %v6410_v63 = vld [vmem:[%s6503_s15 + $0x60] sm:$0xff] }
 0xe89   : > { %v4937_v30 = vsel %vm325_vm0, %v7875_v9, 0.0  ;;  %v7890_v60 = vadd.f32 %v6401_v58, %v4902_v31  ;;  %v6412_v31 = vld [vmem:[%s6503_s15 + $0x68] sm:$0xff] }
 0xe8a   : > { %v7885_v52 = vadd.f32 %v6400_v38, %v4900_v12  ;;  %4938 = vadd.xlane.f32.xlu0 %v4937_v30  ;;  %v4931_v57 = vsel %vm325_vm0, %v7879_v22, 0.0  ;;  %v6411_v12 = vld [vmem:[%s6503_s15 + $0x70] sm:$0xff] }
 0xe8b   : > { %v4940_v36 = vsel %vm325_vm0, %v7890_v60, 0.0 }
 0xe8c   : > { %v6023_v10 = vpop.f32.mrb[68].mxu0  ;;  %v4934_v56 = vsel %vm325_vm0, %v7885_v52, 0.0 }
 0xe8d   : > { %v4905_v32 = vadd.f32 %v6023_v10, %v7870_v1  ;;  %4935 = vadd.xlane.f32.xlu1 %v4934_v56  ;;  %v4829_v48 = vpop.f32.mrb[69].mxu0  ;;  %v6413_v10 = vld [vmem:[%s6503_s15 + $0x78] sm:$0xff] }
 0xe8e   : > { %4932 = vadd.xlane.f32.xlu0 %v4931_v57  ;;  %v6024_v59 = vpop.f32.mrb[70].mxu0  ;;  %v4903_v37 = vadd.f32 %v7870_v1, %v4829_v48 }
 0xe8f   : > { %v4906_v5 = vadd.f32 %v6024_v59, %v7870_v1  ;;  %v4832_v27 = vpop.f32.mrb[71].mxu0  ;;  %v7898_v62 = vadd.f32 %v6402_v3, %v4905_v32 }
 0xe90   : > { %v4904_v8 = vadd.f32 %v7870_v1, %v4832_v27  ;;  %v7912_v44 = vadd.f32 %v6405_v35, %v4903_v37 }
 0xe91   : > { %v7902_v18 = vadd.f32 %v6403_v61, %v4906_v5  ;;  %v4949_v39 = vsel %vm325_vm0, %v7898_v62, 0.0 }
 0xe92   : > { %4941 = vadd.xlane.f32.xlu0 %v4940_v36  ;;  %v7907_v49 = vadd.f32 %v6404_v47, %v4904_v8  ;;  %v4943_v55 = vsel %vm325_vm0, %v7912_v44, 0.0 }
 0xe93   : > { %v4952_v34 = vsel %vm325_vm0, %v7902_v18, 0.0 }
 0xe94   : > { %4953 = vadd.xlane.f32.xlu1 %v4952_v34  ;;  %v4946_v25 = vsel %vm325_vm0, %v7907_v49, 0.0 }
 0xe96   : > { %4950 = vadd.xlane.f32.xlu0 %v4949_v39 }
 0xe98   : > { %4947 = vadd.xlane.f32.xlu1 %v4946_v25 }
 0xe9a   : > { %4944 = vadd.xlane.f32.xlu0 %v4943_v55 }
 0xec5   : > { %v6027_v6 = vpop.f32.mrb[72].mxu0 }
 0xec6   : > { %v4909_v11 = vadd.f32 %v6027_v6, %v7870_v1  ;;  %v4845_v45 = vpop.f32.mrb[73].mxu0 }
 0xec7   : > { %v4907_v17 = vadd.f32 %v7870_v1, %v4845_v45  ;;  %v6028_v16 = vpop.f32.mrb[74].mxu0 }
 0xec8   : > { %v7923_v4 = vadd.f32 %v6406_v40, %v4909_v11  ;;  %v4910_v33 = vadd.f32 %v6028_v16, %v7870_v1  ;;  %v4848_v24 = vpop.f32.mrb[75].mxu0 }
 0xec9   : > { %v4908_v42 = vadd.f32 %v7870_v1, %v4848_v24  ;;  %v7928_v46 = vadd.f32 %v6407_v19, %v4907_v17 }
 0xeca   : > { %v7931_v54 = vadd.f32 %v6408_v41, %v4910_v33  ;;  %v4961_v13 = vsel %vm325_vm0, %v7923_v4, 0.0 }
 0xecb   : > { %4962 = vadd.xlane.f32.xlu0 %v4961_v13  ;;  %v7936_v53 = vadd.f32 %v6409_v21, %v4908_v42  ;;  %v4955_v43 = vsel %vm325_vm0, %v7928_v46, 0.0 }
 0xecc   : > { %v4964_v0 = vsel %vm325_vm0, %v7931_v54, 0.0 }
 0xecd   : > { %4965 = vadd.xlane.f32.xlu1 %v4964_v0  ;;  %v6031_v20 = vpop.f32.mrb[76].mxu0  ;;  %v4958_v15 = vsel %vm325_vm0, %v7936_v53, 0.0 }
 0xece   : > { %v4861_v14 = vpop.f32.mrb[77].mxu0  ;;  %v4913_v2 = vadd.f32 %v6031_v20, %v7870_v1 }
 0xecf   : > { %v4911_v29 = vadd.f32 %v7870_v1, %v4861_v14  ;;  %4956 = vadd.xlane.f32.xlu0 %v4955_v43  ;;  %v6032_v7 = vpop.f32.mrb[78].mxu0 }
 0xed0   : > { %v4864_v23 = vpop.f32.mrb[79].mxu0  ;;  %v4914_v26 = vadd.f32 %v6032_v7, %v7870_v1  ;;  %v7952_v28 = vadd.f32 %v6411_v12, %v4913_v2 }
 0xed1   : > { %v7947_v51 = vadd.f32 %v6410_v63, %v4911_v29  ;;  %v4912_v50 = vadd.f32 %v7870_v1, %v4864_v23  ;;  %4959 = vadd.xlane.f32.xlu1 %v4958_v15 }
 0xed2   : > { %v7960_v56 = vadd.f32 %v6413_v10, %v4914_v26  ;;  %v4973_v1 = vsel %vm325_vm0, %v7952_v28, 0.0 }
 0xed3   : > { %v7955_v30 = vadd.f32 %v6412_v31, %v4912_v50  ;;  %v4967_v38 = vsel %vm325_vm0, %v7947_v51, 0.0 }
 0xed4   : > { %4968 = vadd.xlane.f32.xlu0 %v4967_v38  ;;  %v4976_v32 = vsel %vm325_vm0, %v7960_v56, 0.0 }
 0xed5   : > { %v4970_v58 = vsel %vm325_vm0, %v7955_v30, 0.0 }
 0xed6   : > { %4971 = vadd.xlane.f32.xlu1 %v4970_v58 }
 0xed8   : > { %4974 = vadd.xlane.f32.xlu0 %v4973_v1 }
 0xeda   : > { %4977 = vadd.xlane.f32.xlu1 %v4976_v32 }
 0xf17   : > { %v4939_v48 = vpop.xlane.xlu0 %4938 }
 0xf18   : > { %v4982_v57 = vmul.f32 0.03125, %v4939_v48 }
 0xf1a   : > { %v4936_v59 = vpop.xlane.xlu1 %4935  ;;  %v7972_v37 = vsub.f32 %v7875_v9, %v4982_v57 }
 0xf1b   : > { %v4981_v5 = vmul.f32 0.03125, %v4936_v59  ;;  %v4933_v27 = vpop.xlane.xlu0 %4932 }
 0xf1c   : > { %v4980_v8 = vmul.f32 0.03125, %v4933_v27 }
 0xf1d   : > { %v7969_v3 = vsub.f32 %v7885_v52, %v4981_v5 }
 0xf1e   : > { %v7975_v61 = vsub.f32 %v7879_v22, %v4980_v8  ;;  %v5014_v22 = vmul.f32 %v7972_v37, %v7972_v37 }
 0xf1f   : > { %v4942_v36 = vpop.xlane.xlu0 %4941  ;;  %v5013_v47 = vmul.f32 %v7969_v3, %v7969_v3 }
 0xf20   : > { %v4983_v34 = vmul.f32 0.03125, %v4942_v36  ;;  %v5012_v35 = vmul.f32 %v7975_v61, %v7975_v61  ;;  %v5034_v40 = vsel %vm325_vm0, %v5014_v22, 0.0 }
 0xf21   : > { %v4954_v39 = vpop.xlane.xlu1 %4953  ;;  %v5031_v25 = vsel %vm325_vm0, %v5013_v47, 0.0 }
 0xf22   : > { %v7983_v52 = vsub.f32 %v7890_v60, %v4983_v34  ;;  %5032 = vadd.xlane.f32.xlu1 %v5031_v25  ;;  %v5028_v9 = vsel %vm325_vm0, %v5012_v35, 0.0  ;;  %v4987_v6 = vmul.f32 0.03125, %v4954_v39 }
 0xf23   : > { %v4951_v55 = vpop.xlane.xlu0 %4950  ;;  %5029 = vadd.xlane.f32.xlu0 %v5028_v9 }
 0xf24   : > { %v5015_v11 = vmul.f32 %v7983_v52, %v7983_v52  ;;  %v4986_v17 = vmul.f32 0.03125, %v4951_v55  ;;  %v7993_v24 = vsub.f32 %v7902_v18, %v4987_v6 }
 0xf25   : > { %v4948_v45 = vpop.xlane.xlu1 %4947 }
 0xf26   : > { %v4985_v16 = vmul.f32 0.03125, %v4948_v45  ;;  %v5037_v60 = vsel %vm325_vm0, %v5015_v11, 0.0  ;;  %v7999_v41 = vsub.f32 %v7898_v62, %v4986_v17  ;;  %v5019_v18 = vmul.f32 %v7993_v24, %v7993_v24 }
 0xf27   : > { %v4945_v33 = vpop.xlane.xlu0 %4944  ;;  %5035 = vadd.xlane.f32.xlu0 %v5034_v40  ;;  %5038 = vadd.xlane.f32.xlu1 %v5037_v60 }
 0xf28   : > { %v7996_v42 = vsub.f32 %v7907_v49, %v4985_v16  ;;  %v4984_v19 = vmul.f32 0.03125, %v4945_v33  ;;  %v5018_v62 = vmul.f32 %v7999_v41, %v7999_v41 }
 0xf2a   : > { %v8002_v13 = vsub.f32 %v7912_v44, %v4984_v19  ;;  %v5017_v21 = vmul.f32 %v7996_v42, %v7996_v42  ;;  %v5049_v44 = vsel %vm325_vm0, %v5019_v18, 0.0  ;;  %v5046_v14 = vsel %vm325_vm0, %v5018_v62, 0.0 }
 0xf2c   : > { %v5043_v0 = vsel %vm325_vm0, %v5017_v21, 0.0  ;;  %v5016_v20 = vmul.f32 %v8002_v13, %v8002_v13 }
 0xf2d   : > { %5044 = vadd.xlane.f32.xlu1 %v5043_v0 }
 0xf2e   : > { %v5040_v49 = vsel %vm325_vm0, %v5016_v20, 0.0 }
 0xf2f   : > { %5041 = vadd.xlane.f32.xlu0 %v5040_v49 }
 0xf31   : > { %5050 = vadd.xlane.f32.xlu1 %v5049_v44 }
 0xf33   : > { %5047 = vadd.xlane.f32.xlu0 %v5046_v14 }
 0xf58   : > { %v4963_v43 = vpop.xlane.xlu0 %4962 }
 0xf59   : > { %v4990_v2 = vmul.f32 0.03125, %v4963_v43 }
 0xf5a   : > { %v4966_v29 = vpop.xlane.xlu1 %4965 }
 0xf5b   : > { %v8017_v7 = vsub.f32 %v7923_v4, %v4990_v2  ;;  %v4991_v23 = vmul.f32 0.03125, %v4966_v29  ;;  %v8067_v29 = vld [vmem:[%s8169_s5] ss:$0 sm:$0xff] }
 0xf5c   : > { %v4957_v15 = vpop.xlane.xlu0 %4956 }
 0xf5d   : > { %v8020_v63 = vsub.f32 %v7931_v54, %v4991_v23  ;;  %v4988_v26 = vmul.f32 0.03125, %v4957_v15  ;;  %v5022_v50 = vmul.f32 %v8017_v7, %v8017_v7 }
 0xf5e   : > { %v4960_v12 = vpop.xlane.xlu1 %4959 }
 0xf5f   : > { %v8025_v31 = vsub.f32 %v7928_v46, %v4988_v26  ;;  %v4989_v38 = vmul.f32 0.03125, %v4960_v12  ;;  %v5058_v10 = vsel %vm325_vm0, %v5022_v50, 0.0  ;;  %v5023_v4 = vmul.f32 %v8020_v63, %v8020_v63 }
 0xf60   : > { %5059 = vadd.xlane.f32.xlu0 %v5058_v10 }
 0xf61   : > { %v8031_v58 = vsub.f32 %v7936_v53, %v4989_v38  ;;  %v4969_v54 = vpop.xlane.xlu0 %4968  ;;  %v5061_v1 = vsel %vm325_vm0, %v5023_v4, 0.0  ;;  %v5020_v32 = vmul.f32 %v8025_v31, %v8025_v31  ;;  %v8073_v38 = vld [vmem:[%s8170_s6] ss:$0 sm:$0xff] }
 0xf62   : > { %v4992_v48 = vmul.f32 0.03125, %v4969_v54  ;;  %5062 = vadd.xlane.f32.xlu1 %v5061_v1 }
 0xf63   : > { %v4972_v46 = vpop.xlane.xlu1 %4971  ;;  %v5052_v57 = vsel %vm325_vm0, %v5020_v32, 0.0  ;;  %v5021_v59 = vmul.f32 %v8031_v58, %v8031_v58 }
 0xf64   : > { %v8040_v5 = vsub.f32 %v7947_v51, %v4992_v48  ;;  %v4993_v27 = vmul.f32 0.03125, %v4972_v46  ;;  %5053 = vadd.xlane.f32.xlu0 %v5052_v57 }
 0xf65   : > { %v4975_v53 = vpop.xlane.xlu0 %4974  ;;  %v5055_v8 = vsel %vm325_vm0, %v5021_v59, 0.0 }
 0xf66   : > { %v8044_v36 = vsub.f32 %v7955_v30, %v4993_v27  ;;  %v4994_v47 = vmul.f32 0.03125, %v4975_v53  ;;  %5056 = vadd.xlane.f32.xlu1 %v5055_v8  ;;  %v5024_v34 = vmul.f32 %v8040_v5, %v8040_v5 }
 0xf67   : > { %v4978_v35 = vpop.xlane.xlu1 %4977 }
 0xf68   : > { %v8049_v39 = vsub.f32 %v7952_v28, %v4994_v47  ;;  %v4995_v25 = vmul.f32 0.03125, %v4978_v35  ;;  %v5064_v51 = vsel %vm325_vm0, %v5024_v34, 0.0  ;;  %v5025_v9 = vmul.f32 %v8044_v36, %v8044_v36 }
 0xf69   : > { %5065 = vadd.xlane.f32.xlu0 %v5064_v51 }
 0xf6a   : > { %v8055_v22 = vsub.f32 %v7960_v56, %v4995_v25  ;;  %v5067_v30 = vsel %vm325_vm0, %v5025_v9, 0.0  ;;  %v5026_v55 = vmul.f32 %v8049_v39, %v8049_v39 }
 0xf6b   : > { %5068 = vadd.xlane.f32.xlu1 %v5067_v30 }
 0xf6c   : > { %v5070_v6 = vsel %vm325_vm0, %v5026_v55, 0.0  ;;  %v5027_v28 = vmul.f32 %v8055_v22, %v8055_v22 }
 0xf6d   : > { %5071 = vadd.xlane.f32.xlu0 %v5070_v6 }
 0xf6e   : > { %v5073_v11 = vsel %vm325_vm0, %v5027_v28, 0.0 }
 0xf6f   : > { %5074 = vadd.xlane.f32.xlu1 %v5073_v11 }
 0xfaf   : > { %v5033_v45 = vpop.xlane.xlu1 %5032 }
 0xfb0   : > { %v5077_v17 = vmul.f32 0.03125, %v5033_v45  ;;  %v5030_v16 = vpop.xlane.xlu0 %5029 }
 0xfb1   : > { %v5076_v56 = vmul.f32 0.03125, %v5030_v16 }
 0xfb2   : > { %v5093_v40 = vadd.f32 1e-05, %v5077_v17 }
 0xfb3   : > { %v5092_v60 = vadd.f32 1e-05, %v5076_v56 }
 0xfb4   : > { %6366 = vrsqrt.f32 %v5093_v40  ;;  %v5036_v33 = vpop.xlane.xlu0 %5035  ;;  %v5039_v19 = vpop.xlane.xlu1 %5038 }
 0xfb5   : > { %6368 = vrsqrt.f32 %v5092_v60  ;;  %v5078_v21 = vmul.f32 0.03125, %v5036_v33  ;;  %v5079_v0 = vmul.f32 0.03125, %v5039_v19 }
 0xfb7   : > { %v5094_v20 = vadd.f32 1e-05, %v5078_v21  ;;  %v5095_v18 = vadd.f32 1e-05, %v5079_v0 }
 0xfb9   : > { %6370 = vrsqrt.f32 %v5094_v20 }
 0xfba   : > { %6372 = vrsqrt.f32 %v5095_v18  ;;  %v5045_v49 = vpop.xlane.xlu1 %5044 }
 0xfbb   : > { %v5081_v62 = vmul.f32 0.03125, %v5045_v49 }
 0xfbc   : > { %v5042_v44 = vpop.xlane.xlu0 %5041 }
 0xfbd   : > { %v5097_v14 = vadd.f32 1e-05, %v5081_v62  ;;  %v5080_v43 = vmul.f32 0.03125, %v5042_v44 }
 0xfbe   : > { %v6367_v2 = vpop.eup %6366  ;;  %v5051_v23 = vpop.xlane.xlu1 %5050 }
 0xfbf   : > { %v6369_v15 = vpop.eup %6368  ;;  %v5125_v26 = vmul.f32 %v6367_v2, %v7969_v3  ;;  %6374 = vrsqrt.f32 %v5097_v14  ;;  %v5096_v50 = vadd.f32 1e-05, %v5080_v43  ;;  %v5083_v12 = vmul.f32 0.03125, %v5051_v23 }
 0xfc0   : > { %v5124_v10 = vmul.f32 %v6369_v15, %v7975_v61  ;;  %v5048_v4 = vpop.xlane.xlu0 %5047 }
 0xfc1   : > { %v5148_v54 = vmul.f32 %v8067_v29, %v5125_v26  ;;  %6376 = vrsqrt.f32 %v5096_v50  ;;  %v5099_v1 = vadd.f32 1e-05, %v5083_v12  ;;  %v5082_v32 = vmul.f32 0.03125, %v5048_v4 }
 0xfc2   : > { %v5147_v3 = vmul.f32 %v8067_v29, %v5124_v10 }
 0xfc3   : > { %v6371_v48 = vpop.eup %6370  ;;  %v5171_v61 = vadd.f32 %v8073_v38, %v5148_v54  ;;  %6378 = vrsqrt.f32 %v5099_v1  ;;  %v5098_v46 = vadd.f32 1e-05, %v5082_v32 }
 0xfc4   : > { %v6373_v57 = vpop.eup %6372  ;;  %v5170_v59 = vadd.f32 %v8073_v38, %v5147_v3  ;;  %v5126_v27 = vmul.f32 %v6371_v48, %v7972_v37 }
 0xfc5   : > { %5187 = vst.msk [vmem:[%s8082_s26 + $0x8] sm:$0xff] %vm325_vm0, %v5171_v61  ;;  %v5127_v53 = vmul.f32 %v6373_v57, %v7983_v52  ;;  %6380 = vrsqrt.f32 %v5098_v46 }
 0xfc6   : > { %5186 = vst.msk [vmem:[%s8082_s26] sm:$0xff] %vm325_vm0, %v5170_v59  ;;  %v5149_v8 = vmul.f32 %v8067_v29, %v5126_v27 }
 0xfc7   : > { %v5150_v47 = vmul.f32 %v8067_v29, %v5127_v53 }
 0xfc8   : > { %v5172_v34 = vadd.f32 %v8073_v38, %v5149_v8 }
 0xfc9   : > { %v6375_v35 = vpop.eup %6374  ;;  %v5173_v25 = vadd.f32 %v8073_v38, %v5150_v47 }
 0xfca   : > { %5188 = vst.msk [vmem:[%s8082_s26 + $0x10] sm:$0xff] %vm325_vm0, %v5172_v34  ;;  %v5129_v37 = vmul.f32 %v6375_v35, %v7996_v42 }
 0xfcb   : > { %v6377_v51 = vpop.eup %6376  ;;  %5189 = vst.msk [vmem:[%s8082_s26 + $0x18] sm:$0xff] %vm325_vm0, %v5173_v25 }
 0xfcc   : > { %v5152_v52 = vmul.f32 %v8067_v29, %v5129_v37  ;;  %v5128_v9 = vmul.f32 %v6377_v51, %v8002_v13 }
 0xfcd   : > { %v6379_v30 = vpop.eup %6378 }
 0xfce   : > { %v5175_v55 = vadd.f32 %v8073_v38, %v5152_v52  ;;  %v5151_v6 = vmul.f32 %v8067_v29, %v5128_v9  ;;  %v5131_v28 = vmul.f32 %v6379_v30, %v7993_v24 }
 0xfcf   : > { %v6381_v11 = vpop.eup %6380 }
 0xfd0   : > { %5191 = vst.msk [vmem:[%s8082_s26 + $0x28] sm:$0xff] %vm325_vm0, %v5175_v55  ;;  %v5174_v42 = vadd.f32 %v8073_v38, %v5151_v6  ;;  %v5154_v45 = vmul.f32 %v8067_v29, %v5131_v28  ;;  %v5130_v17 = vmul.f32 %v6381_v11, %v7999_v41 }
 0xfd2   : > { %5190 = vst.msk [vmem:[%s8082_s26 + $0x20] sm:$0xff] %vm325_vm0, %v5174_v42  ;;  %v5177_v13 = vadd.f32 %v8073_v38, %v5154_v45  ;;  %v5153_v16 = vmul.f32 %v8067_v29, %v5130_v17 }
 0xfd4   : > { %5193 = vst.msk [vmem:[%s8082_s26 + $0x38] sm:$0xff] %vm325_vm0, %v5177_v13  ;;  %v5176_v56 = vadd.f32 %v8073_v38, %v5153_v16 }
 0xfd6   : > { %5192 = vst.msk [vmem:[%s8082_s26 + $0x30] sm:$0xff] %vm325_vm0, %v5176_v56 }
 0xfed   : > { %v5060_v24 = vpop.xlane.xlu0 %5059 }
 0xfee   : > { %v5086_v40 = vmul.f32 0.03125, %v5060_v24 }
 0xfef   : > { %v5063_v60 = vpop.xlane.xlu1 %5062 }
 0xff0   : > { %v5102_v33 = vadd.f32 1e-05, %v5086_v40  ;;  %v5087_v19 = vmul.f32 0.03125, %v5063_v60 }
 0xff1   : > { %v5054_v21 = vpop.xlane.xlu0 %5053 }
 0xff2   : > { %6382 = vrsqrt.f32 %v5102_v33  ;;  %v5103_v41 = vadd.f32 1e-05, %v5087_v19  ;;  %v5084_v0 = vmul.f32 0.03125, %v5054_v21 }
 0xff3   : > { %v5057_v20 = vpop.xlane.xlu1 %5056 }
 0xff4   : > { %6384 = vrsqrt.f32 %v5103_v41  ;;  %v5100_v18 = vadd.f32 1e-05, %v5084_v0  ;;  %v5085_v49 = vmul.f32 0.03125, %v5057_v20 }
 0xff6   : > { %6386 = vrsqrt.f32 %v5100_v18  ;;  %v5101_v62 = vadd.f32 1e-05, %v5085_v49  ;;  %v5066_v44 = vpop.xlane.xlu0 %5065 }
 0xff7   : > { %v5088_v14 = vmul.f32 0.03125, %v5066_v44 }
 0xff8   : > { %6388 = vrsqrt.f32 %v5101_v62  ;;  %v5069_v43 = vpop.xlane.xlu1 %5068 }
 0xff9   : > { %v5104_v2 = vadd.f32 1e-05, %v5088_v14  ;;  %v5089_v23 = vmul.f32 0.03125, %v5069_v43 }
 0xffa   : > { %v5072_v15 = vpop.xlane.xlu0 %5071 }
 0xffb   : > { %6390 = vrsqrt.f32 %v5104_v2  ;;  %v5105_v26 = vadd.f32 1e-05, %v5089_v23  ;;  %v5090_v50 = vmul.f32 0.03125, %v5072_v15 }
 0xffc   : > { %v6383_v12 = vpop.eup %6382  ;;  %v5075_v10 = vpop.xlane.xlu1 %5074 }
 0xffd   : > { %v5134_v4 = vmul.f32 %v6383_v12, %v8017_v7  ;;  %6392 = vrsqrt.f32 %v5105_v26  ;;  %v5106_v54 = vadd.f32 1e-05, %v5090_v50  ;;  %v5091_v1 = vmul.f32 0.03125, %v5075_v10 }
 0xffe   : > { %v6385_v32 = vpop.eup %6384 }
 0xfff   : > { %v5157_v3 = vmul.f32 %v8067_v29, %v5134_v4  ;;  %v5135_v48 = vmul.f32 %v6385_v32, %v8020_v63  ;;  %6394 = vrsqrt.f32 %v5106_v54  ;;  %v5107_v61 = vadd.f32 1e-05, %v5091_v1 }
0x1000   : > { %v6387_v46 = vpop.eup %6386 }
0x1001   : > { %v5180_v57 = vadd.f32 %v8073_v38, %v5157_v3  ;;  %v5158_v59 = vmul.f32 %v8067_v29, %v5135_v48  ;;  %v5132_v27 = vmul.f32 %v6387_v46, %v8025_v31  ;;  %6396 = vrsqrt.f32 %v5107_v61 }
0x1002   : > { %v6389_v7 = vpop.eup %6388 }
0x1003   : > { %5196 = vst.msk [vmem:[%s8082_s26 + $0x50] sm:$0xff] %vm325_vm0, %v5180_v57  ;;  %v5181_v53 = vadd.f32 %v8073_v38, %v5158_v59  ;;  %v5155_v8 = vmul.f32 %v8067_v29, %v5132_v27  ;;  %v5133_v63 = vmul.f32 %v6389_v7, %v8031_v58 }
0x1005   : > { %v6391_v47 = vpop.eup %6390  ;;  %5197 = vst.msk [vmem:[%s8082_s26 + $0x58] sm:$0xff] %vm325_vm0, %v5181_v53  ;;  %v5178_v34 = vadd.f32 %v8073_v38, %v5155_v8  ;;  %v5156_v35 = vmul.f32 %v8067_v29, %v5133_v63 }
0x1006   : > { %v5136_v31 = vmul.f32 %v6391_v47, %v8040_v5 }
0x1007   : > { %v6393_v25 = vpop.eup %6392  ;;  %5194 = vst.msk [vmem:[%s8082_s26 + $0x40] sm:$0xff] %vm325_vm0, %v5178_v34  ;;  %v5179_v37 = vadd.f32 %v8073_v38, %v5156_v35 }
0x1008   : > { %v5159_v51 = vmul.f32 %v8067_v29, %v5136_v31  ;;  %v5137_v58 = vmul.f32 %v6393_v25, %v8044_v36 }
0x1009   : > { %v6395_v52 = vpop.eup %6394  ;;  %5195 = vst.msk [vmem:[%s8082_s26 + $0x48] sm:$0xff] %vm325_vm0, %v5179_v37 }
0x100a   : > { %v5182_v9 = vadd.f32 %v8073_v38, %v5159_v51  ;;  %v5160_v30 = vmul.f32 %v8067_v29, %v5137_v58  ;;  %v5138_v5 = vmul.f32 %v6395_v52, %v8049_v39 }
0x100b   : > { %v6397_v55 = vpop.eup %6396 }
0x100c   : > { %5198 = vst.msk [vmem:[%s8082_s26 + $0x60] sm:$0xff] %vm325_vm0, %v5182_v9  ;;  %v5183_v6 = vadd.f32 %v8073_v38, %v5160_v30  ;;  %v5161_v28 = vmul.f32 %v8067_v29, %v5138_v5  ;;  %v5139_v11 = vmul.f32 %v6397_v55, %v8055_v22 }
0x100e   : > { %5199 = vst.msk [vmem:[%s8082_s26 + $0x68] sm:$0xff] %vm325_vm0, %v5183_v6  ;;  %v5184_v36 = vadd.f32 %v8073_v38, %v5161_v28  ;;  %v5162_v42 = vmul.f32 %v8067_v29, %v5139_v11 }
0x1010   : > { %5200 = vst.msk [vmem:[%s8082_s26 + $0x70] sm:$0xff] %vm325_vm0, %v5184_v36  ;;  %v5185_v45 = vadd.f32 %v8073_v38, %v5162_v42 }
0x1012   : > { %5201 = vst.msk [vmem:[%s8082_s26 + $0x78] sm:$0xff] %vm325_vm0, %v5185_v45 }
0x1013 PF: > { %s17_s24 = sadd.s32 1, %s6420_s24  }
0x1014   : > { %p14_p4 = scmp.ge.s32.totalorder %s17_s24, 4  }
0x1016   :  { %16 = sbr.rel (!%p14_p4) target bundleno = 1 (0x1), region = 78 }

// kernel: _lambda_.8
= control target key start
LH: loop header
LB: loop body
LE: loop exit
PB: predicated region body
PF: predicated region fallthrough
CT: control target
= control target key end

     0   :  { %s10207_s24 = smov 0   ;;  %s12612_s0 = inlined_call_operand.vmem [shape: f32[32,8,32], index: 0, kind: input, shape index: {}]   ;;  %s12613_s1 = inlined_call_operand.vmem [shape: f32[32,96], index: 1, kind: input, shape index: {}]   ;;  %s12614_s2 = inlined_call_operand.vmem [shape: f32[1,96], index: 2, kind: input, shape index: {}]   ;;  %s12615_s3 = inlined_call_operand.vmem [shape: f32[32,32], index: 3, kind: input, shape index: {}]   ;;  %s12616_s4 = inlined_call_operand.vmem [shape: f32[1,32], index: 4, kind: input, shape index: {}]   ;;  %s12617_s5 = inlined_call_operand.vmem [shape: f32[1,32], index: 5, kind: input, shape index: {}]   ;;  %s12618_s6 = inlined_call_operand.vmem [shape: f32[1,32], index: 6, kind: input, shape index: {}]   ;;  %s12619_s7 = inlined_call_operand.vmem [shape: f32[32,8,32], index: 7, kind: output, shape index: {}]  }
   0x1 LB: > { %s8420_s25 = sadd.s32 4294967295, %s10152_s24   ;;  %p8424_p0 = scmp.ge.s32.totalorder %s10152_s24, 1  ;;  %s10152_s24 = sphi %s10207_s24, %s17_s24  }
   0x2   : > { %p238_p1 = scmp.lt.s32.totalorder %s10152_s24, 3 }
   0x4   : > { %p239_p2 = pnand %p8424_p0, %p238_p1 }
   0x6   : > { %242 = sbr.rel (%p239_p2) target bundleno = 4097 (0x1001), region = 48 }
   0xd   : > { %v307_v0 = vld [vmem:[%s12613_s1] sm:$0xff]  ;;  %v308_v1 = vld [vmem:[%s12613_s1 + $0x8] sm:$0xff]  ;;  %v309_v2 = vld [vmem:[%s12613_s1 + $0x10] sm:$0xff]  ;;  %s8425_s9 = sshll.u32 %s8420_s25, 4  ;;  %vm320_vm0 = vcmask 261120   ;;  %v12620_v30 = vmov 0.0  }
   0xe   : > { %v311_v3 = vpack.c.bf16 %v308_v1, %v307_v0  ;;  %v310_v4 = vld [vmem:[%s12613_s1 + $0x18] sm:$0xff]  ;;  %p271_p3 = scmp.lt.s32.totalorder %s8425_s9, 31  ;;  %v8429_v31 = vld [vmem:[%s12614_s2] ss:$0 sm:$0xff]  ;;  %vm10155_vm1 = vmmov 0   ;;  %s10156_s18 = smov 96  }
   0xf   : > { %v312_v5 = vpack.c.bf16 %v310_v4, %v309_v2  ;;  %s10157_s19 = smov 64   ;;  %vm467_vm2 = vcmask 64512   ;;  %vm1446_vm3 = vcmask 1043456   ;;  %s10158_s20 = smov 88  }
  0x10   : > { %8905 = vmatprep.subr.bf16.mxu0 %v311_v3  ;;  %s12641_s9 = smov (!%p271_p3, %s8425_s9), 31  ;;  %9765 = vmatprep.subr.bf16.mxu1 %v311_v3  ;;  %s10159_s21 = smov 120  }
  0x11   : > { %8906 = vmatpush3.bf16.msra.mxu0 %v311_v3  ;;  %9767 = vmatpush3.bf16.msra.mxu1 %v311_v3  ;;  %s8426_s12 = sshll.u32 %s12641_s9, 3  ;;  %s10160_s22 = smov 56  }
  0x12   : > { %8907 = vmatprep.subr.bf16.mxu0 %v312_v5  ;;  %9766 = vmatprep.subr.bf16.mxu1 %v312_v5  ;;  %s10235_s15 = scalar_lea.vmem %s12612_s0, %s8426_s12  ;;  %s10161_s23 = smov 112  }
  0x13   : > { %v283_v6 = vld [vmem:[%s10235_s15] sm:$0xff]  ;;  %v284_v7 = vld [vmem:[%s10235_s15 + $0x8] sm:$0xff]  ;;  %v285_v8 = vld [vmem:[%s10235_s15 + $0x10] sm:$0xff]  ;;  %s10162_s25 = smov 80   ;;  %s10163_s26 = smov 48  }
  0x14   : > { %v299_v9 = vpack.c.bf16 %v284_v7, %v283_v6  ;;  %v286_v10 = vld [vmem:[%s10235_s15 + $0x18] sm:$0xff]  ;;  %v287_v11 = vld [vmem:[%s10235_s15 + $0x20] sm:$0xff]  ;;  %v288_v12 = vld [vmem:[%s10235_s15 + $0x28] sm:$0xff]  ;;  %s10164_s8 = smov 72   ;;  %s10165_s10 = smov 104  }
  0x15   : > { %8908 = vmatpush3.bf16.msra.mxu0 %v312_v5  ;;  %9768 = vmatpush3.bf16.msra.mxu1 %v312_v5  ;;  %v300_v13 = vpack.c.bf16 %v286_v10, %v285_v8  ;;  %v301_v14 = vpack.c.bf16 %v288_v12, %v287_v11  ;;  %v291_v15 = vld [vmem:[%s10235_s15 + $0x40] sm:$0xff]  ;;  %v292_v16 = vld [vmem:[%s10235_s15 + $0x48] sm:$0xff]  ;;  %v293_v17 = vld [vmem:[%s10235_s15 + $0x50] sm:$0xff]  ;;  %s10166_s11 = smov 40  }
  0x16   : > { %8909 = vmatprep.mubr.msk.bf16.mxu0 %vm320_vm0, %v299_v9  ;;  %v294_v18 = vld [vmem:[%s10235_s15 + $0x58] sm:$0xff]  ;;  %v303_v19 = vpack.c.bf16 %v292_v16, %v291_v15  ;;  %v295_v21 = vld [vmem:[%s10235_s15 + $0x60] sm:$0xff]  ;;  %v296_v22 = vld [vmem:[%s10235_s15 + $0x68] sm:$0xff]  ;;  %8925 = vmatprep.subr.bf16.mxu1 %v12620_v30 }
  0x17   : > { %v304_v20 = vpack.c.bf16 %v294_v18, %v293_v17  ;;  %v289_v23 = vld [vmem:[%s10235_s15 + $0x30] sm:$0xff]  ;;  %v290_v24 = vld [vmem:[%s10235_s15 + $0x38] sm:$0xff]  ;;  %v305_v25 = vpack.c.bf16 %v296_v22, %v295_v21  ;;  %8949 = vmatprep.subr.bf16.mxu0 %v12620_v30 }
  0x18   : > { %8910 = vmatmul.mubr.msk.bf16.vlgmr.msra.gmra.mrb[0].mxu0 %vm320_vm0, %v300_v13  ;;  %8917 = vmatprep.mubr.msk.bf16.mxu1 %vm320_vm0, %v303_v19  ;;  %v302_v26 = vpack.c.bf16 %v290_v24, %v289_v23  ;;  %v297_v27 = vld [vmem:[%s10235_s15 + $0x70] sm:$0xff]  ;;  %v298_v28 = vld [vmem:[%s10235_s15 + $0x78] sm:$0xff] }
  0x19   : > { %8913 = vmatprep.mubr.msk.bf16.mxu0 %vm320_vm0, %v301_v14  ;;  %8918 = vmatmul.mubr.msk.bf16.vlgmr.msra.gmra.mrb[0].mxu1 %vm320_vm0, %v304_v20  ;;  %v306_v29 = vpack.c.bf16 %v298_v28, %v297_v27 }
  0x1a   : > { %8921 = vmatprep.mubr.msk.bf16.mxu1 %vm320_vm0, %v305_v25 }
  0x20   : > { %8914 = vmatmul.mubr.msk.bf16.gmra.mrb[4].mxu0 %vm320_vm0, %v302_v26 }
  0x21   : > { %8922 = vmatmul.mubr.msk.bf16.gmra.mrb[4].mxu1 %vm320_vm0, %v306_v29  ;;  %8951 = vmatprep.mubr.msk.bf16.mxu0 %vm10155_vm1, %v12620_v30 }
  0x22   : > { %8927 = vmatprep.mubr.msk.bf16.mxu1 %vm10155_vm1, %v12620_v30 }
  0xeb   : > { %v8911_v32 = vpop.f32.mrb[0].mxu0 }
  0xec   : > { %v388_v33 = vadd.f32 %v8911_v32, %v8429_v31  ;;  %v379_v34 = vpop.f32.mrb[1].mxu0  ;;  %v8919_v40 = vpop.f32.mrb[0].mxu1 }
  0xed   : > { %v380_v35 = vadd.f32 %v8429_v31, %v379_v34  ;;  %v8912_v36 = vpop.f32.mrb[2].mxu0  ;;  %v411_v43 = vpop.f32.mrb[1].mxu1  ;;  %v420_v2 = vadd.f32 %v8919_v40, %v8429_v31 }
  0xee   : > { %v10270_v37 = vpack.c.bf16 %v388_v33, %v388_v33  ;;  %v391_v38 = vadd.f32 %v8912_v36, %v8429_v31  ;;  %v382_v39 = vpop.f32.mrb[3].mxu0  ;;  %v8920_v44 = vpop.f32.mrb[2].mxu1  ;;  %v412_v62 = vadd.f32 %v8429_v31, %v411_v43 }
  0xef   : > { %v10272_v41 = vpack.c.bf16 %v380_v35, %v380_v35  ;;  %v383_v42 = vadd.f32 %v8429_v31, %v382_v39  ;;  %v414_v45 = vpop.f32.mrb[3].mxu1  ;;  %v423_v4 = vadd.f32 %v8920_v44, %v8429_v31  ;;  %v10306_v6 = vpack.c.bf16 %v420_v2, %v420_v2 }
  0xf0   : > { %564 = vrot.lane.b32.xlu1 %v10270_v37, %s10156_s18  ;;  %v10278_v46 = vpack.c.bf16 %v391_v38, %v391_v38  ;;  %v415_v1 = vadd.f32 %v8429_v31, %v414_v45  ;;  %v10298_v3 = vpack.c.bf16 %v412_v62, %v412_v62 }
  0xf1   : > { %465 = vrot.lane.b32.xlu0 %v10272_v41, %s10156_s18  ;;  %v10280_v47 = vpack.c.bf16 %v383_v42, %v383_v42  ;;  %v10310_v8 = vpack.c.bf16 %v423_v4, %v423_v4 }
  0xf2   : > { %v10302_v5 = vpack.c.bf16 %v415_v1, %v415_v1 }
  0xf3   : > { %v8915_v48 = vpop.f32.mrb[4].mxu0 }
  0xf4   : > { %613 = vrot.lane.b32.xlu1 %v10278_v46, %s10156_s18  ;;  %v395_v49 = vpop.f32.mrb[5].mxu0  ;;  %v404_v50 = vadd.f32 %v8915_v48, %v8429_v31  ;;  %v8923_v54 = vpop.f32.mrb[4].mxu1 }
  0xf5   : > { %v396_v51 = vadd.f32 %v8429_v31, %v395_v49  ;;  %v8916_v52 = vpop.f32.mrb[6].mxu0  ;;  %515 = vrot.lane.b32.xlu0 %v10280_v47, %s10156_s18  ;;  %v427_v58 = vpop.f32.mrb[5].mxu1  ;;  %v436_v10 = vadd.f32 %v8923_v54, %v8429_v31 }
  0xf6   : > { %v398_v53 = vpop.f32.mrb[7].mxu0  ;;  %v407_v56 = vadd.f32 %v8916_v52, %v8429_v31  ;;  %v8924_v59 = vpop.f32.mrb[6].mxu1  ;;  %v10288_v60 = vpack.c.bf16 %v404_v50, %v404_v50  ;;  %v428_v7 = vadd.f32 %v8429_v31, %v427_v58 }
  0xf7   : > { %v10286_v55 = vpack.c.bf16 %v396_v51, %v396_v51  ;;  %v399_v57 = vadd.f32 %v8429_v31, %v398_v53  ;;  %v430_v63 = vpop.f32.mrb[7].mxu1  ;;  %v439_v12 = vadd.f32 %v8924_v59, %v8429_v31  ;;  %v10322_v14 = vpack.c.bf16 %v436_v10, %v436_v10 }
  0xf8   : > { %v10294_v0 = vpack.c.bf16 %v407_v56, %v407_v56  ;;  %v431_v9 = vadd.f32 %v8429_v31, %v430_v63  ;;  %v10314_v11 = vpack.c.bf16 %v428_v7, %v428_v7 }
  0xf9   : > { %v10290_v61 = vpack.c.bf16 %v399_v57, %v399_v57  ;;  %662 = vrot.lane.b32.xlu0 %v10286_v55, %s10156_s18  ;;  %v10326_v15 = vpack.c.bf16 %v439_v12, %v439_v12 }
  0xfa   : > { %v10318_v13 = vpack.c.bf16 %v431_v9, %v431_v9 }
  0xfb   : > { %711 = vrot.lane.b32.xlu1 %v10290_v61, %s10156_s18 }
  0xfd   : > { %760 = vrot.lane.b32.xlu0 %v10288_v60, %s10156_s18 }
  0xff   : > { %809 = vrot.lane.b32.xlu1 %v10294_v0, %s10156_s18 }
 0x101   : > { %858 = vrot.lane.b32.xlu0 %v10298_v3, %s10156_s18 }
 0x103   : > { %907 = vrot.lane.b32.xlu1 %v10302_v5, %s10156_s18 }
 0x105   : > { %956 = vrot.lane.b32.xlu0 %v10306_v6, %s10156_s18 }
 0x107   : > { %1005 = vrot.lane.b32.xlu1 %v10310_v8, %s10156_s18 }
 0x109   : > { %1054 = vrot.lane.b32.xlu0 %v10314_v11, %s10156_s18 }
 0x10b   : > { %1103 = vrot.lane.b32.xlu1 %v10318_v13, %s10156_s18 }
 0x10d   : > { %1152 = vrot.lane.b32.xlu0 %v10322_v14, %s10156_s18 }
 0x10f   : > { %1201 = vrot.lane.b32.xlu1 %v10326_v15, %s10156_s18 }
 0x111   : > { %1490 = vrot.lane.b32.xlu0 %v10280_v47, %s10157_s19 }
 0x113   : > { %1441 = vrot.lane.b32.xlu1 %v10272_v41, %s10157_s19 }
 0x115   : > { %1586 = vrot.lane.b32.xlu0 %v10278_v46, %s10157_s19 }
 0x117   : > { %1538 = vrot.lane.b32.xlu1 %v10270_v37, %s10157_s19 }
 0x119   : > { %1778 = vrot.lane.b32.xlu0 %v10294_v0, %s10157_s19 }
 0x11b   : > { %1634 = vrot.lane.b32.xlu1 %v10286_v55, %s10157_s19 }
 0x11d   : > { %1874 = vrot.lane.b32.xlu0 %v10302_v5, %s10157_s19 }
 0x11f   : > { %1730 = vrot.lane.b32.xlu1 %v10288_v60, %s10157_s19 }
 0x121   : > { %1682 = vrot.lane.b32.xlu0 %v10290_v61, %s10157_s19 }
 0x123   : > { %1826 = vrot.lane.b32.xlu1 %v10298_v3, %s10157_s19 }
 0x127   : > { %1922 = vrot.lane.b32.xlu1 %v10306_v6, %s10157_s19 }
 0x162   : > { %v565_v19 = vpop.permute.xlu1 %564 }
 0x163   : > { %v466_v16 = vpop.permute.xlu0 %465  ;;  %v570_v26 = vsel %vm467_vm2, %v565_v19, 0 }
 0x164   : > { %v472_v17 = vsel %vm467_vm2, %v466_v16, 0 }
 0x165   : > { %8926 = vmatpush3.bf16.xpose.msra.mxu1 %v472_v17 }
 0x166   : > { %8931 = vmatprep.subr.bf16.mxu1 %v12620_v30  ;;  %v614_v23 = vpop.permute.xlu1 %613 }
 0x167   : > { %v516_v18 = vpop.permute.xlu0 %515  ;;  %v619_v32 = vsel %vm467_vm2, %v614_v23, 0 }
 0x168   : > { %v521_v21 = vsel %vm467_vm2, %v516_v18, 0 }
 0x16b   : > { %v663_v20 = vpop.permute.xlu0 %662 }
 0x16c   : > { %v668_v22 = vsel %vm467_vm2, %v663_v20, 0  ;;  %8928 = vmatmul.mubr.msk.bf16.vlgmr.msra.gmra.mrb[8].mxu1 %vm467_vm2, %v10272_v41 }
 0x16d   : > { %8932 = vmatpush3.bf16.xpose.msra.mxu1 %v521_v21  ;;  %8950 = vmatpush3.bf16.xpose.msra.mxu0 %v668_v22  ;;  %v712_v27 = vpop.permute.xlu1 %711 }
 0x16e   : > { %8933 = vmatprep.mubr.msk.bf16.mxu1 %vm10155_vm1, %v12620_v30  ;;  %8937 = vmatprep.subr.bf16.mxu1 %v12620_v30  ;;  %v717_v36 = vsel %vm467_vm2, %v712_v27, 0 }
 0x16f   : > { %8961 = vmatprep.subr.bf16.mxu0 %v12620_v30  ;;  %v761_v24 = vpop.permute.xlu0 %760 }
 0x170   : > { %v766_v25 = vsel %vm467_vm2, %v761_v24, 0 }
 0x171   : > { %v810_v31 = vpop.permute.xlu1 %809 }
 0x172   : > { %v815_v42 = vsel %vm467_vm2, %v810_v31, 0 }
 0x173   : > { %v859_v28 = vpop.permute.xlu0 %858 }
 0x174   : > { %8934 = vmatmul.mubr.msk.bf16.vlgmr.msra.gmra.mrb[12].mxu1 %vm467_vm2, %v10280_v47  ;;  %8952 = vmatmul.mubr.msk.bf16.vlgmr.msra.gmra.mrb[8].mxu0 %vm467_vm2, %v10286_v55  ;;  %v864_v29 = vsel %vm467_vm2, %v859_v28, 0 }
 0x175   : > { %8938 = vmatpush3.bf16.xpose.msra.mxu1 %v570_v26  ;;  %8962 = vmatpush3.bf16.xpose.msra.mxu0 %v766_v25  ;;  %v908_v33 = vpop.permute.xlu1 %907 }
 0x176   : > { %8939 = vmatprep.mubr.msk.bf16.mxu1 %vm10155_vm1, %v12620_v30  ;;  %8963 = vmatprep.mubr.msk.bf16.mxu0 %vm10155_vm1, %v12620_v30  ;;  %v913_v49 = vsel %vm467_vm2, %v908_v33, 0 }
 0x177   : > { %8943 = vmatprep.subr.bf16.mxu1 %v12620_v30  ;;  %8973 = vmatprep.subr.bf16.mxu0 %v12620_v30  ;;  %v957_v34 = vpop.permute.xlu0 %956 }
 0x178   : > { %v962_v35 = vsel %vm467_vm2, %v957_v34, 0 }
 0x179   : > { %v1006_v38 = vpop.permute.xlu1 %1005 }
 0x17a   : > { %v1011_v51 = vsel %vm467_vm2, %v1006_v38, 0 }
 0x17b   : > { %v1055_v39 = vpop.permute.xlu0 %1054 }
 0x17c   : > { %8940 = vmatmul.mubr.msk.bf16.vlgmr.msra.gmra.mrb[16].mxu1 %vm467_vm2, %v10270_v37  ;;  %8964 = vmatmul.mubr.msk.bf16.vlgmr.msra.gmra.mrb[12].mxu0 %vm467_vm2, %v10288_v60  ;;  %v1060_v40 = vsel %vm467_vm2, %v1055_v39, 0 }
 0x17d   : > { %8944 = vmatpush3.bf16.xpose.msra.mxu1 %v619_v32  ;;  %8974 = vmatpush3.bf16.xpose.msra.mxu0 %v864_v29  ;;  %v1104_v43 = vpop.permute.xlu1 %1103 }
 0x17e   : > { %8945 = vmatprep.mubr.msk.bf16.mxu1 %vm10155_vm1, %v12620_v30  ;;  %8975 = vmatprep.mubr.msk.bf16.mxu0 %vm10155_vm1, %v12620_v30  ;;  %v1109_v53 = vsel %vm467_vm2, %v1104_v43, 0 }
 0x17f   : > { %8955 = vmatprep.subr.bf16.mxu1 %v12620_v30  ;;  %8985 = vmatprep.subr.bf16.mxu0 %v12620_v30  ;;  %v1153_v44 = vpop.permute.xlu0 %1152 }
 0x180   : > { %v1158_v45 = vsel %vm467_vm2, %v1153_v44, 0 }
 0x181   : > { %v1202_v48 = vpop.permute.xlu1 %1201 }
 0x182   : > { %v1207_v54 = vsel %vm467_vm2, %v1202_v48, 0 }
 0x183   : > { %v1491_v56 = vpop.permute.xlu0 %1490 }
 0x184   : > { %8946 = vmatmul.mubr.msk.bf16.vlgmr.msra.gmra.mrb[20].mxu1 %vm467_vm2, %v10278_v46  ;;  %8976 = vmatmul.mubr.msk.bf16.vlgmr.msra.gmra.mrb[16].mxu0 %vm467_vm2, %v10298_v3  ;;  %v1496_v57 = vsel %vm1446_vm3, %v1491_v56, 0 }
 0x185   : > { %8956 = vmatpush3.bf16.xpose.msra.mxu1 %v717_v36  ;;  %8986 = vmatpush3.bf16.xpose.msra.mxu0 %v962_v35  ;;  %v1442_v50 = vpop.permute.xlu1 %1441 }
 0x186   : > { %8957 = vmatprep.mubr.msk.bf16.mxu1 %vm10155_vm1, %v12620_v30  ;;  %8987 = vmatprep.mubr.msk.bf16.mxu0 %vm10155_vm1, %v12620_v30  ;;  %v1448_v52 = vsel %vm1446_vm3, %v1442_v50, 0 }
 0x187   : > { %8967 = vmatprep.subr.bf16.mxu1 %v12620_v30  ;;  %8997 = vmatprep.subr.bf16.mxu0 %v12620_v30 }
 0x18c   : > { %8958 = vmatmul.mubr.msk.bf16.vlgmr.msra.gmra.mrb[24].mxu1 %vm467_vm2, %v10290_v61  ;;  %8988 = vmatmul.mubr.msk.bf16.vlgmr.msra.gmra.mrb[20].mxu0 %vm467_vm2, %v10306_v6 }
 0x18d   : > { %8968 = vmatpush3.bf16.xpose.msra.mxu1 %v815_v42  ;;  %8998 = vmatpush3.bf16.xpose.msra.mxu0 %v1060_v40 }
 0x18e   : > { %8969 = vmatprep.mubr.msk.bf16.mxu1 %vm10155_vm1, %v12620_v30  ;;  %8999 = vmatprep.mubr.msk.bf16.mxu0 %vm10155_vm1, %v12620_v30 }
 0x18f   : > { %8979 = vmatprep.subr.bf16.mxu1 %v12620_v30  ;;  %9009 = vmatprep.subr.bf16.mxu0 %v12620_v30 }
 0x194   : > { %8970 = vmatmul.mubr.msk.bf16.vlgmr.msra.gmra.mrb[28].mxu1 %vm467_vm2, %v10294_v0  ;;  %9000 = vmatmul.mubr.msk.bf16.vlgmr.msra.gmra.mrb[24].mxu0 %vm467_vm2, %v10314_v11 }
 0x195   : > { %8980 = vmatpush3.bf16.xpose.msra.mxu1 %v913_v49  ;;  %9010 = vmatpush3.bf16.xpose.msra.mxu0 %v1158_v45 }
 0x196   : > { %8981 = vmatprep.mubr.msk.bf16.mxu1 %vm10155_vm1, %v12620_v30  ;;  %9011 = vmatprep.mubr.msk.bf16.mxu0 %vm10155_vm1, %v12620_v30 }
 0x197   : > { %8991 = vmatprep.subr.bf16.mxu1 %v12620_v30  ;;  %9021 = vmatprep.subr.bf16.mxu0 %v12620_v30 }
 0x19c   : > { %8982 = vmatmul.mubr.msk.bf16.vlgmr.msra.gmra.mrb[32].mxu1 %vm467_vm2, %v10302_v5  ;;  %9012 = vmatmul.mubr.msk.bf16.vlgmr.msra.gmra.mrb[28].mxu0 %vm467_vm2, %v10322_v14 }
 0x19d   : > { %8992 = vmatpush3.bf16.xpose.msra.mxu1 %v1011_v51  ;;  %9022 = vmatpush3.bf16.msra.mxu0 %v1448_v52 }
 0x19e   : > { %8993 = vmatprep.mubr.msk.bf16.mxu1 %vm10155_vm1, %v12620_v30  ;;  %9003 = vmatprep.subr.bf16.mxu1 %v12620_v30 }
 0x19f   : > { %9023 = vmatprep.mubr.msk.bf16.mxu0 %vm10155_vm1, %v12620_v30  ;;  %9033 = vmatprep.subr.bf16.mxu0 %v12620_v30 }
 0x1a4   : > { %8994 = vmatmul.mubr.msk.bf16.vlgmr.msra.gmra.mrb[36].mxu1 %vm467_vm2, %v10310_v8 }
 0x1a5   : > { %9004 = vmatpush3.bf16.xpose.msra.mxu1 %v1109_v53  ;;  %9005 = vmatprep.mubr.msk.bf16.mxu1 %vm10155_vm1, %v12620_v30 }
 0x1a6   : > { %9015 = vmatprep.subr.bf16.mxu1 %v12620_v30 }
 0x1ac   : > { %9006 = vmatmul.mubr.msk.bf16.vlgmr.msra.gmra.mrb[40].mxu1 %vm467_vm2, %v10318_v13 }
 0x1ad   : > { %9016 = vmatpush3.bf16.xpose.msra.mxu1 %v1207_v54  ;;  %9017 = vmatprep.mubr.msk.bf16.mxu1 %vm10155_vm1, %v12620_v30 }
 0x1ae   : > { %9027 = vmatprep.subr.bf16.mxu1 %v12620_v30 }
 0x1b4   : > { %9018 = vmatmul.mubr.msk.bf16.vlgmr.msra.gmra.mrb[44].mxu1 %vm467_vm2, %v10326_v15 }
 0x1b5   : > { %9028 = vmatpush3.bf16.msra.mxu1 %v1496_v57  ;;  %9029 = vmatprep.mubr.msk.bf16.mxu1 %vm10155_vm1, %v12620_v30 }
 0x1b6   : > { %9039 = vmatprep.subr.bf16.mxu1 %v12620_v30 }
 0x23f   : > { %v10456_v58 = vpop.f32.mrb[8].mxu1 }
 0x240   : > { %v8929_v59 = vpop.f32.mrb[9].mxu1  ;;  %v1249_v62 = vsel %vm467_vm2, %v10456_v58, -inf }
 0x241   : > { %1250 = vmax.xlane.f32.xlu0 %v1249_v62  ;;  %v511_v63 = vpop.f32.mrb[10].mxu1 }
 0x242   : > { %v8930_v1 = vpop.f32.mrb[11].mxu1 }
 0x247   : > { %v10460_v2 = vpop.f32.mrb[12].mxu1  ;;  %v10462_v4 = vpop.f32.mrb[8].mxu0 }
 0x248   : > { %v8935_v7 = vpop.f32.mrb[13].mxu1  ;;  %v8953_v9 = vpop.f32.mrb[9].mxu0  ;;  %v1252_v10 = vsel %vm467_vm2, %v10460_v2, -inf  ;;  %v1261_v19 = vsel %vm467_vm2, %v10462_v4, -inf }
 0x249   : > { %1253 = vmax.xlane.f32.xlu1 %v1252_v10  ;;  %v560_v12 = vpop.f32.mrb[14].mxu1  ;;  %v707_v16 = vpop.f32.mrb[10].mxu0 }
 0x24a   : > { %v8936_v17 = vpop.f32.mrb[15].mxu1  ;;  %v8954_v18 = vpop.f32.mrb[11].mxu0 }
 0x24d   : > { %1262 = vmax.xlane.f32.xlu1 %v1261_v19 }
 0x24f   : > { %v10468_v20 = vpop.f32.mrb[16].mxu1  ;;  %v10470_v21 = vpop.f32.mrb[12].mxu0 }
 0x250   : > { %v8941_v22 = vpop.f32.mrb[17].mxu1  ;;  %v8965_v23 = vpop.f32.mrb[13].mxu0  ;;  %v1255_v24 = vsel %vm467_vm2, %v10468_v20, -inf  ;;  %v1267_v25 = vsel %vm467_vm2, %v10470_v21, -inf }
 0x251   : > { %1256 = vmax.xlane.f32.xlu0 %v1255_v24  ;;  %v609_v26 = vpop.f32.mrb[18].mxu1  ;;  %1268 = vmax.xlane.f32.xlu1 %v1267_v25  ;;  %v805_v27 = vpop.f32.mrb[14].mxu0 }
 0x252   : > { %v8942_v28 = vpop.f32.mrb[19].mxu1  ;;  %v8966_v29 = vpop.f32.mrb[15].mxu0 }
 0x257   : > { %v10476_v31 = vpop.f32.mrb[20].mxu1  ;;  %v10478_v32 = vpop.f32.mrb[16].mxu0 }
 0x258   : > { %v8947_v33 = vpop.f32.mrb[21].mxu1  ;;  %v8977_v34 = vpop.f32.mrb[17].mxu0  ;;  %v1258_v35 = vsel %vm467_vm2, %v10476_v31, -inf  ;;  %v1273_v36 = vsel %vm467_vm2, %v10478_v32, -inf }
 0x259   : > { %1259 = vmax.xlane.f32.xlu0 %v1258_v35  ;;  %v658_v38 = vpop.f32.mrb[22].mxu1  ;;  %1274 = vmax.xlane.f32.xlu1 %v1273_v36  ;;  %v903_v39 = vpop.f32.mrb[18].mxu0 }
 0x25a   : > { %v8948_v40 = vpop.f32.mrb[23].mxu1  ;;  %v8978_v42 = vpop.f32.mrb[19].mxu0 }
 0x25f   : > { %v10484_v43 = vpop.f32.mrb[24].mxu1  ;;  %v10486_v44 = vpop.f32.mrb[20].mxu0 }
 0x260   : > { %v8959_v45 = vpop.f32.mrb[25].mxu1  ;;  %v8989_v48 = vpop.f32.mrb[21].mxu0  ;;  %v1264_v49 = vsel %vm467_vm2, %v10484_v43, -inf }
 0x261   : > { %1265 = vmax.xlane.f32.xlu0 %v1264_v49  ;;  %v756_v50 = vpop.f32.mrb[26].mxu1  ;;  %v1001_v51 = vpop.f32.mrb[22].mxu0  ;;  %v1279_v49 = vsel %vm467_vm2, %v10486_v44, -inf }
 0x262   : > { %v8960_v52 = vpop.f32.mrb[27].mxu1  ;;  %v8990_v53 = vpop.f32.mrb[23].mxu0 }
 0x263   : > { %v10524_v52 = vpop.permute.xlu0 %1586  ;;  %v10526_v53 = vpop.permute.xlu1 %1538 }
 0x267   : > { %v10490_v54 = vpop.f32.mrb[28].mxu1  ;;  %v10492_v56 = vpop.f32.mrb[24].mxu0 }
 0x268   : > { %v8971_v57 = vpop.f32.mrb[29].mxu1  ;;  %v9001_v59 = vpop.f32.mrb[25].mxu0  ;;  %v1270_v62 = vsel %vm467_vm2, %v10490_v54, -inf  ;;  %v1285_v50 = vsel %vm467_vm2, %v10492_v56, -inf }
 0x269   : > { %1271 = vmax.xlane.f32.xlu0 %v1270_v62  ;;  %v854_v63 = vpop.f32.mrb[30].mxu1  ;;  %v1099_v1 = vpop.f32.mrb[26].mxu0 }
 0x26a   : > { %v8972_v7 = vpop.f32.mrb[31].mxu1  ;;  %1970 = vrot.lane.b32.xlu1 %v10310_v8, %s10157_s19  ;;  %v9002_v9 = vpop.f32.mrb[27].mxu0 }
 0x26b   : > { %v10528_v57 = vpop.permute.xlu0 %1778  ;;  %v10530_v59 = vpop.permute.xlu1 %1634 }
 0x26f   : > { %v10498_v10 = vpop.f32.mrb[32].mxu1  ;;  %v10500_v12 = vpop.f32.mrb[28].mxu0 }
 0x270   : > { %v8983_v16 = vpop.f32.mrb[33].mxu1  ;;  %v9013_v17 = vpop.f32.mrb[29].mxu0  ;;  %v1276_v18 = vsel %vm467_vm2, %v10498_v10, -inf  ;;  %v1291_v51 = vsel %vm467_vm2, %v10500_v12, -inf }
 0x271   : > { %1277 = vmax.xlane.f32.xlu0 %v1276_v18  ;;  %v952_v19 = vpop.f32.mrb[34].mxu1  ;;  %v1197_v22 = vpop.f32.mrb[30].mxu0 }
 0x272   : > { %v8984_v23 = vpop.f32.mrb[35].mxu1  ;;  %v9014_v24 = vpop.f32.mrb[31].mxu0 }
 0x273   : > { %v10532_v62 = vpop.permute.xlu0 %1874  ;;  %v10534_v63 = vpop.permute.xlu1 %1730 }
 0x277   : > { %v10504_v25 = vpop.f32.mrb[36].mxu1  ;;  %v10536_v1 = vpop.permute.xlu0 %1682 }
 0x278   : > { %v8995_v26 = vpop.f32.mrb[37].mxu1  ;;  %v1282_v27 = vsel %vm467_vm2, %v10504_v25, -inf  ;;  %v10538_v7 = vpop.permute.xlu1 %1826 }
 0x279   : > { %1283 = vmax.xlane.f32.xlu0 %v1282_v27  ;;  %v1050_v28 = vpop.f32.mrb[38].mxu1 }
 0x27a   : > { %v8996_v29 = vpop.f32.mrb[39].mxu1 }
 0x27c   : > { %v10541_v18 = vpop.permute.xlu1 %1922 }
 0x27f   : > { %v10508_v33 = vpop.f32.mrb[40].mxu1 }
 0x280   : > { %v9007_v34 = vpop.f32.mrb[41].mxu1  ;;  %v1288_v35 = vsel %vm467_vm2, %v10508_v33, -inf }
 0x281   : > { %1289 = vmax.xlane.f32.xlu0 %v1288_v35  ;;  %v1148_v36 = vpop.f32.mrb[42].mxu1 }
 0x282   : > { %v9008_v38 = vpop.f32.mrb[43].mxu1 }
 0x287   : > { %v10512_v39 = vpop.f32.mrb[44].mxu1 }
 0x288   : > { %v9019_v40 = vpop.f32.mrb[45].mxu1  ;;  %v1294_v42 = vsel %vm467_vm2, %v10512_v39, -inf }
 0x289   : > { %1295 = vmax.xlane.f32.xlu0 %v1294_v42  ;;  %v1246_v45 = vpop.f32.mrb[46].mxu1 }
 0x28a   : > { %v9020_v48 = vpop.f32.mrb[47].mxu1 }
 0x28e   : > { %1280 = vmax.xlane.f32.xlu1 %v1279_v49 }
 0x292   : > { %1286 = vmax.xlane.f32.xlu1 %v1285_v50 }
 0x296   : > { %1292 = vmax.xlane.f32.xlu1 %v1291_v51 }
 0x29f   : > { %2018 = vrot.lane.b32.xlu0 %v10314_v11, %s10157_s19 }
 0x2ce   : > { %v1251_v9 = vpop.xlane.xlu0 %1250 }
 0x2cf   : > { %v1297_v16 = vsub.f32 %v10456_v58, %v1251_v9 }
 0x2d1   : > { %v1313_v17 = vmul.f32 1.442695, %v1297_v16 }
 0x2d3   : > { %9842 = vpow2.f32 %v1313_v17 }
 0x2d6   : > { %v1254_v19 = vpop.xlane.xlu1 %1253 }
 0x2d7   : > { %v1298_v22 = vsub.f32 %v10460_v2, %v1254_v19 }
 0x2d9   : > { %v1315_v23 = vmul.f32 1.442695, %v1298_v22 }
 0x2da   : > { %v1263_v24 = vpop.xlane.xlu1 %1262 }
 0x2db   : > { %9844 = vpow2.f32 %v1315_v23  ;;  %v1301_v26 = vsub.f32 %v10462_v4, %v1263_v24 }
 0x2dd   : > { %v10545_v27 = vpop.eup %9842  ;;  %v1321_v28 = vmul.f32 1.442695, %v1301_v26 }
 0x2de   : > { %v1257_v29 = vpop.xlane.xlu0 %1256  ;;  %v1345_v34 = vsel %vm467_vm2, %v10545_v27, 0.0 }
 0x2df   : > { %9846 = vpow2.f32 %v1321_v28  ;;  %v1299_v58 = vsub.f32 %v10468_v20, %v1257_v29  ;;  %1346 = vadd.xlane.f32.xlu1 %v1345_v34 }
 0x2e1   : > { %v1317_v35 = vmul.f32 1.442695, %v1299_v58 }
 0x2e3   : > { %9848 = vpow2.f32 %v1317_v35  ;;  %v1269_v35 = vpop.xlane.xlu1 %1268 }
 0x2e5   : > { %v10550_v36 = vpop.eup %9844 }
 0x2e6   : > { %v1260_v2 = vpop.xlane.xlu0 %1259  ;;  %v1348_v38 = vsel %vm467_vm2, %v10550_v36, 0.0 }
 0x2e7   : > { %v1300_v4 = vsub.f32 %v10476_v31, %v1260_v2  ;;  %1349 = vadd.xlane.f32.xlu0 %v1348_v38 }
 0x2e9   : > { %v10555_v40 = vpop.eup %9846  ;;  %v1319_v42 = vmul.f32 1.442695, %v1300_v4  ;;  %v1303_v4 = vsub.f32 %v10470_v21, %v1269_v35 }
 0x2ea   : > { %v1357_v45 = vsel %vm467_vm2, %v10555_v40, 0.0 }
 0x2eb   : > { %1358 = vadd.xlane.f32.xlu1 %v1357_v45  ;;  %9850 = vpow2.f32 %v1319_v42  ;;  %v1275_v45 = vpop.xlane.xlu1 %1274 }
 0x2ed   : > { %v10559_v20 = vpop.eup %9848 }
 0x2ee   : > { %v1266_v48 = vpop.xlane.xlu0 %1265  ;;  %v1351_v50 = vsel %vm467_vm2, %v10559_v20, 0.0 }
 0x2ef   : > { %v1302_v49 = vsub.f32 %v10484_v43, %v1266_v48  ;;  %1352 = vadd.xlane.f32.xlu1 %v1351_v50 }
 0x2f1   : > { %v1323_v51 = vmul.f32 1.442695, %v1302_v49  ;;  %v1325_v49 = vmul.f32 1.442695, %v1303_v4 }
 0x2f3   : > { %9852 = vpow2.f32 %v1323_v51 }
 0x2f5   : > { %v10564_v31 = vpop.eup %9850 }
 0x2f6   : > { %v1272_v9 = vpop.xlane.xlu0 %1271  ;;  %v1354_v17 = vsel %vm467_vm2, %v10564_v31, 0.0 }
 0x2f7   : > { %v1304_v16 = vsub.f32 %v10490_v54, %v1272_v9  ;;  %1355 = vadd.xlane.f32.xlu0 %v1354_v17 }
 0x2f9   : > { %v1327_v19 = vmul.f32 1.442695, %v1304_v16  ;;  %v10592_v16 = vpop.permute.xlu1 %1970 }
 0x2fb   : > { %9854 = vpow2.f32 %v1327_v19 }
 0x2fd   : > { %v10569_v22 = vpop.eup %9852 }
 0x2fe   : > { %v1278_v43 = vpop.xlane.xlu0 %1277  ;;  %v1360_v23 = vsel %vm467_vm2, %v10569_v22, 0.0 }
 0x2ff   : > { %v1306_v24 = vsub.f32 %v10498_v10, %v1278_v43  ;;  %1361 = vadd.xlane.f32.xlu0 %v1360_v23 }
 0x300   : > { %2066 = vrot.lane.b32.xlu1 %v10318_v13, %s10157_s19 }
 0x301   : > { %v1331_v26 = vmul.f32 1.442695, %v1306_v24 }
 0x303   : > { %9856 = vpow2.f32 %v1331_v26 }
 0x305   : > { %v10576_v54 = vpop.eup %9854 }
 0x306   : > { %v1284_v28 = vpop.xlane.xlu0 %1283  ;;  %v1366_v29 = vsel %vm467_vm2, %v10576_v54, 0.0 }
 0x307   : > { %v1308_v34 = vsub.f32 %v10504_v25, %v1284_v28  ;;  %1367 = vadd.xlane.f32.xlu0 %v1366_v29  ;;  %v1305_v25 = vsub.f32 %v10478_v32, %v1275_v45 }
 0x309   : > { %v1335_v58 = vmul.f32 1.442695, %v1308_v34  ;;  %v1329_v9 = vmul.f32 1.442695, %v1305_v25 }
 0x30b   : > { %9858 = vpow2.f32 %v1335_v58 }
 0x30d   : > { %v10581_v2 = vpop.eup %9856 }
 0x30e   : > { %v1290_v10 = vpop.xlane.xlu0 %1289  ;;  %v1372_v38 = vsel %vm467_vm2, %v10581_v2, 0.0 }
 0x30f   : > { %v1310_v42 = vsub.f32 %v10508_v33, %v1290_v10  ;;  %1373 = vadd.xlane.f32.xlu0 %v1372_v38 }
 0x311   : > { %v1339_v48 = vmul.f32 1.442695, %v1310_v42 }
 0x313   : > { %9860 = vpow2.f32 %v1339_v48 }
 0x314   : > { %9862 = vpow2.f32 %v1325_v49 }
 0x315   : > { %v10588_v50 = vpop.eup %9858  ;;  %9864 = vpow2.f32 %v1329_v9 }
 0x316   : > { %v1378_v51 = vsel %vm467_vm2, %v10588_v50, 0.0  ;;  %v1296_v45 = vpop.xlane.xlu0 %1295 }
 0x317   : > { %1379 = vadd.xlane.f32.xlu0 %v1378_v51  ;;  %v1312_v48 = vsub.f32 %v10512_v39, %v1296_v45 }
 0x319   : > { %v1343_v49 = vmul.f32 1.442695, %v1312_v48 }
 0x31a   : > { %v10654_v9 = vpop.permute.xlu0 %2018 }
 0x31b   : > { %v1281_v21 = vpop.xlane.xlu1 %1280 }
 0x31c   : > { %v1307_v33 = vsub.f32 %v10486_v44, %v1281_v21 }
 0x31d   : > { %v10595_v17 = vpop.eup %9860 }
 0x31e   : > { %v1333_v19 = vmul.f32 1.442695, %v1307_v33  ;;  %v1384_v32 = vsel %vm467_vm2, %v10595_v17, 0.0  ;;  %v10600_v24 = vpop.eup %9862 }
 0x31f   : > { %v1287_v43 = vpop.xlane.xlu1 %1286  ;;  %1385 = vadd.xlane.f32.xlu0 %v1384_v32  ;;  %v1363_v44 = vsel %vm467_vm2, %v10600_v24, 0.0  ;;  %v10605_v34 = vpop.eup %9864 }
 0x320   : > { %9866 = vpow2.f32 %v1333_v19  ;;  %v1309_v23 = vsub.f32 %v10492_v56, %v1287_v43  ;;  %v1369_v35 = vsel %vm467_vm2, %v10605_v34, 0.0 }
 0x322   : > { %v1337_v26 = vmul.f32 1.442695, %v1309_v23  ;;  %v1544_v23 = vsel %vm1446_vm3, %v10526_v53, 0 }
 0x323   : > { %v1293_v28 = vpop.xlane.xlu1 %1292 }
 0x324   : > { %9868 = vpow2.f32 %v1337_v26  ;;  %v1311_v29 = vsub.f32 %v10500_v12, %v1293_v28  ;;  %1364 = vadd.xlane.f32.xlu1 %v1363_v44 }
 0x326   : > { %v1341_v58 = vmul.f32 1.442695, %v1311_v29  ;;  %v1592_v29 = vsel %vm1446_vm3, %v10524_v52, 0 }
 0x328   : > { %9870 = vpow2.f32 %v1341_v58  ;;  %1370 = vadd.xlane.f32.xlu1 %v1369_v35 }
 0x329   : > { %9872 = vpow2.f32 %v1343_v49 }
 0x32a   : > { %v10609_v56 = vpop.eup %9866 }
 0x32b   : > { %v1375_v10 = vsel %vm467_vm2, %v10609_v56, 0.0 }
 0x32c   : > { %1376 = vadd.xlane.f32.xlu1 %v1375_v10 }
 0x32e   : > { %v10613_v38 = vpop.eup %9868 }
 0x32f   : > { %v1381_v12 = vsel %vm467_vm2, %v10613_v38, 0.0 }
 0x330   : > { %1382 = vadd.xlane.f32.xlu1 %v1381_v12  ;;  %v1640_v12 = vsel %vm1446_vm3, %v10530_v59, 0 }
 0x332   : > { %v10617_v4 = vpop.eup %9870 }
 0x333   : > { %v1387_v42 = vsel %vm467_vm2, %v10617_v4, 0.0  ;;  %v10630_v25 = vpop.eup %9872 }
 0x334   : > { %1388 = vadd.xlane.f32.xlu1 %v1387_v42  ;;  %v1390_v39 = vsel %vm467_vm2, %v10630_v25, 0.0 }
 0x335   : > { %2114 = vrot.lane.b32.xlu0 %v10322_v14, %s10157_s19 }
 0x345   : > { %2162 = vrot.lane.b32.xlu1 %v10326_v15, %s10157_s19 }
 0x349   : > { %2270 = vrot.lane.b32.xlu1 %v10280_v47, %s10158_s20 }
 0x34d   : > { %2268 = vrot.lane.b32.xlu1 %v10280_v47, %s10159_s21 }
 0x351   : > { %2370 = vrot.lane.b32.xlu1 %v10278_v46, %s10158_s20 }
 0x354   : > { %1391 = vadd.xlane.f32.xlu0 %v1390_v39  ;;  %v1736_v39 = vsel %vm1446_vm3, %v10534_v63, 0 }
 0x355   : > { %2368 = vrot.lane.b32.xlu1 %v10278_v46, %s10159_s21 }
 0x359   : > { %2470 = vrot.lane.b32.xlu1 %v10290_v61, %s10158_s20 }
 0x35d   : > { %2468 = vrot.lane.b32.xlu1 %v10290_v61, %s10159_s21 }
 0x361   : > { %2570 = vrot.lane.b32.xlu1 %v10294_v0, %s10158_s20 }
 0x365   : > { %2568 = vrot.lane.b32.xlu1 %v10294_v0, %s10159_s21 }
 0x369   : > { %2670 = vrot.lane.b32.xlu1 %v10302_v5, %s10158_s20 }
 0x36a   : > { %2220 = vrot.lane.b32.xlu0 %v10272_v41, %s10158_s20 }
 0x36c   : > { %v1347_v51 = vpop.xlane.xlu1 %1346 }
 0x36d   : > { %9874 = vrcp.f32 %v1347_v51  ;;  %2668 = vrot.lane.b32.xlu1 %v10302_v5, %s10159_s21 }
 0x36e   : > { %2218 = vrot.lane.b32.xlu0 %v10272_v41, %s10159_s21 }
 0x371   : > { %2770 = vrot.lane.b32.xlu1 %v10310_v8, %s10158_s20 }
 0x372   : > { %2320 = vrot.lane.b32.xlu0 %v10270_v37, %s10158_s20 }
 0x374   : > { %v1350_v21 = vpop.xlane.xlu0 %1349 }
 0x375   : > { %9876 = vrcp.f32 %v1350_v21  ;;  %2768 = vrot.lane.b32.xlu1 %v10310_v8, %s10159_s21  ;;  %v1784_v21 = vsel %vm1446_vm3, %v10528_v57, 0 }
 0x376   : > { %2318 = vrot.lane.b32.xlu0 %v10270_v37, %s10159_s21 }
 0x377   : > { %v9875_v33 = vpop.eup %9874 }
 0x378   : > { %v1359_v19 = vpop.xlane.xlu1 %1358  ;;  %v1409_v32 = vmul.f32 %v9875_v33, %v10545_v27 }
 0x379   : > { %2870 = vrot.lane.b32.xlu1 %v10318_v13, %s10158_s20 }
 0x37a   : > { %2420 = vrot.lane.b32.xlu0 %v10286_v55, %s10158_s20  ;;  %v1425_v43 = vpack.c.bf16 %v1409_v32, %v1409_v32  ;;  %v1880_v32 = vsel %vm1446_vm3, %v10532_v62, 0 }
 0x37c   : > { %9024 = vmatmul.mubr.msk.bf16.vlgmr.msra.gmra.mrb[32].mxu0 %vm467_vm2, %v1425_v43  ;;  %v1353_v26 = vpop.xlane.xlu1 %1352 }
 0x37d   : > { %9034 = vmatpush3.bf16.msra.mxu0 %v1544_v23  ;;  %9035 = vmatprep.mubr.msk.bf16.mxu0 %vm10155_vm1, %v12620_v30  ;;  %9878 = vrcp.f32 %v1353_v26  ;;  %v1976_v26 = vsel %vm1446_vm3, %v10592_v16, 0 }
 0x37e   : > { %2868 = vrot.lane.b32.xlu1 %v10318_v13, %s10159_s21  ;;  %2418 = vrot.lane.b32.xlu0 %v10286_v55, %s10159_s21  ;;  %9880 = vrcp.f32 %v1359_v19 }
 0x37f   : > { %v9877_v27 = vpop.eup %9876  ;;  %9045 = vmatprep.subr.bf16.mxu0 %v12620_v30 }
 0x380   : > { %v1410_v28 = vmul.f32 %v9877_v27, %v10550_v36  ;;  %v2067_v27 = vpop.permute.xlu1 %2066 }
 0x381   : > { %v2072_v16 = vsel %vm1446_vm3, %v2067_v27, 0 }
 0x382   : > { %2970 = vrot.lane.b32.xlu1 %v10326_v15, %s10158_s20  ;;  %2520 = vrot.lane.b32.xlu0 %v10288_v60, %s10158_s20  ;;  %v1426_v53 = vpack.c.bf16 %v1410_v28, %v1410_v28 }
 0x384   : > { %9030 = vmatmul.mubr.msk.bf16.vlgmr.msra.gmra.mrb[48].mxu1 %vm467_vm2, %v1426_v53  ;;  %v1356_v44 = vpop.xlane.xlu0 %1355 }
 0x385   : > { %9040 = vmatpush3.bf16.msra.mxu1 %v1592_v29  ;;  %9041 = vmatprep.mubr.msk.bf16.mxu1 %vm10155_vm1, %v12620_v30  ;;  %9882 = vrcp.f32 %v1356_v44 }
 0x386   : > { %2968 = vrot.lane.b32.xlu1 %v10326_v15, %s10159_s21  ;;  %2518 = vrot.lane.b32.xlu0 %v10288_v60, %s10159_s21 }
 0x387   : > { %9051 = vmatprep.subr.bf16.mxu1 %v12620_v30  ;;  %v9879_v36 = vpop.eup %9878 }
 0x388   : > { %v1411_v58 = vmul.f32 %v9879_v36, %v10559_v20  ;;  %v9881_v35 = vpop.eup %9880 }
 0x389   : > { %v1413_v20 = vmul.f32 %v9881_v35, %v10555_v40  ;;  %v1688_v40 = vsel %vm1446_vm3, %v10536_v1, 0 }
 0x38a   : > { %3210 = vrot.lane.b32.xlu1 %v10272_v41, %s10160_s22  ;;  %2620 = vrot.lane.b32.xlu0 %v10298_v3, %s10158_s20  ;;  %v1427_v52 = vpack.c.bf16 %v1411_v58, %v1411_v58 }
 0x38b   : > { %v1429_v48 = vpack.c.bf16 %v1413_v20, %v1413_v20 }
 0x38c   : > { %v1362_v10 = vpop.xlane.xlu0 %1361  ;;  %9036 = vmatmul.mubr.msk.bf16.vlgmr.msra.gmra.mrb[36].mxu0 %vm467_vm2, %v1427_v52 }
 0x38d   : > { %9884 = vrcp.f32 %v1362_v10  ;;  %9046 = vmatpush3.bf16.msra.mxu0 %v1640_v12  ;;  %9047 = vmatprep.mubr.msk.bf16.mxu0 %vm10155_vm1, %v12620_v30 }
 0x38e   : > { %3306 = vrot.lane.b32.xlu1 %v10270_v37, %s10160_s22  ;;  %2618 = vrot.lane.b32.xlu0 %v10298_v3, %s10159_s21 }
 0x38f   : > { %v9883_v42 = vpop.eup %9882  ;;  %9057 = vmatprep.subr.bf16.mxu0 %v12620_v30 }
 0x390   : > { %v1412_v59 = vmul.f32 %v9883_v42, %v10564_v31 }
 0x392   : > { %3402 = vrot.lane.b32.xlu1 %v10286_v55, %s10160_s22  ;;  %2720 = vrot.lane.b32.xlu0 %v10306_v6, %s10158_s20  ;;  %v1428_v45 = vpack.c.bf16 %v1412_v59, %v1412_v59  ;;  %v1832_v59 = vsel %vm1446_vm3, %v10538_v7, 0  ;;  %v1928_v7 = vsel %vm1446_vm3, %v10541_v18, 0 }
 0x394   : > { %v1368_v49 = vpop.xlane.xlu0 %1367  ;;  %9042 = vmatmul.mubr.msk.bf16.vlgmr.msra.gmra.mrb[52].mxu1 %vm467_vm2, %v1428_v45  ;;  %9048 = vmatmul.mubr.msk.bf16.vlgmr.msra.gmra.mrb[40].mxu0 %vm467_vm2, %v1429_v48 }
 0x395   : > { %9886 = vrcp.f32 %v1368_v49  ;;  %9052 = vmatpush3.bf16.msra.mxu1 %v1688_v40  ;;  %9058 = vmatpush3.bf16.msra.mxu0 %v1736_v39 }
 0x396   : > { %3498 = vrot.lane.b32.xlu1 %v10288_v60, %s10160_s22  ;;  %2718 = vrot.lane.b32.xlu0 %v10306_v6, %s10159_s21 }
 0x397   : > { %v9885_v31 = vpop.eup %9884  ;;  %9053 = vmatprep.mubr.msk.bf16.mxu1 %vm10155_vm1, %v12620_v30  ;;  %9063 = vmatprep.subr.bf16.mxu1 %v12620_v30 }
 0x398   : > { %v1414_v63 = vmul.f32 %v9885_v31, %v10569_v22  ;;  %9059 = vmatprep.mubr.msk.bf16.mxu0 %vm10155_vm1, %v12620_v30  ;;  %9069 = vmatprep.subr.bf16.mxu0 %v12620_v30 }
 0x39a   : > { %v1430_v1 = vpack.c.bf16 %v1414_v63, %v1414_v63  ;;  %3594 = vrot.lane.b32.xlu1 %v10298_v3, %s10160_s22  ;;  %2820 = vrot.lane.b32.xlu0 %v10314_v11, %s10158_s20 }
 0x39c   : > { %v1374_v51 = vpop.xlane.xlu0 %1373  ;;  %9054 = vmatmul.mubr.msk.bf16.vlgmr.msra.gmra.mrb[56].mxu1 %vm467_vm2, %v1430_v1 }
 0x39d   : > { %9888 = vrcp.f32 %v1374_v51  ;;  %9064 = vmatpush3.bf16.msra.mxu1 %v1784_v21  ;;  %9065 = vmatprep.mubr.msk.bf16.mxu1 %vm10155_vm1, %v12620_v30  ;;  %v2024_v51 = vsel %vm1446_vm3, %v10654_v9, 0 }
 0x39e   : > { %2818 = vrot.lane.b32.xlu0 %v10314_v11, %s10159_s21  ;;  %9075 = vmatprep.subr.bf16.mxu1 %v12620_v30 }
 0x39f   : > { %v9887_v22 = vpop.eup %9886 }
 0x3a0   : > { %v1416_v33 = vmul.f32 %v9887_v22, %v10576_v54 }
 0x3a2   : > { %v1432_v19 = vpack.c.bf16 %v1416_v33, %v1416_v33  ;;  %2920 = vrot.lane.b32.xlu0 %v10322_v14, %s10158_s20 }
 0x3a4   : > { %v1380_v57 = vpop.xlane.xlu0 %1379  ;;  %9066 = vmatmul.mubr.msk.bf16.vlgmr.msra.gmra.mrb[60].mxu1 %vm467_vm2, %v1432_v19 }
 0x3a5   : > { %9890 = vrcp.f32 %v1380_v57  ;;  %9076 = vmatpush3.bf16.msra.mxu1 %v1880_v32  ;;  %9077 = vmatprep.mubr.msk.bf16.mxu1 %vm10155_vm1, %v12620_v30 }
 0x3a6   : > { %2918 = vrot.lane.b32.xlu0 %v10322_v14, %s10159_s21  ;;  %9087 = vmatprep.subr.bf16.mxu1 %v12620_v30 }
 0x3a7   : > { %v9889_v43 = vpop.eup %9888 }
 0x3a8   : > { %v1418_v54 = vmul.f32 %v9889_v43, %v10581_v2 }
 0x3aa   : > { %v1434_v23 = vpack.c.bf16 %v1418_v54, %v1418_v54  ;;  %3258 = vrot.lane.b32.xlu0 %v10280_v47, %s10160_s22 }
 0x3ac   : > { %v1386_v62 = vpop.xlane.xlu0 %1385  ;;  %9078 = vmatmul.mubr.msk.bf16.vlgmr.msra.gmra.mrb[64].mxu1 %vm467_vm2, %v1434_v23 }
 0x3ad   : > { %9892 = vrcp.f32 %v1386_v62  ;;  %9088 = vmatpush3.bf16.msra.mxu1 %v1976_v26  ;;  %9089 = vmatprep.mubr.msk.bf16.mxu1 %vm10155_vm1, %v12620_v30 }
 0x3ae   : > { %3354 = vrot.lane.b32.xlu0 %v10278_v46, %s10160_s22  ;;  %9099 = vmatprep.subr.bf16.mxu1 %v12620_v30 }
 0x3af   : > { %v9891_v28 = vpop.eup %9890 }
 0x3b0   : > { %v1420_v2 = vmul.f32 %v9891_v28, %v10588_v50 }
 0x3b1   : > { %v1365_v53 = vpop.xlane.xlu1 %1364 }
 0x3b2   : > { %v1436_v29 = vpack.c.bf16 %v1420_v2, %v1420_v2  ;;  %9894 = vrcp.f32 %v1365_v53  ;;  %3450 = vrot.lane.b32.xlu0 %v10290_v61, %s10160_s22 }
 0x3b4   : > { %9090 = vmatmul.mubr.msk.bf16.vlgmr.msra.gmra.mrb[68].mxu1 %vm467_vm2, %v1436_v29 }
 0x3b5   : > { %9100 = vmatpush3.bf16.msra.mxu1 %v2072_v16  ;;  %v1371_v44 = vpop.xlane.xlu1 %1370  ;;  %9101 = vmatprep.mubr.msk.bf16.mxu1 %vm10155_vm1, %v12620_v30 }
 0x3b6   : > { %9896 = vrcp.f32 %v1371_v44  ;;  %3546 = vrot.lane.b32.xlu0 %v10294_v0, %s10160_s22  ;;  %9111 = vmatprep.subr.bf16.mxu1 %v12620_v30 }
 0x3b7   : > { %v9893_v36 = vpop.eup %9892 }
 0x3b8   : > { %v1422_v50 = vmul.f32 %v9893_v36, %v10595_v17 }
 0x3b9   : > { %v1377_v58 = vpop.xlane.xlu1 %1376 }
 0x3ba   : > { %v1438_v52 = vpack.c.bf16 %v1422_v50, %v1422_v50  ;;  %9898 = vrcp.f32 %v1377_v58 }
 0x3bc   : > { %v9895_v35 = vpop.eup %9894  ;;  %9102 = vmatmul.mubr.msk.bf16.vlgmr.msra.gmra.mrb[72].mxu1 %vm467_vm2, %v1438_v52 }
 0x3bd   : > { %v1383_v10 = vpop.xlane.xlu1 %1382  ;;  %v1415_v12 = vmul.f32 %v9895_v35, %v10600_v24  ;;  %9113 = vmatprep.mubr.msk.bf16.mxu1 %vm10155_vm1, %v12620_v30 }
 0x3be   : > { %9900 = vrcp.f32 %v1383_v10 }
 0x3bf   : > { %v1431_v20 = vpack.c.bf16 %v1415_v12, %v1415_v12 }
 0x3c0   : > { %v9897_v42 = vpop.eup %9896 }
 0x3c1   : > { %9060 = vmatmul.mubr.msk.bf16.vlgmr.msra.gmra.mrb[44].mxu0 %vm467_vm2, %v1431_v20  ;;  %v1389_v17 = vpop.xlane.xlu1 %1388  ;;  %v1417_v24 = vmul.f32 %v9897_v42, %v10605_v34 }
 0x3c2   : > { %9070 = vmatpush3.bf16.msra.mxu0 %v1832_v59  ;;  %9071 = vmatprep.mubr.msk.bf16.mxu0 %vm10155_vm1, %v12620_v30  ;;  %9902 = vrcp.f32 %v1389_v17 }
 0x3c3   : > { %9081 = vmatprep.subr.bf16.mxu0 %v12620_v30  ;;  %v1433_v49 = vpack.c.bf16 %v1417_v24, %v1417_v24 }
 0x3c4   : > { %v9899_v39 = vpop.eup %9898 }
 0x3c5   : > { %v2163_v45 = vpop.permute.xlu1 %2162  ;;  %v1419_v34 = vmul.f32 %v9899_v39, %v10609_v56  ;;  %v2115_v56 = vpop.permute.xlu0 %2114 }
 0x3c6   : > { %v2168_v48 = vsel %vm1446_vm3, %v2163_v45, 0  ;;  %v2120_v57 = vsel %vm1446_vm3, %v2115_v56, 0 }
 0x3c7   : > { %9112 = vmatpush3.bf16.msra.mxu1 %v2168_v48  ;;  %v1435_v63 = vpack.c.bf16 %v1419_v34, %v1419_v34 }
 0x3c8   : > { %9123 = vmatprep.subr.bf16.mxu1 %v12620_v30  ;;  %v9901_v1 = vpop.eup %9900 }
 0x3c9   : > { %9072 = vmatmul.mubr.msk.bf16.vlgmr.msra.gmra.mrb[48].mxu0 %vm467_vm2, %v1433_v49  ;;  %v2271_v40 = vpop.permute.xlu1 %2270  ;;  %v1421_v21 = vmul.f32 %v9901_v1, %v10613_v38 }
 0x3ca   : > { %9082 = vmatpush3.bf16.msra.mxu0 %v1928_v7  ;;  %9083 = vmatprep.mubr.msk.bf16.mxu0 %vm10155_vm1, %v12620_v30  ;;  %v2276_v44 = vsel %vm467_vm2, %v2271_v40, 0 }
 0x3cb   : > { %9093 = vmatprep.subr.bf16.mxu0 %v12620_v30  ;;  %v1437_v33 = vpack.c.bf16 %v1421_v21, %v1421_v21 }
 0x3cc   : > { %v9903_v19 = vpop.eup %9902 }
 0x3cd   : > { %v2269_v31 = vpop.permute.xlu1 %2268  ;;  %v1423_v32 = vmul.f32 %v9903_v19, %v10617_v4 }
 0x3cf   : > { %v1439_v43 = vpack.c.bf16 %v1423_v32, %v1423_v32 }
 0x3d1   : > { %9084 = vmatmul.mubr.msk.bf16.vlgmr.msra.gmra.mrb[52].mxu0 %vm467_vm2, %v1435_v63  ;;  %v2371_v18 = vpop.permute.xlu1 %2370 }
 0x3d2   : > { %9094 = vmatpush3.bf16.msra.mxu0 %v2024_v51  ;;  %9095 = vmatprep.mubr.msk.bf16.mxu0 %vm10155_vm1, %v12620_v30  ;;  %v2376_v52 = vsel %vm467_vm2, %v2371_v18, 0 }
 0x3d3   : > { %9105 = vmatprep.subr.bf16.mxu0 %v12620_v30 }
 0x3d5   : > { %v2369_v22 = vpop.permute.xlu1 %2368 }
 0x3d9   : > { %9096 = vmatmul.mubr.msk.bf16.vlgmr.msra.gmra.mrb[56].mxu0 %vm467_vm2, %v1437_v33  ;;  %v2471_v9 = vpop.permute.xlu1 %2470 }
 0x3da   : > { %9106 = vmatpush3.bf16.msra.mxu0 %v2120_v57  ;;  %9107 = vmatprep.mubr.msk.bf16.mxu0 %vm10155_vm1, %v12620_v30  ;;  %v2476_v59 = vsel %vm467_vm2, %v2471_v9, 0 }
 0x3db   : > { %9117 = vmatprep.subr.bf16.mxu0 %v12620_v30 }
 0x3dd   : > { %v2469_v54 = vpop.permute.xlu1 %2468 }
 0x3e1   : > { %v1392_v38 = vpop.xlane.xlu0 %1391  ;;  %9108 = vmatmul.mubr.msk.bf16.vlgmr.msra.gmra.mrb[60].mxu0 %vm467_vm2, %v1439_v43  ;;  %v2571_v26 = vpop.permute.xlu1 %2570 }
 0x3e2   : > { %9904 = vrcp.f32 %v1392_v38  ;;  %9119 = vmatprep.mubr.msk.bf16.mxu0 %vm10155_vm1, %v12620_v30  ;;  %v2576_v49 = vsel %vm467_vm2, %v2571_v26, 0 }
 0x3e5   : > { %v2221_v23 = vpop.permute.xlu0 %2220  ;;  %v10815_v28 = vpop.permute.xlu1 %2568 }
 0x3e6   : > { %v2226_v62 = vsel %vm467_vm2, %v2221_v23, 0 }
 0x3e7   : > { %9118 = vmatpush3.bf16.xpose.msra.mxu0 %v2226_v62 }
 0x3e8   : > { %9129 = vmatprep.subr.bf16.mxu0 %v12620_v30 }
 0x3e9   : > { %v2219_v27 = vpop.permute.xlu0 %2218 }
 0x3ec   : > { %v9905_v4 = vpop.eup %9904 }
 0x3ed   : > { %v2321_v2 = vpop.permute.xlu0 %2320  ;;  %v1424_v53 = vmul.f32 %v9905_v4, %v10630_v25  ;;  %v2671_v25 = vpop.permute.xlu1 %2670 }
 0x3ee   : > { %v2326_v29 = vsel %vm467_vm2, %v2321_v2, 0  ;;  %9120 = vmatmul.mubr.msk.bf16.vlgmr.msra.gmra.mrb[64].mxu0 %vm467_vm2, %v2219_v27 }
 0x3ef   : > { %9130 = vmatpush3.bf16.xpose.msra.mxu0 %v2326_v29  ;;  %v1440_v16 = vpack.c.bf16 %v1424_v53, %v1424_v53  ;;  %9131 = vmatprep.mubr.msk.bf16.mxu0 %vm10155_vm1, %v12620_v30 }
 0x3f0   : > { %9141 = vmatprep.subr.bf16.mxu0 %v12620_v30 }
 0x3f1   : > { %9114 = vmatmul.mubr.msk.bf16.vlgmr.msra.gmra.mrb[76].mxu1 %vm467_vm2, %v1440_v16  ;;  %v2319_v36 = vpop.permute.xlu0 %2318  ;;  %v2669_v35 = vpop.permute.xlu1 %2668 }
 0x3f2   : > { %9124 = vmatpush3.bf16.xpose.msra.mxu1 %v2276_v44  ;;  %9125 = vmatprep.mubr.msk.bf16.mxu1 %vm10155_vm1, %v12620_v30 }
 0x3f3   : > { %9135 = vmatprep.subr.bf16.mxu1 %v12620_v30 }
 0x3f5   : > { %v2421_v50 = vpop.permute.xlu0 %2420  ;;  %v2771_v42 = vpop.permute.xlu1 %2770 }
 0x3f6   : > { %v2426_v58 = vsel %vm467_vm2, %v2421_v50, 0  ;;  %9132 = vmatmul.mubr.msk.bf16.vlgmr.msra.gmra.mrb[68].mxu0 %vm467_vm2, %v2319_v36 }
 0x3f7   : > { %9142 = vmatpush3.bf16.xpose.msra.mxu0 %v2426_v58  ;;  %9143 = vmatprep.mubr.msk.bf16.mxu0 %vm10155_vm1, %v12620_v30 }
 0x3f8   : > { %9153 = vmatprep.subr.bf16.mxu0 %v12620_v30 }
 0x3f9   : > { %9126 = vmatmul.mubr.msk.bf16.vlgmr.msra.gmra.mrb[80].mxu1 %vm467_vm2, %v2269_v31  ;;  %v2419_v10 = vpop.permute.xlu0 %2418  ;;  %v2769_v24 = vpop.permute.xlu1 %2768  ;;  %v2676_v31 = vsel %vm467_vm2, %v2671_v25, 0 }
 0x3fa   : > { %9136 = vmatpush3.bf16.xpose.msra.mxu1 %v2376_v52  ;;  %9137 = vmatprep.mubr.msk.bf16.mxu1 %vm10155_vm1, %v12620_v30 }
 0x3fb   : > { %9147 = vmatprep.subr.bf16.mxu1 %v12620_v30 }
 0x3fd   : > { %v2521_v12 = vpop.permute.xlu0 %2520  ;;  %v2871_v7 = vpop.permute.xlu1 %2870 }
 0x3fe   : > { %v2526_v20 = vsel %vm467_vm2, %v2521_v12, 0  ;;  %9144 = vmatmul.mubr.msk.bf16.vlgmr.msra.gmra.mrb[72].mxu0 %vm467_vm2, %v2419_v10  ;;  %v2876_v9 = vsel %vm467_vm2, %v2871_v7, 0 }
 0x3ff   : > { %9154 = vmatpush3.bf16.xpose.msra.mxu0 %v2526_v20  ;;  %9155 = vmatprep.mubr.msk.bf16.mxu0 %vm10155_vm1, %v12620_v30 }
 0x400   : > { %9165 = vmatprep.subr.bf16.mxu0 %v12620_v30 }
 0x401   : > { %9138 = vmatmul.mubr.msk.bf16.vlgmr.msra.gmra.mrb[84].mxu1 %vm467_vm2, %v2369_v22  ;;  %v2519_v17 = vpop.permute.xlu0 %2518  ;;  %v2869_v63 = vpop.permute.xlu1 %2868  ;;  %v2776_v22 = vsel %vm467_vm2, %v2771_v42, 0 }
 0x402   : > { %9148 = vmatpush3.bf16.xpose.msra.mxu1 %v2476_v59  ;;  %9149 = vmatprep.mubr.msk.bf16.mxu1 %vm10155_vm1, %v12620_v30 }
 0x403   : > { %9159 = vmatprep.subr.bf16.mxu1 %v12620_v30 }
 0x405   : > { %v2621_v45 = vpop.permute.xlu0 %2620  ;;  %v2971_v21 = vpop.permute.xlu1 %2970 }
 0x406   : > { %v2626_v48 = vsel %vm467_vm2, %v2621_v45, 0  ;;  %9156 = vmatmul.mubr.msk.bf16.vlgmr.msra.gmra.mrb[76].mxu0 %vm467_vm2, %v2519_v17  ;;  %v2976_v38 = vsel %vm467_vm2, %v2971_v21, 0 }
 0x407   : > { %9166 = vmatpush3.bf16.xpose.msra.mxu0 %v2626_v48  ;;  %9167 = vmatprep.mubr.msk.bf16.mxu0 %vm10155_vm1, %v12620_v30 }
 0x408   : > { %9177 = vmatprep.subr.bf16.mxu0 %v12620_v30 }
 0x409   : > { %9150 = vmatmul.mubr.msk.bf16.vlgmr.msra.gmra.mrb[88].mxu1 %vm467_vm2, %v2469_v54  ;;  %v2619_v39 = vpop.permute.xlu0 %2618  ;;  %v2969_v33 = vpop.permute.xlu1 %2968 }
 0x40a   : > { %9160 = vmatpush3.bf16.xpose.msra.mxu1 %v2576_v49  ;;  %9161 = vmatprep.mubr.msk.bf16.mxu1 %vm10155_vm1, %v12620_v30 }
 0x40b   : > { %9171 = vmatprep.subr.bf16.mxu1 %v12620_v30 }
 0x40d   : > { %v2721_v40 = vpop.permute.xlu0 %2720  ;;  %v3211_v32 = vpop.permute.xlu1 %3210 }
 0x40e   : > { %v2726_v34 = vsel %vm467_vm2, %v2721_v40, 0  ;;  %9168 = vmatmul.mubr.msk.bf16.vlgmr.msra.gmra.mrb[80].mxu0 %vm467_vm2, %v2619_v39  ;;  %v3216_v54 = vsel %vm1446_vm3, %v3211_v32, 0 }
 0x40f   : > { %9178 = vmatpush3.bf16.xpose.msra.mxu0 %v2726_v34  ;;  %9179 = vmatprep.mubr.msk.bf16.mxu0 %vm10155_vm1, %v12620_v30 }
 0x410   : > { %9189 = vmatprep.subr.bf16.mxu0 %v12620_v30 }
 0x411   : > { %9162 = vmatmul.mubr.msk.bf16.vlgmr.msra.gmra.mrb[92].mxu1 %vm467_vm2, %v10815_v28  ;;  %v2719_v1 = vpop.permute.xlu0 %2718 }
 0x412   : > { %9172 = vmatpush3.bf16.xpose.msra.mxu1 %v2676_v31  ;;  %9173 = vmatprep.mubr.msk.bf16.mxu1 %vm10155_vm1, %v12620_v30 }
 0x413   : > { %9183 = vmatprep.subr.bf16.mxu1 %v12620_v30 }
 0x415   : > { %v2821_v51 = vpop.permute.xlu0 %2820 }
 0x416   : > { %v2826_v18 = vsel %vm467_vm2, %v2821_v51, 0  ;;  %9180 = vmatmul.mubr.msk.bf16.vlgmr.msra.gmra.mrb[84].mxu0 %vm467_vm2, %v2719_v1 }
 0x417   : > { %9190 = vmatpush3.bf16.xpose.msra.mxu0 %v2826_v18  ;;  %9191 = vmatprep.mubr.msk.bf16.mxu0 %vm10155_vm1, %v12620_v30 }
 0x418   : > { %9201 = vmatprep.subr.bf16.mxu0 %v12620_v30 }
 0x419   : > { %9174 = vmatmul.mubr.msk.bf16.vlgmr.msra.gmra.mrb[96].mxu1 %vm467_vm2, %v2669_v35  ;;  %v2819_v56 = vpop.permute.xlu0 %2818 }
 0x41a   : > { %9184 = vmatpush3.bf16.xpose.msra.mxu1 %v2776_v22  ;;  %9185 = vmatprep.mubr.msk.bf16.mxu1 %vm10155_vm1, %v12620_v30 }
 0x41b   : > { %9195 = vmatprep.subr.bf16.mxu1 %v12620_v30 }
 0x41d   : > { %v2921_v19 = vpop.permute.xlu0 %2920 }
 0x41e   : > { %v2926_v57 = vsel %vm467_vm2, %v2921_v19, 0  ;;  %9192 = vmatmul.mubr.msk.bf16.vlgmr.msra.gmra.mrb[88].mxu0 %vm467_vm2, %v2819_v56 }
 0x41f   : > { %9202 = vmatpush3.bf16.xpose.msra.mxu0 %v2926_v57  ;;  %9203 = vmatprep.mubr.msk.bf16.mxu0 %vm10155_vm1, %v12620_v30 }
 0x420   : > { %9213 = vmatprep.subr.bf16.mxu0 %v12620_v30 }
 0x421   : > { %9186 = vmatmul.mubr.msk.bf16.vlgmr.msra.gmra.mrb[100].mxu1 %vm467_vm2, %v2769_v24  ;;  %v2919_v43 = vpop.permute.xlu0 %2918 }
 0x422   : > { %9196 = vmatpush3.bf16.xpose.msra.mxu1 %v2876_v9  ;;  %9197 = vmatprep.mubr.msk.bf16.mxu1 %vm10155_vm1, %v12620_v30 }
 0x423   : > { %9207 = vmatprep.subr.bf16.mxu1 %v12620_v30 }
 0x425   : > { %v3259_v23 = vpop.permute.xlu0 %3258 }
 0x426   : > { %9204 = vmatmul.mubr.msk.bf16.vlgmr.msra.gmra.mrb[92].mxu0 %vm467_vm2, %v2919_v43  ;;  %v3264_v62 = vsel %vm1446_vm3, %v3259_v23, 0 }
 0x427   : > { %9214 = vmatpush3.bf16.msra.mxu0 %v3216_v54  ;;  %9215 = vmatprep.mubr.msk.bf16.mxu0 %vm10155_vm1, %v12620_v30 }
 0x428   : > { %9225 = vmatprep.subr.bf16.mxu0 %v12620_v30 }
 0x429   : > { %9198 = vmatmul.mubr.msk.bf16.vlgmr.msra.gmra.mrb[104].mxu1 %vm467_vm2, %v2869_v63 }
 0x42a   : > { %9208 = vmatpush3.bf16.xpose.msra.mxu1 %v2976_v38  ;;  %9209 = vmatprep.mubr.msk.bf16.mxu1 %vm10155_vm1, %v12620_v30 }
 0x42b   : > { %9219 = vmatprep.subr.bf16.mxu1 %v12620_v30 }
 0x431   : > { %9210 = vmatmul.mubr.msk.bf16.vlgmr.msra.gmra.mrb[108].mxu1 %vm467_vm2, %v2969_v33 }
 0x432   : > { %9220 = vmatpush3.bf16.msra.mxu1 %v3264_v62  ;;  %9221 = vmatprep.mubr.msk.bf16.mxu1 %vm10155_vm1, %v12620_v30 }
 0x433   : > { %9231 = vmatprep.subr.bf16.mxu1 %v12620_v30 }
 0x44f   : > { %v10904_v26 = vpop.f32.mrb[32].mxu0 }
 0x450   : > { %v9025_v27 = vpop.f32.mrb[33].mxu0 }
 0x451   : > { %v1487_v4 = vpop.f32.mrb[34].mxu0 }
 0x452   : > { %v9026_v28 = vpop.f32.mrb[35].mxu0 }
 0x457   : > { %v10906_v2 = vpop.f32.mrb[48].mxu1 }
 0x458   : > { %v9031_v29 = vpop.f32.mrb[49].mxu1 }
 0x459   : > { %v1535_v16 = vpop.f32.mrb[50].mxu1 }
 0x45a   : > { %v9032_v44 = vpop.f32.mrb[51].mxu1 }
 0x45f   : > { %v10910_v36 = vpop.f32.mrb[36].mxu0 }
 0x460   : > { %v9037_v25 = vpop.f32.mrb[37].mxu0 }
 0x461   : > { %v1583_v50 = vpop.f32.mrb[38].mxu0 }
 0x462   : > { %v9038_v58 = vpop.f32.mrb[39].mxu0 }
 0x467   : > { %v10912_v52 = vpop.f32.mrb[52].mxu1  ;;  %v10914_v35 = vpop.f32.mrb[40].mxu0 }
 0x468   : > { %v9043_v12 = vpop.f32.mrb[53].mxu1  ;;  %v9049_v20 = vpop.f32.mrb[41].mxu0 }
 0x469   : > { %v1631_v42 = vpop.f32.mrb[54].mxu1  ;;  %v1679_v59 = vpop.f32.mrb[42].mxu0 }
 0x46a   : > { %v9044_v17 = vpop.f32.mrb[55].mxu1  ;;  %v9050_v24 = vpop.f32.mrb[43].mxu0 }
 0x46f   : > { %v10918_v45 = vpop.f32.mrb[56].mxu1 }
 0x470   : > { %v9055_v49 = vpop.f32.mrb[57].mxu1 }
 0x471   : > { %v1727_v39 = vpop.f32.mrb[58].mxu1 }
 0x472   : > { %v9056_v7 = vpop.f32.mrb[59].mxu1 }
 0x477   : > { %v10922_v40 = vpop.f32.mrb[60].mxu1 }
 0x478   : > { %v9067_v34 = vpop.f32.mrb[61].mxu1 }
 0x479   : > { %v1823_v31 = vpop.f32.mrb[62].mxu1 }
 0x47a   : > { %v9068_v63 = vpop.f32.mrb[63].mxu1 }
 0x47f   : > { %v10924_v1 = vpop.f32.mrb[64].mxu1 }
 0x480   : > { %v9079_v51 = vpop.f32.mrb[65].mxu1 }
 0x481   : > { %v1919_v18 = vpop.f32.mrb[66].mxu1 }
 0x482   : > { %v9080_v21 = vpop.f32.mrb[67].mxu1 }
 0x487   : > { %v10926_v22 = vpop.f32.mrb[68].mxu1 }
 0x488   : > { %v9091_v56 = vpop.f32.mrb[69].mxu1 }
 0x489   : > { %v2015_v33 = vpop.f32.mrb[70].mxu1 }
 0x48a   : > { %v9092_v19 = vpop.f32.mrb[71].mxu1 }
 0x48f   : > { %v10928_v57 = vpop.f32.mrb[72].mxu1 }
 0x490   : > { %v9103_v9 = vpop.f32.mrb[73].mxu1 }
 0x491   : > { %v2111_v32 = vpop.f32.mrb[74].mxu1 }
 0x492   : > { %v9104_v43 = vpop.f32.mrb[75].mxu1 }
 0x494   : > { %v10930_v54 = vpop.f32.mrb[44].mxu0 }
 0x495   : > { %v9061_v23 = vpop.f32.mrb[45].mxu0 }
 0x496   : > { %v1775_v62 = vpop.f32.mrb[46].mxu0 }
 0x497   : > { %v9062_v27 = vpop.f32.mrb[47].mxu0 }
 0x49c   : > { %v10934_v4 = vpop.f32.mrb[48].mxu0 }
 0x49d   : > { %v9073_v29 = vpop.f32.mrb[49].mxu0 }
 0x49e   : > { %v1871_v16 = vpop.f32.mrb[50].mxu0 }
 0x49f   : > { %v9074_v44 = vpop.f32.mrb[51].mxu0 }
 0x4a4   : > { %v10938_v25 = vpop.f32.mrb[52].mxu0 }
 0x4a5   : > { %v9085_v58 = vpop.f32.mrb[53].mxu0 }
 0x4a6   : > { %v1967_v12 = vpop.f32.mrb[54].mxu0 }
 0x4a7   : > { %v9086_v20 = vpop.f32.mrb[55].mxu0 }
 0x4ac   : > { %v10942_v42 = vpop.f32.mrb[56].mxu0 }
 0x4ad   : > { %12625 = vst [vmem:[#allocation2_spill] sm:$0xff] %v10942_v42  ;;  %v9097_v17 = vpop.f32.mrb[57].mxu0 }
 0x4ae   : > { %v2063_v24 = vpop.f32.mrb[58].mxu0 }
 0x4af   : > { %v9098_v49 = vpop.f32.mrb[59].mxu0 }
 0x4b4   : > { %v10946_v39 = vpop.f32.mrb[60].mxu0 }
 0x4b5   : > { %12626 = vst [vmem:[#allocation3_spill] sm:$0xff] %v10946_v39  ;;  %v9109_v7 = vpop.f32.mrb[61].mxu0 }
 0x4b6   : > { %v2159_v34 = vpop.f32.mrb[62].mxu0 }
 0x4b7   : > { %v9110_v31 = vpop.f32.mrb[63].mxu0 }
 0x4c1   : > { %v10948_v63 = vpop.f32.mrb[64].mxu0 }
 0x4c2   : > { %v9121_v51 = vpop.f32.mrb[65].mxu0  ;;  %v3018_v18 = vsel %vm467_vm2, %v10948_v63, -inf }
 0x4c3   : > { %3019 = vmax.xlane.f32.xlu0 %v3018_v18  ;;  %v2265_v21 = vpop.f32.mrb[66].mxu0 }
 0x4c4   : > { %v10952_v56 = vpop.f32.mrb[76].mxu1  ;;  %v9122_v33 = vpop.f32.mrb[67].mxu0 }
 0x4c5   : > { %12627 = vst [vmem:[#allocation4_spill] sm:$0xff] %v10952_v56  ;;  %v9115_v9 = vpop.f32.mrb[77].mxu1 }
 0x4c6   : > { %v2207_v32 = vpop.f32.mrb[78].mxu1 }
 0x4c7   : > { %v9116_v43 = vpop.f32.mrb[79].mxu1 }
 0x4c9   : > { %v10956_v23 = vpop.f32.mrb[68].mxu0 }
 0x4ca   : > { %v9133_v62 = vpop.f32.mrb[69].mxu0  ;;  %v3024_v27 = vsel %vm467_vm2, %v10956_v23, -inf }
 0x4cb   : > { %3025 = vmax.xlane.f32.xlu0 %v3024_v27  ;;  %v2365_v29 = vpop.f32.mrb[70].mxu0 }
 0x4cc   : > { %v10960_v16 = vpop.f32.mrb[80].mxu1  ;;  %v9134_v44 = vpop.f32.mrb[71].mxu0 }
 0x4cd   : > { %v9127_v58 = vpop.f32.mrb[81].mxu1  ;;  %v3021_v12 = vsel %vm467_vm2, %v10960_v16, -inf }
 0x4ce   : > { %3022 = vmax.xlane.f32.xlu1 %v3021_v12  ;;  %v2315_v20 = vpop.f32.mrb[82].mxu1 }
 0x4cf   : > { %v9128_v17 = vpop.f32.mrb[83].mxu1 }
 0x4d1   : > { %v10964_v24 = vpop.f32.mrb[72].mxu0 }
 0x4d2   : > { %v9145_v49 = vpop.f32.mrb[73].mxu0  ;;  %v3030_v7 = vsel %vm467_vm2, %v10964_v24, -inf }
 0x4d3   : > { %3031 = vmax.xlane.f32.xlu1 %v3030_v7  ;;  %v2465_v34 = vpop.f32.mrb[74].mxu0 }
 0x4d4   : > { %v10968_v31 = vpop.f32.mrb[84].mxu1  ;;  %v9146_v51 = vpop.f32.mrb[75].mxu0 }
 0x4d5   : > { %v9139_v18 = vpop.f32.mrb[85].mxu1  ;;  %v3027_v21 = vsel %vm467_vm2, %v10968_v31, -inf }
 0x4d6   : > { %v2415_v33 = vpop.f32.mrb[86].mxu1  ;;  %3028 = vmax.xlane.f32.xlu0 %v3027_v21 }
 0x4d7   : > { %v9140_v9 = vpop.f32.mrb[87].mxu1 }
 0x4d9   : > { %v10972_v32 = vpop.f32.mrb[76].mxu0 }
 0x4da   : > { %v9157_v43 = vpop.f32.mrb[77].mxu0  ;;  %v3036_v62 = vsel %vm467_vm2, %v10972_v32, -inf }
 0x4db   : > { %3037 = vmax.xlane.f32.xlu1 %v3036_v62  ;;  %v2565_v27 = vpop.f32.mrb[78].mxu0 }
 0x4dc   : > { %v10976_v29 = vpop.f32.mrb[88].mxu1  ;;  %v9158_v44 = vpop.f32.mrb[79].mxu0 }
 0x4dd   : > { %v9151_v58 = vpop.f32.mrb[89].mxu1  ;;  %v3033_v12 = vsel %vm467_vm2, %v10976_v29, -inf }
 0x4de   : > { %v2515_v20 = vpop.f32.mrb[90].mxu1  ;;  %3034 = vmax.xlane.f32.xlu0 %v3033_v12 }
 0x4df   : > { %v9152_v17 = vpop.f32.mrb[91].mxu1 }
 0x4e1   : > { %v10980_v49 = vpop.f32.mrb[80].mxu0 }
 0x4e2   : > { %v9169_v7 = vpop.f32.mrb[81].mxu0  ;;  %v3042_v34 = vsel %vm467_vm2, %v10980_v49, -inf }
 0x4e3   : > { %3043 = vmax.xlane.f32.xlu1 %v3042_v34  ;;  %v2665_v51 = vpop.f32.mrb[82].mxu0 }
 0x4e4   : > { %v10984_v18 = vpop.f32.mrb[92].mxu1  ;;  %v9170_v21 = vpop.f32.mrb[83].mxu0 }
 0x4e5   : > { %v9163_v33 = vpop.f32.mrb[93].mxu1  ;;  %v3039_v9 = vsel %vm467_vm2, %v10984_v18, -inf }
 0x4e6   : > { %v2615_v43 = vpop.f32.mrb[94].mxu1  ;;  %3040 = vmax.xlane.f32.xlu0 %v3039_v9 }
 0x4e7   : > { %v9164_v62 = vpop.f32.mrb[95].mxu1 }
 0x4e9   : > { %v10988_v27 = vpop.f32.mrb[84].mxu0 }
 0x4ea   : > { %v9181_v44 = vpop.f32.mrb[85].mxu0  ;;  %v3048_v58 = vsel %vm467_vm2, %v10988_v27, -inf }
 0x4eb   : > { %3049 = vmax.xlane.f32.xlu1 %v3048_v58  ;;  %v2765_v12 = vpop.f32.mrb[86].mxu0 }
 0x4ec   : > { %v10992_v20 = vpop.f32.mrb[96].mxu1  ;;  %v9182_v17 = vpop.f32.mrb[87].mxu0 }
 0x4ed   : > { %v9175_v7 = vpop.f32.mrb[97].mxu1  ;;  %v3045_v34 = vsel %vm467_vm2, %v10992_v20, -inf }
 0x4ee   : > { %v2715_v51 = vpop.f32.mrb[98].mxu1  ;;  %3046 = vmax.xlane.f32.xlu0 %v3045_v34 }
 0x4ef   : > { %v9176_v21 = vpop.f32.mrb[99].mxu1 }
 0x4f1   : > { %v10996_v33 = vpop.f32.mrb[88].mxu0 }
 0x4f2   : > { %v9193_v9 = vpop.f32.mrb[89].mxu0  ;;  %v3054_v43 = vsel %vm467_vm2, %v10996_v33, -inf }
 0x4f3   : > { %3055 = vmax.xlane.f32.xlu1 %v3054_v43  ;;  %v2865_v62 = vpop.f32.mrb[90].mxu0 }
 0x4f4   : > { %v11000_v44 = vpop.f32.mrb[100].mxu1  ;;  %v9194_v58 = vpop.f32.mrb[91].mxu0 }
 0x4f5   : > { %v9187_v12 = vpop.f32.mrb[101].mxu1  ;;  %v3051_v17 = vsel %vm467_vm2, %v11000_v44, -inf }
 0x4f6   : > { %v2815_v7 = vpop.f32.mrb[102].mxu1  ;;  %3052 = vmax.xlane.f32.xlu0 %v3051_v17 }
 0x4f7   : > { %v9188_v51 = vpop.f32.mrb[103].mxu1 }
 0x4f9   : > { %v11004_v34 = vpop.f32.mrb[92].mxu0 }
 0x4fa   : > { %v9205_v21 = vpop.f32.mrb[93].mxu0  ;;  %v3060_v9 = vsel %vm467_vm2, %v11004_v34, -inf }
 0x4fb   : > { %3061 = vmax.xlane.f32.xlu1 %v3060_v9  ;;  %v2965_v19 = vpop.f32.mrb[94].mxu0 }
 0x4fc   : > { %v11008_v43 = vpop.f32.mrb[104].mxu1  ;;  %v9206_v62 = vpop.f32.mrb[95].mxu0 }
 0x4fd   : > { %v9199_v59 = vpop.f32.mrb[105].mxu1  ;;  %v3057_v58 = vsel %vm467_vm2, %v11008_v43, -inf  ;;  %v11024_v19 = vpop.permute.xlu1 %3306 }
 0x4fe   : > { %v2915_v12 = vpop.f32.mrb[106].mxu1  ;;  %3058 = vmax.xlane.f32.xlu0 %v3057_v58  ;;  %v11022_v59 = vpop.permute.xlu0 %3354 }
 0x4ff   : > { %v9200_v7 = vpop.f32.mrb[107].mxu1 }
 0x501   : > { %v11028_v58 = vpop.permute.xlu1 %3402 }
 0x502   : > { %v11026_v62 = vpop.permute.xlu0 %3450 }
 0x504   : > { %v11012_v17 = vpop.f32.mrb[108].mxu1 }
 0x505   : > { %v9211_v51 = vpop.f32.mrb[109].mxu1  ;;  %v3063_v21 = vsel %vm467_vm2, %v11012_v17, -inf  ;;  %v11032_v7 = vpop.permute.xlu1 %3498 }
 0x506   : > { %v3015_v50 = vpop.f32.mrb[110].mxu1  ;;  %3064 = vmax.xlane.f32.xlu0 %v3063_v21 }
 0x507   : > { %v9212_v9 = vpop.f32.mrb[111].mxu1  ;;  %v11030_v50 = vpop.permute.xlu0 %3546 }
 0x509   : > { %v11035_v9 = vpop.permute.xlu1 %3594 }
 0x50c   : > { %3690 = vrot.lane.b32.xlu1 %v10306_v6, %s10160_s22 }
 0x510   : > { %3738 = vrot.lane.b32.xlu1 %v10310_v8, %s10160_s22 }
 0x51c   : > { %3642 = vrot.lane.b32.xlu0 %v10302_v5, %s10160_s22 }
 0x550   : > { %v3020_v12 = vpop.xlane.xlu0 %3019 }
 0x551   : > { %v3066_v51 = vsub.f32 %v10948_v63, %v3020_v12 }
 0x553   : > { %v3082_v21 = vmul.f32 1.442695, %v3066_v51 }
 0x555   : > { %9906 = vpow2.f32 %v3082_v21 }
 0x558   : > { %v3026_v28 = vpop.xlane.xlu0 %3025 }
 0x559   : > { %v3068_v38 = vsub.f32 %v10956_v23, %v3026_v28 }
 0x55b   : > { %v3086_v48 = vmul.f32 1.442695, %v3068_v38  ;;  %v3023_v10 = vpop.xlane.xlu1 %3022 }
 0x55c   : > { %v3067_v53 = vsub.f32 %v10960_v16, %v3023_v10 }
 0x55d   : > { %9908 = vpow2.f32 %v3086_v48 }
 0x55e   : > { %v3084_v30 = vmul.f32 1.442695, %v3067_v53 }
 0x55f   : > { %v11039_v39 = vpop.eup %9906 }
 0x560   : > { %9910 = vpow2.f32 %v3084_v30  ;;  %v3032_v56 = vpop.xlane.xlu1 %3031  ;;  %v3114_v63 = vsel %vm467_vm2, %v11039_v39, 0.0 }
 0x561   : > { %v3070_v12 = vsub.f32 %v10964_v24, %v3032_v56  ;;  %3115 = vadd.xlane.f32.xlu1 %v3114_v63 }
 0x563   : > { %v3090_v51 = vmul.f32 1.442695, %v3070_v12  ;;  %v3029_v21 = vpop.xlane.xlu0 %3028 }
 0x564   : > { %v3069_v28 = vsub.f32 %v10968_v31, %v3029_v21 }
 0x565   : > { %9912 = vpow2.f32 %v3090_v51 }
 0x566   : > { %v3088_v38 = vmul.f32 1.442695, %v3069_v28 }
 0x567   : > { %v11045_v23 = vpop.eup %9908 }
 0x568   : > { %9914 = vpow2.f32 %v3088_v38  ;;  %v3038_v53 = vpop.xlane.xlu1 %3037  ;;  %v3120_v30 = vsel %vm467_vm2, %v11045_v23, 0.0 }
 0x569   : > { %v3072_v10 = vsub.f32 %v10972_v32, %v3038_v53  ;;  %3121 = vadd.xlane.f32.xlu1 %v3120_v30 }
 0x56a   : > { %v11050_v48 = vpop.eup %9910 }
 0x56b   : > { %v3094_v56 = vmul.f32 1.442695, %v3072_v10  ;;  %v3035_v16 = vpop.xlane.xlu0 %3034  ;;  %v3117_v24 = vsel %vm467_vm2, %v11050_v48, 0.0 }
 0x56c   : > { %v3071_v31 = vsub.f32 %v10976_v29, %v3035_v16  ;;  %3118 = vadd.xlane.f32.xlu0 %v3117_v24 }
 0x56d   : > { %9916 = vpow2.f32 %v3094_v56 }
 0x56e   : > { %v3092_v63 = vmul.f32 1.442695, %v3071_v31 }
 0x56f   : > { %v11055_v12 = vpop.eup %9912 }
 0x570   : > { %9918 = vpow2.f32 %v3092_v63  ;;  %v3044_v51 = vpop.xlane.xlu1 %3043  ;;  %v3126_v32 = vsel %vm467_vm2, %v11055_v12, 0.0 }
 0x571   : > { %v3074_v21 = vsub.f32 %v10980_v49, %v3044_v51  ;;  %3127 = vadd.xlane.f32.xlu1 %v3126_v32 }
 0x572   : > { %v11060_v28 = vpop.eup %9914 }
 0x573   : > { %v3098_v38 = vmul.f32 1.442695, %v3074_v21  ;;  %v3041_v53 = vpop.xlane.xlu0 %3040  ;;  %v3123_v29 = vsel %vm467_vm2, %v11060_v28, 0.0 }
 0x574   : > { %v3073_v30 = vsub.f32 %v10984_v18, %v3041_v53  ;;  %3124 = vadd.xlane.f32.xlu0 %v3123_v29 }
 0x575   : > { %9920 = vpow2.f32 %v3098_v38 }
 0x576   : > { %v3096_v10 = vmul.f32 1.442695, %v3073_v30 }
 0x577   : > { %v11065_v56 = vpop.eup %9916 }
 0x578   : > { %9922 = vpow2.f32 %v3096_v10  ;;  %v3050_v16 = vpop.xlane.xlu1 %3049  ;;  %v3132_v49 = vsel %vm467_vm2, %v11065_v56, 0.0 }
 0x579   : > { %v3076_v24 = vsub.f32 %v10988_v27, %v3050_v16  ;;  %3133 = vadd.xlane.f32.xlu1 %v3132_v49 }
 0x57a   : > { %v11070_v31 = vpop.eup %9918 }
 0x57b   : > { %v3102_v63 = vmul.f32 1.442695, %v3076_v24  ;;  %v3047_v51 = vpop.xlane.xlu0 %3046  ;;  %v3129_v18 = vsel %vm467_vm2, %v11070_v31, 0.0 }
 0x57c   : > { %v3075_v32 = vsub.f32 %v10992_v20, %v3047_v51  ;;  %3130 = vadd.xlane.f32.xlu0 %v3129_v18 }
 0x57d   : > { %9924 = vpow2.f32 %v3102_v63 }
 0x57e   : > { %v3100_v21 = vmul.f32 1.442695, %v3075_v32 }
 0x57f   : > { %v11075_v38 = vpop.eup %9920 }
 0x580   : > { %9926 = vpow2.f32 %v3100_v21  ;;  %v3138_v53 = vsel %vm467_vm2, %v11075_v38, 0.0  ;;  %v3056_v18 = vpop.xlane.xlu1 %3055 }
 0x581   : > { %3139 = vadd.xlane.f32.xlu1 %v3138_v53  ;;  %v3078_v32 = vsub.f32 %v10996_v33, %v3056_v18 }
 0x582   : > { %v11079_v27 = vpop.eup %9922 }
 0x583   : > { %v3053_v29 = vpop.xlane.xlu0 %3052  ;;  %v3135_v30 = vsel %vm467_vm2, %v11079_v27, 0.0  ;;  %v3106_v53 = vmul.f32 1.442695, %v3078_v32 }
 0x584   : > { %v3077_v10 = vsub.f32 %v11000_v44, %v3053_v29  ;;  %3136 = vadd.xlane.f32.xlu0 %v3135_v30 }
 0x586   : > { %v3104_v20 = vmul.f32 1.442695, %v3077_v10 }
 0x587   : > { %v11084_v16 = vpop.eup %9924 }
 0x588   : > { %9928 = vpow2.f32 %v3104_v20  ;;  %v3144_v49 = vsel %vm467_vm2, %v11084_v16, 0.0  ;;  %v3062_v21 = vpop.xlane.xlu1 %3061 }
 0x589   : > { %3145 = vadd.xlane.f32.xlu1 %v3144_v49  ;;  %v3080_v29 = vsub.f32 %v11004_v34, %v3062_v21  ;;  %9930 = vpow2.f32 %v3106_v53 }
 0x58a   : > { %v11088_v24 = vpop.eup %9926 }
 0x58b   : > { %v3141_v63 = vsel %vm467_vm2, %v11088_v24, 0.0  ;;  %v3110_v30 = vmul.f32 1.442695, %v3080_v29  ;;  %v3059_v10 = vpop.xlane.xlu0 %3058 }
 0x58c   : > { %3142 = vadd.xlane.f32.xlu0 %v3141_v63  ;;  %v3079_v20 = vsub.f32 %v11008_v43, %v3059_v10  ;;  %v11132_v29 = vpop.permute.xlu1 %3690 }
 0x58d   : > { %9932 = vpow2.f32 %v3110_v30 }
 0x58e   : > { %v3108_v63 = vmul.f32 1.442695, %v3079_v20 }
 0x590   : > { %9934 = vpow2.f32 %v3108_v63  ;;  %v11138_v30 = vpop.permute.xlu1 %3738 }
 0x592   : > { %v11092_v51 = vpop.eup %9928 }
 0x593   : > { %v3147_v44 = vsel %vm467_vm2, %v11092_v51, 0.0  ;;  %v3065_v49 = vpop.xlane.xlu0 %3064  ;;  %v11104_v42 = vpop.eup %9930 }
 0x594   : > { %3148 = vadd.xlane.f32.xlu0 %v3147_v44  ;;  %v3081_v44 = vsub.f32 %v11012_v17, %v3065_v49  ;;  %v3150_v18 = vsel %vm467_vm2, %v11104_v42, 0.0 }
 0x596   : > { %v3112_v33 = vmul.f32 1.442695, %v3081_v44 }
 0x597   : > { %v11108_v32 = vpop.eup %9932  ;;  %v11152_v20 = vpop.permute.xlu0 %3642 }
 0x598   : > { %9936 = vpow2.f32 %v3112_v33  ;;  %v3156_v34 = vsel %vm467_vm2, %v11108_v32, 0.0 }
 0x59a   : > { %3834 = vrot.lane.b32.xlu1 %v10318_v13, %s10160_s22  ;;  %v11112_v43 = vpop.eup %9934 }
 0x59b   : > { %v3153_v17 = vsel %vm467_vm2, %v11112_v43, 0.0 }
 0x5a2   : > { %v11116_v21 = vpop.eup %9936 }
 0x5a3   : > { %v3159_v53 = vsel %vm467_vm2, %v11116_v21, 0.0 }
 0x5aa   : > { %3786 = vrot.lane.b32.xlu0 %v10314_v11, %s10160_s22 }
 0x5be   : > { %3151 = vadd.xlane.f32.xlu1 %v3150_v18 }
 0x5c2   : > { %3157 = vadd.xlane.f32.xlu1 %v3156_v34  ;;  %v3312_v34 = vsel %vm1446_vm3, %v11024_v19, 0 }
 0x5c9   : > { %3154 = vadd.xlane.f32.xlu0 %v3153_v17 }
 0x5cd   : > { %3160 = vadd.xlane.f32.xlu0 %v3159_v53 }
 0x5d3   : > { %3930 = vrot.lane.b32.xlu1 %v10326_v15, %s10160_s22 }
 0x5d7   : > { %4236 = vrot.lane.b32.xlu1 %v10272_v41, %s10161_s23 }
 0x5db   : > { %4286 = vrot.lane.b32.xlu1 %v10280_v47, %s10161_s23 }
 0x5df   : > { %4336 = vrot.lane.b32.xlu1 %v10270_v37, %s10161_s23 }
 0x5e3   : > { %4386 = vrot.lane.b32.xlu1 %v10278_v46, %s10161_s23  ;;  %3882 = vrot.lane.b32.xlu0 %v10322_v14, %s10160_s22 }
 0x5e7   : > { %4436 = vrot.lane.b32.xlu1 %v10286_v55, %s10161_s23  ;;  %4238 = vrot.lane.b32.xlu0 %v10272_v41, %s10162_s25 }
 0x5eb   : > { %4486 = vrot.lane.b32.xlu1 %v10290_v61, %s10161_s23  ;;  %4288 = vrot.lane.b32.xlu0 %v10280_v47, %s10162_s25 }
 0x5ee   : > { %v3116_v10 = vpop.xlane.xlu1 %3115 }
 0x5ef   : > { %9938 = vrcp.f32 %v3116_v10  ;;  %4536 = vrot.lane.b32.xlu1 %v10288_v60, %s10161_s23  ;;  %4338 = vrot.lane.b32.xlu0 %v10270_v37, %s10162_s25 }
 0x5f3   : > { %4586 = vrot.lane.b32.xlu1 %v10294_v0, %s10161_s23  ;;  %4388 = vrot.lane.b32.xlu0 %v10278_v46, %s10162_s25 }
 0x5f6   : > { %v3122_v49 = vpop.xlane.xlu1 %3121 }
 0x5f7   : > { %9940 = vrcp.f32 %v3122_v49  ;;  %4688 = vrot.lane.b32.xlu1 %v10302_v5, %s10162_s25  ;;  %4438 = vrot.lane.b32.xlu0 %v10286_v55, %s10162_s25 }
 0x5f9   : > { %v9939_v63 = vpop.eup %9938  ;;  %v3119_v44 = vpop.xlane.xlu0 %3118 }
 0x5fa   : > { %9942 = vrcp.f32 %v3119_v44  ;;  %v3178_v33 = vmul.f32 %v9939_v63, %v11039_v39  ;;  %v12628_v39 = vmov 0.0  }
 0x5fb   : > { %4686 = vrot.lane.b32.xlu1 %v10302_v5, %s10161_s23  ;;  %4488 = vrot.lane.b32.xlu0 %v10290_v61, %s10162_s25 }
 0x5fc   : > { %v3194_v18 = vpack.c.bf16 %v3178_v33, %v3178_v33  ;;  %v3408_v33 = vsel %vm1446_vm3, %v11028_v58, 0 }
 0x5fe   : > { %9216 = vmatmul.mubr.msk.bf16.vlgmr.msra.gmra.mrb[96].mxu0 %vm467_vm2, %v3194_v18  ;;  %v3128_v17 = vpop.xlane.xlu1 %3127 }
 0x5ff   : > { %9226 = vmatpush3.bf16.msra.mxu0 %v3312_v34  ;;  %9944 = vrcp.f32 %v3128_v17  ;;  %4788 = vrot.lane.b32.xlu1 %v10310_v8, %s10162_s25 }
 0x600   : > { %4538 = vrot.lane.b32.xlu0 %v10288_v60, %s10162_s25  ;;  %9227 = vmatprep.mubr.msk.bf16.mxu0 %vm10155_vm1, %v12628_v39 }
 0x601   : > { %v9941_v53 = vpop.eup %9940  ;;  %v3125_v10 = vpop.xlane.xlu0 %3124  ;;  %9237 = vmatprep.subr.bf16.mxu0 %v12628_v39 }
 0x602   : > { %9946 = vrcp.f32 %v3125_v10  ;;  %v3180_v19 = vmul.f32 %v9941_v53, %v11045_v23 }
 0x603   : > { %4786 = vrot.lane.b32.xlu1 %v10310_v8, %s10161_s23 }
 0x604   : > { %v9943_v49 = vpop.eup %9942  ;;  %4588 = vrot.lane.b32.xlu0 %v10294_v0, %s10162_s25  ;;  %v3196_v63 = vpack.c.bf16 %v3180_v19, %v3180_v19  ;;  %v3504_v19 = vsel %vm1446_vm3, %v11032_v7, 0 }
 0x605   : > { %v3179_v44 = vmul.f32 %v9943_v49, %v11050_v48  ;;  %v3360_v48 = vsel %vm1446_vm3, %v11022_v59, 0 }
 0x606   : > { %9228 = vmatmul.mubr.msk.bf16.vlgmr.msra.gmra.mrb[100].mxu0 %vm467_vm2, %v3196_v63  ;;  %v3134_v18 = vpop.xlane.xlu1 %3133 }
 0x607   : > { %9238 = vmatpush3.bf16.msra.mxu0 %v3408_v33  ;;  %9948 = vrcp.f32 %v3134_v18  ;;  %4888 = vrot.lane.b32.xlu1 %v10318_v13, %s10162_s25  ;;  %v3195_v23 = vpack.c.bf16 %v3179_v44, %v3179_v44 }
 0x608   : > { %4638 = vrot.lane.b32.xlu0 %v10298_v3, %s10162_s25  ;;  %9239 = vmatprep.mubr.msk.bf16.mxu0 %vm10155_vm1, %v12628_v39 }
 0x609   : > { %v9945_v34 = vpop.eup %9944  ;;  %9222 = vmatmul.mubr.msk.bf16.vlgmr.msra.gmra.mrb[112].mxu1 %vm467_vm2, %v3195_v23  ;;  %v3131_v58 = vpop.xlane.xlu0 %3130  ;;  %9249 = vmatprep.subr.bf16.mxu0 %v12628_v39  ;;  %v3600_v23 = vsel %vm1446_vm3, %v11035_v9, 0  ;;  %v3552_v9 = vsel %vm1446_vm3, %v11030_v50, 0 }
 0x60a   : > { %9232 = vmatpush3.bf16.msra.mxu1 %v3360_v48  ;;  %9950 = vrcp.f32 %v3131_v58  ;;  %v3182_v17 = vmul.f32 %v9945_v34, %v11055_v12  ;;  %9233 = vmatprep.mubr.msk.bf16.mxu1 %vm10155_vm1, %v12628_v39 }
 0x60b   : > { %4886 = vrot.lane.b32.xlu1 %v10318_v13, %s10161_s23  ;;  %9243 = vmatprep.subr.bf16.mxu1 %v12628_v39 }
 0x60c   : > { %v9947_v53 = vpop.eup %9946  ;;  %4636 = vrot.lane.b32.xlu0 %v10298_v3, %s10161_s23  ;;  %v3198_v59 = vpack.c.bf16 %v3182_v17, %v3182_v17 }
 0x60d   : > { %v3181_v10 = vmul.f32 %v9947_v53, %v11060_v28  ;;  %v3456_v28 = vsel %vm1446_vm3, %v11026_v62, 0 }
 0x60e   : > { %9240 = vmatmul.mubr.msk.bf16.vlgmr.msra.gmra.mrb[104].mxu0 %vm467_vm2, %v3198_v59  ;;  %v3140_v12 = vpop.xlane.xlu1 %3139  ;;  %v3696_v59 = vsel %vm1446_vm3, %v11132_v29, 0 }
 0x60f   : > { %9250 = vmatpush3.bf16.msra.mxu0 %v3504_v19  ;;  %9952 = vrcp.f32 %v3140_v12  ;;  %4988 = vrot.lane.b32.xlu1 %v10326_v15, %s10162_s25  ;;  %v3197_v49 = vpack.c.bf16 %v3181_v10, %v3181_v10 }
 0x610   : > { %4738 = vrot.lane.b32.xlu0 %v10306_v6, %s10162_s25  ;;  %9251 = vmatprep.mubr.msk.bf16.mxu0 %vm10155_vm1, %v12628_v39 }
 0x611   : > { %v9949_v63 = vpop.eup %9948  ;;  %9234 = vmatmul.mubr.msk.bf16.vlgmr.msra.gmra.mrb[116].mxu1 %vm467_vm2, %v3197_v49  ;;  %v3137_v7 = vpop.xlane.xlu0 %3136  ;;  %9261 = vmatprep.subr.bf16.mxu0 %v12628_v39 }
 0x612   : > { %9244 = vmatpush3.bf16.msra.mxu1 %v3456_v28  ;;  %9954 = vrcp.f32 %v3137_v7  ;;  %v3184_v44 = vmul.f32 %v9949_v63, %v11065_v56  ;;  %9245 = vmatprep.mubr.msk.bf16.mxu1 %vm10155_vm1, %v12628_v39  ;;  %v3744_v7 = vsel %vm1446_vm3, %v11138_v30, 0 }
 0x613   : > { %4986 = vrot.lane.b32.xlu1 %v10326_v15, %s10161_s23  ;;  %9255 = vmatprep.subr.bf16.mxu1 %v12628_v39 }
 0x614   : > { %v9951_v33 = vpop.eup %9950  ;;  %4736 = vrot.lane.b32.xlu0 %v10306_v6, %s10161_s23  ;;  %v3200_v62 = vpack.c.bf16 %v3184_v44, %v3184_v44 }
 0x615   : > { %v3183_v18 = vmul.f32 %v9951_v33, %v11070_v31 }
 0x616   : > { %9252 = vmatmul.mubr.msk.bf16.vlgmr.msra.gmra.mrb[108].mxu0 %vm467_vm2, %v3200_v62  ;;  %v3146_v56 = vpop.xlane.xlu1 %3145 }
 0x617   : > { %9262 = vmatpush3.bf16.msra.mxu0 %v3600_v23  ;;  %9956 = vrcp.f32 %v3146_v56  ;;  %5228 = vrot.lane.b32.xlu1 %v10272_v41, %s10163_s26  ;;  %v3199_v34 = vpack.c.bf16 %v3183_v18, %v3183_v18 }
 0x618   : > { %4838 = vrot.lane.b32.xlu0 %v10314_v11, %s10162_s25  ;;  %9263 = vmatprep.mubr.msk.bf16.mxu0 %vm10155_vm1, %v12628_v39 }
 0x619   : > { %v9953_v31 = vpop.eup %9952  ;;  %9246 = vmatmul.mubr.msk.bf16.vlgmr.msra.gmra.mrb[120].mxu1 %vm467_vm2, %v3199_v34  ;;  %v3143_v48 = vpop.xlane.xlu0 %3142  ;;  %9273 = vmatprep.subr.bf16.mxu0 %v12628_v39 }
 0x61a   : > { %9256 = vmatpush3.bf16.msra.mxu1 %v3552_v9  ;;  %9958 = vrcp.f32 %v3143_v48  ;;  %v3186_v58 = vmul.f32 %v9953_v31, %v11075_v38  ;;  %9257 = vmatprep.mubr.msk.bf16.mxu1 %vm10155_vm1, %v12628_v39  ;;  %v3835_v33 = vpop.permute.xlu1 %3834 }
 0x61b   : > { %5324 = vrot.lane.b32.xlu1 %v10270_v37, %s10163_s26  ;;  %9267 = vmatprep.subr.bf16.mxu1 %v12628_v39  ;;  %v3840_v30 = vsel %vm1446_vm3, %v3835_v33, 0 }
 0x61c   : > { %v9955_v17 = vpop.eup %9954  ;;  %4836 = vrot.lane.b32.xlu0 %v10314_v11, %s10161_s23  ;;  %v3202_v50 = vpack.c.bf16 %v3186_v58, %v3186_v58 }
 0x61d   : > { %v3185_v53 = vmul.f32 %v9955_v17, %v11079_v27  ;;  %v3648_v27 = vsel %vm1446_vm3, %v11152_v20, 0 }
 0x61e   : > { %9264 = vmatmul.mubr.msk.bf16.vlgmr.msra.gmra.mrb[112].mxu0 %vm467_vm2, %v3202_v50 }
 0x61f   : > { %9274 = vmatpush3.bf16.msra.mxu0 %v3696_v59  ;;  %5420 = vrot.lane.b32.xlu1 %v10286_v55, %s10163_s26  ;;  %v3201_v38 = vpack.c.bf16 %v3185_v53, %v3185_v53  ;;  %v442_v53 = vld [vmem:[%s12615_s3] sm:$0xff] }
 0x620   : > { %4938 = vrot.lane.b32.xlu0 %v10322_v14, %s10162_s25  ;;  %9275 = vmatprep.mubr.msk.bf16.mxu0 %vm10155_vm1, %v12628_v39 }
 0x621   : > { %v9957_v10 = vpop.eup %9956  ;;  %9258 = vmatmul.mubr.msk.bf16.vlgmr.msra.gmra.mrb[124].mxu1 %vm467_vm2, %v3201_v38  ;;  %v3149_v29 = vpop.xlane.xlu0 %3148  ;;  %9285 = vmatprep.subr.bf16.mxu0 %v12628_v39 }
 0x622   : > { %9268 = vmatpush3.bf16.msra.mxu1 %v3648_v27  ;;  %9960 = vrcp.f32 %v3149_v29  ;;  %v3188_v19 = vmul.f32 %v9957_v10, %v11084_v16  ;;  %9269 = vmatprep.mubr.msk.bf16.mxu1 %vm10155_vm1, %v12628_v39 }
 0x623   : > { %5516 = vrot.lane.b32.xlu1 %v10288_v60, %s10163_s26  ;;  %9279 = vmatprep.subr.bf16.mxu1 %v12628_v39 }
 0x624   : > { %v9959_v12 = vpop.eup %9958  ;;  %4936 = vrot.lane.b32.xlu0 %v10322_v14, %s10161_s23  ;;  %v3204_v20 = vpack.c.bf16 %v3188_v19, %v3188_v19 }
 0x625   : > { %v3787_v49 = vpop.permute.xlu0 %3786  ;;  %v3187_v63 = vmul.f32 %v9959_v12, %v11088_v24 }
 0x626   : > { %v3792_v28 = vsel %vm1446_vm3, %v3787_v49, 0  ;;  %9276 = vmatmul.mubr.msk.bf16.vlgmr.msra.gmra.mrb[116].mxu0 %vm467_vm2, %v3204_v20 }
 0x627   : > { %9286 = vmatpush3.bf16.msra.mxu0 %v3792_v28  ;;  %v3203_v16 = vpack.c.bf16 %v3187_v63, %v3187_v63  ;;  %9287 = vmatprep.mubr.msk.bf16.mxu0 %vm10155_vm1, %v12628_v39 }
 0x628   : > { %5276 = vrot.lane.b32.xlu0 %v10280_v47, %s10163_s26  ;;  %9297 = vmatprep.subr.bf16.mxu0 %v12628_v39 }
 0x629   : > { %9270 = vmatmul.mubr.msk.bf16.vlgmr.msra.gmra.mrb[128].mxu1 %vm467_vm2, %v3203_v16 }
 0x62a   : > { %9280 = vmatpush3.bf16.msra.mxu1 %v3744_v7  ;;  %9281 = vmatprep.mubr.msk.bf16.mxu1 %vm10155_vm1, %v12628_v39 }
 0x62b   : > { %9291 = vmatprep.subr.bf16.mxu1 %v12628_v39 }
 0x62c   : > { %v9961_v24 = vpop.eup %9960  ;;  %5372 = vrot.lane.b32.xlu0 %v10278_v46, %s10163_s26 }
 0x62d   : > { %v3189_v44 = vmul.f32 %v9961_v24, %v11092_v51 }
 0x62f   : > { %v3205_v62 = vpack.c.bf16 %v3189_v44, %v3189_v44 }
 0x630   : > { %5468 = vrot.lane.b32.xlu0 %v10290_v61, %s10163_s26 }
 0x631   : > { %9282 = vmatmul.mubr.msk.bf16.vlgmr.msra.gmra.mrb[132].mxu1 %vm467_vm2, %v3205_v62 }
 0x632   : > { %9292 = vmatpush3.bf16.msra.mxu1 %v3840_v30  ;;  %9293 = vmatprep.mubr.msk.bf16.mxu1 %vm10155_vm1, %v12628_v39 }
 0x633   : > { %9303 = vmatprep.subr.bf16.mxu1 %v12628_v39 }
 0x64b   : > { %v3152_v18 = vpop.xlane.xlu1 %3151 }
 0x64c   : > { %9962 = vrcp.f32 %v3152_v18 }
 0x64f   : > { %v3158_v23 = vpop.xlane.xlu1 %3157 }
 0x650   : > { %9964 = vrcp.f32 %v3158_v23 }
 0x653   : > { %v3931_v29 = vpop.permute.xlu1 %3930 }
 0x654   : > { %v3936_v49 = vsel %vm1446_vm3, %v3931_v29, 0 }
 0x656   : > { %v9963_v51 = vpop.eup %9962  ;;  %v3155_v56 = vpop.xlane.xlu0 %3154 }
 0x657   : > { %9966 = vrcp.f32 %v3155_v56  ;;  %v3190_v34 = vmul.f32 %v9963_v51, %v11104_v42  ;;  %v443_v42 = vld [vmem:[%s12615_s3 + $0x8] sm:$0xff]  ;;  %v4237_v7 = vpop.permute.xlu1 %4236 }
 0x658   : > { %v11302_v10 = vpack.c.bf16 %v443_v42, %v442_v53 }
 0x659   : > { %v3206_v31 = vpack.c.bf16 %v3190_v34, %v3190_v34 }
 0x65a   : > { %v9965_v9 = vpop.eup %9964  ;;  %v3161_v48 = vpop.xlane.xlu0 %3160 }
 0x65b   : > { %9968 = vrcp.f32 %v3161_v48  ;;  %9288 = vmatmul.mubr.msk.bf16.vlgmr.msra.gmra.mrb[120].mxu0 %vm467_vm2, %v3206_v31  ;;  %v3192_v58 = vmul.f32 %v9965_v9, %v11108_v32  ;;  %v3987_v32 = vrot.slane %v11302_v10, 4 }
 0x65c   : > { %9299 = vmatprep.mubr.msk.bf16.mxu0 %vm10155_vm1, %v12628_v39 }
 0x65d   : > { %v3208_v38 = vpack.c.bf16 %v3192_v58, %v3192_v58  ;;  %v4013_v20 = vsel %vm1446_vm3, %v3987_v32, 0 }
 0x65e   : > { %v3883_v17 = vpop.permute.xlu0 %3882 }
 0x65f   : > { %v3888_v50 = vsel %vm1446_vm3, %v3883_v17, 0 }
 0x660   : > { %9298 = vmatpush3.bf16.msra.mxu0 %v3888_v50 }
 0x661   : > { %v9967_v59 = vpop.eup %9966  ;;  %9817 = vmatprep.subr.msk.bf16.mxu0 %vm1446_vm3, %v3987_v32 }
 0x662   : > { %v3191_v27 = vmul.f32 %v9967_v59, %v11112_v43  ;;  %v4239_v63 = vpop.permute.xlu0 %4238 }
 0x663   : > { %9300 = vmatmul.mubr.msk.bf16.vlgmr.msra.gmra.mrb[124].mxu0 %vm467_vm2, %v3208_v38  ;;  %v4244_v16 = vsel %vm467_vm2, %v4239_v63, 0 }
 0x664   : > { %v3207_v19 = vpack.c.bf16 %v3191_v27, %v3191_v27  ;;  %9310 = vmatpush3.bf16.msra.mxu0 %v4013_v20 }
 0x665   : > { %v9969_v12 = vpop.eup %9968  ;;  %9818 = vmatprep.subr.msk.bf16.mxu0 %vm1446_vm3, %v11302_v10 }
 0x666   : > { %9294 = vmatmul.mubr.msk.bf16.vlgmr.msra.gmra.mrb[136].mxu1 %vm467_vm2, %v3207_v19  ;;  %v3193_v43 = vmul.f32 %v9969_v12, %v11116_v21  ;;  %v4289_v24 = vpop.permute.xlu0 %4288  ;;  %v4287_v21 = vpop.permute.xlu1 %4286 }
 0x667   : > { %9304 = vmatpush3.bf16.msra.mxu1 %v3936_v49  ;;  %9305 = vmatprep.mubr.msk.bf16.mxu1 %vm10155_vm1, %v12628_v39  ;;  %v4294_v44 = vsel %vm467_vm2, %v4289_v24, 0 }
 0x668   : > { %9345 = vmatprep.subr.bf16.mxu1 %v12628_v39  ;;  %v3209_v28 = vpack.c.bf16 %v3193_v43, %v3193_v43 }
 0x66a   : > { %v4339_v33 = vpop.permute.xlu0 %4338  ;;  %v4337_v62 = vpop.permute.xlu1 %4336 }
 0x66b   : > { %v4344_v18 = vsel %vm467_vm2, %v4339_v33, 0 }
 0x66e   : > { %9306 = vmatmul.mubr.msk.bf16.vlgmr.msra.gmra.mrb[140].mxu1 %vm467_vm2, %v3209_v28  ;;  %v4389_v30 = vpop.permute.xlu0 %4388  ;;  %v4387_v23 = vpop.permute.xlu1 %4386 }
 0x66f   : > { %9347 = vmatprep.mubr.msk.bf16.mxu1 %vm10155_vm1, %v12628_v39  ;;  %v4394_v56 = vsel %vm467_vm2, %v4389_v30, 0 }
 0x670   : > { %9346 = vmatpush3.bf16.xpose.msra.mxu1 %v4244_v16 }
 0x671   : > { %9351 = vmatprep.subr.bf16.mxu1 %v12628_v39 }
 0x672   : > { %v4439_v51 = vpop.permute.xlu0 %4438  ;;  %v4437_v34 = vpop.permute.xlu1 %4436 }
 0x673   : > { %v4444_v48 = vsel %vm467_vm2, %v4439_v51, 0 }
 0x676   : > { %v4489_v31 = vpop.permute.xlu0 %4488  ;;  %v4487_v9 = vpop.permute.xlu1 %4486 }
 0x677   : > { %9348 = vmatmul.mubr.msk.bf16.vlgmr.msra.gmra.mrb[144].mxu1 %vm467_vm2, %v4237_v7  ;;  %v4494_v53 = vsel %vm467_vm2, %v4489_v31, 0 }
 0x678   : > { %9352 = vmatpush3.bf16.xpose.msra.mxu1 %v4294_v44  ;;  %9353 = vmatprep.mubr.msk.bf16.mxu1 %vm10155_vm1, %v12628_v39 }
 0x679   : > { %9357 = vmatprep.subr.bf16.mxu1 %v12628_v39 }
 0x67a   : > { %v4539_v58 = vpop.permute.xlu0 %4538  ;;  %v4537_v17 = vpop.permute.xlu1 %4536 }
 0x67b   : > { %v4544_v38 = vsel %vm467_vm2, %v4539_v58, 0 }
 0x67e   : > { %v4589_v50 = vpop.permute.xlu0 %4588  ;;  %v4587_v42 = vpop.permute.xlu1 %4586 }
 0x67f   : > { %9354 = vmatmul.mubr.msk.bf16.vlgmr.msra.gmra.mrb[148].mxu1 %vm467_vm2, %v4287_v21  ;;  %v4594_v19 = vsel %vm467_vm2, %v4589_v50, 0 }
 0x680   : > { %9358 = vmatpush3.bf16.xpose.msra.mxu1 %v4344_v18  ;;  %9359 = vmatprep.mubr.msk.bf16.mxu1 %vm10155_vm1, %v12628_v39 }
 0x681   : > { %9363 = vmatprep.subr.bf16.mxu1 %v12628_v39 }
 0x682   : > { %v11347_v59 = vpop.permute.xlu0 %4638  ;;  %v4689_v27 = vpop.permute.xlu1 %4688 }
 0x683   : > { %v4694_v43 = vsel %vm467_vm2, %v4689_v27, 0 }
 0x686   : > { %v11354_v29 = vpop.permute.xlu0 %4636  ;;  %v4687_v32 = vpop.permute.xlu1 %4686 }
 0x687   : > { %9360 = vmatmul.mubr.msk.bf16.vlgmr.msra.gmra.mrb[152].mxu1 %vm467_vm2, %v4337_v62 }
 0x688   : > { %9364 = vmatpush3.bf16.xpose.msra.mxu1 %v4394_v56  ;;  %9365 = vmatprep.mubr.msk.bf16.mxu1 %vm10155_vm1, %v12628_v39 }
 0x689   : > { %9369 = vmatprep.subr.bf16.mxu1 %v12628_v39 }
 0x68a   : > { %v11358_v12 = vpop.permute.xlu0 %4738  ;;  %v4789_v20 = vpop.permute.xlu1 %4788 }
 0x68b   : > { %v4794_v16 = vsel %vm467_vm2, %v4789_v20, 0 }
 0x68e   : > { %v11363_v49 = vpop.permute.xlu0 %4736  ;;  %v4787_v63 = vpop.permute.xlu1 %4786 }
 0x68f   : > { %9366 = vmatmul.mubr.msk.bf16.vlgmr.msra.gmra.mrb[156].mxu1 %vm467_vm2, %v4387_v23 }
 0x690   : > { %9370 = vmatpush3.bf16.xpose.msra.mxu1 %v4444_v48  ;;  %9371 = vmatprep.mubr.msk.bf16.mxu1 %vm10155_vm1, %v12628_v39 }
 0x691   : > { %9375 = vmatprep.subr.bf16.mxu1 %v12628_v39 }
 0x692   : > { %v11370_v28 = vpop.permute.xlu0 %4838  ;;  %v4889_v7 = vpop.permute.xlu1 %4888 }
 0x693   : > { %v4894_v44 = vsel %vm467_vm2, %v4889_v7, 0 }
 0x696   : > { %v11377_v24 = vpop.permute.xlu0 %4836  ;;  %v4887_v21 = vpop.permute.xlu1 %4886 }
 0x697   : > { %9372 = vmatmul.mubr.msk.bf16.vlgmr.msra.gmra.mrb[160].mxu1 %vm467_vm2, %v4437_v34 }
 0x698   : > { %9376 = vmatpush3.bf16.xpose.msra.mxu1 %v4494_v53  ;;  %9377 = vmatprep.mubr.msk.bf16.mxu1 %vm10155_vm1, %v12628_v39 }
 0x699   : > { %9381 = vmatprep.subr.bf16.mxu1 %v12628_v39 }
 0x69a   : > { %v11381_v33 = vpop.permute.xlu0 %4938  ;;  %v4989_v62 = vpop.permute.xlu1 %4988 }
 0x69b   : > { %v4994_v18 = vsel %vm467_vm2, %v4989_v62, 0  ;;  %v4137_v62 = vsel %vm1446_vm3, %v11302_v10, 0 }
 0x69e   : > { %v11386_v30 = vpop.permute.xlu0 %4936  ;;  %v4987_v51 = vpop.permute.xlu1 %4986 }
 0x69f   : > { %9378 = vmatmul.mubr.msk.bf16.vlgmr.msra.gmra.mrb[164].mxu1 %vm467_vm2, %v4487_v9 }
 0x6a0   : > { %9382 = vmatpush3.bf16.xpose.msra.mxu1 %v4544_v38  ;;  %9383 = vmatprep.mubr.msk.bf16.mxu1 %vm10155_vm1, %v12628_v39 }
 0x6a1   : > { %9387 = vmatprep.subr.bf16.mxu1 %v12628_v39 }
 0x6a2   : > { %v5277_v23 = vpop.permute.xlu0 %5276 }
 0x6a3   : > { %v5282_v56 = vsel %vm1446_vm3, %v5277_v23, 0 }
 0x6a7   : > { %9384 = vmatmul.mubr.msk.bf16.vlgmr.msra.gmra.mrb[168].mxu1 %vm467_vm2, %v4537_v17 }
 0x6a8   : > { %9388 = vmatpush3.bf16.xpose.msra.mxu1 %v4594_v19  ;;  %9389 = vmatprep.mubr.msk.bf16.mxu1 %vm10155_vm1, %v12628_v39 }
 0x6a9   : > { %9399 = vmatprep.subr.bf16.mxu1 %v12628_v39 }
 0x6af   : > { %9390 = vmatmul.mubr.msk.bf16.vlgmr.msra.gmra.mrb[172].mxu1 %vm467_vm2, %v4587_v42 }
 0x6b0   : > { %9400 = vmatpush3.bf16.xpose.msra.mxu1 %v4694_v43  ;;  %9401 = vmatprep.mubr.msk.bf16.mxu1 %vm10155_vm1, %v12628_v39 }
 0x6b1   : > { %9411 = vmatprep.subr.bf16.mxu1 %v12628_v39 }
 0x6b7   : > { %9402 = vmatmul.mubr.msk.bf16.vlgmr.msra.gmra.mrb[176].mxu1 %vm467_vm2, %v4687_v32 }
 0x6b8   : > { %9412 = vmatpush3.bf16.xpose.msra.mxu1 %v4794_v16  ;;  %9413 = vmatprep.mubr.msk.bf16.mxu1 %vm10155_vm1, %v12628_v39 }
 0x6b9   : > { %9423 = vmatprep.subr.bf16.mxu1 %v12628_v39 }
 0x6bf   : > { %9414 = vmatmul.mubr.msk.bf16.vlgmr.msra.gmra.mrb[180].mxu1 %vm467_vm2, %v4787_v63 }
 0x6c0   : > { %9424 = vmatpush3.bf16.xpose.msra.mxu1 %v4894_v44  ;;  %9425 = vmatprep.mubr.msk.bf16.mxu1 %vm10155_vm1, %v12628_v39 }
 0x6c1   : > { %9435 = vmatprep.subr.bf16.mxu1 %v12628_v39 }
 0x6c7   : > { %9426 = vmatmul.mubr.msk.bf16.vlgmr.msra.gmra.mrb[184].mxu1 %vm467_vm2, %v4887_v21 }
 0x6c8   : > { %9436 = vmatpush3.bf16.xpose.msra.mxu1 %v4994_v18  ;;  %9437 = vmatprep.mubr.msk.bf16.mxu1 %vm10155_vm1, %v12628_v39 }
 0x6c9   : > { %9447 = vmatprep.subr.bf16.mxu1 %v12628_v39 }
 0x6cf   : > { %9438 = vmatmul.mubr.msk.bf16.vlgmr.msra.gmra.mrb[188].mxu1 %vm467_vm2, %v4987_v51 }
 0x6d0   : > { %9448 = vmatpush3.bf16.msra.mxu1 %v5282_v56  ;;  %9449 = vmatprep.mubr.msk.bf16.mxu1 %vm10155_vm1, %v12628_v39 }
 0x6d1   : > { %v3252_v34 = vpop.f32.mrb[96].mxu0  ;;  %9459 = vmatprep.subr.bf16.mxu1 %v12628_v39 }
 0x6d2   : > { %v9217_v31 = vpop.f32.mrb[97].mxu0 }
 0x6d3   : > { %v3255_v9 = vpop.f32.mrb[98].mxu0 }
 0x6d4   : > { %v9218_v48 = vpop.f32.mrb[99].mxu0 }
 0x6d9   : > { %v3348_v58 = vpop.f32.mrb[100].mxu0 }
 0x6da   : > { %v9229_v17 = vpop.f32.mrb[101].mxu0 }
 0x6db   : > { %v3351_v50 = vpop.f32.mrb[102].mxu0 }
 0x6dc   : > { %v3300_v53 = vpop.f32.mrb[112].mxu1  ;;  %v9230_v42 = vpop.f32.mrb[103].mxu0 }
 0x6dd   : > { %v3978_v38 = vpack.c.bf16 %v3300_v53, %v3252_v34  ;;  %v9223_v27 = vpop.f32.mrb[113].mxu1 }
 0x6de   : > { %v3303_v32 = vpop.f32.mrb[114].mxu1 }
 0x6df   : > { %v9224_v19 = vpop.f32.mrb[115].mxu1  ;;  %9311 = vmatprep.mubr.msk.bf16.mxu0 %vm467_vm2, %v3978_v38 }
 0x6e1   : > { %v3444_v20 = vpop.f32.mrb[104].mxu0 }
 0x6e2   : > { %v9241_v43 = vpop.f32.mrb[105].mxu0 }
 0x6e3   : > { %v3447_v63 = vpop.f32.mrb[106].mxu0 }
 0x6e4   : > { %v3396_v16 = vpop.f32.mrb[116].mxu1  ;;  %v9242_v7 = vpop.f32.mrb[107].mxu0 }
 0x6e5   : > { %v3979_v21 = vpack.c.bf16 %v3396_v16, %v3348_v58  ;;  %v9235_v44 = vpop.f32.mrb[117].mxu1 }
 0x6e6   : > { %v3399_v18 = vpop.f32.mrb[118].mxu1 }
 0x6e7   : > { %v9236_v23 = vpop.f32.mrb[119].mxu1  ;;  %9312 = vmatmul.mubr.msk.bf16.vlgmr.msra.gmra.mrb[128].mxu0 %vm467_vm2, %v3979_v21 }
 0x6e8   : > { %9328 = vmatpush3.bf16.msra.mxu0 %v4137_v62 }
 0x6e9   : > { %v3540_v51 = vpop.f32.mrb[108].mxu0  ;;  %9393 = vmatprep.subr.bf16.mxu0 %v12628_v39 }
 0x6ea   : > { %v9253_v56 = vpop.f32.mrb[109].mxu0 }
 0x6eb   : > { %v3543_v34 = vpop.f32.mrb[110].mxu0 }
 0x6ec   : > { %v3492_v31 = vpop.f32.mrb[120].mxu1  ;;  %v9254_v9 = vpop.f32.mrb[111].mxu0 }
 0x6ed   : > { %v3980_v48 = vpack.c.bf16 %v3492_v31, %v3444_v20  ;;  %v9247_v17 = vpop.f32.mrb[121].mxu1 }
 0x6ee   : > { %v3495_v50 = vpop.f32.mrb[122].mxu1 }
 0x6ef   : > { %v9248_v58 = vpop.f32.mrb[123].mxu1  ;;  %9315 = vmatprep.mubr.msk.bf16.mxu0 %vm467_vm2, %v3980_v48 }
 0x6f1   : > { %v3636_v53 = vpop.f32.mrb[112].mxu0 }
 0x6f2   : > { %v9265_v10 = vpop.f32.mrb[113].mxu0 }
 0x6f3   : > { %v3639_v42 = vpop.f32.mrb[114].mxu0 }
 0x6f4   : > { %v3588_v38 = vpop.f32.mrb[124].mxu1  ;;  %v9266_v27 = vpop.f32.mrb[115].mxu0 }
 0x6f5   : > { %v3981_v32 = vpack.c.bf16 %v3588_v38, %v3540_v51  ;;  %v9259_v19 = vpop.f32.mrb[125].mxu1 }
 0x6f6   : > { %v3591_v43 = vpop.f32.mrb[126].mxu1 }
 0x6f7   : > { %v9260_v63 = vpop.f32.mrb[127].mxu1  ;;  %9316 = vmatmul.mubr.msk.bf16.gmra.mrb[132].mxu0 %vm467_vm2, %v3981_v32 }
 0x6f9   : > { %v3732_v16 = vpop.f32.mrb[116].mxu0 }
 0x6fa   : > { %v9277_v7 = vpop.f32.mrb[117].mxu0 }
 0x6fb   : > { %v3735_v21 = vpop.f32.mrb[118].mxu0 }
 0x6fc   : > { %v3684_v20 = vpop.f32.mrb[128].mxu1  ;;  %v9278_v44 = vpop.f32.mrb[119].mxu0 }
 0x6fd   : > { %v3982_v62 = vpack.c.bf16 %v3684_v20, %v3636_v53  ;;  %v9271_v18 = vpop.f32.mrb[129].mxu1 }
 0x6fe   : > { %v3687_v23 = vpop.f32.mrb[130].mxu1  ;;  %v12629_v18 = vpack.c.bf16 %v10906_v2, %v10904_v26  ;;  %v12631_v26 = vpack.c.bf16 %v10918_v45, %v10914_v35  ;;  %v12633_v35 = vpack.c.bf16 %v10924_v1, %v10934_v4 }
 0x6ff   : > { %v9272_v56 = vpop.f32.mrb[131].mxu1  ;;  %9319 = vmatprep.mubr.msk.bf16.mxu0 %vm467_vm2, %v3982_v62 }
 0x704   : > { %v3780_v34 = vpop.f32.mrb[132].mxu1 }
 0x705   : > { %v3983_v31 = vpack.c.bf16 %v3780_v34, %v3732_v16  ;;  %v9283_v9 = vpop.f32.mrb[133].mxu1 }
 0x706   : > { %v3783_v51 = vpop.f32.mrb[134].mxu1 }
 0x707   : > { %v9284_v48 = vpop.f32.mrb[135].mxu1  ;;  %9320 = vmatmul.mubr.msk.bf16.gmra.mrb[136].mxu0 %vm467_vm2, %v3983_v31  ;;  %v4644_v31 = vsel %vm467_vm2, %v11347_v59, 0  ;;  %v12630_v51 = vpack.c.bf16 %v10912_v52, %v10910_v36  ;;  %v12632_v36 = vpack.c.bf16 %v10922_v40, %v10930_v54  ;;  %v12635_v54 = vld [vmem:[#allocation2_spill] sm:$0xff] }
 0x72e   : > { %v3828_v17 = vpop.f32.mrb[120].mxu0 }
 0x72f   : > { %v9289_v50 = vpop.f32.mrb[121].mxu0 }
 0x730   : > { %v3831_v58 = vpop.f32.mrb[122].mxu0 }
 0x731   : > { %v9290_v10 = vpop.f32.mrb[123].mxu0 }
 0x736   : > { %v3924_v42 = vpop.f32.mrb[124].mxu0 }
 0x737   : > { %v9301_v38 = vpop.f32.mrb[125].mxu0 }
 0x738   : > { %v3927_v27 = vpop.f32.mrb[126].mxu0  ;;  %v12634_v38 = vpack.c.bf16 %v10926_v22, %v10938_v25 }
 0x739   : > { %v3876_v53 = vpop.f32.mrb[136].mxu1  ;;  %v9302_v32 = vpop.f32.mrb[127].mxu0  ;;  %v12636_v27 = vpack.c.bf16 %v10928_v57, %v12635_v54 }
 0x73a   : > { %v3984_v19 = vpack.c.bf16 %v3876_v53, %v3828_v17  ;;  %v9295_v43 = vpop.f32.mrb[137].mxu1 }
 0x73b   : > { %v3879_v63 = vpop.f32.mrb[138].mxu1  ;;  %v12638_v43 = vld [vmem:[#allocation3_spill] sm:$0xff] }
 0x73c   : > { %v9296_v7 = vpop.f32.mrb[139].mxu1  ;;  %9323 = vmatprep.mubr.msk.bf16.mxu0 %vm467_vm2, %v3984_v19  ;;  %v12637_v19 = vld [vmem:[#allocation4_spill] sm:$0xff] }
 0x73d   : > { %v12639_v63 = vpack.c.bf16 %v12637_v19, %v12638_v43 }
 0x741   : > { %v3972_v16 = vpop.f32.mrb[140].mxu1 }
 0x742   : > { %v3985_v21 = vpack.c.bf16 %v3972_v16, %v3924_v42  ;;  %v9307_v20 = vpop.f32.mrb[141].mxu1  ;;  %v4744_v16 = vsel %vm467_vm2, %v11358_v12, 0  ;;  %v4844_v12 = vsel %vm467_vm2, %v11370_v28, 0  ;;  %v4944_v28 = vsel %vm467_vm2, %v11381_v33, 0 }
 0x743   : > { %v3975_v44 = vpop.f32.mrb[142].mxu1 }
 0x744   : > { %v9308_v62 = vpop.f32.mrb[143].mxu1  ;;  %9324 = vmatmul.mubr.msk.bf16.gmra.mrb[140].mxu0 %vm467_vm2, %v3985_v21 }
 0x745   : > { %9329 = vmatprep.mubr.msk.bf16.mxu0 %vm467_vm2, %v12629_v18 }
 0x74a   : > { %v11413_v23 = vpop.f32.mrb[144].mxu1 }
 0x74b   : > { %v9349_v56 = vpop.f32.mrb[145].mxu1  ;;  %v5036_v34 = vsel %vm467_vm2, %v11413_v23, -inf }
 0x74c   : > { %5037 = vmax.xlane.f32.xlu0 %v5036_v34  ;;  %v4283_v9 = vpop.f32.mrb[146].mxu1  ;;  %9330 = vmatmul.mubr.msk.bf16.vlgmr.msra.gmra.mrb[128].mxu0 %vm467_vm2, %v12630_v51 }
 0x74d   : > { %v9350_v48 = vpop.f32.mrb[147].mxu1  ;;  %9394 = vmatpush3.bf16.xpose.msra.mxu0 %v4644_v31  ;;  %9333 = vmatprep.mubr.msk.bf16.mxu0 %vm467_vm2, %v12631_v26 }
 0x74e   : > { %9405 = vmatprep.subr.bf16.mxu0 %v12628_v39  ;;  %v5229_v48 = vpop.permute.xlu1 %5228 }
 0x74f   : > { %v5234_v33 = vsel %vm1446_vm3, %v5229_v48, 0 }
 0x752   : > { %v11428_v2 = vpop.f32.mrb[148].mxu1 }
 0x753   : > { %v9355_v17 = vpop.f32.mrb[149].mxu1  ;;  %v5039_v59 = vsel %vm467_vm2, %v11428_v2, -inf }
 0x754   : > { %5040 = vmax.xlane.f32.xlu1 %v5039_v59  ;;  %v4333_v50 = vpop.f32.mrb[150].mxu1  ;;  %9334 = vmatmul.mubr.msk.bf16.gmra.mrb[132].mxu0 %vm467_vm2, %v12632_v36 }
 0x755   : > { %v9356_v52 = vpop.f32.mrb[151].mxu1  ;;  %9337 = vmatprep.mubr.msk.bf16.mxu0 %vm467_vm2, %v12633_v35 }
 0x75a   : > { %v11440_v45 = vpop.f32.mrb[152].mxu1 }
 0x75b   : > { %v9361_v58 = vpop.f32.mrb[153].mxu1  ;;  %v5042_v10 = vsel %vm467_vm2, %v11440_v45, -inf }
 0x75c   : > { %5043 = vmax.xlane.f32.xlu0 %v5042_v10  ;;  %v4383_v42 = vpop.f32.mrb[154].mxu1  ;;  %9338 = vmatmul.mubr.msk.bf16.gmra.mrb[136].mxu0 %vm467_vm2, %v12634_v38 }
 0x75d   : > { %v9362_v40 = vpop.f32.mrb[155].mxu1  ;;  %9341 = vmatprep.mubr.msk.bf16.mxu0 %vm467_vm2, %v12636_v27 }
 0x762   : > { %v11452_v1 = vpop.f32.mrb[156].mxu1 }
 0x763   : > { %v9367_v4 = vpop.f32.mrb[157].mxu1  ;;  %v5045_v53 = vsel %vm467_vm2, %v11452_v1, -inf }
 0x764   : > { %5046 = vmax.xlane.f32.xlu0 %v5045_v53  ;;  %v4433_v32 = vpop.f32.mrb[158].mxu1  ;;  %9342 = vmatmul.mubr.msk.bf16.gmra.mrb[140].mxu0 %vm467_vm2, %v12639_v63 }
 0x765   : > { %v9368_v22 = vpop.f32.mrb[159].mxu1  ;;  %9395 = vmatprep.mubr.msk.bf16.mxu0 %vm10155_vm1, %v12628_v39 }
 0x76a   : > { %v11462_v57 = vpop.f32.mrb[160].mxu1 }
 0x76b   : > { %v9373_v25 = vpop.f32.mrb[161].mxu1  ;;  %v5048_v7 = vsel %vm467_vm2, %v11462_v57, -inf }
 0x76c   : > { %5049 = vmax.xlane.f32.xlu1 %v5048_v7  ;;  %v4483_v21 = vpop.f32.mrb[162].mxu1  ;;  %9396 = vmatmul.mubr.msk.bf16.vlgmr.msra.gmra.mrb[144].mxu0 %vm467_vm2, %v11354_v29 }
 0x76d   : > { %v9374_v20 = vpop.f32.mrb[163].mxu1  ;;  %9406 = vmatpush3.bf16.xpose.msra.mxu0 %v4744_v16  ;;  %9407 = vmatprep.mubr.msk.bf16.mxu0 %vm10155_vm1, %v12628_v39  ;;  %v11525_v16 = vpop.permute.xlu0 %5372 }
 0x76e   : > { %9417 = vmatprep.subr.bf16.mxu0 %v12628_v39  ;;  %v11527_v21 = vpop.permute.xlu1 %5324 }
 0x771   : > { %v11529_v20 = vpop.permute.xlu0 %5468 }
 0x772   : > { %v11473_v44 = vpop.f32.mrb[164].mxu1 }
 0x773   : > { %v9379_v62 = vpop.f32.mrb[165].mxu1  ;;  %v5051_v18 = vsel %vm467_vm2, %v11473_v44, -inf }
 0x774   : > { %5052 = vmax.xlane.f32.xlu0 %v5051_v18  ;;  %v4533_v56 = vpop.f32.mrb[166].mxu1  ;;  %9408 = vmatmul.mubr.msk.bf16.vlgmr.msra.gmra.mrb[148].mxu0 %vm467_vm2, %v11363_v49  ;;  %v11531_v62 = vpop.permute.xlu1 %5420 }
 0x775   : > { %v9380_v29 = vpop.f32.mrb[167].mxu1  ;;  %9418 = vmatpush3.bf16.xpose.msra.mxu0 %v4844_v12  ;;  %9419 = vmatprep.mubr.msk.bf16.mxu0 %vm10155_vm1, %v12628_v39 }
 0x776   : > { %9429 = vmatprep.subr.bf16.mxu0 %v12628_v39 }
 0x778   : > { %v11534_v29 = vpop.permute.xlu1 %5516 }
 0x77a   : > { %v11484_v34 = vpop.f32.mrb[168].mxu1 }
 0x77b   : > { %v9385_v31 = vpop.f32.mrb[169].mxu1  ;;  %v5054_v9 = vsel %vm467_vm2, %v11484_v34, -inf }
 0x77c   : > { %5055 = vmax.xlane.f32.xlu1 %v5054_v9  ;;  %v4583_v51 = vpop.f32.mrb[170].mxu1  ;;  %9420 = vmatmul.mubr.msk.bf16.vlgmr.msra.gmra.mrb[152].mxu0 %vm467_vm2, %v11377_v24 }
 0x77d   : > { %v9386_v49 = vpop.f32.mrb[171].mxu1  ;;  %9430 = vmatpush3.bf16.xpose.msra.mxu0 %v4944_v28  ;;  %9431 = vmatprep.mubr.msk.bf16.mxu0 %vm10155_vm1, %v12628_v39 }
 0x77e   : > { %9441 = vmatprep.subr.bf16.mxu0 %v12628_v39 }
 0x782   : > { %v11495_v26 = vpop.f32.mrb[172].mxu1 }
 0x783   : > { %v9391_v17 = vpop.f32.mrb[173].mxu1  ;;  %v5057_v59 = vsel %vm467_vm2, %v11495_v26, -inf }
 0x784   : > { %5058 = vmax.xlane.f32.xlu0 %v5057_v59  ;;  %v4633_v50 = vpop.f32.mrb[174].mxu1  ;;  %9432 = vmatmul.mubr.msk.bf16.vlgmr.msra.gmra.mrb[156].mxu0 %vm467_vm2, %v11386_v30 }
 0x785   : > { %v9392_v24 = vpop.f32.mrb[175].mxu1  ;;  %9442 = vmatpush3.bf16.msra.mxu0 %v5234_v33  ;;  %9443 = vmatprep.mubr.msk.bf16.mxu0 %vm10155_vm1, %v12628_v39 }
 0x786   : > { %9453 = vmatprep.subr.bf16.mxu0 %v12628_v39 }
 0x78a   : > { %v11505_v36 = vpop.f32.mrb[176].mxu1 }
 0x78b   : > { %v9403_v52 = vpop.f32.mrb[177].mxu1  ;;  %v5063_v35 = vsel %vm467_vm2, %v11505_v36, -inf }
 0x78c   : > { %5064 = vmax.xlane.f32.xlu0 %v5063_v35  ;;  %v4733_v58 = vpop.f32.mrb[178].mxu1 }
 0x78d   : > { %5612 = vrot.lane.b32.xlu1 %v10298_v3, %s10163_s26  ;;  %v9404_v10 = vpop.f32.mrb[179].mxu1 }
 0x792   : > { %v11511_v30 = vpop.f32.mrb[180].mxu1 }
 0x793   : > { %v9415_v42 = vpop.f32.mrb[181].mxu1  ;;  %v5069_v38 = vsel %vm467_vm2, %v11511_v30, -inf }
 0x794   : > { %5070 = vmax.xlane.f32.xlu0 %v5069_v38  ;;  %v4833_v40 = vpop.f32.mrb[182].mxu1 }
 0x795   : > { %v9416_v54 = vpop.f32.mrb[183].mxu1 }
 0x79a   : > { %v11515_v27 = vpop.f32.mrb[184].mxu1 }
 0x79b   : > { %v9427_v4 = vpop.f32.mrb[185].mxu1  ;;  %v5075_v25 = vsel %vm467_vm2, %v11515_v27, -inf }
 0x79c   : > { %v4933_v53 = vpop.f32.mrb[186].mxu1 }
 0x79d   : > { %v9428_v32 = vpop.f32.mrb[187].mxu1 }
 0x7a2   : > { %v11517_v19 = vpop.f32.mrb[188].mxu1 }
 0x7a3   : > { %v9439_v43 = vpop.f32.mrb[189].mxu1  ;;  %v5081_v7 = vsel %vm467_vm2, %v11517_v19, -inf }
 0x7a4   : > { %v5033_v63 = vpop.f32.mrb[190].mxu1 }
 0x7a5   : > { %v9440_v22 = vpop.f32.mrb[191].mxu1 }
 0x7aa   : > { %5564 = vrot.lane.b32.xlu0 %v10294_v0, %s10163_s26 }
 0x7c9   : > { %5076 = vmax.xlane.f32.xlu0 %v5075_v25 }
 0x7cd   : > { %5082 = vmax.xlane.f32.xlu0 %v5081_v7 }
 0x7d9   : > { %v5038_v18 = vpop.xlane.xlu0 %5037 }
 0x7da   : > { %v5084_v12 = vsub.f32 %v11413_v23, %v5038_v18 }
 0x7dc   : > { %v5100_v56 = vmul.f32 1.442695, %v5084_v12 }
 0x7de   : > { %9970 = vpow2.f32 %v5100_v56 }
 0x7e1   : > { %v5041_v31 = vpop.xlane.xlu1 %5040 }
 0x7e2   : > { %v5085_v9 = vsub.f32 %v11428_v2, %v5041_v31 }
 0x7e4   : > { %v5102_v28 = vmul.f32 1.442695, %v5085_v9 }
 0x7e6   : > { %9972 = vpow2.f32 %v5102_v28 }
 0x7e8   : > { %v11537_v51 = vpop.eup %9970 }
 0x7e9   : > { %v5044_v49 = vpop.xlane.xlu0 %5043  ;;  %v5132_v48 = vsel %vm467_vm2, %v11537_v51, 0.0 }
 0x7ea   : > { %v5086_v17 = vsub.f32 %v11440_v45, %v5044_v49  ;;  %5133 = vadd.xlane.f32.xlu1 %v5132_v48 }
 0x7ec   : > { %v5104_v59 = vmul.f32 1.442695, %v5086_v17 }
 0x7ee   : > { %9974 = vpow2.f32 %v5104_v59 }
 0x7f0   : > { %v11542_v23 = vpop.eup %9972 }
 0x7f1   : > { %v5047_v33 = vpop.xlane.xlu0 %5046  ;;  %v5135_v50 = vsel %vm467_vm2, %v11542_v23, 0.0 }
 0x7f2   : > { %v5087_v2 = vsub.f32 %v11452_v1, %v5047_v33  ;;  %5136 = vadd.xlane.f32.xlu0 %v5135_v50 }
 0x7f4   : > { %v5106_v24 = vmul.f32 1.442695, %v5087_v2 }
 0x7f6   : > { %9976 = vpow2.f32 %v5106_v24 }
 0x7f8   : > { %v11547_v52 = vpop.eup %9974 }
 0x7f9   : > { %v5050_v35 = vpop.xlane.xlu1 %5049  ;;  %v5138_v45 = vsel %vm467_vm2, %v11547_v52, 0.0 }
 0x7fa   : > { %v5088_v58 = vsub.f32 %v11462_v57, %v5050_v35  ;;  %5139 = vadd.xlane.f32.xlu1 %v5138_v45 }
 0x7fc   : > { %v5108_v10 = vmul.f32 1.442695, %v5088_v58 }
 0x7fe   : > { %9978 = vpow2.f32 %v5108_v10 }
 0x800   : > { %v11552_v42 = vpop.eup %9976 }
 0x801   : > { %v5053_v38 = vpop.xlane.xlu0 %5052  ;;  %v5141_v1 = vsel %vm467_vm2, %v11552_v42, 0.0 }
 0x802   : > { %v5089_v40 = vsub.f32 %v11473_v44, %v5053_v38  ;;  %5142 = vadd.xlane.f32.xlu0 %v5141_v1 }
 0x804   : > { %v5110_v54 = vmul.f32 1.442695, %v5089_v40 }
 0x806   : > { %9980 = vpow2.f32 %v5110_v54 }
 0x808   : > { %v11557_v4 = vpop.eup %9978 }
 0x809   : > { %v5056_v53 = vpop.xlane.xlu1 %5055  ;;  %v5144_v57 = vsel %vm467_vm2, %v11557_v4, 0.0 }
 0x80a   : > { %v5090_v32 = vsub.f32 %v11484_v34, %v5056_v53  ;;  %5145 = vadd.xlane.f32.xlu1 %v5144_v57 }
 0x80c   : > { %v5112_v43 = vmul.f32 1.442695, %v5090_v32 }
 0x80e   : > { %9982 = vpow2.f32 %v5112_v43 }
 0x810   : > { %v11562_v63 = vpop.eup %9980 }
 0x811   : > { %v5059_v22 = vpop.xlane.xlu0 %5058  ;;  %v5147_v44 = vsel %vm467_vm2, %v11562_v63, 0.0 }
 0x812   : > { %v5091_v25 = vsub.f32 %v11495_v26, %v5059_v22  ;;  %5148 = vadd.xlane.f32.xlu0 %v5147_v44 }
 0x814   : > { %v5114_v7 = vmul.f32 1.442695, %v5091_v25 }
 0x816   : > { %9984 = vpow2.f32 %v5114_v7 }
 0x818   : > { %v11567_v18 = vpop.eup %9982 }
 0x819   : > { %v5150_v12 = vsel %vm467_vm2, %v11567_v18, 0.0  ;;  %v5065_v26 = vpop.xlane.xlu0 %5064 }
 0x81a   : > { %5151 = vadd.xlane.f32.xlu1 %v5150_v12  ;;  %v5093_v28 = vsub.f32 %v11505_v36, %v5065_v26 }
 0x81c   : > { %v5118_v59 = vmul.f32 1.442695, %v5093_v28 }
 0x81e   : > { %9986 = vpow2.f32 %v5118_v59 }
 0x820   : > { %v11571_v34 = vpop.eup %9984 }
 0x821   : > { %v5153_v56 = vsel %vm467_vm2, %v11571_v34, 0.0  ;;  %v5071_v48 = vpop.xlane.xlu0 %5070 }
 0x822   : > { %5154 = vadd.xlane.f32.xlu0 %v5153_v56  ;;  %v5095_v33 = vsub.f32 %v11511_v30, %v5071_v48 }
 0x824   : > { %v5122_v24 = vmul.f32 1.442695, %v5095_v33 }
 0x825   : > { %v11589_v1 = vpop.permute.xlu0 %5564 }
 0x826   : > { %9988 = vpow2.f32 %v5122_v24 }
 0x828   : > { %v11593_v54 = vpop.eup %9986 }
 0x829   : > { %v5159_v32 = vsel %vm467_vm2, %v11593_v54, 0.0 }
 0x82b   : > { %5708 = vrot.lane.b32.xlu1 %v10306_v6, %s10163_s26 }
 0x830   : > { %v11599_v43 = vpop.eup %9988 }
 0x831   : > { %v5165_v28 = vsel %vm467_vm2, %v11599_v43, 0.0 }
 0x838   : > { %5660 = vrot.lane.b32.xlu0 %v10302_v5, %s10163_s26 }
 0x83f   : > { %v11579_v31 = vpop.f32.mrb[144].mxu0 }
 0x840   : > { %v9397_v9 = vpop.f32.mrb[145].mxu0  ;;  %v5060_v58 = vsel %vm467_vm2, %v11579_v31, -inf }
 0x841   : > { %v4683_v49 = vpop.f32.mrb[146].mxu0 }
 0x842   : > { %v9398_v17 = vpop.f32.mrb[147].mxu0 }
 0x847   : > { %v11583_v50 = vpop.f32.mrb[148].mxu0 }
 0x848   : > { %v9409_v2 = vpop.f32.mrb[149].mxu0  ;;  %v5066_v30 = vsel %vm467_vm2, %v11583_v50, -inf }
 0x849   : > { %v4783_v35 = vpop.f32.mrb[150].mxu0 }
 0x84a   : > { %v9410_v45 = vpop.f32.mrb[151].mxu0 }
 0x84f   : > { %5061 = vmax.xlane.f32.xlu1 %v5060_v58  ;;  %v11587_v10 = vpop.f32.mrb[152].mxu0 }
 0x850   : > { %v9421_v36 = vpop.f32.mrb[153].mxu0  ;;  %v5072_v57 = vsel %vm467_vm2, %v11587_v10, -inf }
 0x851   : > { %v4883_v38 = vpop.f32.mrb[154].mxu0  ;;  %v5330_v36 = vsel %vm1446_vm3, %v11527_v21, 0 }
 0x852   : > { %v9422_v40 = vpop.f32.mrb[155].mxu0 }
 0x853   : > { %5067 = vmax.xlane.f32.xlu1 %v5066_v30  ;;  %v5378_v30 = vsel %vm1446_vm3, %v11525_v16, 0 }
 0x856   : > { %v5077_v53 = vpop.xlane.xlu0 %5076 }
 0x857   : > { %v5097_v22 = vsub.f32 %v11515_v27, %v5077_v53  ;;  %5073 = vmax.xlane.f32.xlu1 %v5072_v57  ;;  %5160 = vadd.xlane.f32.xlu0 %v5159_v32  ;;  %v11602_v44 = vpop.f32.mrb[156].mxu0  ;;  %v5426_v32 = vsel %vm1446_vm3, %v11531_v62, 0 }
 0x858   : > { %v9433_v25 = vpop.f32.mrb[157].mxu0  ;;  %v5078_v7 = vsel %vm467_vm2, %v11602_v44, -inf }
 0x859   : > { %v5126_v12 = vmul.f32 1.442695, %v5097_v22  ;;  %v4983_v56 = vpop.f32.mrb[158].mxu0 }
 0x85a   : > { %v5083_v26 = vpop.xlane.xlu0 %5082  ;;  %v9434_v9 = vpop.f32.mrb[159].mxu0 }
 0x85b   : > { %9990 = vpow2.f32 %v5126_v12  ;;  %v5099_v49 = vsub.f32 %v11517_v19, %v5083_v26  ;;  %5079 = vmax.xlane.f32.xlu1 %v5078_v7  ;;  %5166 = vadd.xlane.f32.xlu0 %v5165_v28  ;;  %v11619_v19 = vpop.permute.xlu1 %5612  ;;  %v5474_v7 = vsel %vm1446_vm3, %v11529_v20, 0  ;;  %v5522_v26 = vsel %vm1446_vm3, %v11534_v29, 0 }
 0x85d   : > { %v5130_v27 = vmul.f32 1.442695, %v5099_v49  ;;  %v5570_v49 = vsel %vm1446_vm3, %v11589_v1, 0 }
 0x85f   : > { %9992 = vpow2.f32 %v5130_v27 }
 0x865   : > { %v11609_v48 = vpop.eup %9990 }
 0x866   : > { %v5171_v17 = vsel %vm467_vm2, %v11609_v48, 0.0 }
 0x867   : > { %5172 = vadd.xlane.f32.xlu0 %v5171_v17 }
 0x869   : > { %v11613_v59 = vpop.eup %9992 }
 0x86a   : > { %v5177_v33 = vsel %vm467_vm2, %v11613_v59, 0.0 }
 0x86b   : > { %5178 = vadd.xlane.f32.xlu0 %v5177_v33  ;;  %v5618_v33 = vsel %vm1446_vm3, %v11619_v19, 0 }
 0x86c   : > { %5756 = vrot.lane.b32.xlu1 %v10310_v8, %s10163_s26 }
 0x877   : > { %v5134_v2 = vpop.xlane.xlu1 %5133 }
 0x878   : > { %9994 = vrcp.f32 %v5134_v2 }
 0x87f   : > { %v5137_v24 = vpop.xlane.xlu0 %5136 }
 0x880   : > { %9996 = vrcp.f32 %v5137_v24 }
 0x881   : > { %5804 = vrot.lane.b32.xlu0 %v10314_v11, %s10163_s26 }
 0x882   : > { %v9995_v35 = vpop.eup %9994 }
 0x883   : > { %v5196_v45 = vmul.f32 %v9995_v35, %v11537_v51 }
 0x885   : > { %5900 = vrot.lane.b32.xlu0 %v10322_v14, %s10163_s26  ;;  %v5212_v58 = vpack.c.bf16 %v5196_v45, %v5196_v45 }
 0x887   : > { %9444 = vmatmul.mubr.msk.bf16.vlgmr.msra.gmra.mrb[160].mxu0 %vm467_vm2, %v5212_v58  ;;  %v5140_v38 = vpop.xlane.xlu1 %5139 }
 0x888   : > { %9454 = vmatpush3.bf16.msra.mxu0 %v5330_v36  ;;  %9998 = vrcp.f32 %v5140_v38  ;;  %9455 = vmatprep.mubr.msk.bf16.mxu0 %vm10155_vm1, %v12628_v39 }
 0x889   : > { %6146 = vrot.lane.b32.xlu0 %v10272_v41, %s10164_s8  ;;  %9465 = vmatprep.subr.bf16.mxu0 %v12628_v39 }
 0x88a   : > { %v9997_v51 = vpop.eup %9996 }
 0x88b   : > { %v5197_v40 = vmul.f32 %v9997_v51, %v11542_v23 }
 0x88d   : > { %6196 = vrot.lane.b32.xlu0 %v10280_v47, %s10164_s8  ;;  %v5213_v21 = vpack.c.bf16 %v5197_v40, %v5197_v40 }
 0x88f   : > { %9450 = vmatmul.mubr.msk.bf16.vlgmr.msra.gmra.mrb[192].mxu1 %vm467_vm2, %v5213_v21  ;;  %v5143_v53 = vpop.xlane.xlu0 %5142 }
 0x890   : > { %9460 = vmatpush3.bf16.msra.mxu1 %v5378_v30  ;;  %10000 = vrcp.f32 %v5143_v53  ;;  %9461 = vmatprep.mubr.msk.bf16.mxu1 %vm10155_vm1, %v12628_v39 }
 0x891   : > { %6246 = vrot.lane.b32.xlu0 %v10270_v37, %s10164_s8  ;;  %9471 = vmatprep.subr.bf16.mxu1 %v12628_v39 }
 0x892   : > { %v9999_v23 = vpop.eup %9998 }
 0x893   : > { %v5198_v57 = vmul.f32 %v9999_v23, %v11547_v52 }
 0x895   : > { %6296 = vrot.lane.b32.xlu0 %v10278_v46, %s10164_s8  ;;  %v5214_v16 = vpack.c.bf16 %v5198_v57, %v5198_v57 }
 0x897   : > { %9456 = vmatmul.mubr.msk.bf16.vlgmr.msra.gmra.mrb[164].mxu0 %vm467_vm2, %v5214_v16  ;;  %v5146_v22 = vpop.xlane.xlu1 %5145 }
 0x898   : > { %9466 = vmatpush3.bf16.msra.mxu0 %v5426_v32  ;;  %10002 = vrcp.f32 %v5146_v22  ;;  %9467 = vmatprep.mubr.msk.bf16.mxu0 %vm10155_vm1, %v12628_v39 }
 0x899   : > { %6346 = vrot.lane.b32.xlu0 %v10286_v55, %s10164_s8  ;;  %9477 = vmatprep.subr.bf16.mxu0 %v12628_v39 }
 0x89a   : > { %v10001_v52 = vpop.eup %10000 }
 0x89b   : > { %v5199_v25 = vmul.f32 %v10001_v52, %v11552_v42 }
 0x89d   : > { %6344 = vrot.lane.b32.xlu0 %v10286_v55, %s10165_s10  ;;  %v5215_v62 = vpack.c.bf16 %v5199_v25, %v5199_v25 }
 0x89f   : > { %9462 = vmatmul.mubr.msk.bf16.vlgmr.msra.gmra.mrb[196].mxu1 %vm467_vm2, %v5215_v62  ;;  %v5149_v12 = vpop.xlane.xlu0 %5148 }
 0x8a0   : > { %9472 = vmatpush3.bf16.msra.mxu1 %v5474_v7  ;;  %10004 = vrcp.f32 %v5149_v12  ;;  %9473 = vmatprep.mubr.msk.bf16.mxu1 %vm10155_vm1, %v12628_v39 }
 0x8a1   : > { %6446 = vrot.lane.b32.xlu0 %v10288_v60, %s10164_s8  ;;  %9483 = vmatprep.subr.bf16.mxu1 %v12628_v39 }
 0x8a2   : > { %v10003_v42 = vpop.eup %10002 }
 0x8a3   : > { %v5200_v56 = vmul.f32 %v10003_v42, %v11557_v4 }
 0x8a5   : > { %6444 = vrot.lane.b32.xlu0 %v10288_v60, %s10165_s10  ;;  %v5216_v20 = vpack.c.bf16 %v5200_v56, %v5200_v56 }
 0x8a7   : > { %9468 = vmatmul.mubr.msk.bf16.vlgmr.msra.gmra.mrb[168].mxu0 %vm467_vm2, %v5216_v20  ;;  %v5152_v9 = vpop.xlane.xlu1 %5151 }
 0x8a8   : > { %9478 = vmatpush3.bf16.msra.mxu0 %v5522_v26  ;;  %10006 = vrcp.f32 %v5152_v9  ;;  %9479 = vmatprep.mubr.msk.bf16.mxu0 %vm10155_vm1, %v12628_v39 }
 0x8a9   : > { %6546 = vrot.lane.b32.xlu0 %v10298_v3, %s10164_s8  ;;  %9489 = vmatprep.subr.bf16.mxu0 %v12628_v39 }
 0x8aa   : > { %v10005_v4 = vpop.eup %10004 }
 0x8ab   : > { %v5201_v28 = vmul.f32 %v10005_v4, %v11562_v63 }
 0x8ad   : > { %6544 = vrot.lane.b32.xlu0 %v10298_v3, %s10165_s10  ;;  %v5217_v29 = vpack.c.bf16 %v5201_v28, %v5201_v28 }
 0x8af   : > { %9474 = vmatmul.mubr.msk.bf16.vlgmr.msra.gmra.mrb[200].mxu1 %vm467_vm2, %v5217_v29  ;;  %v5155_v27 = vpop.xlane.xlu0 %5154 }
 0x8b0   : > { %9484 = vmatpush3.bf16.msra.mxu1 %v5570_v49  ;;  %10008 = vrcp.f32 %v5155_v27  ;;  %9485 = vmatprep.mubr.msk.bf16.mxu1 %vm10155_vm1, %v12628_v39 }
 0x8b1   : > { %6646 = vrot.lane.b32.xlu0 %v10306_v6, %s10164_s8  ;;  %9495 = vmatprep.subr.bf16.mxu1 %v12628_v39 }
 0x8b2   : > { %v10007_v63 = vpop.eup %10006 }
 0x8b3   : > { %v5202_v17 = vmul.f32 %v10007_v63, %v11567_v18  ;;  %v5661_v24 = vpop.permute.xlu0 %5660 }
 0x8b4   : > { %v5666_v19 = vsel %vm1446_vm3, %v5661_v24, 0 }
 0x8b5   : > { %6644 = vrot.lane.b32.xlu0 %v10306_v6, %s10165_s10  ;;  %v5218_v1 = vpack.c.bf16 %v5202_v17, %v5202_v17 }
 0x8b7   : > { %9480 = vmatmul.mubr.msk.bf16.vlgmr.msra.gmra.mrb[172].mxu0 %vm467_vm2, %v5218_v1 }
 0x8b8   : > { %9490 = vmatpush3.bf16.msra.mxu0 %v5618_v33  ;;  %9491 = vmatprep.mubr.msk.bf16.mxu0 %vm10155_vm1, %v12628_v39 }
 0x8b9   : > { %6746 = vrot.lane.b32.xlu0 %v10314_v11, %s10164_s8  ;;  %9501 = vmatprep.subr.bf16.mxu0 %v12628_v39 }
 0x8ba   : > { %v10009_v2 = vpop.eup %10008 }
 0x8bb   : > { %v5203_v18 = vmul.f32 %v10009_v2, %v11571_v34  ;;  %v11718_v34 = vpop.permute.xlu1 %5708 }
 0x8bd   : > { %6744 = vrot.lane.b32.xlu0 %v10314_v11, %s10165_s10  ;;  %v5219_v35 = vpack.c.bf16 %v5203_v18, %v5203_v18 }
 0x8bf   : > { %9486 = vmatmul.mubr.msk.bf16.vlgmr.msra.gmra.mrb[204].mxu1 %vm467_vm2, %v5219_v35 }
 0x8c0   : > { %9496 = vmatpush3.bf16.msra.mxu1 %v5666_v19  ;;  %9497 = vmatprep.mubr.msk.bf16.mxu1 %vm10155_vm1, %v12628_v39 }
 0x8c1   : > { %6846 = vrot.lane.b32.xlu0 %v10322_v14, %s10164_s8  ;;  %9507 = vmatprep.subr.bf16.mxu1 %v12628_v39 }
 0x8c5   : > { %6844 = vrot.lane.b32.xlu0 %v10322_v14, %s10165_s10 }
 0x8c9   : > { %7184 = vrot.lane.b32.xlu0 %v10280_v47, %s10166_s11 }
 0x8cd   : > { %7280 = vrot.lane.b32.xlu0 %v10278_v46, %s10166_s11 }
 0x8d1   : > { %7376 = vrot.lane.b32.xlu0 %v10290_v61, %s10166_s11 }
 0x8dc   : > { %v5062_v45 = vpop.xlane.xlu1 %5061 }
 0x8dd   : > { %v5092_v58 = vsub.f32 %v11579_v31, %v5062_v45 }
 0x8df   : > { %v5116_v36 = vmul.f32 1.442695, %v5092_v58 }
 0x8e0   : > { %v5068_v38 = vpop.xlane.xlu1 %5067 }
 0x8e1   : > { %10010 = vpow2.f32 %v5116_v36 }
 0x8e4   : > { %v5161_v51 = vpop.xlane.xlu0 %5160  ;;  %v5074_v40 = vpop.xlane.xlu1 %5073 }
 0x8e5   : > { %10012 = vrcp.f32 %v5161_v51  ;;  %v5096_v12 = vsub.f32 %v11587_v10, %v5074_v40 }
 0x8e7   : > { %v5124_v42 = vmul.f32 1.442695, %v5096_v12 }
 0x8e8   : > { %v5167_v21 = vpop.xlane.xlu0 %5166  ;;  %v5080_v53 = vpop.xlane.xlu1 %5079 }
 0x8e9   : > { %10014 = vrcp.f32 %v5167_v21 }
 0x8eb   : > { %v11721_v30 = vpop.eup %10010 }
 0x8ec   : > { %v5156_v23 = vsel %vm467_vm2, %v11721_v30, 0.0  ;;  %v5757_v32 = vpop.permute.xlu1 %5756 }
 0x8ed   : > { %5157 = vadd.xlane.f32.xlu1 %v5156_v23  ;;  %v5762_v52 = vsel %vm1446_vm3, %v5757_v32, 0 }
 0x8ef   : > { %v10013_v57 = vpop.eup %10012 }
 0x8f0   : > { %v5205_v16 = vmul.f32 %v10013_v57, %v11593_v54  ;;  %v5094_v54 = vsub.f32 %v11583_v50, %v5068_v38 }
 0x8f2   : > { %v5221_v31 = vpack.c.bf16 %v5205_v16, %v5205_v16  ;;  %v5120_v7 = vmul.f32 1.442695, %v5094_v54 }
 0x8f3   : > { %v10015_v22 = vpop.eup %10014 }
 0x8f4   : > { %9498 = vmatmul.mubr.msk.bf16.vlgmr.msra.gmra.mrb[208].mxu1 %vm467_vm2, %v5221_v31  ;;  %v5207_v25 = vmul.f32 %v10015_v22, %v11599_v43  ;;  %10016 = vpow2.f32 %v5120_v7  ;;  %v5098_v43 = vsub.f32 %v11602_v44, %v5080_v53  ;;  %v5173_v2 = vpop.xlane.xlu0 %5172  ;;  %v5714_v7 = vsel %vm1446_vm3, %v11718_v34, 0 }
 0x8f5   : > { %9508 = vmatpush3.bf16.msra.mxu1 %v5762_v52  ;;  %9509 = vmatprep.mubr.msk.bf16.mxu1 %vm10155_vm1, %v12628_v39  ;;  %10018 = vpow2.f32 %v5124_v42 }
 0x8f6   : > { %9519 = vmatprep.subr.bf16.mxu1 %v12628_v39  ;;  %v5223_v62 = vpack.c.bf16 %v5207_v25, %v5207_v25  ;;  %v5128_v56 = vmul.f32 1.442695, %v5098_v43 }
 0x8f8   : > { %10020 = vpow2.f32 %v5128_v56 }
 0x8f9   : > { %10022 = vrcp.f32 %v5173_v2 }
 0x8fc   : > { %9510 = vmatmul.mubr.msk.bf16.vlgmr.msra.gmra.mrb[212].mxu1 %vm467_vm2, %v5223_v62 }
 0x8fd   : > { %9521 = vmatprep.mubr.msk.bf16.mxu1 %vm10155_vm1, %v12628_v39 }
 0x8fe   : > { %5852 = vrot.lane.b32.xlu1 %v10318_v13, %s10163_s26  ;;  %v11740_v20 = vpop.eup %10016 }
 0x8ff   : > { %v5162_v26 = vsel %vm467_vm2, %v11740_v20, 0.0  ;;  %v11744_v9 = vpop.eup %10018 }
 0x900   : > { %v5168_v50 = vsel %vm467_vm2, %v11744_v9, 0.0 }
 0x902   : > { %v11748_v4 = vpop.eup %10020 }
 0x903   : > { %v5174_v10 = vsel %vm467_vm2, %v11748_v4, 0.0  ;;  %v10023_v36 = vpop.eup %10022 }
 0x904   : > { %v5209_v23 = vmul.f32 %v10023_v36, %v11609_v48 }
 0x906   : > { %v5225_v32 = vpack.c.bf16 %v5209_v23, %v5209_v23 }
 0x922   : > { %5163 = vadd.xlane.f32.xlu1 %v5162_v26 }
 0x926   : > { %5169 = vadd.xlane.f32.xlu1 %v5168_v50  ;;  %v5179_v50 = vpop.xlane.xlu0 %5178 }
 0x92a   : > { %5175 = vadd.xlane.f32.xlu1 %v5174_v10  ;;  %v5805_v10 = vpop.permute.xlu0 %5804 }
 0x93b   : > { %5948 = vrot.lane.b32.xlu1 %v10326_v15, %s10163_s26  ;;  %s12530_s26 = scalar_lea.vmem %s12619_s7, %s8426_s12 }
 0x93f   : > { %6144 = vrot.lane.b32.xlu1 %v10272_v41, %s10165_s10 }
 0x943   : > { %6194 = vrot.lane.b32.xlu1 %v10280_v47, %s10165_s10 }
 0x947   : > { %6244 = vrot.lane.b32.xlu1 %v10270_v37, %s10165_s10 }
 0x94b   : > { %6294 = vrot.lane.b32.xlu1 %v10278_v46, %s10165_s10 }
 0x94f   : > { %6396 = vrot.lane.b32.xlu1 %v10290_v61, %s10164_s8 }
 0x953   : > { %6394 = vrot.lane.b32.xlu1 %v10290_v61, %s10165_s10 }
 0x957   : > { %6496 = vrot.lane.b32.xlu1 %v10294_v0, %s10164_s8 }
 0x95a   : > { %v11768_v44 = vpop.f32.mrb[160].mxu0 }
 0x95b   : > { %v9445_v28 = vpop.f32.mrb[161].mxu0  ;;  %6494 = vrot.lane.b32.xlu1 %v10294_v0, %s10165_s10 }
 0x95c   : > { %v5273_v47 = vpop.f32.mrb[162].mxu0  ;;  %v5901_v28 = vpop.permute.xlu0 %5900 }
 0x95d   : > { %v9446_v29 = vpop.f32.mrb[163].mxu0 }
 0x95f   : > { %6596 = vrot.lane.b32.xlu1 %v10302_v5, %s10164_s8 }
 0x960   : > { %v6147_v47 = vpop.permute.xlu0 %6146 }
 0x962   : > { %v11774_v46 = vpop.f32.mrb[192].mxu1 }
 0x963   : > { %v5996_v49 = vpack.c.bf16 %v11774_v46, %v11768_v44  ;;  %6594 = vrot.lane.b32.xlu1 %v10302_v5, %s10165_s10  ;;  %v9451_v61 = vpop.f32.mrb[193].mxu1 }
 0x964   : > { %v5321_v27 = vpop.f32.mrb[194].mxu1 }
 0x965   : > { %v9452_v63 = vpop.f32.mrb[195].mxu1 }
 0x966   : > { %v6197_v63 = vpop.permute.xlu0 %6196 }
 0x967   : > { %6696 = vrot.lane.b32.xlu1 %v10310_v8, %s10164_s8 }
 0x96a   : > { %v11782_v17 = vpop.f32.mrb[164].mxu0  ;;  %v6247_v36 = vpop.permute.xlu0 %6246 }
 0x96b   : > { %v9457_v1 = vpop.f32.mrb[165].mxu0  ;;  %6694 = vrot.lane.b32.xlu1 %v10310_v8, %s10165_s10 }
 0x96c   : > { %v5369_v33 = vpop.f32.mrb[166].mxu0 }
 0x96d   : > { %v9458_v18 = vpop.f32.mrb[167].mxu0 }
 0x96f   : > { %6796 = vrot.lane.b32.xlu1 %v10318_v13, %s10164_s8 }
 0x972   : > { %v11788_v24 = vpop.f32.mrb[196].mxu1 }
 0x973   : > { %v5997_v35 = vpack.c.bf16 %v11788_v24, %v11782_v17  ;;  %6794 = vrot.lane.b32.xlu1 %v10318_v13, %s10165_s10  ;;  %v9463_v19 = vpop.f32.mrb[197].mxu1 }
 0x974   : > { %v5417_v45 = vpop.f32.mrb[198].mxu1 }
 0x975   : > { %v9464_v58 = vpop.f32.mrb[199].mxu1 }
 0x977   : > { %6896 = vrot.lane.b32.xlu1 %v10326_v15, %s10164_s8 }
 0x97a   : > { %v11796_v38 = vpop.f32.mrb[168].mxu0  ;;  %v5158_v51 = vpop.xlane.xlu1 %5157 }
 0x97b   : > { %10024 = vrcp.f32 %v5158_v51  ;;  %v9469_v40 = vpop.f32.mrb[169].mxu0  ;;  %6894 = vrot.lane.b32.xlu1 %v10326_v15, %s10165_s10 }
 0x97c   : > { %v5465_v21 = vpop.f32.mrb[170].mxu0  ;;  %10026 = vrcp.f32 %v5179_v50  ;;  %v5810_v40 = vsel %vm1446_vm3, %v5805_v10, 0 }
 0x97d   : > { %v9470_v53 = vpop.f32.mrb[171].mxu0 }
 0x97e   : > { %v5853_v57 = vpop.permute.xlu1 %5852  ;;  %v445_v53 = vld [vmem:[%s12615_s3 + $0x18] sm:$0xff] }
 0x97f   : > { %v5858_v16 = vsel %vm1446_vm3, %v5853_v57, 0  ;;  %7136 = vrot.lane.b32.xlu1 %v10272_v41, %s10166_s11  ;;  %v6297_v57 = vpop.permute.xlu0 %6296 }
 0x980   : > { %9520 = vmatpush3.bf16.msra.mxu1 %v5858_v16  ;;  %v6152_v16 = vsel %vm467_vm2, %v6147_v47, 0 }
 0x981   : > { %9531 = vmatprep.subr.bf16.mxu1 %v12628_v39 }
 0x982   : > { %v11805_v31 = vpop.f32.mrb[200].mxu1 }
 0x983   : > { %v5998_v22 = vpack.c.bf16 %v11805_v31, %v11796_v38  ;;  %7232 = vrot.lane.b32.xlu1 %v10270_v37, %s10166_s11  ;;  %v9475_v52 = vpop.f32.mrb[201].mxu1  ;;  %9522 = vmatmul.mubr.msk.bf16.vlgmr.msra.gmra.mrb[216].mxu1 %vm467_vm2, %v5225_v32 }
 0x984   : > { %v5513_v48 = vpop.f32.mrb[202].mxu1  ;;  %9533 = vmatprep.mubr.msk.bf16.mxu1 %vm10155_vm1, %v12628_v39 }
 0x985   : > { %v10025_v41 = vpop.eup %10024  ;;  %v9476_v25 = vpop.f32.mrb[203].mxu1 }
 0x986   : > { %v5204_v62 = vmul.f32 %v10025_v41, %v11721_v30  ;;  %v10027_v61 = vpop.eup %10026 }
 0x987   : > { %7328 = vrot.lane.b32.xlu1 %v10286_v55, %s10166_s11  ;;  %v5211_v33 = vmul.f32 %v10027_v61, %v11613_v59  ;;  %v6252_v61 = vsel %vm467_vm2, %v6247_v36, 0 }
 0x988   : > { %v5220_v54 = vpack.c.bf16 %v5204_v62, %v5204_v62 }
 0x989   : > { %v5227_v51 = vpack.c.bf16 %v5211_v33, %v5211_v33 }
 0x98a   : > { %v11819_v12 = vpop.f32.mrb[172].mxu0  ;;  %9492 = vmatmul.mubr.msk.bf16.vlgmr.msra.gmra.mrb[176].mxu0 %vm467_vm2, %v5220_v54 }
 0x98b   : > { %9502 = vmatpush3.bf16.msra.mxu0 %v5714_v7  ;;  %v9481_v37 = vpop.f32.mrb[173].mxu0  ;;  %7424 = vrot.lane.b32.xlu1 %v10288_v60, %s10166_s11  ;;  %v6347_v7 = vpop.permute.xlu0 %6346 }
 0x98c   : > { %v5561_v42 = vpop.f32.mrb[174].mxu0  ;;  %9503 = vmatprep.mubr.msk.bf16.mxu0 %vm10155_vm1, %v12628_v39  ;;  %9513 = vmatprep.subr.bf16.mxu0 %v12628_v39  ;;  %v6352_v44 = vsel %vm467_vm2, %v6347_v7, 0 }
 0x98d   : > { %v9482_v55 = vpop.f32.mrb[175].mxu0 }
 0x992   : > { %v11827_v30 = vpop.f32.mrb[204].mxu1 }
 0x993   : > { %v5999_v34 = vpack.c.bf16 %v11827_v30, %v11819_v12  ;;  %v9487_v43 = vpop.f32.mrb[205].mxu1 }
 0x994   : > { %v5609_v56 = vpop.f32.mrb[206].mxu1  ;;  %v6202_v43 = vsel %vm467_vm2, %v6197_v63, 0  ;;  %v6302_v63 = vsel %vm467_vm2, %v6297_v57, 0 }
 0x995   : > { %v9488_v26 = vpop.f32.mrb[207].mxu1 }
 0x9af   : > { %v5164_v60 = vpop.xlane.xlu1 %5163 }
 0x9b0   : > { %10028 = vrcp.f32 %v5164_v60 }
 0x9b3   : > { %v5170_v29 = vpop.xlane.xlu1 %5169 }
 0x9b4   : > { %10030 = vrcp.f32 %v5170_v29 }
 0x9b7   : > { %v5176_v27 = vpop.xlane.xlu1 %5175 }
 0x9b8   : > { %10032 = vrcp.f32 %v5176_v27 }
 0x9ba   : > { %v10029_v1 = vpop.eup %10028 }
 0x9bb   : > { %v5949_v2 = vpop.permute.xlu1 %5948  ;;  %v5206_v18 = vmul.f32 %v10029_v1, %v11740_v20  ;;  %v444_v20 = vld [vmem:[%s12615_s3 + $0x10] sm:$0xff] }
 0x9bc   : > { %v5954_v19 = vsel %vm1446_vm3, %v5949_v2, 0  ;;  %v11851_v52 = vpack.c.bf16 %v445_v53, %v444_v20 }
 0x9bd   : > { %9532 = vmatpush3.bf16.msra.mxu1 %v5954_v19  ;;  %v5222_v45 = vpack.c.bf16 %v5206_v18, %v5206_v18 }
 0x9be   : > { %v10031_v58 = vpop.eup %10030  ;;  %9555 = vmatprep.subr.bf16.mxu1 %v12628_v39  ;;  %v6029_v26 = vsel %vm1446_vm3, %v11851_v52, 0 }
 0x9bf   : > { %9504 = vmatmul.mubr.msk.bf16.vlgmr.msra.gmra.mrb[180].mxu0 %vm467_vm2, %v5222_v45  ;;  %v6145_v21 = vpop.permute.xlu1 %6144  ;;  %v5208_v59 = vmul.f32 %v10031_v58, %v11744_v9  ;;  %v5906_v9 = vsel %vm1446_vm3, %v5901_v28, 0 }
 0x9c0   : > { %9514 = vmatpush3.bf16.msra.mxu0 %v5810_v40  ;;  %9534 = vmatmul.mubr.msk.bf16.vlgmr.msra.gmra.mrb[220].mxu1 %vm467_vm2, %v5227_v51 }
 0x9c1   : > { %9515 = vmatprep.mubr.msk.bf16.mxu0 %vm10155_vm1, %v12628_v39  ;;  %9525 = vmatprep.subr.bf16.mxu0 %v12628_v39  ;;  %v5224_v32 = vpack.c.bf16 %v5208_v59, %v5208_v59 }
 0x9c2   : > { %9557 = vmatprep.mubr.msk.bf16.mxu1 %vm10155_vm1, %v12628_v39  ;;  %v10033_v48 = vpop.eup %10032 }
 0x9c3   : > { %v6195_v23 = vpop.permute.xlu1 %6194  ;;  %v5210_v54 = vmul.f32 %v10033_v48, %v11748_v4  ;;  %v11871_v4 = vpop.permute.xlu0 %6344 }
 0x9c5   : > { %v5226_v56 = vpack.c.bf16 %v5210_v54, %v5210_v54 }
 0x9c6   : > { %9556 = vmatpush3.bf16.xpose.msra.mxu1 %v6152_v16 }
 0x9c7   : > { %v6245_v41 = vpop.permute.xlu1 %6244  ;;  %9516 = vmatmul.mubr.msk.bf16.vlgmr.msra.gmra.mrb[184].mxu0 %vm467_vm2, %v5224_v32  ;;  %9561 = vmatprep.subr.bf16.mxu1 %v12628_v39  ;;  %v11856_v25 = vpop.f32.mrb[208].mxu1 }
 0x9c8   : > { %9526 = vmatpush3.bf16.msra.mxu0 %v5906_v9  ;;  %9527 = vmatprep.mubr.msk.bf16.mxu0 %vm10155_vm1, %v12628_v39  ;;  %v9499_v62 = vpop.f32.mrb[209].mxu1  ;;  %v11882_v27 = vpop.permute.xlu0 %6446 }
 0x9c9   : > { %9819 = vmatprep.subr.msk.bf16.mxu0 %vm1446_vm3, %v11851_v52  ;;  %v5705_v37 = vpop.f32.mrb[210].mxu1 }
 0x9ca   : > { %v9500_v42 = vpop.f32.mrb[211].mxu1 }
 0x9cb   : > { %v6295_v55 = vpop.permute.xlu1 %6294 }
 0x9cd   : > { %9558 = vmatmul.mubr.msk.bf16.vlgmr.msra.gmra.mrb[224].mxu1 %vm467_vm2, %v6145_v21 }
 0x9ce   : > { %9562 = vmatpush3.bf16.xpose.msra.mxu1 %v6202_v43  ;;  %9563 = vmatprep.mubr.msk.bf16.mxu1 %vm10155_vm1, %v12628_v39 }
 0x9cf   : > { %v6397_v50 = vpop.permute.xlu1 %6396  ;;  %9528 = vmatmul.mubr.msk.bf16.vlgmr.msra.gmra.mrb[188].mxu0 %vm467_vm2, %v5226_v56  ;;  %9567 = vmatprep.subr.bf16.mxu1 %v12628_v39  ;;  %v11873_v10 = vpop.f32.mrb[212].mxu1 }
 0x9d0   : > { %9538 = vmatpush3.bf16.msra.mxu0 %v6029_v26  ;;  %9539 = vmatprep.mubr.msk.bf16.mxu0 %vm467_vm2, %v5996_v49  ;;  %v9511_v28 = vpop.f32.mrb[213].mxu1  ;;  %v11897_v49 = vpop.permute.xlu0 %6444 }
 0x9d1   : > { %9579 = vmatprep.subr.bf16.mxu0 %v12628_v39  ;;  %v5801_v60 = vpop.f32.mrb[214].mxu1 }
 0x9d2   : > { %v9512_v47 = vpop.f32.mrb[215].mxu1 }
 0x9d3   : > { %v6395_v29 = vpop.permute.xlu1 %6394 }
 0x9d4   : > { %v11908_v24 = vpop.permute.xlu0 %6546 }
 0x9d5   : > { %9564 = vmatmul.mubr.msk.bf16.vlgmr.msra.gmra.mrb[228].mxu1 %vm467_vm2, %v6195_v23 }
 0x9d6   : > { %9568 = vmatpush3.bf16.xpose.msra.mxu1 %v6252_v61  ;;  %9569 = vmatprep.mubr.msk.bf16.mxu1 %vm10155_vm1, %v12628_v39 }
 0x9d7   : > { %9540 = vmatmul.mubr.msk.bf16.vlgmr.msra.gmra.mrb[128].mxu0 %vm467_vm2, %v5997_v35  ;;  %9573 = vmatprep.subr.bf16.mxu1 %v12628_v39  ;;  %v6497_v46 = vpop.permute.xlu1 %6496  ;;  %v6402_v35 = vsel %vm467_vm2, %v6397_v50, 0 }
 0x9d8   : > { %9543 = vmatprep.mubr.msk.bf16.mxu0 %vm467_vm2, %v5998_v22  ;;  %v11915_v31 = vpop.permute.xlu0 %6544  ;;  %v6502_v12 = vsel %vm467_vm2, %v6497_v46, 0 }
 0x9d9   : > { %9580 = vmatpush3.bf16.xpose.msra.mxu0 %v6352_v44 }
 0x9da   : > { %9591 = vmatprep.subr.bf16.mxu0 %v12628_v39 }
 0x9db   : > { %v6495_v17 = vpop.permute.xlu1 %6494 }
 0x9dc   : > { %v11919_v30 = vpop.permute.xlu0 %6646 }
 0x9dd   : > { %9570 = vmatmul.mubr.msk.bf16.vlgmr.msra.gmra.mrb[232].mxu1 %vm467_vm2, %v6245_v41 }
 0x9de   : > { %9574 = vmatpush3.bf16.xpose.msra.mxu1 %v6302_v63  ;;  %9575 = vmatprep.mubr.msk.bf16.mxu1 %vm10155_vm1, %v12628_v39 }
 0x9df   : > { %9544 = vmatmul.mubr.msk.bf16.gmra.mrb[132].mxu0 %vm467_vm2, %v5999_v34  ;;  %9585 = vmatprep.subr.bf16.mxu1 %v12628_v39  ;;  %v6597_v38 = vpop.permute.xlu1 %6596 }
 0x9e0   : > { %v11924_v1 = vpop.permute.xlu0 %6644  ;;  %v6602_v33 = vsel %vm467_vm2, %v6597_v38, 0 }
 0x9e3   : > { %v6595_v22 = vpop.permute.xlu1 %6594 }
 0x9e4   : > { %v11931_v18 = vpop.permute.xlu0 %6746 }
 0x9e5   : > { %9576 = vmatmul.mubr.msk.bf16.vlgmr.msra.gmra.mrb[236].mxu1 %vm467_vm2, %v6295_v55 }
 0x9e6   : > { %9586 = vmatpush3.bf16.xpose.msra.mxu1 %v6402_v35  ;;  %9587 = vmatprep.mubr.msk.bf16.mxu1 %vm10155_vm1, %v12628_v39 }
 0x9e7   : > { %9597 = vmatprep.subr.bf16.mxu1 %v12628_v39  ;;  %v6697_v34 = vpop.permute.xlu1 %6696 }
 0x9e8   : > { %v6702_v19 = vsel %vm467_vm2, %v6697_v34, 0  ;;  %v11938_v58 = vpop.permute.xlu0 %6744 }
 0x9eb   : > { %v6695_v2 = vpop.permute.xlu1 %6694 }
 0x9ec   : > { %v11942_v40 = vpop.permute.xlu0 %6846 }
 0x9ed   : > { %9588 = vmatmul.mubr.msk.bf16.vlgmr.msra.gmra.mrb[240].mxu1 %vm467_vm2, %v6395_v29 }
 0x9ee   : > { %9598 = vmatpush3.bf16.xpose.msra.mxu1 %v6502_v12  ;;  %9599 = vmatprep.mubr.msk.bf16.mxu1 %vm10155_vm1, %v12628_v39 }
 0x9ef   : > { %9609 = vmatprep.subr.bf16.mxu1 %v12628_v39  ;;  %v6797_v45 = vpop.permute.xlu1 %6796 }
 0x9f0   : > { %v6802_v51 = vsel %vm467_vm2, %v6797_v45, 0  ;;  %v11947_v59 = vpop.permute.xlu0 %6844 }
 0x9f3   : > { %v6795_v36 = vpop.permute.xlu1 %6794 }
 0x9f4   : > { %v7185_v53 = vpop.permute.xlu0 %7184 }
 0x9f5   : > { %9600 = vmatmul.mubr.msk.bf16.vlgmr.msra.gmra.mrb[244].mxu1 %vm467_vm2, %v6495_v17  ;;  %v7190_v57 = vsel %vm1446_vm3, %v7185_v53, 0 }
 0x9f6   : > { %9610 = vmatpush3.bf16.xpose.msra.mxu1 %v6602_v33  ;;  %9611 = vmatprep.mubr.msk.bf16.mxu1 %vm10155_vm1, %v12628_v39 }
 0x9f7   : > { %9621 = vmatprep.subr.bf16.mxu1 %v12628_v39  ;;  %v6897_v21 = vpop.permute.xlu1 %6896 }
 0x9f8   : > { %v6902_v20 = vsel %vm467_vm2, %v6897_v21, 0 }
 0x9fb   : > { %v6895_v23 = vpop.permute.xlu1 %6894 }
 0x9fd   : > { %9612 = vmatmul.mubr.msk.bf16.vlgmr.msra.gmra.mrb[248].mxu1 %vm467_vm2, %v6595_v22 }
 0x9fe   : > { %9622 = vmatpush3.bf16.xpose.msra.mxu1 %v6702_v19  ;;  %9623 = vmatprep.mubr.msk.bf16.mxu1 %vm10155_vm1, %v12628_v39 }
 0x9ff   : > { %9633 = vmatprep.subr.bf16.mxu1 %v12628_v39 }
 0xa05   : > { %9624 = vmatmul.mubr.msk.bf16.vlgmr.msra.gmra.mrb[252].mxu1 %vm467_vm2, %v6695_v2 }
 0xa06   : > { %9634 = vmatpush3.bf16.xpose.msra.mxu1 %v6802_v51  ;;  %9635 = vmatprep.mubr.msk.bf16.mxu1 %vm10155_vm1, %v12628_v39 }
 0xa07   : > { %9645 = vmatprep.subr.bf16.mxu1 %v12628_v39 }
 0xa0d   : > { %9636 = vmatmul.mubr.msk.bf16.vlgmr.msra.gmra.mrb[0].mxu1 %vm467_vm2, %v6795_v36 }
 0xa0e   : > { %9646 = vmatpush3.bf16.xpose.msra.mxu1 %v6902_v20  ;;  %9647 = vmatprep.mubr.msk.bf16.mxu1 %vm10155_vm1, %v12628_v39  ;;  %v6452_v20 = vsel %vm467_vm2, %v11882_v27, 0  ;;  %v6552_v27 = vsel %vm467_vm2, %v11908_v24, 0 }
 0xa0f   : > { %9657 = vmatprep.subr.bf16.mxu1 %v12628_v39 }
 0xa15   : > { %9648 = vmatmul.mubr.msk.bf16.vlgmr.msra.gmra.mrb[4].mxu1 %vm467_vm2, %v6895_v23 }
 0xa16   : > { %9658 = vmatpush3.bf16.msra.mxu1 %v7190_v57  ;;  %9659 = vmatprep.mubr.msk.bf16.mxu1 %vm10155_vm1, %v12628_v39 }
 0xa17   : > { %9669 = vmatprep.subr.bf16.mxu1 %v12628_v39 }
 0xa56   : > { %v5894_v16 = vpop.f32.mrb[216].mxu1 }
 0xa57   : > { %v9523_v32 = vpop.f32.mrb[217].mxu1 }
 0xa58   : > { %v5897_v48 = vpop.f32.mrb[218].mxu1 }
 0xa59   : > { %v9524_v9 = vpop.f32.mrb[219].mxu1 }
 0xa5d   : > { %v5654_v41 = vpop.f32.mrb[176].mxu0 }
 0xa5e   : > { %v6000_v62 = vpack.c.bf16 %v11856_v25, %v5654_v41  ;;  %v9493_v54 = vpop.f32.mrb[177].mxu0 }
 0xa5f   : > { %v5657_v7 = vpop.f32.mrb[178].mxu0 }
 0xa60   : > { %v9494_v37 = vpop.f32.mrb[179].mxu0  ;;  %9547 = vmatprep.mubr.msk.bf16.mxu0 %vm467_vm2, %v6000_v62 }
 0xa92   : > { %v5750_v42 = vpop.f32.mrb[180].mxu0 }
 0xa93   : > { %v6001_v55 = vpack.c.bf16 %v11873_v10, %v5750_v42  ;;  %v9505_v43 = vpop.f32.mrb[181].mxu0  ;;  %v5990_v56 = vpop.f32.mrb[220].mxu1 }
 0xa94   : > { %v5753_v26 = vpop.f32.mrb[182].mxu0  ;;  %v9535_v50 = vpop.f32.mrb[221].mxu1 }
 0xa95   : > { %v9506_v28 = vpop.f32.mrb[183].mxu0  ;;  %v5993_v60 = vpop.f32.mrb[222].mxu1  ;;  %9548 = vmatmul.mubr.msk.bf16.gmra.mrb[136].mxu0 %vm467_vm2, %v6001_v55 }
 0xa96   : > { %v9536_v47 = vpop.f32.mrb[223].mxu1  ;;  %v7137_v28 = vpop.permute.xlu1 %7136 }
 0xa9a   : > { %v5846_v29 = vpop.f32.mrb[184].mxu0 }
 0xa9b   : > { %v6002_v61 = vpack.c.bf16 %v5894_v16, %v5846_v29  ;;  %v9517_v25 = vpop.f32.mrb[185].mxu0 }
 0xa9c   : > { %v5849_v44 = vpop.f32.mrb[186].mxu0 }
 0xa9d   : > { %v9518_v46 = vpop.f32.mrb[187].mxu0  ;;  %9551 = vmatprep.mubr.msk.bf16.mxu0 %vm467_vm2, %v6002_v61 }
 0xaa0   : > { %v11964_v63 = vpop.f32.mrb[224].mxu1 }
 0xaa1   : > { %v9559_v17 = vpop.f32.mrb[225].mxu1  ;;  %v6944_v10 = vsel %vm467_vm2, %v11964_v63, -inf }
 0xaa2   : > { %v5942_v35 = vpop.f32.mrb[188].mxu0  ;;  %6945 = vmax.xlane.f32.xlu0 %v6944_v10  ;;  %v6191_v38 = vpop.f32.mrb[226].mxu1 }
 0xaa3   : > { %v6003_v22 = vpack.c.bf16 %v5990_v56, %v5942_v35  ;;  %v9529_v12 = vpop.f32.mrb[189].mxu0  ;;  %v9560_v34 = vpop.f32.mrb[227].mxu1 }
 0xaa4   : > { %v5945_v33 = vpop.f32.mrb[190].mxu0 }
 0xaa5   : > { %v9530_v2 = vpop.f32.mrb[191].mxu0  ;;  %9552 = vmatmul.mubr.msk.bf16.gmra.mrb[140].mxu0 %vm467_vm2, %v6003_v22 }
 0xaa6   : > { %9581 = vmatprep.mubr.msk.bf16.mxu0 %vm10155_vm1, %v12628_v39  ;;  %v12052_v2 = vpop.permute.xlu0 %7280 }
 0xaa8   : > { %v11971_v19 = vpop.f32.mrb[228].mxu1 }
 0xaa9   : > { %v9565_v45 = vpop.f32.mrb[229].mxu1  ;;  %v6947_v36 = vsel %vm467_vm2, %v11971_v19, -inf }
 0xaaa   : > { %6948 = vmax.xlane.f32.xlu1 %v6947_v36  ;;  %v6241_v51 = vpop.f32.mrb[230].mxu1  ;;  %v12054_v45 = vpop.permute.xlu1 %7232 }
 0xaab   : > { %v9566_v21 = vpop.f32.mrb[231].mxu1  ;;  %v12056_v36 = vpop.permute.xlu0 %7376 }
 0xaad   : > { %9582 = vmatmul.mubr.msk.bf16.vlgmr.msra.gmra.mrb[192].mxu0 %vm467_vm2, %v11871_v4 }
 0xaae   : > { %9592 = vmatpush3.bf16.xpose.msra.mxu0 %v6452_v20  ;;  %9593 = vmatprep.mubr.msk.bf16.mxu0 %vm10155_vm1, %v12628_v39  ;;  %v12058_v51 = vpop.permute.xlu1 %7328 }
 0xaaf   : > { %9603 = vmatprep.subr.bf16.mxu0 %v12628_v39 }
 0xab0   : > { %v11982_v53 = vpop.f32.mrb[232].mxu1 }
 0xab1   : > { %v9571_v23 = vpop.f32.mrb[233].mxu1  ;;  %v6950_v57 = vsel %vm467_vm2, %v11982_v53, -inf }
 0xab2   : > { %6951 = vmax.xlane.f32.xlu0 %v6950_v57  ;;  %v6291_v16 = vpop.f32.mrb[234].mxu1  ;;  %v12061_v23 = vpop.permute.xlu1 %7424 }
 0xab3   : > { %v9572_v32 = vpop.f32.mrb[235].mxu1 }
 0xab5   : > { %9594 = vmatmul.mubr.msk.bf16.vlgmr.msra.gmra.mrb[196].mxu0 %vm467_vm2, %v11897_v49  ;;  %v6652_v49 = vsel %vm467_vm2, %v11919_v30, 0  ;;  %v6752_v30 = vsel %vm467_vm2, %v11931_v18, 0  ;;  %v6852_v18 = vsel %vm467_vm2, %v11942_v40, 0  ;;  %v7142_v40 = vsel %vm1446_vm3, %v7137_v28, 0 }
 0xab6   : > { %9604 = vmatpush3.bf16.xpose.msra.mxu0 %v6552_v27  ;;  %9605 = vmatprep.mubr.msk.bf16.mxu0 %vm10155_vm1, %v12628_v39 }
 0xab7   : > { %9615 = vmatprep.subr.bf16.mxu0 %v12628_v39 }
 0xab8   : > { %v11993_v4 = vpop.f32.mrb[236].mxu1 }
 0xab9   : > { %v9577_v48 = vpop.f32.mrb[237].mxu1  ;;  %v6953_v9 = vsel %vm467_vm2, %v11993_v4, -inf }
 0xaba   : > { %6954 = vmax.xlane.f32.xlu0 %v6953_v9  ;;  %v6341_v41 = vpop.f32.mrb[238].mxu1 }
 0xabb   : > { %7520 = vrot.lane.b32.xlu1 %v10298_v3, %s10166_s11  ;;  %v9578_v24 = vpop.f32.mrb[239].mxu1 }
 0xabd   : > { %9606 = vmatmul.mubr.msk.bf16.vlgmr.msra.gmra.mrb[200].mxu0 %vm467_vm2, %v11915_v31 }
 0xabe   : > { %9616 = vmatpush3.bf16.xpose.msra.mxu0 %v6652_v49  ;;  %9617 = vmatprep.mubr.msk.bf16.mxu0 %vm10155_vm1, %v12628_v39 }
 0xabf   : > { %9627 = vmatprep.subr.bf16.mxu0 %v12628_v39 }
 0xac0   : > { %v12006_v62 = vpop.f32.mrb[240].mxu1 }
 0xac1   : > { %v9589_v54 = vpop.f32.mrb[241].mxu1  ;;  %v6959_v7 = vsel %vm467_vm2, %v12006_v62, -inf }
 0xac2   : > { %6960 = vmax.xlane.f32.xlu0 %v6959_v7  ;;  %v6441_v3 = vpop.f32.mrb[242].mxu1 }
 0xac3   : > { %v9590_v37 = vpop.f32.mrb[243].mxu1 }
 0xac5   : > { %9618 = vmatmul.mubr.msk.bf16.vlgmr.msra.gmra.mrb[204].mxu0 %vm467_vm2, %v11924_v1 }
 0xac6   : > { %9628 = vmatpush3.bf16.xpose.msra.mxu0 %v6752_v30  ;;  %9629 = vmatprep.mubr.msk.bf16.mxu0 %vm10155_vm1, %v12628_v39 }
 0xac7   : > { %9639 = vmatprep.subr.bf16.mxu0 %v12628_v39 }
 0xac8   : > { %v12017_v31 = vpop.f32.mrb[244].mxu1 }
 0xac9   : > { %v9601_v42 = vpop.f32.mrb[245].mxu1  ;;  %v6965_v55 = vsel %vm467_vm2, %v12017_v31, -inf }
 0xaca   : > { %6966 = vmax.xlane.f32.xlu0 %v6965_v55  ;;  %v6541_v43 = vpop.f32.mrb[246].mxu1 }
 0xacb   : > { %v9602_v56 = vpop.f32.mrb[247].mxu1 }
 0xacd   : > { %9630 = vmatmul.mubr.msk.bf16.vlgmr.msra.gmra.mrb[208].mxu0 %vm467_vm2, %v11938_v58 }
 0xace   : > { %9640 = vmatpush3.bf16.xpose.msra.mxu0 %v6852_v18  ;;  %9641 = vmatprep.mubr.msk.bf16.mxu0 %vm10155_vm1, %v12628_v39 }
 0xacf   : > { %9651 = vmatprep.subr.bf16.mxu0 %v12628_v39 }
 0xad0   : > { %v12028_v1 = vpop.f32.mrb[248].mxu1 }
 0xad1   : > { %v9613_v26 = vpop.f32.mrb[249].mxu1  ;;  %v6971_v50 = vsel %vm467_vm2, %v12028_v1, -inf }
 0xad2   : > { %6972 = vmax.xlane.f32.xlu0 %v6971_v50  ;;  %v6641_v60 = vpop.f32.mrb[250].mxu1 }
 0xad3   : > { %v9614_v47 = vpop.f32.mrb[251].mxu1 }
 0xad5   : > { %9642 = vmatmul.mubr.msk.bf16.vlgmr.msra.gmra.mrb[212].mxu0 %vm467_vm2, %v11947_v59 }
 0xad6   : > { %9652 = vmatpush3.bf16.msra.mxu0 %v7142_v40  ;;  %9653 = vmatprep.mubr.msk.bf16.mxu0 %vm10155_vm1, %v12628_v39 }
 0xad7   : > { %9663 = vmatprep.subr.bf16.mxu0 %v12628_v39 }
 0xad8   : > { %v12038_v58 = vpop.f32.mrb[252].mxu1 }
 0xad9   : > { %v9625_v29 = vpop.f32.mrb[253].mxu1  ;;  %v6977_v61 = vsel %vm467_vm2, %v12038_v58, -inf }
 0xada   : > { %6978 = vmax.xlane.f32.xlu0 %v6977_v61  ;;  %v6741_v25 = vpop.f32.mrb[254].mxu1 }
 0xadb   : > { %v9626_v44 = vpop.f32.mrb[255].mxu1 }
 0xae0   : > { %v12042_v46 = vpop.f32.mrb[0].mxu1 }
 0xae1   : > { %v9637_v17 = vpop.f32.mrb[1].mxu1  ;;  %v6983_v34 = vsel %vm467_vm2, %v12042_v46, -inf }
 0xae2   : > { %v6841_v10 = vpop.f32.mrb[2].mxu1 }
 0xae3   : > { %v9638_v59 = vpop.f32.mrb[3].mxu1 }
 0xae8   : > { %v12044_v35 = vpop.f32.mrb[4].mxu1 }
 0xae9   : > { %v9649_v38 = vpop.f32.mrb[5].mxu1  ;;  %v6989_v33 = vsel %vm467_vm2, %v12044_v35, -inf }
 0xaea   : > { %v6941_v22 = vpop.f32.mrb[6].mxu1 }
 0xaeb   : > { %v9650_v12 = vpop.f32.mrb[7].mxu1 }
 0xaf0   : > { %7472 = vrot.lane.b32.xlu0 %v10294_v0, %s10166_s11 }
 0xb0f   : > { %6984 = vmax.xlane.f32.xlu0 %v6983_v34 }
 0xb13   : > { %6990 = vmax.xlane.f32.xlu0 %v6989_v33 }
 0xb2f   : > { %v6946_v21 = vpop.xlane.xlu0 %6945 }
 0xb30   : > { %v6992_v20 = vsub.f32 %v11964_v63, %v6946_v21 }
 0xb32   : > { %v7008_v0 = vmul.f32 1.442695, %v6992_v20 }
 0xb34   : > { %10034 = vpow2.f32 %v7008_v0 }
 0xb37   : > { %v6949_v57 = vpop.xlane.xlu1 %6948 }
 0xb38   : > { %v6993_v16 = vsub.f32 %v11971_v19, %v6949_v57 }
 0xb3a   : > { %v7010_v32 = vmul.f32 1.442695, %v6993_v16 }
 0xb3c   : > { %10036 = vpow2.f32 %v7010_v32 }
 0xb3e   : > { %v12064_v27 = vpop.eup %10034 }
 0xb3f   : > { %v6952_v48 = vpop.xlane.xlu0 %6951  ;;  %v7040_v9 = vsel %vm467_vm2, %v12064_v27, 0.0 }
 0xb40   : > { %v6994_v41 = vsub.f32 %v11982_v53, %v6952_v48  ;;  %7041 = vadd.xlane.f32.xlu1 %v7040_v9 }
 0xb42   : > { %v7012_v24 = vmul.f32 1.442695, %v6994_v41 }
 0xb44   : > { %10038 = vpow2.f32 %v7012_v24 }
 0xb46   : > { %v12069_v63 = vpop.eup %10036 }
 0xb47   : > { %v6955_v49 = vpop.xlane.xlu0 %6954  ;;  %v7043_v54 = vsel %vm467_vm2, %v12069_v63, 0.0 }
 0xb48   : > { %v6995_v19 = vsub.f32 %v11993_v4, %v6955_v49  ;;  %7044 = vadd.xlane.f32.xlu0 %v7043_v54 }
 0xb4a   : > { %v7014_v7 = vmul.f32 1.442695, %v6995_v19 }
 0xb4c   : > { %10040 = vpow2.f32 %v7014_v7 }
 0xb4e   : > { %v12074_v3 = vpop.eup %10038 }
 0xb4f   : > { %v6961_v37 = vpop.xlane.xlu0 %6960  ;;  %v7046_v53 = vsel %vm467_vm2, %v12074_v3, 0.0 }
 0xb50   : > { %v6997_v30 = vsub.f32 %v12006_v62, %v6961_v37  ;;  %7047 = vadd.xlane.f32.xlu1 %v7046_v53 }
 0xb52   : > { %v7018_v42 = vmul.f32 1.442695, %v6997_v30 }
 0xb54   : > { %10042 = vpow2.f32 %v7018_v42 }
 0xb56   : > { %v12079_v55 = vpop.eup %10040 }
 0xb57   : > { %v6967_v43 = vpop.xlane.xlu0 %6966  ;;  %v7049_v4 = vsel %vm467_vm2, %v12079_v55, 0.0 }
 0xb58   : > { %v6999_v56 = vsub.f32 %v12017_v31, %v6967_v43  ;;  %7050 = vadd.xlane.f32.xlu0 %v7049_v4 }
 0xb5a   : > { %v7022_v18 = vmul.f32 1.442695, %v6999_v56 }
 0xb5c   : > { %10044 = vpow2.f32 %v7022_v18 }
 0xb5e   : > { %v12084_v26 = vpop.eup %10042 }
 0xb5f   : > { %v7055_v50 = vsel %vm467_vm2, %v12084_v26, 0.0  ;;  %v6973_v29 = vpop.xlane.xlu0 %6972 }
 0xb60   : > { %7056 = vadd.xlane.f32.xlu0 %v7055_v50 }
 0xb61   : > { %7616 = vrot.lane.b32.xlu1 %v10306_v6, %s10166_s11  ;;  %v7001_v6 = vsub.f32 %v12028_v1, %v6973_v29 }
 0xb63   : > { %v7026_v59 = vmul.f32 1.442695, %v7001_v6  ;;  %v12146_v6 = vpop.permute.xlu1 %7520 }
 0xb65   : > { %10046 = vpow2.f32 %v7026_v59 }
 0xb66   : > { %v12090_v62 = vpop.eup %10044 }
 0xb67   : > { %v7061_v28 = vsel %vm467_vm2, %v12090_v62, 0.0  ;;  %v6979_v25 = vpop.xlane.xlu0 %6978 }
 0xb68   : > { %7062 = vadd.xlane.f32.xlu0 %v7061_v28  ;;  %v7003_v38 = vsub.f32 %v12038_v58, %v6979_v25 }
 0xb6a   : > { %v7030_v12 = vmul.f32 1.442695, %v7003_v38  ;;  %v7238_v38 = vsel %vm1446_vm3, %v12054_v45, 0 }
 0xb6b   : > { %v12110_v0 = vpop.permute.xlu0 %7472 }
 0xb6c   : > { %10048 = vpow2.f32 %v7030_v12 }
 0xb6f   : > { %v12114_v16 = vpop.eup %10046 }
 0xb70   : > { %v7067_v24 = vsel %vm467_vm2, %v12114_v16, 0.0 }
 0xb76   : > { %v12120_v49 = vpop.eup %10048 }
 0xb77   : > { %v7073_v53 = vsel %vm467_vm2, %v12120_v49, 0.0 }
 0xb7e   : > { %7568 = vrot.lane.b32.xlu0 %v10302_v5, %s10166_s11 }
 0xb80   : > { %v12096_v31 = vpop.f32.mrb[192].mxu0 }
 0xb81   : > { %v9583_v60 = vpop.f32.mrb[193].mxu0  ;;  %v6956_v61 = vsel %vm467_vm2, %v12096_v31, -inf }
 0xb82   : > { %v6391_v47 = vpop.f32.mrb[194].mxu0 }
 0xb83   : > { %v9584_v40 = vpop.f32.mrb[195].mxu0 }
 0xb85   : > { %6957 = vmax.xlane.f32.xlu1 %v6956_v61 }
 0xb88   : > { %v12101_v44 = vpop.f32.mrb[196].mxu0 }
 0xb89   : > { %v9595_v17 = vpop.f32.mrb[197].mxu0  ;;  %v6962_v10 = vsel %vm467_vm2, %v12101_v44, -inf }
 0xb8a   : > { %v6491_v5 = vpop.f32.mrb[198].mxu0  ;;  %6963 = vmax.xlane.f32.xlu1 %v6962_v10 }
 0xb8b   : > { %v9596_v22 = vpop.f32.mrb[199].mxu0 }
 0xb90   : > { %v12106_v34 = vpop.f32.mrb[200].mxu0 }
 0xb91   : > { %v9607_v33 = vpop.f32.mrb[201].mxu0  ;;  %v6968_v1 = vsel %vm467_vm2, %v12106_v34, -inf }
 0xb92   : > { %v6591_v21 = vpop.f32.mrb[202].mxu0  ;;  %6969 = vmax.xlane.f32.xlu1 %v6968_v1 }
 0xb93   : > { %v9608_v20 = vpop.f32.mrb[203].mxu0 }
 0xb98   : > { %v12112_v57 = vpop.f32.mrb[204].mxu0 }
 0xb99   : > { %v9619_v58 = vpop.f32.mrb[205].mxu0  ;;  %v6974_v32 = vsel %vm467_vm2, %v12112_v57, -inf }
 0xb9a   : > { %v6691_v48 = vpop.f32.mrb[206].mxu0  ;;  %6975 = vmax.xlane.f32.xlu1 %v6974_v32 }
 0xb9b   : > { %v9620_v9 = vpop.f32.mrb[207].mxu0 }
 0xb9c   : > { %v6985_v41 = vpop.xlane.xlu0 %6984 }
 0xb9d   : > { %v7005_v54 = vsub.f32 %v12042_v46, %v6985_v41  ;;  %7068 = vadd.xlane.f32.xlu0 %v7067_v24 }
 0xb9f   : > { %v7034_v19 = vmul.f32 1.442695, %v7005_v54 }
 0xba0   : > { %v12123_v7 = vpop.f32.mrb[208].mxu0  ;;  %v6991_v37 = vpop.xlane.xlu0 %6990 }
 0xba1   : > { %10050 = vpow2.f32 %v7034_v19  ;;  %v7007_v30 = vsub.f32 %v12044_v35, %v6991_v37  ;;  %v9631_v42 = vpop.f32.mrb[209].mxu0  ;;  %7074 = vadd.xlane.f32.xlu0 %v7073_v53  ;;  %v6980_v43 = vsel %vm467_vm2, %v12123_v7, -inf }
 0xba2   : > { %v6791_v4 = vpop.f32.mrb[210].mxu0  ;;  %6981 = vmax.xlane.f32.xlu1 %v6980_v43 }
 0xba3   : > { %v7038_v56 = vmul.f32 1.442695, %v7007_v30  ;;  %v9632_v46 = vpop.f32.mrb[211].mxu0 }
 0xba5   : > { %10052 = vpow2.f32 %v7038_v56 }
 0xba8   : > { %v12130_v18 = vpop.f32.mrb[212].mxu0 }
 0xba9   : > { %v9643_v50 = vpop.f32.mrb[213].mxu0  ;;  %v6986_v28 = vsel %vm467_vm2, %v12130_v18, -inf }
 0xbaa   : > { %v6891_v60 = vpop.f32.mrb[214].mxu0  ;;  %6987 = vmax.xlane.f32.xlu1 %v6986_v28 }
 0xbab   : > { %v12134_v47 = vpop.eup %10050  ;;  %v9644_v35 = vpop.f32.mrb[215].mxu0 }
 0xbac   : > { %v7079_v40 = vsel %vm467_vm2, %v12134_v47, 0.0 }
 0xbad   : > { %7080 = vadd.xlane.f32.xlu0 %v7079_v40 }
 0xbaf   : > { %v12138_v29 = vpop.eup %10052 }
 0xbb0   : > { %v7085_v61 = vsel %vm467_vm2, %v12138_v29, 0.0 }
 0xbb1   : > { %7086 = vadd.xlane.f32.xlu0 %v7085_v61 }
 0xbbb   : > { %7664 = vrot.lane.b32.xlu1 %v10310_v8, %s10166_s11 }
 0xbc7   : > { %7712 = vrot.lane.b32.xlu0 %v10314_v11, %s10166_s11 }
 0xbcb   : > { %7808 = vrot.lane.b32.xlu0 %v10322_v14, %s10166_s11 }
 0xbcd   : > { %v7042_v25 = vpop.xlane.xlu1 %7041 }
 0xbce   : > { %10054 = vrcp.f32 %v7042_v25 }
 0xbd5   : > { %v7045_v17 = vpop.xlane.xlu0 %7044 }
 0xbd6   : > { %10056 = vrcp.f32 %v7045_v17 }
 0xbd8   : > { %v10055_v10 = vpop.eup %10054 }
 0xbd9   : > { %v7104_v5 = vmul.f32 %v10055_v10, %v12064_v27  ;;  %v7286_v27 = vsel %vm1446_vm3, %v12052_v2, 0 }
 0xbdb   : > { %v7120_v59 = vpack.c.bf16 %v7104_v5, %v7104_v5 }
 0xbdd   : > { %9654 = vmatmul.mubr.msk.bf16.vlgmr.msra.gmra.mrb[216].mxu0 %vm467_vm2, %v7120_v59  ;;  %v7048_v8 = vpop.xlane.xlu1 %7047 }
 0xbde   : > { %9664 = vmatpush3.bf16.msra.mxu0 %v7238_v38  ;;  %10058 = vrcp.f32 %v7048_v8  ;;  %9665 = vmatprep.mubr.msk.bf16.mxu0 %vm10155_vm1, %v12628_v39 }
 0xbdf   : > { %9675 = vmatprep.subr.bf16.mxu0 %v12628_v39 }
 0xbe0   : > { %v10057_v11 = vpop.eup %10056 }
 0xbe1   : > { %v7105_v14 = vmul.f32 %v10057_v11, %v12069_v63  ;;  %v7334_v63 = vsel %vm1446_vm3, %v12058_v51, 0 }
 0xbe3   : > { %v7121_v22 = vpack.c.bf16 %v7105_v14, %v7105_v14 }
 0xbe5   : > { %9660 = vmatmul.mubr.msk.bf16.vlgmr.msra.gmra.mrb[8].mxu1 %vm467_vm2, %v7121_v22  ;;  %v7051_v45 = vpop.xlane.xlu0 %7050 }
 0xbe6   : > { %9670 = vmatpush3.bf16.msra.mxu1 %v7286_v27  ;;  %10060 = vrcp.f32 %v7051_v45  ;;  %9671 = vmatprep.mubr.msk.bf16.mxu1 %vm10155_vm1, %v12628_v39 }
 0xbe7   : > { %9681 = vmatprep.subr.bf16.mxu1 %v12628_v39 }
 0xbe8   : > { %v10059_v12 = vpop.eup %10058 }
 0xbe9   : > { %v7106_v33 = vmul.f32 %v10059_v12, %v12074_v3  ;;  %v7382_v3 = vsel %vm1446_vm3, %v12056_v36, 0 }
 0xbeb   : > { %v7122_v1 = vpack.c.bf16 %v7106_v33, %v7106_v33 }
 0xbed   : > { %9666 = vmatmul.mubr.msk.bf16.vlgmr.msra.gmra.mrb[220].mxu0 %vm467_vm2, %v7122_v1  ;;  %v7057_v2 = vpop.xlane.xlu0 %7056 }
 0xbee   : > { %9676 = vmatpush3.bf16.msra.mxu0 %v7334_v63  ;;  %10062 = vrcp.f32 %v7057_v2  ;;  %9677 = vmatprep.mubr.msk.bf16.mxu0 %vm10155_vm1, %v12628_v39 }
 0xbef   : > { %9687 = vmatprep.subr.bf16.mxu0 %v12628_v39 }
 0xbf0   : > { %v10061_v21 = vpop.eup %10060 }
 0xbf1   : > { %v7107_v20 = vmul.f32 %v10061_v21, %v12079_v55  ;;  %v7478_v55 = vsel %vm1446_vm3, %v12110_v0, 0 }
 0xbf3   : > { %v7123_v58 = vpack.c.bf16 %v7107_v20, %v7107_v20 }
 0xbf5   : > { %9672 = vmatmul.mubr.msk.bf16.vlgmr.msra.gmra.mrb[12].mxu1 %vm467_vm2, %v7123_v58  ;;  %v7063_v51 = vpop.xlane.xlu0 %7062 }
 0xbf6   : > { %9682 = vmatpush3.bf16.msra.mxu1 %v7382_v3  ;;  %10064 = vrcp.f32 %v7063_v51  ;;  %9683 = vmatprep.mubr.msk.bf16.mxu1 %vm10155_vm1, %v12628_v39 }
 0xbf7   : > { %9693 = vmatprep.subr.bf16.mxu1 %v12628_v39 }
 0xbf8   : > { %v10063_v32 = vpop.eup %10062 }
 0xbf9   : > { %v7109_v48 = vmul.f32 %v10063_v32, %v12084_v26  ;;  %v7569_v24 = vpop.permute.xlu0 %7568  ;;  %v12191_v26 = vpop.permute.xlu1 %7616 }
 0xbfa   : > { %v7574_v19 = vsel %vm1446_vm3, %v7569_v24, 0 }
 0xbfb   : > { %v7125_v9 = vpack.c.bf16 %v7109_v48, %v7109_v48 }
 0xbfd   : > { %9684 = vmatmul.mubr.msk.bf16.vlgmr.msra.gmra.mrb[16].mxu1 %vm467_vm2, %v7125_v9 }
 0xbfe   : > { %9694 = vmatpush3.bf16.msra.mxu1 %v7478_v55  ;;  %9695 = vmatprep.mubr.msk.bf16.mxu1 %vm10155_vm1, %v12628_v39 }
 0xbff   : > { %9705 = vmatprep.subr.bf16.mxu1 %v12628_v39 }
 0xc00   : > { %v10065_v36 = vpop.eup %10064 }
 0xc01   : > { %v7111_v41 = vmul.f32 %v10065_v36, %v12090_v62 }
 0xc03   : > { %v7127_v54 = vpack.c.bf16 %v7111_v41, %v7111_v41 }
 0xc05   : > { %9696 = vmatmul.mubr.msk.bf16.vlgmr.msra.gmra.mrb[20].mxu1 %vm467_vm2, %v7127_v54 }
 0xc06   : > { %9706 = vmatpush3.bf16.msra.mxu1 %v7574_v19  ;;  %9707 = vmatprep.mubr.msk.bf16.mxu1 %vm10155_vm1, %v12628_v39 }
 0xc07   : > { %9717 = vmatprep.subr.bf16.mxu1 %v12628_v39 }
 0xc12   : > { %v6958_v0 = vpop.xlane.xlu1 %6957 }
 0xc13   : > { %v6996_v37 = vsub.f32 %v12096_v31, %v6958_v0 }
 0xc15   : > { %v7016_v53 = vmul.f32 1.442695, %v6996_v37  ;;  %v7430_v37 = vsel %vm1446_vm3, %v12061_v23, 0 }
 0xc17   : > { %10066 = vpow2.f32 %v7016_v53  ;;  %v6964_v62 = vpop.xlane.xlu1 %6963 }
 0xc18   : > { %v6998_v30 = vsub.f32 %v12101_v44, %v6964_v62 }
 0xc1a   : > { %v7020_v42 = vmul.f32 1.442695, %v6998_v30 }
 0xc1c   : > { %10068 = vpow2.f32 %v7020_v42 }
 0xc1f   : > { %v6970_v43 = vpop.xlane.xlu1 %6969 }
 0xc20   : > { %v7000_v4 = vsub.f32 %v12106_v34, %v6970_v43 }
 0xc21   : > { %v12196_v56 = vpop.eup %10066 }
 0xc22   : > { %v7024_v46 = vmul.f32 1.442695, %v7000_v4  ;;  %v7052_v50 = vsel %vm467_vm2, %v12196_v56, 0.0 }
 0xc23   : > { %7053 = vadd.xlane.f32.xlu1 %v7052_v50 }
 0xc24   : > { %10070 = vpow2.f32 %v7024_v46 }
 0xc26   : > { %v12200_v28 = vpop.eup %10068 }
 0xc27   : > { %v7058_v31 = vsel %vm467_vm2, %v12200_v28, 0.0  ;;  %v6976_v34 = vpop.xlane.xlu1 %6975 }
 0xc28   : > { %7059 = vadd.xlane.f32.xlu1 %v7058_v31 }
 0xc2a   : > { %v7069_v44 = vpop.xlane.xlu0 %7068 }
 0xc2b   : > { %10072 = vrcp.f32 %v7069_v44 }
 0xc2e   : > { %v12204_v60 = vpop.eup %10070  ;;  %v7075_v35 = vpop.xlane.xlu0 %7074 }
 0xc2f   : > { %10074 = vrcp.f32 %v7075_v35  ;;  %v7064_v40 = vsel %vm467_vm2, %v12204_v60, 0.0  ;;  %v6982_v61 = vpop.xlane.xlu1 %6981 }
 0xc30   : > { %7065 = vadd.xlane.f32.xlu1 %v7064_v40  ;;  %v7004_v27 = vsub.f32 %v12123_v7, %v6982_v61 }
 0xc35   : > { %v10073_v25 = vpop.eup %10072 }
 0xc36   : > { %v7113_v17 = vmul.f32 %v10073_v25, %v12114_v16  ;;  %v7002_v16 = vsub.f32 %v12112_v57, %v6976_v34 }
 0xc37   : > { %v6988_v10 = vpop.xlane.xlu1 %6987 }
 0xc38   : > { %v7129_v5 = vpack.c.bf16 %v7113_v17, %v7113_v17  ;;  %v7028_v22 = vmul.f32 1.442695, %v7002_v16  ;;  %v7006_v45 = vsub.f32 %v12130_v18, %v6988_v10 }
 0xc39   : > { %v10075_v59 = vpop.eup %10074 }
 0xc3a   : > { %9708 = vmatmul.mubr.msk.bf16.vlgmr.msra.gmra.mrb[24].mxu1 %vm467_vm2, %v7129_v5  ;;  %v7115_v8 = vmul.f32 %v10075_v59, %v12120_v49  ;;  %10076 = vpow2.f32 %v7028_v22  ;;  %v7032_v49 = vmul.f32 1.442695, %v7004_v27  ;;  %v7036_v12 = vmul.f32 1.442695, %v7006_v45  ;;  %v7081_v18 = vpop.xlane.xlu0 %7080 }
 0xc3b   : > { %v7665_v38 = vpop.permute.xlu1 %7664  ;;  %9719 = vmatprep.mubr.msk.bf16.mxu1 %vm10155_vm1, %v12628_v39 }
 0xc3c   : > { %v7670_v11 = vsel %vm1446_vm3, %v7665_v38, 0  ;;  %v7131_v14 = vpack.c.bf16 %v7115_v8, %v7115_v8  ;;  %10078 = vpow2.f32 %v7032_v49 }
 0xc3d   : > { %9718 = vmatpush3.bf16.msra.mxu1 %v7670_v11  ;;  %10080 = vpow2.f32 %v7036_v12 }
 0xc3e   : > { %9729 = vmatprep.subr.bf16.mxu1 %v12628_v39 }
 0xc41   : > { %7760 = vrot.lane.b32.xlu1 %v10318_v13, %s10166_s11 }
 0xc42   : > { %9720 = vmatmul.mubr.msk.bf16.vlgmr.msra.gmra.mrb[28].mxu1 %vm467_vm2, %v7131_v14  ;;  %v7087_v14 = vpop.xlane.xlu0 %7086 }
 0xc43   : > { %9731 = vmatprep.mubr.msk.bf16.mxu1 %vm10155_vm1, %v12628_v39 }
 0xc44   : > { %v12223_v33 = vpop.eup %10076 }
 0xc45   : > { %v7070_v13 = vsel %vm467_vm2, %v12223_v33, 0.0 }
 0xc46   : > { %v12227_v1 = vpop.eup %10078 }
 0xc47   : > { %v7076_v57 = vsel %vm467_vm2, %v12227_v1, 0.0  ;;  %v12231_v63 = vpop.eup %10080 }
 0xc48   : > { %v7082_v7 = vsel %vm467_vm2, %v12231_v63, 0.0 }
 0xc65   : > { %7071 = vadd.xlane.f32.xlu1 %v7070_v13 }
 0xc69   : > { %7077 = vadd.xlane.f32.xlu1 %v7076_v57  ;;  %v7713_v57 = vpop.permute.xlu0 %7712 }
 0xc6d   : > { %7083 = vadd.xlane.f32.xlu1 %v7082_v7 }
 0xc7e   : > { %7856 = vrot.lane.b32.xlu1 %v10326_v15, %s10166_s11 }
 0xcb0   : > { %v12237_v2 = vpop.f32.mrb[216].mxu0  ;;  %v7054_v21 = vpop.xlane.xlu1 %7053 }
 0xcb1   : > { %10082 = vrcp.f32 %v7054_v21  ;;  %v9655_v20 = vpop.f32.mrb[217].mxu0 }
 0xcb2   : > { %v7181_v58 = vpop.f32.mrb[218].mxu0  ;;  %10084 = vrcp.f32 %v7081_v18 }
 0xcb3   : > { %v9656_v3 = vpop.f32.mrb[219].mxu0  ;;  %v7718_v58 = vsel %vm1446_vm3, %v7713_v57, 0 }
 0xcb5   : > { %v7060_v51 = vpop.xlane.xlu1 %7059 }
 0xcb6   : > { %10086 = vrcp.f32 %v7060_v51  ;;  %v7913_v51 = vrot.slane %v11851_v52, 4 }
 0xcb8   : > { %v12239_v32 = vpop.f32.mrb[8].mxu1  ;;  %v7939_v52 = vsel %vm1446_vm3, %v7913_v51, 0 }
 0xcb9   : > { %v7904_v48 = vpack.c.bf16 %v12239_v32, %v12237_v2  ;;  %v9661_v9 = vpop.f32.mrb[9].mxu1 }
 0xcba   : > { %v7229_v55 = vpop.f32.mrb[10].mxu1 }
 0xcbb   : > { %v10083_v36 = vpop.eup %10082  ;;  %v9662_v15 = vpop.f32.mrb[11].mxu1 }
 0xcbc   : > { %v7108_v41 = vmul.f32 %v10083_v36, %v12196_v56  ;;  %v10085_v24 = vpop.eup %10084 }
 0xcbd   : > { %v7066_v54 = vpop.xlane.xlu1 %7065  ;;  %v7117_v53 = vmul.f32 %v10085_v24, %v12134_v47 }
 0xcbe   : > { %10088 = vrcp.f32 %v7066_v54  ;;  %v7124_v19 = vpack.c.bf16 %v7108_v41, %v7108_v41 }
 0xcbf   : > { %v7133_v47 = vpack.c.bf16 %v7117_v53, %v7117_v53  ;;  %10090 = vrcp.f32 %v7087_v14 }
 0xcc0   : > { %v10087_v0 = vpop.eup %10086  ;;  %v12247_v62 = vpop.f32.mrb[220].mxu0  ;;  %9678 = vmatmul.mubr.msk.bf16.vlgmr.msra.gmra.mrb[224].mxu0 %vm467_vm2, %v7124_v19 }
 0xcc1   : > { %9688 = vmatpush3.bf16.msra.mxu0 %v7430_v37  ;;  %v9667_v30 = vpop.f32.mrb[221].mxu0  ;;  %v7761_v42 = vpop.permute.xlu1 %7760  ;;  %9689 = vmatprep.mubr.msk.bf16.mxu0 %vm10155_vm1, %v12628_v39  ;;  %v7110_v43 = vmul.f32 %v10087_v0, %v12200_v28  ;;  %v7526_v28 = vsel %vm1446_vm3, %v12146_v6, 0  ;;  %v7622_v6 = vsel %vm1446_vm3, %v12191_v26, 0 }
 0xcc2   : > { %v7766_v4 = vsel %vm1446_vm3, %v7761_v42, 0  ;;  %v7277_v56 = vpop.f32.mrb[222].mxu0  ;;  %9699 = vmatprep.subr.bf16.mxu0 %v12628_v39 }
 0xcc3   : > { %v9668_v23 = vpop.f32.mrb[223].mxu0  ;;  %9730 = vmatpush3.bf16.msra.mxu1 %v7766_v4  ;;  %v7126_v46 = vpack.c.bf16 %v7110_v43, %v7110_v43 }
 0xcc4   : > { %9741 = vmatprep.subr.bf16.mxu1 %v12628_v39 }
 0xcc6   : > { %9732 = vmatmul.mubr.msk.bf16.vlgmr.msra.gmra.mrb[32].mxu1 %vm467_vm2, %v7133_v47 }
 0xcc7   : > { %9743 = vmatprep.mubr.msk.bf16.mxu1 %vm10155_vm1, %v12628_v39 }
 0xcc8   : > { %v10089_v50 = vpop.eup %10088  ;;  %v12261_v31 = vpop.f32.mrb[12].mxu1  ;;  %9690 = vmatmul.mubr.msk.bf16.vlgmr.msra.gmra.mrb[228].mxu0 %vm467_vm2, %v7126_v46 }
 0xcc9   : > { %v7905_v44 = vpack.c.bf16 %v12261_v31, %v12247_v62  ;;  %9700 = vmatpush3.bf16.msra.mxu0 %v7526_v28  ;;  %v9673_v35 = vpop.f32.mrb[13].mxu1  ;;  %9701 = vmatprep.mubr.msk.bf16.mxu0 %vm10155_vm1, %v12628_v39  ;;  %v7112_v34 = vmul.f32 %v10089_v50, %v12204_v60  ;;  %v10091_v22 = vpop.eup %10090 }
 0xcca   : > { %v7325_v40 = vpop.f32.mrb[14].mxu1  ;;  %9711 = vmatprep.subr.bf16.mxu0 %v12628_v39  ;;  %v7119_v45 = vmul.f32 %v10091_v22, %v12138_v29 }
 0xccb   : > { %v9674_v61 = vpop.f32.mrb[15].mxu1  ;;  %v7128_v25 = vpack.c.bf16 %v7112_v34, %v7112_v34 }
 0xccc   : > { %v7135_v20 = vpack.c.bf16 %v7119_v45, %v7119_v45  ;;  %v12318_v45 = vld [vmem:[%s12616_s4] ss:$0 sm:$0xff] }
 0xcd0   : > { %v12272_v17 = vpop.f32.mrb[16].mxu1  ;;  %9702 = vmatmul.mubr.msk.bf16.vlgmr.msra.gmra.mrb[232].mxu0 %vm467_vm2, %v7128_v25 }
 0xcd1   : > { %9712 = vmatpush3.bf16.msra.mxu0 %v7622_v6  ;;  %v9685_v10 = vpop.f32.mrb[17].mxu1  ;;  %9713 = vmatprep.mubr.msk.bf16.mxu0 %vm10155_vm1, %v12628_v39 }
 0xcd2   : > { %v7421_v5 = vpop.f32.mrb[18].mxu1  ;;  %9723 = vmatprep.subr.bf16.mxu0 %v12628_v39 }
 0xcd3   : > { %v9686_v60 = vpop.f32.mrb[19].mxu1 }
 0xcd8   : > { %v12278_v59 = vpop.f32.mrb[20].mxu1 }
 0xcd9   : > { %v9697_v38 = vpop.f32.mrb[21].mxu1 }
 0xcda   : > { %v7517_v8 = vpop.f32.mrb[22].mxu1 }
 0xcdb   : > { %v9698_v11 = vpop.f32.mrb[23].mxu1 }
 0xcf2   : > { %v7072_v26 = vpop.xlane.xlu1 %7071 }
 0xcf3   : > { %10092 = vrcp.f32 %v7072_v26 }
 0xcf6   : > { %v7078_v16 = vpop.xlane.xlu1 %7077 }
 0xcf7   : > { %10094 = vrcp.f32 %v7078_v16 }
 0xcfa   : > { %v7084_v27 = vpop.xlane.xlu1 %7083 }
 0xcfb   : > { %10096 = vrcp.f32 %v7084_v27 }
 0xcfd   : > { %v10093_v49 = vpop.eup %10092 }
 0xcfe   : > { %v7114_v12 = vmul.f32 %v10093_v49, %v12223_v33  ;;  %v7857_v13 = vpop.permute.xlu1 %7856  ;;  %v7809_v33 = vpop.permute.xlu0 %7808 }
 0xcff   : > { %v7862_v7 = vsel %vm1446_vm3, %v7857_v13, 0  ;;  %v7814_v55 = vsel %vm1446_vm3, %v7809_v33, 0  ;;  %v10131_v33 = vld [vmem:[%s10235_s15] sm:$0xff] }
 0xd00   : > { %9742 = vmatpush3.bf16.msra.mxu1 %v7862_v7  ;;  %v7130_v18 = vpack.c.bf16 %v7114_v12, %v7114_v12 }
 0xd01   : > { %v10095_v21 = vpop.eup %10094 }
 0xd02   : > { %9714 = vmatmul.mubr.msk.bf16.vlgmr.msra.gmra.mrb[236].mxu0 %vm467_vm2, %v7130_v18  ;;  %v7116_v29 = vmul.f32 %v10095_v21, %v12227_v1  ;;  %v10130_v21 = vld [vmem:[%s10235_s15 + $0x10] sm:$0xff] }
 0xd03   : > { %9724 = vmatpush3.bf16.msra.mxu0 %v7718_v58  ;;  %9744 = vmatmul.mubr.msk.bf16.vlgmr.msra.gmra.mrb[36].mxu1 %vm467_vm2, %v7135_v20 }
 0xd04   : > { %9725 = vmatprep.mubr.msk.bf16.mxu0 %vm10155_vm1, %v12628_v39  ;;  %9735 = vmatprep.subr.bf16.mxu0 %v12628_v39  ;;  %v7132_v3 = vpack.c.bf16 %v7116_v29, %v7116_v29 }
 0xd05   : > { %v10097_v9 = vpop.eup %10096 }
 0xd06   : > { %v7118_v1 = vmul.f32 %v10097_v9, %v12231_v63 }
 0xd08   : > { %v7134_v54 = vpack.c.bf16 %v7118_v1, %v7118_v1 }
 0xd0a   : > { %9726 = vmatmul.mubr.msk.bf16.vlgmr.msra.gmra.mrb[240].mxu0 %vm467_vm2, %v7132_v3 }
 0xd0b   : > { %9736 = vmatpush3.bf16.msra.mxu0 %v7814_v55  ;;  %9737 = vmatprep.mubr.msk.bf16.mxu0 %vm10155_vm1, %v12628_v39  ;;  %v10132_v55 = vld [vmem:[%s10235_s15 + $0x8] sm:$0xff] }
 0xd0c   : > { %9820 = vmatprep.subr.msk.bf16.mxu0 %vm1446_vm3, %v7913_v51 }
 0xd0d   : > { %v7610_v36 = vpop.f32.mrb[24].mxu1 }
 0xd0e   : > { %v9709_v15 = vpop.f32.mrb[25].mxu1 }
 0xd0f   : > { %v7613_v41 = vpop.f32.mrb[26].mxu1  ;;  %v10133_v15 = vld [vmem:[%s10235_s15 + $0x18] sm:$0xff] }
 0xd10   : > { %v9710_v24 = vpop.f32.mrb[27].mxu1 }
 0xd12   : > { %9738 = vmatmul.mubr.msk.bf16.vlgmr.msra.gmra.mrb[244].mxu0 %vm467_vm2, %v7134_v54 }
 0xd13   : > { %9749 = vmatprep.mubr.msk.bf16.mxu0 %vm467_vm2, %v7904_v48  ;;  %9748 = vmatpush3.bf16.msra.mxu0 %v7939_v52 }
 0xd15   : > { %v7706_v39 = vpop.f32.mrb[28].mxu1 }
 0xd16   : > { %v9721_v19 = vpop.f32.mrb[29].mxu1 }
 0xd17   : > { %v7709_v63 = vpop.f32.mrb[30].mxu1 }
 0xd18   : > { %v9722_v0 = vpop.f32.mrb[31].mxu1 }
 0xd1a   : > { %9750 = vmatmul.mubr.msk.bf16.vlgmr.msra.gmra.mrb[128].mxu0 %vm467_vm2, %v7905_v44 }
 0xd93   : > { %v7370_v37 = vpop.f32.mrb[224].mxu0 }
 0xd94   : > { %v7906_v53 = vpack.c.bf16 %v12272_v17, %v7370_v37  ;;  %v9679_v30 = vpop.f32.mrb[225].mxu0  ;;  %v10134_v37 = vld [vmem:[%s10235_s15 + $0x30] sm:$0xff] }
 0xd95   : > { %v7373_v42 = vpop.f32.mrb[226].mxu0 }
 0xd96   : > { %v9680_v43 = vpop.f32.mrb[227].mxu0  ;;  %9753 = vmatprep.mubr.msk.bf16.mxu0 %vm467_vm2, %v7906_v53 }
 0xd99   : > { %v7802_v2 = vpop.f32.mrb[32].mxu1 }
 0xd9a   : > { %v9733_v32 = vpop.f32.mrb[33].mxu1 }
 0xd9b   : > { %v7466_v48 = vpop.f32.mrb[228].mxu0  ;;  %v7805_v4 = vpop.f32.mrb[34].mxu1 }
 0xd9c   : > { %v7907_v56 = vpack.c.bf16 %v12278_v59, %v7466_v48  ;;  %v9691_v23 = vpop.f32.mrb[229].mxu0  ;;  %v9734_v47 = vpop.f32.mrb[35].mxu1  ;;  %v10136_v48 = vld [vmem:[%s10235_s15 + $0x38] sm:$0xff] }
 0xd9d   : > { %v7469_v46 = vpop.f32.mrb[230].mxu0  ;;  %v10137_v23 = vld [vmem:[%s10235_s15 + $0x28] sm:$0xff] }
 0xd9e   : > { %v9692_v62 = vpop.f32.mrb[231].mxu0  ;;  %9754 = vmatmul.mubr.msk.bf16.gmra.mrb[132].mxu0 %vm467_vm2, %v7907_v56 }
 0xda3   : > { %v7562_v50 = vpop.f32.mrb[232].mxu0 }
 0xda4   : > { %v7908_v28 = vpack.c.bf16 %v7610_v36, %v7562_v50  ;;  %v9703_v31 = vpop.f32.mrb[233].mxu0 }
 0xda5   : > { %v7565_v44 = vpop.f32.mrb[234].mxu0 }
 0xda6   : > { %v9704_v35 = vpop.f32.mrb[235].mxu0  ;;  %9757 = vmatprep.mubr.msk.bf16.mxu0 %vm467_vm2, %v7908_v28 }
 0xdd5   : > { %v7658_v34 = vpop.f32.mrb[236].mxu0 }
 0xdd6   : > { %v7909_v40 = vpack.c.bf16 %v7706_v39, %v7658_v34  ;;  %v9715_v61 = vpop.f32.mrb[237].mxu0  ;;  %v7898_v25 = vpop.f32.mrb[36].mxu1 }
 0xdd7   : > { %v7661_v6 = vpop.f32.mrb[238].mxu0  ;;  %v9745_v17 = vpop.f32.mrb[37].mxu1 }
 0xdd8   : > { %v9716_v10 = vpop.f32.mrb[239].mxu0  ;;  %v7901_v5 = vpop.f32.mrb[38].mxu1  ;;  %9758 = vmatmul.mubr.msk.bf16.gmra.mrb[136].mxu0 %vm467_vm2, %v7909_v40  ;;  %v10138_v40 = vld [vmem:[%s10235_s15 + $0x50] sm:$0xff] }
 0xdd9   : > { %v9746_v60 = vpop.f32.mrb[39].mxu1  ;;  %v10139_v10 = vld [vmem:[%s10235_s15 + $0x40] sm:$0xff] }
 0xdda   : > { %v10140_v60 = vld [vmem:[%s10235_s15 + $0x58] sm:$0xff] }
 0xddd   : > { %v7754_v59 = vpop.f32.mrb[240].mxu0 }
 0xdde   : > { %v7910_v38 = vpack.c.bf16 %v7802_v2, %v7754_v59  ;;  %v9727_v8 = vpop.f32.mrb[241].mxu0  ;;  %v10135_v2 = vld [vmem:[%s10235_s15 + $0x20] sm:$0xff] }
 0xddf   : > { %v7757_v11 = vpop.f32.mrb[242].mxu0  ;;  %v10141_v8 = vld [vmem:[%s10235_s15 + $0x48] sm:$0xff] }
 0xde0   : > { %v9728_v14 = vpop.f32.mrb[243].mxu0  ;;  %9761 = vmatprep.mubr.msk.bf16.mxu0 %vm467_vm2, %v7910_v38 }
 0xde5   : > { %v7850_v26 = vpop.f32.mrb[244].mxu0 }
 0xde6   : > { %v7911_v16 = vpack.c.bf16 %v7898_v25, %v7850_v26  ;;  %v9739_v22 = vpop.f32.mrb[245].mxu0 }
 0xde7   : > { %v7853_v27 = vpop.f32.mrb[246].mxu0 }
 0xde8   : > { %v9740_v49 = vpop.f32.mrb[247].mxu0  ;;  %9762 = vmatmul.mubr.msk.bf16.gmra.mrb[140].mxu0 %vm467_vm2, %v7911_v16 }
 0xded   : > { %v9751_v12 = vpop.f32.mrb[128].mxu0 }
 0xdee   : > { %v8063_v13 = vadd.f32 %v9751_v12, %v12318_v45  ;;  %v7975_v57 = vpop.f32.mrb[129].mxu0 }
 0xdef   : > { %v8061_v7 = vadd.f32 %v12318_v45, %v7975_v57  ;;  %v9752_v18 = vpop.f32.mrb[130].mxu0 }
 0xdf0   : > { %v12323_v20 = vadd.f32 %v10130_v21, %v8063_v13  ;;  %v7978_v58 = vpop.f32.mrb[131].mxu0  ;;  %v8064_v51 = vadd.f32 %v9752_v18, %v12318_v45 }
 0xdf1   : > { %v8062_v29 = vadd.f32 %v12318_v45, %v7978_v58  ;;  %v12327_v3 = vadd.f32 %v10131_v33, %v8061_v7  ;;  %v10142_v33 = vld [vmem:[%s10235_s15 + $0x60] sm:$0xff] }
 0xdf2   : > { %v8099_v9 = vsel %vm320_vm0, %v12323_v20, 0.0  ;;  %v12338_v41 = vadd.f32 %v10133_v15, %v8064_v51 }
 0xdf3   : > { %v12333_v1 = vadd.f32 %v10132_v55, %v8062_v29  ;;  %8100 = vadd.xlane.f32.xlu0 %v8099_v9  ;;  %v8093_v24 = vsel %vm320_vm0, %v12327_v3, 0.0 }
 0xdf4   : > { %v8102_v54 = vsel %vm320_vm0, %v12338_v41, 0.0 }
 0xdf5   : > { %v8096_v36 = vsel %vm320_vm0, %v12333_v1, 0.0 }
 0xdf6   : > { %8097 = vadd.xlane.f32.xlu1 %v8096_v36 }
 0xdf7   : > { %8094 = vadd.xlane.f32.xlu0 %v8093_v24 }
 0xdfb   : > { %8103 = vadd.xlane.f32.xlu0 %v8102_v54  ;;  %v10143_v54 = vld [vmem:[%s10235_s15 + $0x70] sm:$0xff] }
 0xe71   : > { %v9755_v52 = vpop.f32.mrb[132].mxu0 }
 0xe72   : > { %v8067_v39 = vadd.f32 %v9755_v52, %v12318_v45  ;;  %v7991_v19 = vpop.f32.mrb[133].mxu0 }
 0xe73   : > { %v8065_v63 = vadd.f32 %v12318_v45, %v7991_v19  ;;  %v9756_v0 = vpop.f32.mrb[134].mxu0 }
 0xe74   : > { %v12347_v53 = vadd.f32 %v10134_v37, %v8067_v39  ;;  %v8068_v30 = vadd.f32 %v9756_v0, %v12318_v45  ;;  %v7994_v42 = vpop.f32.mrb[135].mxu0  ;;  %v10144_v39 = vld [vmem:[%s10235_s15 + $0x68] sm:$0xff] }
 0xe75   : > { %v8066_v43 = vadd.f32 %v12318_v45, %v7994_v42  ;;  %v12352_v32 = vadd.f32 %v10135_v2, %v8065_v63 }
 0xe76   : > { %v12355_v4 = vadd.f32 %v10136_v48, %v8068_v30  ;;  %v8111_v56 = vsel %vm320_vm0, %v12347_v53, 0.0 }
 0xe77   : > { %8112 = vadd.xlane.f32.xlu1 %v8111_v56  ;;  %v12360_v47 = vadd.f32 %v10137_v23, %v8066_v43  ;;  %v8105_v62 = vsel %vm320_vm0, %v12352_v32, 0.0 }
 0xe78   : > { %v8114_v46 = vsel %vm320_vm0, %v12355_v4, 0.0 }
 0xe79   : > { %8115 = vadd.xlane.f32.xlu0 %v8114_v46  ;;  %v8108_v50 = vsel %vm320_vm0, %v12360_v47, 0.0 }
 0xe7b   : > { %8106 = vadd.xlane.f32.xlu1 %v8105_v62 }
 0xe7d   : > { %8109 = vadd.xlane.f32.xlu0 %v8108_v50 }
 0xe80   : > { %v8101_v26 = vpop.xlane.xlu0 %8100 }
 0xe81   : > { %v8144_v36 = vmul.f32 0.03125, %v8101_v26 }
 0xe83   : > { %v8098_v12 = vpop.xlane.xlu1 %8097  ;;  %v12419_v42 = vsub.f32 %v12323_v20, %v8144_v36 }
 0xe84   : > { %v8095_v27 = vpop.xlane.xlu0 %8094  ;;  %v8143_v29 = vmul.f32 0.03125, %v8098_v12 }
 0xe85   : > { %v8142_v57 = vmul.f32 0.03125, %v8095_v27  ;;  %v8176_v23 = vmul.f32 %v12419_v42, %v12419_v42 }
 0xe86   : > { %v12411_v0 = vsub.f32 %v12333_v1, %v8143_v29 }
 0xe87   : > { %v12400_v24 = vsub.f32 %v12327_v3, %v8142_v57 }
 0xe88   : > { %v8104_v15 = vpop.xlane.xlu0 %8103  ;;  %v8175_v56 = vmul.f32 %v12411_v0, %v12411_v0 }
 0xe89   : > { %v8145_v37 = vmul.f32 0.03125, %v8104_v15  ;;  %v8174_v2 = vmul.f32 %v12400_v24, %v12400_v24 }
 0xe8a   : > { %v8193_v46 = vsel %vm320_vm0, %v8175_v56, 0.0 }
 0xe8b   : > { %v12426_v1 = vsub.f32 %v12338_v41, %v8145_v37  ;;  %v8190_v20 = vsel %vm320_vm0, %v8174_v2, 0.0  ;;  %v8196_v41 = vsel %vm320_vm0, %v8176_v23, 0.0 }
 0xe8d   : > { %v8177_v62 = vmul.f32 %v12426_v1, %v12426_v1 }
 0xe8f   : > { %v8199_v50 = vsel %vm320_vm0, %v8177_v62, 0.0 }
 0xeab   : > { %v9759_v28 = vpop.f32.mrb[136].mxu0 }
 0xeac   : > { %v8071_v31 = vadd.f32 %v9759_v28, %v12318_v45  ;;  %v8007_v44 = vpop.f32.mrb[137].mxu0 }
 0xead   : > { %v8069_v35 = vadd.f32 %v12318_v45, %v8007_v44  ;;  %v9760_v34 = vpop.f32.mrb[138].mxu0 }
 0xeae   : > { %v12371_v61 = vadd.f32 %v10138_v40, %v8071_v31  ;;  %v8072_v25 = vadd.f32 %v9760_v34, %v12318_v45  ;;  %v8010_v6 = vpop.f32.mrb[139].mxu0 }
 0xeaf   : > { %v8070_v17 = vadd.f32 %v12318_v45, %v8010_v6  ;;  %v12376_v5 = vadd.f32 %v10139_v10, %v8069_v35 }
 0xeb0   : > { %v12379_v59 = vadd.f32 %v10140_v60, %v8072_v25  ;;  %v8123_v38 = vsel %vm320_vm0, %v12371_v61, 0.0 }
 0xeb1   : > { %8124 = vadd.xlane.f32.xlu1 %v8123_v38  ;;  %v12384_v11 = vadd.f32 %v10141_v8, %v8070_v17  ;;  %v8117_v16 = vsel %vm320_vm0, %v12376_v5, 0.0 }
 0xeb2   : > { %v8126_v14 = vsel %vm320_vm0, %v12379_v59, 0.0 }
 0xeb3   : > { %8127 = vadd.xlane.f32.xlu0 %v8126_v14  ;;  %v8120_v22 = vsel %vm320_vm0, %v12384_v11, 0.0 }
 0xeb5   : > { %8118 = vadd.xlane.f32.xlu1 %v8117_v16 }
 0xeb7   : > { %8121 = vadd.xlane.f32.xlu0 %v8120_v22 }
 0xebb   : > { %v9763_v49 = vpop.f32.mrb[140].mxu0 }
 0xebc   : > { %v8023_v13 = vpop.f32.mrb[141].mxu0  ;;  %v8075_v7 = vadd.f32 %v9763_v49, %v12318_v45 }
 0xebd   : > { %v8073_v18 = vadd.f32 %v12318_v45, %v8023_v13  ;;  %v9764_v21 = vpop.f32.mrb[142].mxu0 }
 0xebe   : > { %v8026_v58 = vpop.f32.mrb[143].mxu0  ;;  %v8076_v9 = vadd.f32 %v9764_v21, %v12318_v45  ;;  %v12403_v52 = vadd.f32 %v10143_v54, %v8075_v7 }
 0xebf   : > { %v12395_v51 = vadd.f32 %v10142_v33, %v8073_v18  ;;  %v8074_v55 = vadd.f32 %v12318_v45, %v8026_v58  ;;  %v10145_v45 = vld [vmem:[%s10235_s15 + $0x78] sm:$0xff] }
 0xec0   : > { %v12414_v30 = vadd.f32 %v10145_v45, %v8076_v9  ;;  %v8135_v43 = vsel %vm320_vm0, %v12403_v52, 0.0 }
 0xec1   : > { %v12406_v19 = vadd.f32 %v10144_v39, %v8074_v55  ;;  %v8129_v63 = vsel %vm320_vm0, %v12395_v51, 0.0 }
 0xec2   : > { %8130 = vadd.xlane.f32.xlu1 %v8129_v63  ;;  %v8138_v48 = vsel %vm320_vm0, %v12414_v30, 0.0 }
 0xec3   : > { %v8132_v3 = vsel %vm320_vm0, %v12406_v19, 0.0 }
 0xec4   : > { %8133 = vadd.xlane.f32.xlu0 %v8132_v3 }
 0xec6   : > { %8136 = vadd.xlane.f32.xlu1 %v8135_v43 }
 0xec8   : > { %8139 = vadd.xlane.f32.xlu0 %v8138_v48 }
 0xeca   : > { %8191 = vadd.xlane.f32.xlu1 %v8190_v20 }
 0xecc   : > { %8194 = vadd.xlane.f32.xlu0 %v8193_v46 }
 0xece   : > { %8197 = vadd.xlane.f32.xlu1 %v8196_v41 }
 0xed0   : > { %8200 = vadd.xlane.f32.xlu0 %v8199_v50 }
 0xf04   : > { %v8113_v28 = vpop.xlane.xlu1 %8112 }
 0xf05   : > { %v8148_v31 = vmul.f32 0.03125, %v8113_v28 }
 0xf06   : > { %v8116_v44 = vpop.xlane.xlu0 %8115 }
 0xf07   : > { %v12441_v35 = vsub.f32 %v12347_v53, %v8148_v31  ;;  %v8149_v34 = vmul.f32 0.03125, %v8116_v44 }
 0xf08   : > { %v8107_v40 = vpop.xlane.xlu1 %8106 }
 0xf09   : > { %v12444_v25 = vsub.f32 %v12355_v4, %v8149_v34  ;;  %v8146_v6 = vmul.f32 0.03125, %v8107_v40  ;;  %v8180_v17 = vmul.f32 %v12441_v35, %v12441_v35 }
 0xf0a   : > { %v8110_v10 = vpop.xlane.xlu0 %8109 }
 0xf0b   : > { %v12449_v60 = vsub.f32 %v12352_v32, %v8146_v6  ;;  %v8147_v38 = vmul.f32 0.03125, %v8110_v10  ;;  %v8208_v8 = vsel %vm320_vm0, %v8180_v17, 0.0  ;;  %v8181_v53 = vmul.f32 %v12444_v25, %v12444_v25 }
 0xf0c   : > { %8209 = vadd.xlane.f32.xlu1 %v8208_v8 }
 0xf0d   : > { %v12455_v14 = vsub.f32 %v12360_v47, %v8147_v38  ;;  %v8211_v4 = vsel %vm320_vm0, %v8181_v53, 0.0  ;;  %v8178_v26 = vmul.f32 %v12449_v60, %v12449_v60 }
 0xf0e   : > { %8212 = vadd.xlane.f32.xlu0 %v8211_v4 }
 0xf0f   : > { %v8202_v16 = vsel %vm320_vm0, %v8178_v26, 0.0  ;;  %v8179_v32 = vmul.f32 %v12455_v14, %v12455_v14 }
 0xf10   : > { %8203 = vadd.xlane.f32.xlu1 %v8202_v16  ;;  %v12515_v16 = vld [vmem:[%s12617_s5] ss:$0 sm:$0xff] }
 0xf11   : > { %v8205_v22 = vsel %vm320_vm0, %v8179_v32, 0.0 }
 0xf12   : > { %8206 = vadd.xlane.f32.xlu0 %v8205_v22 }
 0xf3e   : > { %v8125_v27 = vpop.xlane.xlu1 %8124 }
 0xf3f   : > { %v8152_v49 = vmul.f32 0.03125, %v8125_v27  ;;  %v12521_v27 = vld [vmem:[%s12618_s6] ss:$0 sm:$0xff] }
 0xf40   : > { %v8128_v12 = vpop.xlane.xlu0 %8127 }
 0xf41   : > { %v12465_v47 = vsub.f32 %v12371_v61, %v8152_v49  ;;  %v8153_v13 = vmul.f32 0.03125, %v8128_v12 }
 0xf42   : > { %v8119_v57 = vpop.xlane.xlu1 %8118 }
 0xf43   : > { %v12468_v7 = vsub.f32 %v12379_v59, %v8153_v13  ;;  %v8150_v18 = vmul.f32 0.03125, %v8119_v57  ;;  %v8184_v21 = vmul.f32 %v12465_v47, %v12465_v47 }
 0xf44   : > { %v8122_v58 = vpop.xlane.xlu0 %8121 }
 0xf45   : > { %v12473_v29 = vsub.f32 %v12376_v5, %v8150_v18  ;;  %v8151_v33 = vmul.f32 0.03125, %v8122_v58  ;;  %v8220_v9 = vsel %vm320_vm0, %v8184_v21, 0.0  ;;  %v8185_v61 = vmul.f32 %v12468_v7, %v12468_v7 }
 0xf46   : > { %8221 = vadd.xlane.f32.xlu1 %v8220_v9 }
 0xf47   : > { %v12479_v55 = vsub.f32 %v12384_v11, %v8151_v33  ;;  %v8223_v59 = vsel %vm320_vm0, %v8185_v61, 0.0  ;;  %v8182_v36 = vmul.f32 %v12473_v29, %v12473_v29 }
 0xf48   : > { %8224 = vadd.xlane.f32.xlu0 %v8223_v59 }
 0xf49   : > { %v8214_v15 = vsel %vm320_vm0, %v8182_v36, 0.0  ;;  %v8183_v5 = vmul.f32 %v12479_v55, %v12479_v55 }
 0xf4a   : > { %8215 = vadd.xlane.f32.xlu1 %v8214_v15 }
 0xf4b   : > { %v8217_v54 = vsel %vm320_vm0, %v8183_v5, 0.0 }
 0xf4c   : > { %8218 = vadd.xlane.f32.xlu0 %v8217_v54 }
 0xf4f   : > { %v8131_v39 = vpop.xlane.xlu1 %8130 }
 0xf50   : > { %v8154_v63 = vmul.f32 0.03125, %v8131_v39 }
 0xf51   : > { %v8134_v37 = vpop.xlane.xlu0 %8133 }
 0xf52   : > { %v12489_v11 = vsub.f32 %v12395_v51, %v8154_v63  ;;  %v8155_v45 = vmul.f32 0.03125, %v8134_v37 }
 0xf53   : > { %v8137_v3 = vpop.xlane.xlu1 %8136 }
 0xf54   : > { %v12492_v43 = vsub.f32 %v12406_v19, %v8155_v45  ;;  %v8156_v2 = vmul.f32 0.03125, %v8137_v3  ;;  %v8186_v48 = vmul.f32 %v12489_v11, %v12489_v11 }
 0xf55   : > { %v8140_v56 = vpop.xlane.xlu0 %8139 }
 0xf56   : > { %v12497_v20 = vsub.f32 %v12403_v52, %v8156_v2  ;;  %v8157_v23 = vmul.f32 0.03125, %v8140_v56  ;;  %v8226_v46 = vsel %vm320_vm0, %v8186_v48, 0.0  ;;  %v8187_v51 = vmul.f32 %v12492_v43, %v12492_v43 }
 0xf57   : > { %8227 = vadd.xlane.f32.xlu1 %v8226_v46  ;;  %v8192_v62 = vpop.xlane.xlu1 %8191 }
 0xf58   : > { %v12503_v41 = vsub.f32 %v12414_v30, %v8157_v23  ;;  %v8238_v19 = vmul.f32 0.03125, %v8192_v62  ;;  %v8229_v50 = vsel %vm320_vm0, %v8187_v51, 0.0  ;;  %v8188_v28 = vmul.f32 %v12497_v20, %v12497_v20 }
 0xf59   : > { %8230 = vadd.xlane.f32.xlu0 %v8229_v50  ;;  %v8195_v52 = vpop.xlane.xlu0 %8194 }
 0xf5a   : > { %v8254_v31 = vadd.f32 1e-05, %v8238_v19  ;;  %v8239_v44 = vmul.f32 0.03125, %v8195_v52  ;;  %v8232_v34 = vsel %vm320_vm0, %v8188_v28, 0.0  ;;  %v8189_v40 = vmul.f32 %v12503_v41, %v12503_v41 }
 0xf5b   : > { %8233 = vadd.xlane.f32.xlu1 %v8232_v34  ;;  %v8198_v6 = vpop.xlane.xlu1 %8197 }
 0xf5c   : > { %10098 = vrsqrt.f32 %v8254_v31  ;;  %v8255_v30 = vadd.f32 1e-05, %v8239_v44  ;;  %v8240_v17 = vmul.f32 0.03125, %v8198_v6  ;;  %v8235_v10 = vsel %vm320_vm0, %v8189_v40, 0.0 }
 0xf5d   : > { %8236 = vadd.xlane.f32.xlu0 %v8235_v10  ;;  %v8201_v38 = vpop.xlane.xlu0 %8200 }
 0xf5e   : > { %10100 = vrsqrt.f32 %v8255_v30  ;;  %v8256_v8 = vadd.f32 1e-05, %v8240_v17  ;;  %v8241_v53 = vmul.f32 0.03125, %v8201_v38 }
 0xf60   : > { %10102 = vrsqrt.f32 %v8256_v8  ;;  %v8257_v4 = vadd.f32 1e-05, %v8241_v53 }
 0xf62   : > { %10104 = vrsqrt.f32 %v8257_v4 }
 0xf66   : > { %v10099_v26 = vpop.eup %10098 }
 0xf67   : > { %v8286_v32 = vmul.f32 %v10099_v26, %v12400_v24 }
 0xf68   : > { %v10101_v22 = vpop.eup %10100 }
 0xf69   : > { %v8309_v49 = vmul.f32 %v12515_v16, %v8286_v32  ;;  %v8287_v12 = vmul.f32 %v10101_v22, %v12411_v0 }
 0xf6a   : > { %v10103_v13 = vpop.eup %10102 }
 0xf6b   : > { %v8332_v24 = vadd.f32 %v12521_v27, %v8309_v49  ;;  %v8310_v57 = vmul.f32 %v12515_v16, %v8287_v12  ;;  %v8288_v18 = vmul.f32 %v10103_v13, %v12419_v42 }
 0xf6c   : > { %v10105_v21 = vpop.eup %10104 }
 0xf6d   : > { %8348 = vst.msk [vmem:[%s12530_s26] sm:$0xff] %vm320_vm0, %v8332_v24  ;;  %v8333_v0 = vadd.f32 %v12521_v27, %v8310_v57  ;;  %v8311_v58 = vmul.f32 %v12515_v16, %v8288_v18  ;;  %v8289_v33 = vmul.f32 %v10105_v21, %v12426_v1 }
 0xf6f   : > { %8349 = vst.msk [vmem:[%s12530_s26 + $0x8] sm:$0xff] %vm320_vm0, %v8333_v0  ;;  %v8334_v9 = vadd.f32 %v12521_v27, %v8311_v58  ;;  %v8312_v61 = vmul.f32 %v12515_v16, %v8289_v33 }
 0xf71   : > { %8350 = vst.msk [vmem:[%s12530_s26 + $0x10] sm:$0xff] %vm320_vm0, %v8334_v9  ;;  %v8335_v59 = vadd.f32 %v12521_v27, %v8312_v61 }
 0xf73   : > { %8351 = vst.msk [vmem:[%s12530_s26 + $0x18] sm:$0xff] %vm320_vm0, %v8335_v59 }
 0xf99   : > { %v8210_v42 = vpop.xlane.xlu1 %8209 }
 0xf9a   : > { %v8244_v36 = vmul.f32 0.03125, %v8210_v42 }
 0xf9b   : > { %v8213_v15 = vpop.xlane.xlu0 %8212 }
 0xf9c   : > { %v8260_v5 = vadd.f32 1e-05, %v8244_v36  ;;  %v8245_v54 = vmul.f32 0.03125, %v8213_v15 }
 0xf9d   : > { %v8204_v39 = vpop.xlane.xlu1 %8203 }
 0xf9e   : > { %10106 = vrsqrt.f32 %v8260_v5  ;;  %v8261_v1 = vadd.f32 1e-05, %v8245_v54  ;;  %v8242_v63 = vmul.f32 0.03125, %v8204_v39 }
 0xf9f   : > { %v8207_v37 = vpop.xlane.xlu0 %8206 }
 0xfa0   : > { %10108 = vrsqrt.f32 %v8261_v1  ;;  %v8258_v45 = vadd.f32 1e-05, %v8242_v63  ;;  %v8243_v3 = vmul.f32 0.03125, %v8207_v37 }
 0xfa2   : > { %10110 = vrsqrt.f32 %v8258_v45  ;;  %v8259_v2 = vadd.f32 1e-05, %v8243_v3 }
 0xfa4   : > { %10112 = vrsqrt.f32 %v8259_v2 }
 0xfa8   : > { %v10107_v48 = vpop.eup %10106 }
 0xfa9   : > { %v8292_v56 = vmul.f32 %v10107_v48, %v12441_v35 }
 0xfaa   : > { %v10109_v23 = vpop.eup %10108 }
 0xfab   : > { %v8315_v46 = vmul.f32 %v12515_v16, %v8292_v56  ;;  %v8293_v51 = vmul.f32 %v10109_v23, %v12444_v25 }
 0xfac   : > { %v10111_v62 = vpop.eup %10110 }
 0xfad   : > { %v8338_v19 = vadd.f32 %v12521_v27, %v8315_v46  ;;  %v8316_v50 = vmul.f32 %v12515_v16, %v8293_v51  ;;  %v8290_v28 = vmul.f32 %v10111_v62, %v12449_v60 }
 0xfae   : > { %v10113_v52 = vpop.eup %10112 }
 0xfaf   : > { %8354 = vst.msk [vmem:[%s12530_s26 + $0x30] sm:$0xff] %vm320_vm0, %v8338_v19  ;;  %v8339_v31 = vadd.f32 %v12521_v27, %v8316_v50  ;;  %v8313_v35 = vmul.f32 %v12515_v16, %v8290_v28  ;;  %v8291_v44 = vmul.f32 %v10113_v52, %v12455_v14 }
 0xfb1   : > { %8355 = vst.msk [vmem:[%s12530_s26 + $0x38] sm:$0xff] %vm320_vm0, %v8339_v31  ;;  %v8336_v25 = vadd.f32 %v12521_v27, %v8313_v35  ;;  %v8314_v34 = vmul.f32 %v12515_v16, %v8291_v44 }
 0xfb3   : > { %8352 = vst.msk [vmem:[%s12530_s26 + $0x20] sm:$0xff] %vm320_vm0, %v8336_v25  ;;  %v8337_v40 = vadd.f32 %v12521_v27, %v8314_v34 }
 0xfb5   : > { %8353 = vst.msk [vmem:[%s12530_s26 + $0x28] sm:$0xff] %vm320_vm0, %v8337_v40 }
 0xfd3   : > { %v8222_v60 = vpop.xlane.xlu1 %8221 }
 0xfd4   : > { %v8248_v6 = vmul.f32 0.03125, %v8222_v60 }
 0xfd5   : > { %v8225_v30 = vpop.xlane.xlu0 %8224 }
 0xfd6   : > { %v8264_v17 = vadd.f32 1e-05, %v8248_v6  ;;  %v8249_v10 = vmul.f32 0.03125, %v8225_v30 }
 0xfd7   : > { %v8216_v38 = vpop.xlane.xlu1 %8215 }
 0xfd8   : > { %10114 = vrsqrt.f32 %v8264_v17  ;;  %v8265_v14 = vadd.f32 1e-05, %v8249_v10  ;;  %v8246_v8 = vmul.f32 0.03125, %v8216_v38 }
 0xfd9   : > { %v8219_v53 = vpop.xlane.xlu0 %8218 }
 0xfda   : > { %10116 = vrsqrt.f32 %v8265_v14  ;;  %v8262_v4 = vadd.f32 1e-05, %v8246_v8  ;;  %v8247_v26 = vmul.f32 0.03125, %v8219_v53 }
 0xfdc   : > { %10118 = vrsqrt.f32 %v8262_v4  ;;  %v8263_v32 = vadd.f32 1e-05, %v8247_v26 }
 0xfde   : > { %10120 = vrsqrt.f32 %v8263_v32 }
 0xfe2   : > { %v10115_v22 = vpop.eup %10114 }
 0xfe3   : > { %v8296_v49 = vmul.f32 %v10115_v22, %v12465_v47 }
 0xfe4   : > { %v10117_v12 = vpop.eup %10116  ;;  %v8228_v13 = vpop.xlane.xlu1 %8227 }
 0xfe5   : > { %v8319_v24 = vmul.f32 %v12515_v16, %v8296_v49  ;;  %v8297_v57 = vmul.f32 %v10117_v12, %v12468_v7  ;;  %v8250_v18 = vmul.f32 0.03125, %v8228_v13 }
 0xfe6   : > { %v10119_v21 = vpop.eup %10118  ;;  %v8231_v0 = vpop.xlane.xlu0 %8230 }
 0xfe7   : > { %v8342_v58 = vadd.f32 %v12521_v27, %v8319_v24  ;;  %v8320_v33 = vmul.f32 %v12515_v16, %v8297_v57  ;;  %v8294_v9 = vmul.f32 %v10119_v21, %v12473_v29  ;;  %v8266_v61 = vadd.f32 1e-05, %v8250_v18 }
 0xfe8   : > { %v10121_v59 = vpop.eup %10120  ;;  %v8251_v42 = vmul.f32 0.03125, %v8231_v0  ;;  %v8234_v47 = vpop.xlane.xlu1 %8233 }
 0xfe9   : > { %8358 = vst.msk [vmem:[%s12530_s26 + $0x50] sm:$0xff] %vm320_vm0, %v8342_v58  ;;  %v8343_v36 = vadd.f32 %v12521_v27, %v8320_v33  ;;  %v8317_v7 = vmul.f32 %v12515_v16, %v8294_v9  ;;  %v8295_v15 = vmul.f32 %v10121_v59, %v12479_v55  ;;  %10122 = vrsqrt.f32 %v8266_v61 }
 0xfea   : > { %v8267_v5 = vadd.f32 1e-05, %v8251_v42  ;;  %v8252_v54 = vmul.f32 0.03125, %v8234_v47  ;;  %v8237_v39 = vpop.xlane.xlu0 %8236 }
 0xfeb   : > { %8359 = vst.msk [vmem:[%s12530_s26 + $0x58] sm:$0xff] %vm320_vm0, %v8343_v36  ;;  %v8340_v29 = vadd.f32 %v12521_v27, %v8317_v7  ;;  %v8318_v1 = vmul.f32 %v12515_v16, %v8295_v15  ;;  %v8253_v63 = vmul.f32 0.03125, %v8237_v39 }
 0xfec   : > { %10124 = vrsqrt.f32 %v8267_v5  ;;  %v8268_v37 = vadd.f32 1e-05, %v8252_v54 }
 0xfed   : > { %8356 = vst.msk [vmem:[%s12530_s26 + $0x40] sm:$0xff] %vm320_vm0, %v8340_v29  ;;  %v8341_v45 = vadd.f32 %v12521_v27, %v8318_v1  ;;  %v8269_v3 = vadd.f32 1e-05, %v8253_v63 }
 0xfee   : > { %10126 = vrsqrt.f32 %v8268_v37 }
 0xfef   : > { %8357 = vst.msk [vmem:[%s12530_s26 + $0x48] sm:$0xff] %vm320_vm0, %v8341_v45  ;;  %10128 = vrsqrt.f32 %v8269_v3 }
 0xff3   : > { %v10123_v55 = vpop.eup %10122 }
 0xff4   : > { %v8298_v2 = vmul.f32 %v10123_v55, %v12489_v11 }
 0xff6   : > { %v10125_v48 = vpop.eup %10124  ;;  %v8321_v56 = vmul.f32 %v12515_v16, %v8298_v2 }
 0xff7   : > { %v8299_v23 = vmul.f32 %v10125_v48, %v12492_v43 }
 0xff8   : > { %v10127_v46 = vpop.eup %10126  ;;  %v8344_v51 = vadd.f32 %v12521_v27, %v8321_v56 }
 0xff9   : > { %v10129_v62 = vpop.eup %10128  ;;  %v8322_v19 = vmul.f32 %v12515_v16, %v8299_v23  ;;  %v8300_v50 = vmul.f32 %v10127_v46, %v12497_v20 }
 0xffa   : > { %8360 = vst.msk [vmem:[%s12530_s26 + $0x60] sm:$0xff] %vm320_vm0, %v8344_v51  ;;  %v8301_v28 = vmul.f32 %v10129_v62, %v12503_v41 }
 0xffb   : > { %v8345_v11 = vadd.f32 %v12521_v27, %v8322_v19  ;;  %v8323_v52 = vmul.f32 %v12515_v16, %v8300_v50 }
 0xffc   : > { %v8324_v31 = vmul.f32 %v12515_v16, %v8301_v28 }
 0xffd   : > { %8361 = vst.msk [vmem:[%s12530_s26 + $0x68] sm:$0xff] %vm320_vm0, %v8345_v11  ;;  %v8346_v43 = vadd.f32 %v12521_v27, %v8323_v52 }
 0xffe   : > { %v8347_v35 = vadd.f32 %v12521_v27, %v8324_v31 }
 0xfff   : > { %8362 = vst.msk [vmem:[%s12530_s26 + $0x70] sm:$0xff] %vm320_vm0, %v8346_v43 }
0x1000   : > { %8363 = vst.msk [vmem:[%s12530_s26 + $0x78] sm:$0xff] %vm320_vm0, %v8347_v35 }
0x1001 PF: > { %s17_s24 = sadd.s32 1, %s10152_s24  }
0x1002   : > { %p14_p4 = scmp.ge.s32.totalorder %s17_s24, 4  }
0x1004   :  { %16 = sbr.rel (!%p14_p4) target bundleno = 1 (0x1), region = 78 }

</bundles_post_ra>
